<compile_context>
chip_gen: v7x
topology: tpu7x:2x2x1
jax: 0.10.0
libtpu: 0.0.40
codegen_flags: <defaults>
</compile_context>

<pallas_src>
import functools

import jax
import jax.numpy as jnp
from jax.experimental import pallas as pl
from jax.experimental.pallas import tpu as pltpu

BF16 = jnp.bfloat16
F32 = jnp.float32


# ----------------------------------------------------------------------------
# Kernels
# ----------------------------------------------------------------------------
def cv1_cv2_matmul_stats_kernel(x_ref, w_ref, y1_ref, y2_ref, s_ref, q_ref):
    """Single wide GEMM: [y1 | y2] = x @ [W1 | W2], plus per-channel stats."""
    @pl.when(pl.program_id(0) == 0)
    def _():
        s_ref[...] = jnp.zeros_like(s_ref)
        q_ref[...] = jnp.zeros_like(q_ref)

    x = x_ref[...].astype(BF16)
    y = jnp.dot(x, w_ref[...], preferred_element_type=F32)     # (tn, 2c)
    c = y1_ref.shape[1]
    y1_ref[...] = y[:, :c].astype(y1_ref.dtype)
    y2_ref[...] = y[:, c:].astype(y2_ref.dtype)
    s_ref[...] += jnp.sum(y, axis=0, keepdims=True)
    q_ref[...] += jnp.sum(y * y, axis=0, keepdims=True)


def bn_silu_matmul_stats_kernel(*refs, has_res, store_act):
    """a = [res +] SiLU(y*scale+shift); z = a @ W; stats(z).

    Ref order: y, scale, shift, [res], W  |  [a], z, s, q
    """
    it = iter(refs)
    y_ref = next(it)
    sc_ref = next(it)
    sh_ref = next(it)
    r_ref = next(it) if has_res else None
    w_ref = next(it)
    a_ref = next(it) if store_act else None
    z_ref = next(it)
    s_ref = next(it)
    q_ref = next(it)

    @pl.when(pl.program_id(0) == 0)
    def _():
        s_ref[...] = jnp.zeros_like(s_ref)
        q_ref[...] = jnp.zeros_like(q_ref)

    yn = y_ref[...].astype(F32) * sc_ref[...] + sh_ref[...]
    a = yn * jax.nn.sigmoid(yn)
    if has_res:
        a = r_ref[...].astype(F32) + a
    if store_act:
        a_ref[...] = a.astype(a_ref.dtype)
    z = jnp.dot(a.astype(BF16), w_ref[...], preferred_element_type=F32)
    z_ref[...] = z.astype(z_ref.dtype)
    s_ref[...] += jnp.sum(z, axis=0, keepdims=True)
    q_ref[...] += jnp.sum(z * z, axis=0, keepdims=True)


def cat_bn_silu_matmul_stats_kernel(y1_ref, y2_ref, sc_ref, sh_ref, w_ref,
                                    o_ref, s_ref, q_ref):
    """o = SiLU(bn(cat[y1,y2])) @ W4 (concat only inside VMEM); stats(o)."""
    @pl.when(pl.program_id(0) == 0)
    def _():
        s_ref[...] = jnp.zeros_like(s_ref)
        q_ref[...] = jnp.zeros_like(q_ref)

    y = jnp.concatenate(
        [y1_ref[...].astype(F32), y2_ref[...].astype(F32)], axis=1)
    yn = y * sc_ref[...] + sh_ref[...]
    a = yn * jax.nn.sigmoid(yn)
    o = jnp.dot(a.astype(BF16), w_ref[...], preferred_element_type=F32)
    o_ref[...] = o.astype(o_ref.dtype)
    s_ref[...] += jnp.sum(o, axis=0, keepdims=True)
    q_ref[...] += jnp.sum(o * o, axis=0, keepdims=True)


def bn_silu_kernel(y_ref, sc_ref, sh_ref, o_ref):
    """o = SiLU(y*scale+shift) (final pass, f32 output)."""
    yn = y_ref[...].astype(F32) * sc_ref[...] + sh_ref[...]
    o_ref[...] = (yn * jax.nn.sigmoid(yn)).astype(o_ref.dtype)


def bn_silu_conv3x3_stats_kernel(x_ref, sc_ref, sh_ref, w_ref,
                                 o_ref, s_ref, q_ref, xp_ref, acc_ref):
    """Per-batch: a = SiLU(x*scale+shift); o = conv3x3(a) (zero pad 1); stats.

    x_ref: (1, H, W, Ci) bf16   w_ref: (9, Ci, Co) bf16 with k = ky*3 + kx
    xp_ref: f32 VMEM scratch (H+2, W+2, Ci) used as the zero-padded image.
    acc_ref: f32 VMEM accumulator (H*W, Co).
    """
    _, H, W, Ci = x_ref.shape
    Co = o_ref.shape[3]

    @pl.when(pl.program_id(0) == 0)
    def _():
        s_ref[...] = jnp.zeros_like(s_ref)
        q_ref[...] = jnp.zeros_like(q_ref)
        xp_ref[...] = jnp.zeros_like(xp_ref)   # borders stay zero afterwards

    yn = x_ref[0].astype(F32) * sc_ref[...] + sh_ref[...]
    a = yn * jax.nn.sigmoid(yn)
    xp_ref[1:H + 1, 1:W + 1, :] = a

    acc_ref[...] = jnp.zeros_like(acc_ref)
    # TODO(synk): replace the 9 strided window slices with pltpu.roll-based
    # tap shifts + row-band (halo) tiling for large H*W (v7x 64 MiB VMEM).
    for k in range(9):                          # static unroll over the taps
        ky, kx = k // 3, k % 3
        win = xp_ref[ky:ky + H, kx:kx + W, :].reshape(H * W, Ci).astype(BF16)
        acc_ref[...] += jnp.dot(win, w_ref[k], preferred_element_type=F32)

    acc = acc_ref[...]
    o_ref[0] = acc.reshape(H, W, Co).astype(o_ref.dtype)
    s_ref[...] += jnp.sum(acc, axis=0, keepdims=True)
    q_ref[...] += jnp.sum(acc * acc, axis=0, keepdims=True)


# ----------------------------------------------------------------------------
# BlockSpec helpers + wrappers
# ----------------------------------------------------------------------------
def _row_spec(tn, c):
    # token-tiled (tn, full-C) block; new rows each grid step (lane-dense)
    return pl.BlockSpec((tn, c), lambda i: (i, 0))


def _rep_spec(shape):
    # grid-invariant block (weights / scale / shift / stats accumulators)
    nd = len(shape)
    return pl.BlockSpec(shape, lambda i: (0,) * nd)


def _choose_tile(n, max_tile=1024):
    if n <= max_tile:
        return n
    t = max_tile - (max_tile % 8)
    while t >= 8:
        if n % t == 0:
            return t
        t -= 8
    return n


def _cparams(sem):
    return pltpu.CompilerParams(dimension_semantics=(sem,),
                                vmem_limit_bytes=48 * 1024 * 1024)


def cv1_cv2_matmul_stats(x, w12t, tn):
    n, ci = x.shape
    c2x = w12t.shape[1]
    c = c2x // 2
    return pl.pallas_call(
        cv1_cv2_matmul_stats_kernel,
        out_shape=(jax.ShapeDtypeStruct((n, c), BF16),
                   jax.ShapeDtypeStruct((n, c), BF16),
                   jax.ShapeDtypeStruct((1, c2x), F32),
                   jax.ShapeDtypeStruct((1, c2x), F32)),
        grid=(n // tn,),
        in_specs=[_row_spec(tn, ci), _rep_spec((ci, c2x))],
        out_specs=(_row_spec(tn, c), _row_spec(tn, c),
                   _rep_spec((1, c2x)), _rep_spec((1, c2x))),
        compiler_params=_cparams("arbitrary"),
    )(x, w12t)


def bn_silu_matmul_stats(y, scale, shift, wt, tn, *, res=None, store_act=True):
    n, ci = y.shape
    co = wt.shape[1]
    has_res = res is not None

    in_specs = [_row_spec(tn, ci), _rep_spec((1, ci)), _rep_spec((1, ci))]
    inputs = [y, scale, shift]
    if has_res:
        in_specs.append(_row_spec(tn, ci))
        inputs.append(res)
    in_specs.append(_rep_spec((ci, co)))
    inputs.append(wt)

    out_shape = []
    out_specs = []
    if store_act:
        out_shape.append(jax.ShapeDtypeStruct((n, ci), BF16))
        out_specs.append(_row_spec(tn, ci))
    out_shape += [jax.ShapeDtypeStruct((n, co), BF16),
                  jax.ShapeDtypeStruct((1, co), F32),
                  jax.ShapeDtypeStruct((1, co), F32)]
    out_specs += [_row_spec(tn, co), _rep_spec((1, co)), _rep_spec((1, co))]

    outs = pl.pallas_call(
        functools.partial(bn_silu_matmul_stats_kernel,
                          has_res=has_res, store_act=store_act),
        out_shape=tuple(out_shape),
        grid=(n // tn,),
        in_specs=in_specs,
        out_specs=tuple(out_specs),
        compiler_params=_cparams("arbitrary"),
    )(*inputs)

    if store_act:
        a, z, s, q = outs
        return a, z, s, q
    z, s, q = outs
    return None, z, s, q


def cat_bn_silu_matmul_stats(y1, y2, scale, shift, wt, tn):
    n, c_ = y1.shape
    co = wt.shape[1]
    return pl.pallas_call(
        cat_bn_silu_matmul_stats_kernel,
        out_shape=(jax.ShapeDtypeStruct((n, co), BF16),
                   jax.ShapeDtypeStruct((1, co), F32),
                   jax.ShapeDtypeStruct((1, co), F32)),
        grid=(n // tn,),
        in_specs=[_row_spec(tn, c_), _row_spec(tn, c_),
                  _rep_spec((1, 2 * c_)), _rep_spec((1, 2 * c_)),
                  _rep_spec((2 * c_, co))],
        out_specs=(_row_spec(tn, co), _rep_spec((1, co)), _rep_spec((1, co))),
        compiler_params=_cparams("arbitrary"),
    )(y1, y2, scale, shift, wt)


def bn_silu(y, scale, shift, tn):
    n, c = y.shape
    return pl.pallas_call(
        bn_silu_kernel,
        out_shape=jax.ShapeDtypeStruct((n, c), F32),
        grid=(n // tn,),
        in_specs=[_row_spec(tn, c), _rep_spec((1, c)), _rep_spec((1, c))],
        out_specs=_row_spec(tn, c),
        compiler_params=_cparams("parallel"),
    )(y, scale, shift)


def bn_silu_conv3x3_stats(x_img, scale, shift, w3x3):
    b, h, w, ci = x_img.shape
    co = w3x3.shape[0]
    # (co, ci, 3, 3) -> (ky, kx, ci, co) -> (9, ci, co), bf16 for the MXU
    w9 = jnp.transpose(w3x3, (2, 3, 1, 0)).reshape(9, ci, co).astype(BF16)
    return pl.pallas_call(
        bn_silu_conv3x3_stats_kernel,
        out_shape=(jax.ShapeDtypeStruct((b, h, w, co), BF16),
                   jax.ShapeDtypeStruct((1, co), F32),
                   jax.ShapeDtypeStruct((1, co), F32)),
        grid=(b,),
        in_specs=[pl.BlockSpec((1, h, w, ci), lambda i: (i, 0, 0, 0)),
                  _rep_spec((1, 1, ci)), _rep_spec((1, 1, ci)),
                  _rep_spec((9, ci, co))],
        out_specs=(pl.BlockSpec((1, h, w, co), lambda i: (i, 0, 0, 0)),
                   _rep_spec((1, co)), _rep_spec((1, co))),
        scratch_shapes=[pltpu.VMEM((h + 2, w + 2, ci), F32),
                        pltpu.VMEM((h * w, co), F32)],
        compiler_params=_cparams("arbitrary"),
    )(x_img, scale.reshape(1, 1, ci), shift.reshape(1, 1, ci), w9)


# ----------------------------------------------------------------------------
# Forward
# ----------------------------------------------------------------------------
def _bn_scale_shift(s, q, n, gamma, beta, eps=1e-5):
    """Fold batch-stat BatchNorm into per-channel scale/shift (training mode)."""
    mean = s / n
    var = jnp.maximum(q / n - mean * mean, 0.0)
    scale = gamma[None, :] * jax.lax.rsqrt(var + eps)
    shift = beta[None, :] - mean * scale
    return scale, shift


def bottleneck_csp_forward(x, params, token_tile=None):
    """Pallas implementation of BottleneckCSP.forward."""
    B, c1, H, W = x.shape
    c_ = params["cv1_w"].shape[0]
    c2 = params["cv4_w"].shape[0]
    S = H * W
    N = B * S
    eps = 1e-5
    tn = token_tile if (token_tile and N % token_tile == 0) else _choose_tile(N)

    # NCHW -> token-major (N, c1), row = b*H*W + h*W + w
    # TODO(synk): fuse this transpose (and the inverse at the end) into the
    # first/last kernels to avoid two extra full HBM round trips.
    t = x.reshape(B, c1, S).transpose(0, 2, 1).reshape(N, c1)

    # ---- cv1 + cv2 in one wide GEMM pass, with per-channel stats
    w12 = jnp.concatenate([params["cv1_w"].T, params["cv2_w"].T],
                          axis=1).astype(BF16)
    y1raw, y2, s12, q12 = cv1_cv2_matmul_stats(t, w12, tn)
    s1, s2 = s12[:, :c_], s12[:, c_:]
    q1, q2 = q12[:, :c_], q12[:, c_:]

    cur_raw = y1raw
    cur_scale, cur_shift = _bn_scale_shift(s1, q1, N,
                                           params["cv1_g"], params["cv1_b"], eps)
    res = None

    # ---- Bottleneck chain m: each = 1x1 conv-bn-silu, 3x3 conv-bn-silu, add
    for bp in params["m"]:
        a, braw, sb, qb = bn_silu_matmul_stats(
            cur_raw, cur_scale, cur_shift, bp["cv1_w"].T.astype(BF16), tn,
            res=res, store_act=True)
        scb, shb = _bn_scale_shift(sb, qb, N, bp["cv1_g"], bp["cv1_b"], eps)

        # 3x3 conv, BN-apply+SiLU fused on its input, gridded over batch
        b2raw_img, sb2, qb2 = bn_silu_conv3x3_stats(
            braw.reshape(B, H, W, c_), scb, shb, bp["cv2_w"])
        cur_raw = b2raw_img.reshape(N, c_)
        cur_scale, cur_shift = _bn_scale_shift(sb2, qb2, N,
                                               bp["cv2_g"], bp["cv2_b"], eps)
        res = a

    # ---- cv3 on m_out = res + SiLU(bn(cur_raw)); activation output dropped
    _, y1, sy1, qy1 = bn_silu_matmul_stats(
        cur_raw, cur_scale, cur_shift, params["cv3_w"].T.astype(BF16), tn,
        res=res, store_act=False)

    # ---- shared BN over cat([y1, y2]) + cv4 GEMM (concat only inside VMEM)
    s_cat = jnp.concatenate([sy1, s2], axis=1)
    q_cat = jnp.concatenate([qy1, q2], axis=1)
    scc, shc = _bn_scale_shift(s_cat, q_cat, N,
                               params["bn_g"], params["bn_b"], eps)
    w4t = params["cv4_w"].T.astype(BF16)                     # (2c_, c2)
    outraw, s4, q4 = cat_bn_silu_matmul_stats(y1, y2, scc, shc, w4t, tn)

    # ---- cv4's own BN + SiLU (final pass, f32 output)
    sc4, sh4 = _bn_scale_shift(s4, q4, N, params["cv4_g"], params["cv4_b"], eps)
    out = bn_silu(outraw, sc4, sh4, tn)

    # (N, c2) -> (B, S, c2) -> NCHW
    return out.reshape(B, S, c2).transpose(0, 2, 1).reshape(B, c2, H, W)


# ----------------------------------------------------------------------------
# Pure-JAX reference (mirrors the PyTorch forward, training-mode BN)
# ----------------------------------------------------------------------------
def ref_forward(x, p):
    eps = 1e-5

    def bn(y, g, b):
        mean = jnp.mean(y, axis=(0, 2, 3), keepdims=True)
        var = jnp.mean((y - mean) ** 2, axis=(0, 2, 3), keepdims=True)
        return ((y - mean) * jax.lax.rsqrt(var + eps) * g[None, :, None, None]
                + b[None, :, None, None])

    def silu(y):
        return y * jax.nn.sigmoid(y)

    def conv1x1(y, w):
        return jnp.einsum("oc,bchw->bohw", w, y)

    def conv3x3(y, w):
        return jax.lax.conv_general_dilated(
            y, w, window_strides=(1, 1), padding=((1, 1), (1, 1)),
            dimension_numbers=("NCHW", "OIHW", "NCHW"))

    a = silu(bn(conv1x1(x, p["cv1_w"]), p["cv1_g"], p["cv1_b"]))
    for bp in p["m"]:
        b1 = silu(bn(conv1x1(a, bp["cv1_w"]), bp["cv1_g"], bp["cv1_b"]))
        b2 = silu(bn(conv3x3(b1, bp["cv2_w"]), bp["cv2_g"], bp["cv2_b"]))
        a = a + b2
    y1 = conv1x1(a, p["cv3_w"])
    y2 = conv1x1(x, p["cv2_w"])
    cat = jnp.concatenate([y1, y2], axis=1)
    z = silu(bn(cat, p["bn_g"], p["bn_b"]))
    return silu(bn(conv1x1(z, p["cv4_w"]), p["cv4_g"], p["cv4_b"]))


# ----------------------------------------------------------------------------
# Parameter init + main
# ----------------------------------------------------------------------------
def init_params(key, c1, c2, n=1, e=0.5):
    c_ = int(c2 * e)
    ks = list(jax.random.split(key, 10 + 6 * n))

    def nrm(k, shape, s=0.1):
        return (jax.random.normal(k, shape) * s).astype(jnp.float32)

    p = {
        "cv1_w": nrm(ks[0], (c_, c1), 0.3),
        "cv1_g": (1.0 + nrm(ks[1], (c_,), 0.05)).astype(jnp.float32),
        "cv1_b": nrm(ks[2], (c_,), 0.05),
        "cv2_w": nrm(ks[3], (c_, c1), 0.3),
        "cv3_w": nrm(ks[4], (c_, c_), 0.3),
        "cv4_w": nrm(ks[5], (c2, 2 * c_), 0.3),
        "cv4_g": (1.0 + nrm(ks[6], (c2,), 0.05)).astype(jnp.float32),
        "cv4_b": nrm(ks[7], (c2,), 0.05),
        "bn_g": (1.0 + nrm(ks[8], (2 * c_,), 0.05)).astype(jnp.float32),
        "bn_b": nrm(ks[9], (2 * c_,), 0.05),
        "m": [],
    }
    for j in range(n):
        kk = ks[10 + 6 * j: 10 + 6 * (j + 1)]
        p["m"].append({
            "cv1_w": nrm(kk[0], (c_, c_), 0.3),
            "cv1_g": (1.0 + nrm(kk[1], (c_,), 0.05)).astype(jnp.float32),
            "cv1_b": nrm(kk[2], (c_,), 0.05),
            "cv2_w": nrm(kk[3], (c_, c_, 3, 3), 0.2),
            "cv2_g": (1.0 + nrm(kk[4], (c_,), 0.05)).astype(jnp.float32),
            "cv2_b": nrm(kk[5], (c_,), 0.05),
        })
    return p


if __name__ == "__main__":
    B, C1, C2 = 2, 16, 32
    H = W = 16
    N_BOTTLENECKS = 1

    key = jax.random.PRNGKey(0)
    kx, kp = jax.random.split(key)
    x = jax.random.normal(kx, (B, C1, H, W), dtype=jnp.float32)
    params = init_params(kp, C1, C2, n=N_BOTTLENECKS)

    # token_tile=256 -> 2 grid steps over the N = B*H*W = 512 tokens,
    # exercising the tiled pipeline and the cross-step stats accumulation.
    fwd = jax.jit(functools.partial(bottleneck_csp_forward, token_tile=256))
    out = jax.block_until_ready(fwd(x, params))

    ref = jax.block_until_ready(ref_forward(x, params))
    assert out.shape == ref.shape == (B, C2, H, W), out.shape
    max_err = float(jnp.max(jnp.abs(out - ref)))
    # bf16 intermediates / bf16 MXU inputs -> slightly looser elementwise
    # tolerance than a pure-f32 pipeline (ref stays f32).
    assert jnp.allclose(out, ref, rtol=3e-2, atol=3e-2), max_err

    print("KERNEL_OK")
</pallas_src>

<mosaic_0001>
module attributes {stable_mosaic.version = 11 : i64} {
  func.func @cv1_cv2_matmul_stats_kernel(%arg0: i32, %arg1: memref<256x16xf32, #tpu.memory_space<vmem>>, %arg2: memref<16x32xbf16, #tpu.memory_space<vmem>>, %arg3: memref<256x16xbf16, #tpu.memory_space<vmem>>, %arg4: memref<256x16xbf16, #tpu.memory_space<vmem>>, %arg5: memref<1x32xf32, #tpu.memory_space<vmem>>, %arg6: memref<1x32xf32, #tpu.memory_space<vmem>>) attributes {dimension_semantics = [#tpu.dimension_semantics<arbitrary>], iteration_bounds = array<i64: 2>, scalar_prefetch = 0 : i64, scratch_operands = 0 : i64, tpu.core_type = #tpu.core_type<tc>, window_params = [{transform_indices = @transform_0, window_bounds = array<i64: 256, 16>}, {pipeline_mode = #tpu.pipeline_mode<synchronous>, transform_indices = @transform_1, window_bounds = array<i64: 16, 32>}, {transform_indices = @transform_2, window_bounds = array<i64: 256, 16>}, {transform_indices = @transform_3, window_bounds = array<i64: 256, 16>}, {pipeline_mode = #tpu.pipeline_mode<synchronous>, transform_indices = @transform_4, window_bounds = array<i64: 1, 32>}, {pipeline_mode = #tpu.pipeline_mode<synchronous>, transform_indices = @transform_5, window_bounds = array<i64: 1, 32>}]} {
    %c0_i32 = arith.constant 0 : i32
    %0 = arith.cmpi eq, %arg0, %c0_i32 : i32
    %1 = arith.extui %0 : i1 to i32
    %c0_i32_0 = arith.constant 0 : i32
    %2 = arith.cmpi ne, %1, %c0_i32_0 : i32
    scf.if %2 {
      %cst_18 = arith.constant 0.000000e+00 : f32
      %24 = vector.broadcast %cst_18 : f32 to vector<1x32xf32>
      %c0_19 = arith.constant 0 : index
      %c0_20 = arith.constant 0 : index
      %25 = vector.load %arg5[%c0_19, %c0_20] : memref<1x32xf32, #tpu.memory_space<vmem>>, vector<1x32xf32>
      tpu.vector_store %arg5[%c0_19, %c0_20], %24 {strides = array<i32>} : memref<1x32xf32, #tpu.memory_space<vmem>>, vector<1x32xf32>,
      %cst_21 = arith.constant 0.000000e+00 : f32
      %26 = vector.broadcast %cst_21 : f32 to vector<1x32xf32>
      %c0_22 = arith.constant 0 : index
      %c0_23 = arith.constant 0 : index
      %27 = vector.load %arg6[%c0_22, %c0_23] : memref<1x32xf32, #tpu.memory_space<vmem>>, vector<1x32xf32>
      tpu.vector_store %arg6[%c0_22, %c0_23], %26 {strides = array<i32>} : memref<1x32xf32, #tpu.memory_space<vmem>>, vector<1x32xf32>,
    } else {
    }
    %c0 = arith.constant 0 : index
    %c0_1 = arith.constant 0 : index
    %3 = vector.load %arg1[%c0, %c0_1] : memref<256x16xf32, #tpu.memory_space<vmem>>, vector<256x16xf32>
    %4 = arith.truncf %3 : vector<256x16xf32> to vector<256x16xbf16>
    %c0_2 = arith.constant 0 : index
    %c0_3 = arith.constant 0 : index
    %5 = vector.load %arg2[%c0_2, %c0_3] : memref<16x32xbf16, #tpu.memory_space<vmem>>, vector<16x32xbf16>
    %cst = arith.constant dense<0.000000e+00> : vector<256x32xf32>
    %6 = tpu.matmul %4, %5, %cst {dimension_numbers = #tpu.dot_dimension_numbers<[1], [0], [0], [1], [0, 0, 1, 1], [], []>} : vector<256x16xbf16>, vector<16x32xbf16>, vector<256x32xf32> -> vector<256x32xf32>
    %7 = vector.extract_strided_slice %6 {offsets = [0, 0], sizes = [256, 16], strides = [1, 1]} : vector<256x32xf32> to vector<256x16xf32>
    %8 = arith.truncf %7 : vector<256x16xf32> to vector<256x16xbf16>
    %c0_4 = arith.constant 0 : index
    %c0_5 = arith.constant 0 : index
    %9 = vector.load %arg3[%c0_4, %c0_5] : memref<256x16xbf16, #tpu.memory_space<vmem>>, vector<256x16xbf16>
    tpu.vector_store %arg3[%c0_4, %c0_5], %8 {strides = array<i32>} : memref<256x16xbf16, #tpu.memory_space<vmem>>, vector<256x16xbf16>,
    %10 = vector.extract_strided_slice %6 {offsets = [0, 16], sizes = [256, 16], strides = [1, 1]} : vector<256x32xf32> to vector<256x16xf32>
    %11 = arith.truncf %10 : vector<256x16xf32> to vector<256x16xbf16>
    %c0_6 = arith.constant 0 : index
    %c0_7 = arith.constant 0 : index
    %12 = vector.load %arg4[%c0_6, %c0_7] : memref<256x16xbf16, #tpu.memory_space<vmem>>, vector<256x16xbf16>
    tpu.vector_store %arg4[%c0_6, %c0_7], %11 {strides = array<i32>} : memref<256x16xbf16, #tpu.memory_space<vmem>>, vector<256x16xbf16>,
    %c0_8 = arith.constant 0 : index
    %c0_9 = arith.constant 0 : index
    %13 = vector.load %arg5[%c0_8, %c0_9] : memref<1x32xf32, #tpu.memory_space<vmem>>, vector<1x32xf32>
    %cst_10 = arith.constant dense<0.000000e+00> : vector<32xf32>
    %14 = vector.multi_reduction <add>, %6, %cst_10 [0] : vector<256x32xf32> to vector<32xf32>
    %15 = vector.shape_cast %14 : vector<32xf32> to vector<1x32xf32>
    %16 = arith.addf %13, %15 : vector<1x32xf32>
    %c0_11 = arith.constant 0 : index
    %c0_12 = arith.constant 0 : index
    %17 = vector.load %arg5[%c0_11, %c0_12] : memref<1x32xf32, #tpu.memory_space<vmem>>, vector<1x32xf32>
    tpu.vector_store %arg5[%c0_11, %c0_12], %16 {strides = array<i32>} : memref<1x32xf32, #tpu.memory_space<vmem>>, vector<1x32xf32>,
    %c0_13 = arith.constant 0 : index
    %c0_14 = arith.constant 0 : index
    %18 = vector.load %arg6[%c0_13, %c0_14] : memref<1x32xf32, #tpu.memory_space<vmem>>, vector<1x32xf32>
    %19 = arith.mulf %6, %6 : vector<256x32xf32>
    %cst_15 = arith.constant dense<0.000000e+00> : vector<32xf32>
    %20 = vector.multi_reduction <add>, %19, %cst_15 [0] : vector<256x32xf32> to vector<32xf32>
    %21 = vector.shape_cast %20 : vector<32xf32> to vector<1x32xf32>
    %22 = arith.addf %18, %21 : vector<1x32xf32>
    %c0_16 = arith.constant 0 : index
    %c0_17 = arith.constant 0 : index
    %23 = vector.load %arg6[%c0_16, %c0_17] : memref<1x32xf32, #tpu.memory_space<vmem>>, vector<1x32xf32>
    tpu.vector_store %arg6[%c0_16, %c0_17], %22 {strides = array<i32>} : memref<1x32xf32, #tpu.memory_space<vmem>>, vector<1x32xf32>,
    return
  }
  func.func @transform_0(%arg0: i32) -> (i32, i32) {
    %c0_i32 = arith.constant 0 : i32
    %c0_i32_0 = arith.constant 0 : i32
    return %arg0, %c0_i32 : i32, i32
  }
  func.func @transform_1(%arg0: i32) -> (i32, i32) {
    %c0_i32 = arith.constant 0 : i32
    %c0_i32_0 = arith.constant 0 : i32
    %c0_i32_1 = arith.constant 0 : i32
    return %c0_i32, %c0_i32_0 : i32, i32
  }
  func.func @transform_2(%arg0: i32) -> (i32, i32) {
    %c0_i32 = arith.constant 0 : i32
    %c0_i32_0 = arith.constant 0 : i32
    return %arg0, %c0_i32 : i32, i32
  }
  func.func @transform_3(%arg0: i32) -> (i32, i32) {
    %c0_i32 = arith.constant 0 : i32
    %c0_i32_0 = arith.constant 0 : i32
    return %arg0, %c0_i32 : i32, i32
  }
  func.func @transform_4(%arg0: i32) -> (i32, i32) {
    %c0_i32 = arith.constant 0 : i32
    %c0_i32_0 = arith.constant 0 : i32
    %c0_i32_1 = arith.constant 0 : i32
    return %c0_i32, %c0_i32_0 : i32, i32
  }
  func.func @transform_5(%arg0: i32) -> (i32, i32) {
    %c0_i32 = arith.constant 0 : i32
    %c0_i32_0 = arith.constant 0 : i32
    %c0_i32_1 = arith.constant 0 : i32
    return %c0_i32, %c0_i32_0 : i32, i32
  }
}

module attributes {stable_mosaic.version = 11 : i64} {
  func.func @bn_silu_matmul_stats_kernel(%arg0: i32, %arg1: memref<256x16xbf16, #tpu.memory_space<vmem>>, %arg2: memref<1x16xf32, #tpu.memory_space<vmem>>, %arg3: memref<1x16xf32, #tpu.memory_space<vmem>>, %arg4: memref<16x16xbf16, #tpu.memory_space<vmem>>, %arg5: memref<256x16xbf16, #tpu.memory_space<vmem>>, %arg6: memref<256x16xbf16, #tpu.memory_space<vmem>>, %arg7: memref<1x16xf32, #tpu.memory_space<vmem>>, %arg8: memref<1x16xf32, #tpu.memory_space<vmem>>) attributes {dimension_semantics = [#tpu.dimension_semantics<arbitrary>], iteration_bounds = array<i64: 2>, scalar_prefetch = 0 : i64, scratch_operands = 0 : i64, tpu.core_type = #tpu.core_type<tc>, window_params = [{transform_indices = @transform_0, window_bounds = array<i64: 256, 16>}, {pipeline_mode = #tpu.pipeline_mode<synchronous>, transform_indices = @transform_1, window_bounds = array<i64: 1, 16>}, {pipeline_mode = #tpu.pipeline_mode<synchronous>, transform_indices = @transform_2, window_bounds = array<i64: 1, 16>}, {pipeline_mode = #tpu.pipeline_mode<synchronous>, transform_indices = @transform_3, window_bounds = array<i64: 16, 16>}, {transform_indices = @transform_4, window_bounds = array<i64: 256, 16>}, {transform_indices = @transform_5, window_bounds = array<i64: 256, 16>}, {pipeline_mode = #tpu.pipeline_mode<synchronous>, transform_indices = @transform_6, window_bounds = array<i64: 1, 16>}, {pipeline_mode = #tpu.pipeline_mode<synchronous>, transform_indices = @transform_7, window_bounds = array<i64: 1, 16>}]} {
    %c0_i32 = arith.constant 0 : i32
    %0 = arith.cmpi eq, %arg0, %c0_i32 : i32
    %1 = arith.extui %0 : i1 to i32
    %c0_i32_0 = arith.constant 0 : i32
    %2 = arith.cmpi ne, %1, %c0_i32_0 : i32
    scf.if %2 {
      %cst_23 = arith.constant 0.000000e+00 : f32
      %35 = vector.broadcast %cst_23 : f32 to vector<1x16xf32>
      %c0_24 = arith.constant 0 : index
      %c0_25 = arith.constant 0 : index
      %36 = vector.load %arg7[%c0_24, %c0_25] : memref<1x16xf32, #tpu.memory_space<vmem>>, vector<1x16xf32>
      tpu.vector_store %arg7[%c0_24, %c0_25], %35 {strides = array<i32>} : memref<1x16xf32, #tpu.memory_space<vmem>>, vector<1x16xf32>,
      %cst_26 = arith.constant 0.000000e+00 : f32
      %37 = vector.broadcast %cst_26 : f32 to vector<1x16xf32>
      %c0_27 = arith.constant 0 : index
      %c0_28 = arith.constant 0 : index
      %38 = vector.load %arg8[%c0_27, %c0_28] : memref<1x16xf32, #tpu.memory_space<vmem>>, vector<1x16xf32>
      tpu.vector_store %arg8[%c0_27, %c0_28], %37 {strides = array<i32>} : memref<1x16xf32, #tpu.memory_space<vmem>>, vector<1x16xf32>,
    } else {
    }
    %c0 = arith.constant 0 : index
    %c0_1 = arith.constant 0 : index
    %3 = vector.load %arg1[%c0, %c0_1] : memref<256x16xbf16, #tpu.memory_space<vmem>>, vector<256x16xbf16>
    %4 = arith.extf %3 : vector<256x16xbf16> to vector<256x16xf32>
    %c0_2 = arith.constant 0 : index
    %c0_3 = arith.constant 0 : index
    %5 = vector.load %arg2[%c0_2, %c0_3] : memref<1x16xf32, #tpu.memory_space<vmem>>, vector<1x16xf32>
    %6 = vector.broadcast %5 : vector<1x16xf32> to vector<256x16xf32>
    %7 = arith.mulf %4, %6 : vector<256x16xf32>
    %c0_4 = arith.constant 0 : index
    %c0_5 = arith.constant 0 : index
    %8 = vector.load %arg3[%c0_4, %c0_5] : memref<1x16xf32, #tpu.memory_space<vmem>>, vector<1x16xf32>
    %9 = vector.broadcast %8 : vector<1x16xf32> to vector<256x16xf32>
    %10 = arith.addf %7, %9 : vector<256x16xf32>
    %11 = arith.negf %10 : vector<256x16xf32>
    %12 = math.exp %11 : vector<256x16xf32>
    %cst = arith.constant 1.000000e+00 : f32
    %13 = vector.broadcast %cst : f32 to vector<256x16xf32>
    %14 = arith.addf %13, %12 : vector<256x16xf32>
    %15 = arith.divf %13, %14 : vector<256x16xf32>
    %16 = arith.mulf %10, %15 : vector<256x16xf32>
    %17 = arith.truncf %16 : vector<256x16xf32> to vector<256x16xbf16>
    %c0_6 = arith.constant 0 : index
    %c0_7 = arith.constant 0 : index
    %18 = vector.load %arg5[%c0_6, %c0_7] : memref<256x16xbf16, #tpu.memory_space<vmem>>, vector<256x16xbf16>
    tpu.vector_store %arg5[%c0_6, %c0_7], %17 {strides = array<i32>} : memref<256x16xbf16, #tpu.memory_space<vmem>>, vector<256x16xbf16>,
    %19 = arith.truncf %16 : vector<256x16xf32> to vector<256x16xbf16>
    %c0_8 = arith.constant 0 : index
    %c0_9 = arith.constant 0 : index
    %20 = vector.load %arg4[%c0_8, %c0_9] : memref<16x16xbf16, #tpu.memory_space<vmem>>, vector<16x16xbf16>
    %cst_10 = arith.constant dense<0.000000e+00> : vector<256x16xf32>
    %21 = tpu.matmul %19, %20, %cst_10 {dimension_numbers = #tpu.dot_dimension_numbers<[1], [0], [0], [1], [0, 0, 1, 1], [], []>} : vector<256x16xbf16>, vector<16x16xbf16>, vector<256x16xf32> -> vector<256x16xf32>
    %22 = arith.truncf %21 : vector<256x16xf32> to vector<256x16xbf16>
    %c0_11 = arith.constant 0 : index
    %c0_12 = arith.constant 0 : index
    %23 = vector.load %arg6[%c0_11, %c0_12] : memref<256x16xbf16, #tpu.memory_space<vmem>>, vector<256x16xbf16>
    tpu.vector_store %arg6[%c0_11, %c0_12], %22 {strides = array<i32>} : memref<256x16xbf16, #tpu.memory_space<vmem>>, vector<256x16xbf16>,
    %c0_13 = arith.constant 0 : index
    %c0_14 = arith.constant 0 : index
    %24 = vector.load %arg7[%c0_13, %c0_14] : memref<1x16xf32, #tpu.memory_space<vmem>>, vector<1x16xf32>
    %cst_15 = arith.constant dense<0.000000e+00> : vector<16xf32>
    %25 = vector.multi_reduction <add>, %21, %cst_15 [0] : vector<256x16xf32> to vector<16xf32>
    %26 = vector.shape_cast %25 : vector<16xf32> to vector<1x16xf32>
    %27 = arith.addf %24, %26 : vector<1x16xf32>
    %c0_16 = arith.constant 0 : index
    %c0_17 = arith.constant 0 : index
    %28 = vector.load %arg7[%c0_16, %c0_17] : memref<1x16xf32, #tpu.memory_space<vmem>>, vector<1x16xf32>
    tpu.vector_store %arg7[%c0_16, %c0_17], %27 {strides = array<i32>} : memref<1x16xf32, #tpu.memory_space<vmem>>, vector<1x16xf32>,
    %c0_18 = arith.constant 0 : index
    %c0_19 = arith.constant 0 : index
    %29 = vector.load %arg8[%c0_18, %c0_19] : memref<1x16xf32, #tpu.memory_space<vmem>>, vector<1x16xf32>
    %30 = arith.mulf %21, %21 : vector<256x16xf32>
    %cst_20 = arith.constant dense<0.000000e+00> : vector<16xf32>
    %31 = vector.multi_reduction <add>, %30, %cst_20 [0] : vector<256x16xf32> to vector<16xf32>
    %32 = vector.shape_cast %31 : vector<16xf32> to vector<1x16xf32>
    %33 = arith.addf %29, %32 : vector<1x16xf32>
    %c0_21 = arith.constant 0 : index
    %c0_22 = arith.constant 0 : index
    %34 = vector.load %arg8[%c0_21, %c0_22] : memref<1x16xf32, #tpu.memory_space<vmem>>, vector<1x16xf32>
    tpu.vector_store %arg8[%c0_21, %c0_22], %33 {strides = array<i32>} : memref<1x16xf32, #tpu.memory_space<vmem>>, vector<1x16xf32>,
    return
  }
  func.func @transform_0(%arg0: i32) -> (i32, i32) {
    %c0_i32 = arith.constant 0 : i32
    %c0_i32_0 = arith.constant 0 : i32
    return %arg0, %c0_i32 : i32, i32
  }
  func.func @transform_1(%arg0: i32) -> (i32, i32) {
    %c0_i32 = arith.constant 0 : i32
    %c0_i32_0 = arith.constant 0 : i32
    %c0_i32_1 = arith.constant 0 : i32
    return %c0_i32, %c0_i32_0 : i32, i32
  }
  func.func @transform_2(%arg0: i32) -> (i32, i32) {
    %c0_i32 = arith.constant 0 : i32
    %c0_i32_0 = arith.constant 0 : i32
    %c0_i32_1 = arith.constant 0 : i32
    return %c0_i32, %c0_i32_0 : i32, i32
  }
  func.func @transform_3(%arg0: i32) -> (i32, i32) {
    %c0_i32 = arith.constant 0 : i32
    %c0_i32_0 = arith.constant 0 : i32
    %c0_i32_1 = arith.constant 0 : i32
    return %c0_i32, %c0_i32_0 : i32, i32
  }
  func.func @transform_4(%arg0: i32) -> (i32, i32) {
    %c0_i32 = arith.constant 0 : i32
    %c0_i32_0 = arith.constant 0 : i32
    return %arg0, %c0_i32 : i32, i32
  }
  func.func @transform_5(%arg0: i32) -> (i32, i32) {
    %c0_i32 = arith.constant 0 : i32
    %c0_i32_0 = arith.constant 0 : i32
    return %arg0, %c0_i32 : i32, i32
  }
  func.func @transform_6(%arg0: i32) -> (i32, i32) {
    %c0_i32 = arith.constant 0 : i32
    %c0_i32_0 = arith.constant 0 : i32
    %c0_i32_1 = arith.constant 0 : i32
    return %c0_i32, %c0_i32_0 : i32, i32
  }
  func.func @transform_7(%arg0: i32) -> (i32, i32) {
    %c0_i32 = arith.constant 0 : i32
    %c0_i32_0 = arith.constant 0 : i32
    %c0_i32_1 = arith.constant 0 : i32
    return %c0_i32, %c0_i32_0 : i32, i32
  }
}

module attributes {stable_mosaic.version = 11 : i64} {
  func.func @bn_silu_matmul_stats_kernel(%arg0: i32, %arg1: memref<256x16xbf16, #tpu.memory_space<vmem>>, %arg2: memref<1x16xf32, #tpu.memory_space<vmem>>, %arg3: memref<1x16xf32, #tpu.memory_space<vmem>>, %arg4: memref<256x16xbf16, #tpu.memory_space<vmem>>, %arg5: memref<16x16xbf16, #tpu.memory_space<vmem>>, %arg6: memref<256x16xbf16, #tpu.memory_space<vmem>>, %arg7: memref<1x16xf32, #tpu.memory_space<vmem>>, %arg8: memref<1x16xf32, #tpu.memory_space<vmem>>) attributes {dimension_semantics = [#tpu.dimension_semantics<arbitrary>], iteration_bounds = array<i64: 2>, scalar_prefetch = 0 : i64, scratch_operands = 0 : i64, tpu.core_type = #tpu.core_type<tc>, window_params = [{transform_indices = @transform_0, window_bounds = array<i64: 256, 16>}, {pipeline_mode = #tpu.pipeline_mode<synchronous>, transform_indices = @transform_1, window_bounds = array<i64: 1, 16>}, {pipeline_mode = #tpu.pipeline_mode<synchronous>, transform_indices = @transform_2, window_bounds = array<i64: 1, 16>}, {transform_indices = @transform_3, window_bounds = array<i64: 256, 16>}, {pipeline_mode = #tpu.pipeline_mode<synchronous>, transform_indices = @transform_4, window_bounds = array<i64: 16, 16>}, {transform_indices = @transform_5, window_bounds = array<i64: 256, 16>}, {pipeline_mode = #tpu.pipeline_mode<synchronous>, transform_indices = @transform_6, window_bounds = array<i64: 1, 16>}, {pipeline_mode = #tpu.pipeline_mode<synchronous>, transform_indices = @transform_7, window_bounds = array<i64: 1, 16>}]} {
    %c0_i32 = arith.constant 0 : i32
    %0 = arith.cmpi eq, %arg0, %c0_i32 : i32
    %1 = arith.extui %0 : i1 to i32
    %c0_i32_0 = arith.constant 0 : i32
    %2 = arith.cmpi ne, %1, %c0_i32_0 : i32
    scf.if %2 {
      %cst_23 = arith.constant 0.000000e+00 : f32
      %36 = vector.broadcast %cst_23 : f32 to vector<1x16xf32>
      %c0_24 = arith.constant 0 : index
      %c0_25 = arith.constant 0 : index
      %37 = vector.load %arg7[%c0_24, %c0_25] : memref<1x16xf32, #tpu.memory_space<vmem>>, vector<1x16xf32>
      tpu.vector_store %arg7[%c0_24, %c0_25], %36 {strides = array<i32>} : memref<1x16xf32, #tpu.memory_space<vmem>>, vector<1x16xf32>,
      %cst_26 = arith.constant 0.000000e+00 : f32
      %38 = vector.broadcast %cst_26 : f32 to vector<1x16xf32>
      %c0_27 = arith.constant 0 : index
      %c0_28 = arith.constant 0 : index
      %39 = vector.load %arg8[%c0_27, %c0_28] : memref<1x16xf32, #tpu.memory_space<vmem>>, vector<1x16xf32>
      tpu.vector_store %arg8[%c0_27, %c0_28], %38 {strides = array<i32>} : memref<1x16xf32, #tpu.memory_space<vmem>>, vector<1x16xf32>,
    } else {
    }
    %c0 = arith.constant 0 : index
    %c0_1 = arith.constant 0 : index
    %3 = vector.load %arg1[%c0, %c0_1] : memref<256x16xbf16, #tpu.memory_space<vmem>>, vector<256x16xbf16>
    %4 = arith.extf %3 : vector<256x16xbf16> to vector<256x16xf32>
    %c0_2 = arith.constant 0 : index
    %c0_3 = arith.constant 0 : index
    %5 = vector.load %arg2[%c0_2, %c0_3] : memref<1x16xf32, #tpu.memory_space<vmem>>, vector<1x16xf32>
    %6 = vector.broadcast %5 : vector<1x16xf32> to vector<256x16xf32>
    %7 = arith.mulf %4, %6 : vector<256x16xf32>
    %c0_4 = arith.constant 0 : index
    %c0_5 = arith.constant 0 : index
    %8 = vector.load %arg3[%c0_4, %c0_5] : memref<1x16xf32, #tpu.memory_space<vmem>>, vector<1x16xf32>
    %9 = vector.broadcast %8 : vector<1x16xf32> to vector<256x16xf32>
    %10 = arith.addf %7, %9 : vector<256x16xf32>
    %11 = arith.negf %10 : vector<256x16xf32>
    %12 = math.exp %11 : vector<256x16xf32>
    %cst = arith.constant 1.000000e+00 : f32
    %13 = vector.broadcast %cst : f32 to vector<256x16xf32>
    %14 = arith.addf %13, %12 : vector<256x16xf32>
    %15 = arith.divf %13, %14 : vector<256x16xf32>
    %16 = arith.mulf %10, %15 : vector<256x16xf32>
    %c0_6 = arith.constant 0 : index
    %c0_7 = arith.constant 0 : index
    %17 = vector.load %arg4[%c0_6, %c0_7] : memref<256x16xbf16, #tpu.memory_space<vmem>>, vector<256x16xbf16>
    %18 = arith.extf %17 : vector<256x16xbf16> to vector<256x16xf32>
    %19 = arith.addf %18, %16 : vector<256x16xf32>
    %20 = arith.truncf %19 : vector<256x16xf32> to vector<256x16xbf16>
    %c0_8 = arith.constant 0 : index
    %c0_9 = arith.constant 0 : index
    %21 = vector.load %arg5[%c0_8, %c0_9] : memref<16x16xbf16, #tpu.memory_space<vmem>>, vector<16x16xbf16>
    %cst_10 = arith.constant dense<0.000000e+00> : vector<256x16xf32>
    %22 = tpu.matmul %20, %21, %cst_10 {dimension_numbers = #tpu.dot_dimension_numbers<[1], [0], [0], [1], [0, 0, 1, 1], [], []>} : vector<256x16xbf16>, vector<16x16xbf16>, vector<256x16xf32> -> vector<256x16xf32>
    %23 = arith.truncf %22 : vector<256x16xf32> to vector<256x16xbf16>
    %c0_11 = arith.constant 0 : index
    %c0_12 = arith.constant 0 : index
    %24 = vector.load %arg6[%c0_11, %c0_12] : memref<256x16xbf16, #tpu.memory_space<vmem>>, vector<256x16xbf16>
    tpu.vector_store %arg6[%c0_11, %c0_12], %23 {strides = array<i32>} : memref<256x16xbf16, #tpu.memory_space<vmem>>, vector<256x16xbf16>,
    %c0_13 = arith.constant 0 : index
    %c0_14 = arith.constant 0 : index
    %25 = vector.load %arg7[%c0_13, %c0_14] : memref<1x16xf32, #tpu.memory_space<vmem>>, vector<1x16xf32>
    %cst_15 = arith.constant dense<0.000000e+00> : vector<16xf32>
    %26 = vector.multi_reduction <add>, %22, %cst_15 [0] : vector<256x16xf32> to vector<16xf32>
    %27 = vector.shape_cast %26 : vector<16xf32> to vector<1x16xf32>
    %28 = arith.addf %25, %27 : vector<1x16xf32>
    %c0_16 = arith.constant 0 : index
    %c0_17 = arith.constant 0 : index
    %29 = vector.load %arg7[%c0_16, %c0_17] : memref<1x16xf32, #tpu.memory_space<vmem>>, vector<1x16xf32>
    tpu.vector_store %arg7[%c0_16, %c0_17], %28 {strides = array<i32>} : memref<1x16xf32, #tpu.memory_space<vmem>>, vector<1x16xf32>,
    %c0_18 = arith.constant 0 : index
    %c0_19 = arith.constant 0 : index
    %30 = vector.load %arg8[%c0_18, %c0_19] : memref<1x16xf32, #tpu.memory_space<vmem>>, vector<1x16xf32>
    %31 = arith.mulf %22, %22 : vector<256x16xf32>
    %cst_20 = arith.constant dense<0.000000e+00> : vector<16xf32>
    %32 = vector.multi_reduction <add>, %31, %cst_20 [0] : vector<256x16xf32> to vector<16xf32>
    %33 = vector.shape_cast %32 : vector<16xf32> to vector<1x16xf32>
    %34 = arith.addf %30, %33 : vector<1x16xf32>
    %c0_21 = arith.constant 0 : index
    %c0_22 = arith.constant 0 : index
    %35 = vector.load %arg8[%c0_21, %c0_22] : memref<1x16xf32, #tpu.memory_space<vmem>>, vector<1x16xf32>
    tpu.vector_store %arg8[%c0_21, %c0_22], %34 {strides = array<i32>} : memref<1x16xf32, #tpu.memory_space<vmem>>, vector<1x16xf32>,
    return
  }
  func.func @transform_0(%arg0: i32) -> (i32, i32) {
    %c0_i32 = arith.constant 0 : i32
    %c0_i32_0 = arith.constant 0 : i32
    return %arg0, %c0_i32 : i32, i32
  }
  func.func @transform_1(%arg0: i32) -> (i32, i32) {
    %c0_i32 = arith.constant 0 : i32
    %c0_i32_0 = arith.constant 0 : i32
    %c0_i32_1 = arith.constant 0 : i32
    return %c0_i32, %c0_i32_0 : i32, i32
  }
  func.func @transform_2(%arg0: i32) -> (i32, i32) {
    %c0_i32 = arith.constant 0 : i32
    %c0_i32_0 = arith.constant 0 : i32
    %c0_i32_1 = arith.constant 0 : i32
    return %c0_i32, %c0_i32_0 : i32, i32
  }
  func.func @transform_3(%arg0: i32) -> (i32, i32) {
    %c0_i32 = arith.constant 0 : i32
    %c0_i32_0 = arith.constant 0 : i32
    return %arg0, %c0_i32 : i32, i32
  }
  func.func @transform_4(%arg0: i32) -> (i32, i32) {
    %c0_i32 = arith.constant 0 : i32
    %c0_i32_0 = arith.constant 0 : i32
    %c0_i32_1 = arith.constant 0 : i32
    return %c0_i32, %c0_i32_0 : i32, i32
  }
  func.func @transform_5(%arg0: i32) -> (i32, i32) {
    %c0_i32 = arith.constant 0 : i32
    %c0_i32_0 = arith.constant 0 : i32
    return %arg0, %c0_i32 : i32, i32
  }
  func.func @transform_6(%arg0: i32) -> (i32, i32) {
    %c0_i32 = arith.constant 0 : i32
    %c0_i32_0 = arith.constant 0 : i32
    %c0_i32_1 = arith.constant 0 : i32
    return %c0_i32, %c0_i32_0 : i32, i32
  }
  func.func @transform_7(%arg0: i32) -> (i32, i32) {
    %c0_i32 = arith.constant 0 : i32
    %c0_i32_0 = arith.constant 0 : i32
    %c0_i32_1 = arith.constant 0 : i32
    return %c0_i32, %c0_i32_0 : i32, i32
  }
}

module attributes {stable_mosaic.version = 11 : i64} {
  func.func @bn_silu_conv3x3_stats_kernel(%arg0: i32, %arg1: memref<1x16x16x16xbf16, #tpu.memory_space<vmem>>, %arg2: memref<1x1x16xf32, #tpu.memory_space<vmem>>, %arg3: memref<1x1x16xf32, #tpu.memory_space<vmem>>, %arg4: memref<9x16x16xbf16, #tpu.memory_space<vmem>>, %arg5: memref<1x16x16x16xbf16, #tpu.memory_space<vmem>>, %arg6: memref<1x16xf32, #tpu.memory_space<vmem>>, %arg7: memref<1x16xf32, #tpu.memory_space<vmem>>, %arg8: memref<18x18x16xf32, #tpu.memory_space<vmem>>, %arg9: memref<256x16xf32, #tpu.memory_space<vmem>>) attributes {dimension_semantics = [#tpu.dimension_semantics<arbitrary>], iteration_bounds = array<i64: 2>, scalar_prefetch = 0 : i64, scratch_operands = 2 : i64, tpu.core_type = #tpu.core_type<tc>, window_params = [{transform_indices = @transform_0, window_bounds = array<i64: 1, 16, 16, 16>}, {pipeline_mode = #tpu.pipeline_mode<synchronous>, transform_indices = @transform_1, window_bounds = array<i64: 1, 1, 16>}, {pipeline_mode = #tpu.pipeline_mode<synchronous>, transform_indices = @transform_2, window_bounds = array<i64: 1, 1, 16>}, {pipeline_mode = #tpu.pipeline_mode<synchronous>, transform_indices = @transform_3, window_bounds = array<i64: 9, 16, 16>}, {transform_indices = @transform_4, window_bounds = array<i64: 1, 16, 16, 16>}, {pipeline_mode = #tpu.pipeline_mode<synchronous>, transform_indices = @transform_5, window_bounds = array<i64: 1, 16>}, {pipeline_mode = #tpu.pipeline_mode<synchronous>, transform_indices = @transform_6, window_bounds = array<i64: 1, 16>}]} {
    %c0_i32 = arith.constant 0 : i32
    %0 = arith.cmpi eq, %arg0, %c0_i32 : i32
    %1 = arith.extui %0 : i1 to i32
    %c0_i32_0 = arith.constant 0 : i32
    %2 = arith.cmpi ne, %1, %c0_i32_0 : i32
    scf.if %2 {
      %cst_123 = arith.constant 0.000000e+00 : f32
      %119 = vector.broadcast %cst_123 : f32 to vector<1x16xf32>
      %c0_124 = arith.constant 0 : index
      %c0_125 = arith.constant 0 : index
      %120 = vector.load %arg6[%c0_124, %c0_125] : memref<1x16xf32, #tpu.memory_space<vmem>>, vector<1x16xf32>
      tpu.vector_store %arg6[%c0_124, %c0_125], %119 {strides = array<i32>} : memref<1x16xf32, #tpu.memory_space<vmem>>, vector<1x16xf32>,
      %cst_126 = arith.constant 0.000000e+00 : f32
      %121 = vector.broadcast %cst_126 : f32 to vector<1x16xf32>
      %c0_127 = arith.constant 0 : index
      %c0_128 = arith.constant 0 : index
      %122 = vector.load %arg7[%c0_127, %c0_128] : memref<1x16xf32, #tpu.memory_space<vmem>>, vector<1x16xf32>
      tpu.vector_store %arg7[%c0_127, %c0_128], %121 {strides = array<i32>} : memref<1x16xf32, #tpu.memory_space<vmem>>, vector<1x16xf32>,
      %cst_129 = arith.constant 0.000000e+00 : f32
      %123 = vector.broadcast %cst_129 : f32 to vector<18x18x16xf32>
      %c0_130 = arith.constant 0 : index
      %c0_131 = arith.constant 0 : index
      %c0_132 = arith.constant 0 : index
      %124 = vector.load %arg8[%c0_130, %c0_131, %c0_132] : memref<18x18x16xf32, #tpu.memory_space<vmem>>, vector<18x18x16xf32>
      tpu.vector_store %arg8[%c0_130, %c0_131, %c0_132], %123 {strides = array<i32>} : memref<18x18x16xf32, #tpu.memory_space<vmem>>, vector<18x18x16xf32>,
    } else {
    }
    %c0 = arith.constant 0 : index
    %c0_1 = arith.constant 0 : index
    %c0_2 = arith.constant 0 : index
    %c0_3 = arith.constant 0 : index
    %3 = vector.load %arg1[%c0, %c0_1, %c0_2, %c0_3] : memref<1x16x16x16xbf16, #tpu.memory_space<vmem>>, vector<1x16x16x16xbf16>
    %4 = vector.shape_cast %3 : vector<1x16x16x16xbf16> to vector<16x16x16xbf16>
    %5 = arith.extf %4 : vector<16x16x16xbf16> to vector<16x16x16xf32>
    %c0_4 = arith.constant 0 : index
    %c0_5 = arith.constant 0 : index
    %c0_6 = arith.constant 0 : index
    %6 = vector.load %arg2[%c0_4, %c0_5, %c0_6] : memref<1x1x16xf32, #tpu.memory_space<vmem>>, vector<1x1x16xf32>
    %7 = vector.broadcast %6 : vector<1x1x16xf32> to vector<16x16x16xf32>
    %8 = arith.mulf %5, %7 : vector<16x16x16xf32>
    %c0_7 = arith.constant 0 : index
    %c0_8 = arith.constant 0 : index
    %c0_9 = arith.constant 0 : index
    %9 = vector.load %arg3[%c0_7, %c0_8, %c0_9] : memref<1x1x16xf32, #tpu.memory_space<vmem>>, vector<1x1x16xf32>
    %10 = vector.broadcast %9 : vector<1x1x16xf32> to vector<16x16x16xf32>
    %11 = arith.addf %8, %10 : vector<16x16x16xf32>
    %12 = arith.negf %11 : vector<16x16x16xf32>
    %13 = math.exp %12 : vector<16x16x16xf32>
    %cst = arith.constant 1.000000e+00 : f32
    %14 = vector.broadcast %cst : f32 to vector<16x16x16xf32>
    %15 = arith.addf %14, %13 : vector<16x16x16xf32>
    %16 = arith.divf %14, %15 : vector<16x16x16xf32>
    %17 = arith.mulf %11, %16 : vector<16x16x16xf32>
    %c1 = arith.constant 1 : index
    %c1_10 = arith.constant 1 : index
    %c0_11 = arith.constant 0 : index
    %18 = vector.load %arg8[%c1, %c1_10, %c0_11] : memref<18x18x16xf32, #tpu.memory_space<vmem>>, vector<16x16x16xf32>
    tpu.vector_store %arg8[%c1, %c1_10, %c0_11], %17 {strides = array<i32>} : memref<18x18x16xf32, #tpu.memory_space<vmem>>, vector<16x16x16xf32>,
    %cst_12 = arith.constant 0.000000e+00 : f32
    %19 = vector.broadcast %cst_12 : f32 to vector<256x16xf32>
    %c0_13 = arith.constant 0 : index
    %c0_14 = arith.constant 0 : index
    %20 = vector.load %arg9[%c0_13, %c0_14] : memref<256x16xf32, #tpu.memory_space<vmem>>, vector<256x16xf32>
    tpu.vector_store %arg9[%c0_13, %c0_14], %19 {strides = array<i32>} : memref<256x16xf32, #tpu.memory_space<vmem>>, vector<256x16xf32>,
    %c0_15 = arith.constant 0 : index
    %c0_16 = arith.constant 0 : index
    %c0_17 = arith.constant 0 : index
    %21 = vector.load %arg8[%c0_15, %c0_16, %c0_17] : memref<18x18x16xf32, #tpu.memory_space<vmem>>, vector<16x16x16xf32>
    %22 = vector.shape_cast %21 : vector<16x16x16xf32> to vector<256x16xf32>
    %23 = arith.truncf %22 : vector<256x16xf32> to vector<256x16xbf16>
    %c0_18 = arith.constant 0 : index
    %c0_19 = arith.constant 0 : index
    %24 = vector.load %arg9[%c0_18, %c0_19] : memref<256x16xf32, #tpu.memory_space<vmem>>, vector<256x16xf32>
    %c0_20 = arith.constant 0 : index
    %c0_21 = arith.constant 0 : index
    %c0_22 = arith.constant 0 : index
    %25 = vector.load %arg4[%c0_20, %c0_21, %c0_22] : memref<9x16x16xbf16, #tpu.memory_space<vmem>>, vector<1x16x16xbf16>
    %26 = vector.shape_cast %25 : vector<1x16x16xbf16> to vector<16x16xbf16>
    %cst_23 = arith.constant dense<0.000000e+00> : vector<256x16xf32>
    %27 = tpu.matmul %23, %26, %cst_23 {dimension_numbers = #tpu.dot_dimension_numbers<[1], [0], [0], [1], [0, 0, 1, 1], [], []>} : vector<256x16xbf16>, vector<16x16xbf16>, vector<256x16xf32> -> vector<256x16xf32>
    %28 = arith.addf %24, %27 : vector<256x16xf32>
    %c0_24 = arith.constant 0 : index
    %c0_25 = arith.constant 0 : index
    %29 = vector.load %arg9[%c0_24, %c0_25] : memref<256x16xf32, #tpu.memory_space<vmem>>, vector<256x16xf32>
    tpu.vector_store %arg9[%c0_24, %c0_25], %28 {strides = array<i32>} : memref<256x16xf32, #tpu.memory_space<vmem>>, vector<256x16xf32>,
    %c0_26 = arith.constant 0 : index
    %c1_27 = arith.constant 1 : index
    %c0_28 = arith.constant 0 : index
    %30 = vector.load %arg8[%c0_26, %c1_27, %c0_28] : memref<18x18x16xf32, #tpu.memory_space<vmem>>, vector<16x16x16xf32>
    %31 = vector.shape_cast %30 : vector<16x16x16xf32> to vector<256x16xf32>
    %32 = arith.truncf %31 : vector<256x16xf32> to vector<256x16xbf16>
    %c0_29 = arith.constant 0 : index
    %c0_30 = arith.constant 0 : index
    %33 = vector.load %arg9[%c0_29, %c0_30] : memref<256x16xf32, #tpu.memory_space<vmem>>, vector<256x16xf32>
    %c1_31 = arith.constant 1 : index
    %c0_32 = arith.constant 0 : index
    %c0_33 = arith.constant 0 : index
    %34 = vector.load %arg4[%c1_31, %c0_32, %c0_33] : memref<9x16x16xbf16, #tpu.memory_space<vmem>>, vector<1x16x16xbf16>
    %35 = vector.shape_cast %34 : vector<1x16x16xbf16> to vector<16x16xbf16>
    %cst_34 = arith.constant dense<0.000000e+00> : vector<256x16xf32>
    %36 = tpu.matmul %32, %35, %cst_34 {dimension_numbers = #tpu.dot_dimension_numbers<[1], [0], [0], [1], [0, 0, 1, 1], [], []>} : vector<256x16xbf16>, vector<16x16xbf16>, vector<256x16xf32> -> vector<256x16xf32>
    %37 = arith.addf %33, %36 : vector<256x16xf32>
    %c0_35 = arith.constant 0 : index
    %c0_36 = arith.constant 0 : index
    %38 = vector.load %arg9[%c0_35, %c0_36] : memref<256x16xf32, #tpu.memory_space<vmem>>, vector<256x16xf32>
    tpu.vector_store %arg9[%c0_35, %c0_36], %37 {strides = array<i32>} : memref<256x16xf32, #tpu.memory_space<vmem>>, vector<256x16xf32>,
    %c0_37 = arith.constant 0 : index
    %c2 = arith.constant 2 : index
    %c0_38 = arith.constant 0 : index
    %39 = vector.load %arg8[%c0_37, %c2, %c0_38] : memref<18x18x16xf32, #tpu.memory_space<vmem>>, vector<16x16x16xf32>
    %40 = vector.shape_cast %39 : vector<16x16x16xf32> to vector<256x16xf32>
    %41 = arith.truncf %40 : vector<256x16xf32> to vector<256x16xbf16>
    %c0_39 = arith.constant 0 : index
    %c0_40 = arith.constant 0 : index
    %42 = vector.load %arg9[%c0_39, %c0_40] : memref<256x16xf32, #tpu.memory_space<vmem>>, vector<256x16xf32>
    %c2_41 = arith.constant 2 : index
    %c0_42 = arith.constant 0 : index
    %c0_43 = arith.constant 0 : index
    %43 = vector.load %arg4[%c2_41, %c0_42, %c0_43] : memref<9x16x16xbf16, #tpu.memory_space<vmem>>, vector<1x16x16xbf16>
    %44 = vector.shape_cast %43 : vector<1x16x16xbf16> to vector<16x16xbf16>
    %cst_44 = arith.constant dense<0.000000e+00> : vector<256x16xf32>
    %45 = tpu.matmul %41, %44, %cst_44 {dimension_numbers = #tpu.dot_dimension_numbers<[1], [0], [0], [1], [0, 0, 1, 1], [], []>} : vector<256x16xbf16>, vector<16x16xbf16>, vector<256x16xf32> -> vector<256x16xf32>
    %46 = arith.addf %42, %45 : vector<256x16xf32>
    %c0_45 = arith.constant 0 : index
    %c0_46 = arith.constant 0 : index
    %47 = vector.load %arg9[%c0_45, %c0_46] : memref<256x16xf32, #tpu.memory_space<vmem>>, vector<256x16xf32>
    tpu.vector_store %arg9[%c0_45, %c0_46], %46 {strides = array<i32>} : memref<256x16xf32, #tpu.memory_space<vmem>>, vector<256x16xf32>,
    %c1_47 = arith.constant 1 : index
    %c0_48 = arith.constant 0 : index
    %c0_49 = arith.constant 0 : index
    %48 = vector.load %arg8[%c1_47, %c0_48, %c0_49] : memref<18x18x16xf32, #tpu.memory_space<vmem>>, vector<16x16x16xf32>
    %49 = vector.shape_cast %48 : vector<16x16x16xf32> to vector<256x16xf32>
    %50 = arith.truncf %49 : vector<256x16xf32> to vector<256x16xbf16>
    %c0_50 = arith.constant 0 : index
    %c0_51 = arith.constant 0 : index
    %51 = vector.load %arg9[%c0_50, %c0_51] : memref<256x16xf32, #tpu.memory_space<vmem>>, vector<256x16xf32>
    %c3 = arith.constant 3 : index
    %c0_52 = arith.constant 0 : index
    %c0_53 = arith.constant 0 : index
    %52 = vector.load %arg4[%c3, %c0_52, %c0_53] : memref<9x16x16xbf16, #tpu.memory_space<vmem>>, vector<1x16x16xbf16>
    %53 = vector.shape_cast %52 : vector<1x16x16xbf16> to vector<16x16xbf16>
    %cst_54 = arith.constant dense<0.000000e+00> : vector<256x16xf32>
    %54 = tpu.matmul %50, %53, %cst_54 {dimension_numbers = #tpu.dot_dimension_numbers<[1], [0], [0], [1], [0, 0, 1, 1], [], []>} : vector<256x16xbf16>, vector<16x16xbf16>, vector<256x16xf32> -> vector<256x16xf32>
    %55 = arith.addf %51, %54 : vector<256x16xf32>
    %c0_55 = arith.constant 0 : index
    %c0_56 = arith.constant 0 : index
    %56 = vector.load %arg9[%c0_55, %c0_56] : memref<256x16xf32, #tpu.memory_space<vmem>>, vector<256x16xf32>
    tpu.vector_store %arg9[%c0_55, %c0_56], %55 {strides = array<i32>} : memref<256x16xf32, #tpu.memory_space<vmem>>, vector<256x16xf32>,
    %c1_57 = arith.constant 1 : index
    %c1_58 = arith.constant 1 : index
    %c0_59 = arith.constant 0 : index
    %57 = vector.load %arg8[%c1_57, %c1_58, %c0_59] : memref<18x18x16xf32, #tpu.memory_space<vmem>>, vector<16x16x16xf32>
    %58 = vector.shape_cast %57 : vector<16x16x16xf32> to vector<256x16xf32>
    %59 = arith.truncf %58 : vector<256x16xf32> to vector<256x16xbf16>
    %c0_60 = arith.constant 0 : index
    %c0_61 = arith.constant 0 : index
    %60 = vector.load %arg9[%c0_60, %c0_61] : memref<256x16xf32, #tpu.memory_space<vmem>>, vector<256x16xf32>
    %c4 = arith.constant 4 : index
    %c0_62 = arith.constant 0 : index
    %c0_63 = arith.constant 0 : index
    %61 = vector.load %arg4[%c4, %c0_62, %c0_63] : memref<9x16x16xbf16, #tpu.memory_space<vmem>>, vector<1x16x16xbf16>
    %62 = vector.shape_cast %61 : vector<1x16x16xbf16> to vector<16x16xbf16>
    %cst_64 = arith.constant dense<0.000000e+00> : vector<256x16xf32>
    %63 = tpu.matmul %59, %62, %cst_64 {dimension_numbers = #tpu.dot_dimension_numbers<[1], [0], [0], [1], [0, 0, 1, 1], [], []>} : vector<256x16xbf16>, vector<16x16xbf16>, vector<256x16xf32> -> vector<256x16xf32>
    %64 = arith.addf %60, %63 : vector<256x16xf32>
    %c0_65 = arith.constant 0 : index
    %c0_66 = arith.constant 0 : index
    %65 = vector.load %arg9[%c0_65, %c0_66] : memref<256x16xf32, #tpu.memory_space<vmem>>, vector<256x16xf32>
    tpu.vector_store %arg9[%c0_65, %c0_66], %64 {strides = array<i32>} : memref<256x16xf32, #tpu.memory_space<vmem>>, vector<256x16xf32>,
    %c1_67 = arith.constant 1 : index
    %c2_68 = arith.constant 2 : index
    %c0_69 = arith.constant 0 : index
    %66 = vector.load %arg8[%c1_67, %c2_68, %c0_69] : memref<18x18x16xf32, #tpu.memory_space<vmem>>, vector<16x16x16xf32>
    %67 = vector.shape_cast %66 : vector<16x16x16xf32> to vector<256x16xf32>
    %68 = arith.truncf %67 : vector<256x16xf32> to vector<256x16xbf16>
    %c0_70 = arith.constant 0 : index
    %c0_71 = arith.constant 0 : index
    %69 = vector.load %arg9[%c0_70, %c0_71] : memref<256x16xf32, #tpu.memory_space<vmem>>, vector<256x16xf32>
    %c5 = arith.constant 5 : index
    %c0_72 = arith.constant 0 : index
    %c0_73 = arith.constant 0 : index
    %70 = vector.load %arg4[%c5, %c0_72, %c0_73] : memref<9x16x16xbf16, #tpu.memory_space<vmem>>, vector<1x16x16xbf16>
    %71 = vector.shape_cast %70 : vector<1x16x16xbf16> to vector<16x16xbf16>
    %cst_74 = arith.constant dense<0.000000e+00> : vector<256x16xf32>
    %72 = tpu.matmul %68, %71, %cst_74 {dimension_numbers = #tpu.dot_dimension_numbers<[1], [0], [0], [1], [0, 0, 1, 1], [], []>} : vector<256x16xbf16>, vector<16x16xbf16>, vector<256x16xf32> -> vector<256x16xf32>
    %73 = arith.addf %69, %72 : vector<256x16xf32>
    %c0_75 = arith.constant 0 : index
    %c0_76 = arith.constant 0 : index
    %74 = vector.load %arg9[%c0_75, %c0_76] : memref<256x16xf32, #tpu.memory_space<vmem>>, vector<256x16xf32>
    tpu.vector_store %arg9[%c0_75, %c0_76], %73 {strides = array<i32>} : memref<256x16xf32, #tpu.memory_space<vmem>>, vector<256x16xf32>,
    %c2_77 = arith.constant 2 : index
    %c0_78 = arith.constant 0 : index
    %c0_79 = arith.constant 0 : index
    %75 = vector.load %arg8[%c2_77, %c0_78, %c0_79] : memref<18x18x16xf32, #tpu.memory_space<vmem>>, vector<16x16x16xf32>
    %76 = vector.shape_cast %75 : vector<16x16x16xf32> to vector<256x16xf32>
    %77 = arith.truncf %76 : vector<256x16xf32> to vector<256x16xbf16>
    %c0_80 = arith.constant 0 : index
    %c0_81 = arith.constant 0 : index
    %78 = vector.load %arg9[%c0_80, %c0_81] : memref<256x16xf32, #tpu.memory_space<vmem>>, vector<256x16xf32>
    %c6 = arith.constant 6 : index
    %c0_82 = arith.constant 0 : index
    %c0_83 = arith.constant 0 : index
    %79 = vector.load %arg4[%c6, %c0_82, %c0_83] : memref<9x16x16xbf16, #tpu.memory_space<vmem>>, vector<1x16x16xbf16>
    %80 = vector.shape_cast %79 : vector<1x16x16xbf16> to vector<16x16xbf16>
    %cst_84 = arith.constant dense<0.000000e+00> : vector<256x16xf32>
    %81 = tpu.matmul %77, %80, %cst_84 {dimension_numbers = #tpu.dot_dimension_numbers<[1], [0], [0], [1], [0, 0, 1, 1], [], []>} : vector<256x16xbf16>, vector<16x16xbf16>, vector<256x16xf32> -> vector<256x16xf32>
    %82 = arith.addf %78, %81 : vector<256x16xf32>
    %c0_85 = arith.constant 0 : index
    %c0_86 = arith.constant 0 : index
    %83 = vector.load %arg9[%c0_85, %c0_86] : memref<256x16xf32, #tpu.memory_space<vmem>>, vector<256x16xf32>
    tpu.vector_store %arg9[%c0_85, %c0_86], %82 {strides = array<i32>} : memref<256x16xf32, #tpu.memory_space<vmem>>, vector<256x16xf32>,
    %c2_87 = arith.constant 2 : index
    %c1_88 = arith.constant 1 : index
    %c0_89 = arith.constant 0 : index
    %84 = vector.load %arg8[%c2_87, %c1_88, %c0_89] : memref<18x18x16xf32, #tpu.memory_space<vmem>>, vector<16x16x16xf32>
    %85 = vector.shape_cast %84 : vector<16x16x16xf32> to vector<256x16xf32>
    %86 = arith.truncf %85 : vector<256x16xf32> to vector<256x16xbf16>
    %c0_90 = arith.constant 0 : index
    %c0_91 = arith.constant 0 : index
    %87 = vector.load %arg9[%c0_90, %c0_91] : memref<256x16xf32, #tpu.memory_space<vmem>>, vector<256x16xf32>
    %c7 = arith.constant 7 : index
    %c0_92 = arith.constant 0 : index
    %c0_93 = arith.constant 0 : index
    %88 = vector.load %arg4[%c7, %c0_92, %c0_93] : memref<9x16x16xbf16, #tpu.memory_space<vmem>>, vector<1x16x16xbf16>
    %89 = vector.shape_cast %88 : vector<1x16x16xbf16> to vector<16x16xbf16>
    %cst_94 = arith.constant dense<0.000000e+00> : vector<256x16xf32>
    %90 = tpu.matmul %86, %89, %cst_94 {dimension_numbers = #tpu.dot_dimension_numbers<[1], [0], [0], [1], [0, 0, 1, 1], [], []>} : vector<256x16xbf16>, vector<16x16xbf16>, vector<256x16xf32> -> vector<256x16xf32>
    %91 = arith.addf %87, %90 : vector<256x16xf32>
    %c0_95 = arith.constant 0 : index
    %c0_96 = arith.constant 0 : index
    %92 = vector.load %arg9[%c0_95, %c0_96] : memref<256x16xf32, #tpu.memory_space<vmem>>, vector<256x16xf32>
    tpu.vector_store %arg9[%c0_95, %c0_96], %91 {strides = array<i32>} : memref<256x16xf32, #tpu.memory_space<vmem>>, vector<256x16xf32>,
    %c2_97 = arith.constant 2 : index
    %c2_98 = arith.constant 2 : index
    %c0_99 = arith.constant 0 : index
    %93 = vector.load %arg8[%c2_97, %c2_98, %c0_99] : memref<18x18x16xf32, #tpu.memory_space<vmem>>, vector<16x16x16xf32>
    %94 = vector.shape_cast %93 : vector<16x16x16xf32> to vector<256x16xf32>
    %95 = arith.truncf %94 : vector<256x16xf32> to vector<256x16xbf16>
    %c0_100 = arith.constant 0 : index
    %c0_101 = arith.constant 0 : index
    %96 = vector.load %arg9[%c0_100, %c0_101] : memref<256x16xf32, #tpu.memory_space<vmem>>, vector<256x16xf32>
    %c8 = arith.constant 8 : index
    %c0_102 = arith.constant 0 : index
    %c0_103 = arith.constant 0 : index
    %97 = vector.load %arg4[%c8, %c0_102, %c0_103] : memref<9x16x16xbf16, #tpu.memory_space<vmem>>, vector<1x16x16xbf16>
    %98 = vector.shape_cast %97 : vector<1x16x16xbf16> to vector<16x16xbf16>
    %cst_104 = arith.constant dense<0.000000e+00> : vector<256x16xf32>
    %99 = tpu.matmul %95, %98, %cst_104 {dimension_numbers = #tpu.dot_dimension_numbers<[1], [0], [0], [1], [0, 0, 1, 1], [], []>} : vector<256x16xbf16>, vector<16x16xbf16>, vector<256x16xf32> -> vector<256x16xf32>
    %100 = arith.addf %96, %99 : vector<256x16xf32>
    %c0_105 = arith.constant 0 : index
    %c0_106 = arith.constant 0 : index
    %101 = vector.load %arg9[%c0_105, %c0_106] : memref<256x16xf32, #tpu.memory_space<vmem>>, vector<256x16xf32>
    tpu.vector_store %arg9[%c0_105, %c0_106], %100 {strides = array<i32>} : memref<256x16xf32, #tpu.memory_space<vmem>>, vector<256x16xf32>,
    %c0_107 = arith.constant 0 : index
    %c0_108 = arith.constant 0 : index
    %102 = vector.load %arg9[%c0_107, %c0_108] : memref<256x16xf32, #tpu.memory_space<vmem>>, vector<256x16xf32>
    %103 = vector.shape_cast %102 : vector<256x16xf32> to vector<16x16x16xf32>
    %104 = arith.truncf %103 : vector<16x16x16xf32> to vector<16x16x16xbf16>
    %c0_109 = arith.constant 0 : index
    %c0_110 = arith.constant 0 : index
    %c0_111 = arith.constant 0 : index
    %c0_112 = arith.constant 0 : index
    %105 = vector.load %arg5[%c0_109, %c0_110, %c0_111, %c0_112] : memref<1x16x16x16xbf16, #tpu.memory_space<vmem>>, vector<1x16x16x16xbf16>
    %106 = vector.shape_cast %105 : vector<1x16x16x16xbf16> to vector<16x16x16xbf16>
    %107 = vector.shape_cast %104 : vector<16x16x16xbf16> to vector<1x16x16x16xbf16>
    tpu.vector_store %arg5[%c0_109, %c0_110, %c0_111, %c0_112], %107 {strides = array<i32>} : memref<1x16x16x16xbf16, #tpu.memory_space<vmem>>, vector<1x16x16x16xbf16>,
    %c0_113 = arith.constant 0 : index
    %c0_114 = arith.constant 0 : index
    %108 = vector.load %arg6[%c0_113, %c0_114] : memref<1x16xf32, #tpu.memory_space<vmem>>, vector<1x16xf32>
    %cst_115 = arith.constant dense<0.000000e+00> : vector<16xf32>
    %109 = vector.multi_reduction <add>, %102, %cst_115 [0] : vector<256x16xf32> to vector<16xf32>
    %110 = vector.shape_cast %109 : vector<16xf32> to vector<1x16xf32>
    %111 = arith.addf %108, %110 : vector<1x16xf32>
    %c0_116 = arith.constant 0 : index
    %c0_117 = arith.constant 0 : index
    %112 = vector.load %arg6[%c0_116, %c0_117] : memref<1x16xf32, #tpu.memory_space<vmem>>, vector<1x16xf32>
    tpu.vector_store %arg6[%c0_116, %c0_117], %111 {strides = array<i32>} : memref<1x16xf32, #tpu.memory_space<vmem>>, vector<1x16xf32>,
    %c0_118 = arith.constant 0 : index
    %c0_119 = arith.constant 0 : index
    %113 = vector.load %arg7[%c0_118, %c0_119] : memref<1x16xf32, #tpu.memory_space<vmem>>, vector<1x16xf32>
    %114 = arith.mulf %102, %102 : vector<256x16xf32>
    %cst_120 = arith.constant dense<0.000000e+00> : vector<16xf32>
    %115 = vector.multi_reduction <add>, %114, %cst_120 [0] : vector<256x16xf32> to vector<16xf32>
    %116 = vector.shape_cast %115 : vector<16xf32> to vector<1x16xf32>
    %117 = arith.addf %113, %116 : vector<1x16xf32>
    %c0_121 = arith.constant 0 : index
    %c0_122 = arith.constant 0 : index
    %118 = vector.load %arg7[%c0_121, %c0_122] : memref<1x16xf32, #tpu.memory_space<vmem>>, vector<1x16xf32>
    tpu.vector_store %arg7[%c0_121, %c0_122], %117 {strides = array<i32>} : memref<1x16xf32, #tpu.memory_space<vmem>>, vector<1x16xf32>,
    return
  }
  func.func @transform_0(%arg0: i32) -> (i32, i32, i32, i32) {
    %c0_i32 = arith.constant 0 : i32
    %c0_i32_0 = arith.constant 0 : i32
    %c0_i32_1 = arith.constant 0 : i32
    %c0_i32_2 = arith.constant 0 : i32
    return %arg0, %c0_i32, %c0_i32_0, %c0_i32_1 : i32, i32, i32, i32
  }
  func.func @transform_1(%arg0: i32) -> (i32, i32, i32) {
    %c0_i32 = arith.constant 0 : i32
    %c0_i32_0 = arith.constant 0 : i32
    %c0_i32_1 = arith.constant 0 : i32
    %c0_i32_2 = arith.constant 0 : i32
    return %c0_i32, %c0_i32_0, %c0_i32_1 : i32, i32, i32
  }
  func.func @transform_2(%arg0: i32) -> (i32, i32, i32) {
    %c0_i32 = arith.constant 0 : i32
    %c0_i32_0 = arith.constant 0 : i32
    %c0_i32_1 = arith.constant 0 : i32
    %c0_i32_2 = arith.constant 0 : i32
    return %c0_i32, %c0_i32_0, %c0_i32_1 : i32, i32, i32
  }
  func.func @transform_3(%arg0: i32) -> (i32, i32, i32) {
    %c0_i32 = arith.constant 0 : i32
    %c0_i32_0 = arith.constant 0 : i32
    %c0_i32_1 = arith.constant 0 : i32
    %c0_i32_2 = arith.constant 0 : i32
    return %c0_i32, %c0_i32_0, %c0_i32_1 : i32, i32, i32
  }
  func.func @transform_4(%arg0: i32) -> (i32, i32, i32, i32) {
    %c0_i32 = arith.constant 0 : i32
    %c0_i32_0 = arith.constant 0 : i32
    %c0_i32_1 = arith.constant 0 : i32
    %c0_i32_2 = arith.constant 0 : i32
    return %arg0, %c0_i32, %c0_i32_0, %c0_i32_1 : i32, i32, i32, i32
  }
  func.func @transform_5(%arg0: i32) -> (i32, i32) {
    %c0_i32 = arith.constant 0 : i32
    %c0_i32_0 = arith.constant 0 : i32
    %c0_i32_1 = arith.constant 0 : i32
    return %c0_i32, %c0_i32_0 : i32, i32
  }
  func.func @transform_6(%arg0: i32) -> (i32, i32) {
    %c0_i32 = arith.constant 0 : i32
    %c0_i32_0 = arith.constant 0 : i32
    %c0_i32_1 = arith.constant 0 : i32
    return %c0_i32, %c0_i32_0 : i32, i32
  }
}

module attributes {stable_mosaic.version = 11 : i64} {
  func.func @cat_bn_silu_matmul_stats_kernel(%arg0: i32, %arg1: memref<256x16xbf16, #tpu.memory_space<vmem>>, %arg2: memref<256x16xbf16, #tpu.memory_space<vmem>>, %arg3: memref<1x32xf32, #tpu.memory_space<vmem>>, %arg4: memref<1x32xf32, #tpu.memory_space<vmem>>, %arg5: memref<32x32xbf16, #tpu.memory_space<vmem>>, %arg6: memref<256x32xbf16, #tpu.memory_space<vmem>>, %arg7: memref<1x32xf32, #tpu.memory_space<vmem>>, %arg8: memref<1x32xf32, #tpu.memory_space<vmem>>) attributes {dimension_semantics = [#tpu.dimension_semantics<arbitrary>], iteration_bounds = array<i64: 2>, scalar_prefetch = 0 : i64, scratch_operands = 0 : i64, tpu.core_type = #tpu.core_type<tc>, window_params = [{transform_indices = @transform_0, window_bounds = array<i64: 256, 16>}, {transform_indices = @transform_1, window_bounds = array<i64: 256, 16>}, {pipeline_mode = #tpu.pipeline_mode<synchronous>, transform_indices = @transform_2, window_bounds = array<i64: 1, 32>}, {pipeline_mode = #tpu.pipeline_mode<synchronous>, transform_indices = @transform_3, window_bounds = array<i64: 1, 32>}, {pipeline_mode = #tpu.pipeline_mode<synchronous>, transform_indices = @transform_4, window_bounds = array<i64: 32, 32>}, {transform_indices = @transform_5, window_bounds = array<i64: 256, 32>}, {pipeline_mode = #tpu.pipeline_mode<synchronous>, transform_indices = @transform_6, window_bounds = array<i64: 1, 32>}, {pipeline_mode = #tpu.pipeline_mode<synchronous>, transform_indices = @transform_7, window_bounds = array<i64: 1, 32>}]} {
    %c0_i32 = arith.constant 0 : i32
    %0 = arith.cmpi eq, %arg0, %c0_i32 : i32
    %1 = arith.extui %0 : i1 to i32
    %c0_i32_0 = arith.constant 0 : i32
    %2 = arith.cmpi ne, %1, %c0_i32_0 : i32
    scf.if %2 {
      %cst_23 = arith.constant 0.000000e+00 : f32
      %36 = vector.broadcast %cst_23 : f32 to vector<1x32xf32>
      %c0_24 = arith.constant 0 : index
      %c0_25 = arith.constant 0 : index
      %37 = vector.load %arg7[%c0_24, %c0_25] : memref<1x32xf32, #tpu.memory_space<vmem>>, vector<1x32xf32>
      tpu.vector_store %arg7[%c0_24, %c0_25], %36 {strides = array<i32>} : memref<1x32xf32, #tpu.memory_space<vmem>>, vector<1x32xf32>,
      %cst_26 = arith.constant 0.000000e+00 : f32
      %38 = vector.broadcast %cst_26 : f32 to vector<1x32xf32>
      %c0_27 = arith.constant 0 : index
      %c0_28 = arith.constant 0 : index
      %39 = vector.load %arg8[%c0_27, %c0_28] : memref<1x32xf32, #tpu.memory_space<vmem>>, vector<1x32xf32>
      tpu.vector_store %arg8[%c0_27, %c0_28], %38 {strides = array<i32>} : memref<1x32xf32, #tpu.memory_space<vmem>>, vector<1x32xf32>,
    } else {
    }
    %c0 = arith.constant 0 : index
    %c0_1 = arith.constant 0 : index
    %3 = vector.load %arg1[%c0, %c0_1] : memref<256x16xbf16, #tpu.memory_space<vmem>>, vector<256x16xbf16>
    %4 = arith.extf %3 : vector<256x16xbf16> to vector<256x16xf32>
    %c0_2 = arith.constant 0 : index
    %c0_3 = arith.constant 0 : index
    %5 = vector.load %arg2[%c0_2, %c0_3] : memref<256x16xbf16, #tpu.memory_space<vmem>>, vector<256x16xbf16>
    %6 = arith.extf %5 : vector<256x16xbf16> to vector<256x16xf32>
    %7 = tpu.concatenate %4, %6 in 1 : vector<256x16xf32>, vector<256x16xf32> -> vector<256x32xf32>
    %c0_4 = arith.constant 0 : index
    %c0_5 = arith.constant 0 : index
    %8 = vector.load %arg3[%c0_4, %c0_5] : memref<1x32xf32, #tpu.memory_space<vmem>>, vector<1x32xf32>
    %9 = vector.broadcast %8 : vector<1x32xf32> to vector<256x32xf32>
    %10 = arith.mulf %7, %9 : vector<256x32xf32>
    %c0_6 = arith.constant 0 : index
    %c0_7 = arith.constant 0 : index
    %11 = vector.load %arg4[%c0_6, %c0_7] : memref<1x32xf32, #tpu.memory_space<vmem>>, vector<1x32xf32>
    %12 = vector.broadcast %11 : vector<1x32xf32> to vector<256x32xf32>
    %13 = arith.addf %10, %12 : vector<256x32xf32>
    %14 = arith.negf %13 : vector<256x32xf32>
    %15 = math.exp %14 : vector<256x32xf32>
    %cst = arith.constant 1.000000e+00 : f32
    %16 = vector.broadcast %cst : f32 to vector<256x32xf32>
    %17 = arith.addf %16, %15 : vector<256x32xf32>
    %18 = arith.divf %16, %17 : vector<256x32xf32>
    %19 = arith.mulf %13, %18 : vector<256x32xf32>
    %20 = arith.truncf %19 : vector<256x32xf32> to vector<256x32xbf16>
    %c0_8 = arith.constant 0 : index
    %c0_9 = arith.constant 0 : index
    %21 = vector.load %arg5[%c0_8, %c0_9] : memref<32x32xbf16, #tpu.memory_space<vmem>>, vector<32x32xbf16>
    %cst_10 = arith.constant dense<0.000000e+00> : vector<256x32xf32>
    %22 = tpu.matmul %20, %21, %cst_10 {dimension_numbers = #tpu.dot_dimension_numbers<[1], [0], [0], [1], [0, 0, 1, 1], [], []>} : vector<256x32xbf16>, vector<32x32xbf16>, vector<256x32xf32> -> vector<256x32xf32>
    %23 = arith.truncf %22 : vector<256x32xf32> to vector<256x32xbf16>
    %c0_11 = arith.constant 0 : index
    %c0_12 = arith.constant 0 : index
    %24 = vector.load %arg6[%c0_11, %c0_12] : memref<256x32xbf16, #tpu.memory_space<vmem>>, vector<256x32xbf16>
    tpu.vector_store %arg6[%c0_11, %c0_12], %23 {strides = array<i32>} : memref<256x32xbf16, #tpu.memory_space<vmem>>, vector<256x32xbf16>,
    %c0_13 = arith.constant 0 : index
    %c0_14 = arith.constant 0 : index
    %25 = vector.load %arg7[%c0_13, %c0_14] : memref<1x32xf32, #tpu.memory_space<vmem>>, vector<1x32xf32>
    %cst_15 = arith.constant dense<0.000000e+00> : vector<32xf32>
    %26 = vector.multi_reduction <add>, %22, %cst_15 [0] : vector<256x32xf32> to vector<32xf32>
    %27 = vector.shape_cast %26 : vector<32xf32> to vector<1x32xf32>
    %28 = arith.addf %25, %27 : vector<1x32xf32>
    %c0_16 = arith.constant 0 : index
    %c0_17 = arith.constant 0 : index
    %29 = vector.load %arg7[%c0_16, %c0_17] : memref<1x32xf32, #tpu.memory_space<vmem>>, vector<1x32xf32>
    tpu.vector_store %arg7[%c0_16, %c0_17], %28 {strides = array<i32>} : memref<1x32xf32, #tpu.memory_space<vmem>>, vector<1x32xf32>,
    %c0_18 = arith.constant 0 : index
    %c0_19 = arith.constant 0 : index
    %30 = vector.load %arg8[%c0_18, %c0_19] : memref<1x32xf32, #tpu.memory_space<vmem>>, vector<1x32xf32>
    %31 = arith.mulf %22, %22 : vector<256x32xf32>
    %cst_20 = arith.constant dense<0.000000e+00> : vector<32xf32>
    %32 = vector.multi_reduction <add>, %31, %cst_20 [0] : vector<256x32xf32> to vector<32xf32>
    %33 = vector.shape_cast %32 : vector<32xf32> to vector<1x32xf32>
    %34 = arith.addf %30, %33 : vector<1x32xf32>
    %c0_21 = arith.constant 0 : index
    %c0_22 = arith.constant 0 : index
    %35 = vector.load %arg8[%c0_21, %c0_22] : memref<1x32xf32, #tpu.memory_space<vmem>>, vector<1x32xf32>
    tpu.vector_store %arg8[%c0_21, %c0_22], %34 {strides = array<i32>} : memref<1x32xf32, #tpu.memory_space<vmem>>, vector<1x32xf32>,
    return
  }
  func.func @transform_0(%arg0: i32) -> (i32, i32) {
    %c0_i32 = arith.constant 0 : i32
    %c0_i32_0 = arith.constant 0 : i32
    return %arg0, %c0_i32 : i32, i32
  }
  func.func @transform_1(%arg0: i32) -> (i32, i32) {
    %c0_i32 = arith.constant 0 : i32
    %c0_i32_0 = arith.constant 0 : i32
    return %arg0, %c0_i32 : i32, i32
  }
  func.func @transform_2(%arg0: i32) -> (i32, i32) {
    %c0_i32 = arith.constant 0 : i32
    %c0_i32_0 = arith.constant 0 : i32
    %c0_i32_1 = arith.constant 0 : i32
    return %c0_i32, %c0_i32_0 : i32, i32
  }
  func.func @transform_3(%arg0: i32) -> (i32, i32) {
    %c0_i32 = arith.constant 0 : i32
    %c0_i32_0 = arith.constant 0 : i32
    %c0_i32_1 = arith.constant 0 : i32
    return %c0_i32, %c0_i32_0 : i32, i32
  }
  func.func @transform_4(%arg0: i32) -> (i32, i32) {
    %c0_i32 = arith.constant 0 : i32
    %c0_i32_0 = arith.constant 0 : i32
    %c0_i32_1 = arith.constant 0 : i32
    return %c0_i32, %c0_i32_0 : i32, i32
  }
  func.func @transform_5(%arg0: i32) -> (i32, i32) {
    %c0_i32 = arith.constant 0 : i32
    %c0_i32_0 = arith.constant 0 : i32
    return %arg0, %c0_i32 : i32, i32
  }
  func.func @transform_6(%arg0: i32) -> (i32, i32) {
    %c0_i32 = arith.constant 0 : i32
    %c0_i32_0 = arith.constant 0 : i32
    %c0_i32_1 = arith.constant 0 : i32
    return %c0_i32, %c0_i32_0 : i32, i32
  }
  func.func @transform_7(%arg0: i32) -> (i32, i32) {
    %c0_i32 = arith.constant 0 : i32
    %c0_i32_0 = arith.constant 0 : i32
    %c0_i32_1 = arith.constant 0 : i32
    return %c0_i32, %c0_i32_0 : i32, i32
  }
}

module attributes {stable_mosaic.version = 11 : i64} {
  func.func @bn_silu_kernel(%arg0: i32, %arg1: memref<256x32xbf16, #tpu.memory_space<vmem>>, %arg2: memref<1x32xf32, #tpu.memory_space<vmem>>, %arg3: memref<1x32xf32, #tpu.memory_space<vmem>>, %arg4: memref<256x32xf32, #tpu.memory_space<vmem>>) attributes {dimension_semantics = [#tpu.dimension_semantics<parallel>], iteration_bounds = array<i64: 2>, scalar_prefetch = 0 : i64, scratch_operands = 0 : i64, tpu.core_type = #tpu.core_type<tc>, window_params = [{transform_indices = @transform_0, window_bounds = array<i64: 256, 32>}, {pipeline_mode = #tpu.pipeline_mode<synchronous>, transform_indices = @transform_1, window_bounds = array<i64: 1, 32>}, {pipeline_mode = #tpu.pipeline_mode<synchronous>, transform_indices = @transform_2, window_bounds = array<i64: 1, 32>}, {transform_indices = @transform_3, window_bounds = array<i64: 256, 32>}]} {
    %c0 = arith.constant 0 : index
    %c0_0 = arith.constant 0 : index
    %0 = vector.load %arg1[%c0, %c0_0] : memref<256x32xbf16, #tpu.memory_space<vmem>>, vector<256x32xbf16>
    %1 = arith.extf %0 : vector<256x32xbf16> to vector<256x32xf32>
    %c0_1 = arith.constant 0 : index
    %c0_2 = arith.constant 0 : index
    %2 = vector.load %arg2[%c0_1, %c0_2] : memref<1x32xf32, #tpu.memory_space<vmem>>, vector<1x32xf32>
    %3 = vector.broadcast %2 : vector<1x32xf32> to vector<256x32xf32>
    %4 = arith.mulf %1, %3 : vector<256x32xf32>
    %c0_3 = arith.constant 0 : index
    %c0_4 = arith.constant 0 : index
    %5 = vector.load %arg3[%c0_3, %c0_4] : memref<1x32xf32, #tpu.memory_space<vmem>>, vector<1x32xf32>
    %6 = vector.broadcast %5 : vector<1x32xf32> to vector<256x32xf32>
    %7 = arith.addf %4, %6 : vector<256x32xf32>
    %8 = arith.negf %7 : vector<256x32xf32>
    %9 = math.exp %8 : vector<256x32xf32>
    %cst = arith.constant 1.000000e+00 : f32
    %10 = vector.broadcast %cst : f32 to vector<256x32xf32>
    %11 = arith.addf %10, %9 : vector<256x32xf32>
    %12 = arith.divf %10, %11 : vector<256x32xf32>
    %13 = arith.mulf %7, %12 : vector<256x32xf32>
    %c0_5 = arith.constant 0 : index
    %c0_6 = arith.constant 0 : index
    %14 = vector.load %arg4[%c0_5, %c0_6] : memref<256x32xf32, #tpu.memory_space<vmem>>, vector<256x32xf32>
    tpu.vector_store %arg4[%c0_5, %c0_6], %13 {strides = array<i32>} : memref<256x32xf32, #tpu.memory_space<vmem>>, vector<256x32xf32>,
    return
  }
  func.func @transform_0(%arg0: i32) -> (i32, i32) {
    %c0_i32 = arith.constant 0 : i32
    %c0_i32_0 = arith.constant 0 : i32
    return %arg0, %c0_i32 : i32, i32
  }
  func.func @transform_1(%arg0: i32) -> (i32, i32) {
    %c0_i32 = arith.constant 0 : i32
    %c0_i32_0 = arith.constant 0 : i32
    %c0_i32_1 = arith.constant 0 : i32
    return %c0_i32, %c0_i32_0 : i32, i32
  }
  func.func @transform_2(%arg0: i32) -> (i32, i32) {
    %c0_i32 = arith.constant 0 : i32
    %c0_i32_0 = arith.constant 0 : i32
    %c0_i32_1 = arith.constant 0 : i32
    return %c0_i32, %c0_i32_0 : i32, i32
  }
  func.func @transform_3(%arg0: i32) -> (i32, i32) {
    %c0_i32 = arith.constant 0 : i32
    %c0_i32_0 = arith.constant 0 : i32
    return %arg0, %c0_i32 : i32, i32
  }
}

</mosaic_0001>

<bundles_post_ra>
// kernel: bottleneck_csp_forward.6
= control target key start
LH: loop header
LB: loop body
LE: loop exit
PB: predicated region body
PF: predicated region fallthrough
CT: control target
= control target key end

     0   :  { %s1278_s18 = smov 0   ;;  %s1817_s0 = inlined_call_operand.vmem [shape: f32[512,16], index: 0, kind: input, shape index: {}]   ;;  %s1818_s1 = inlined_call_operand.vmem [shape: bf16[16,32], index: 1, kind: input, shape index: {}]   ;;  %s1819_s2 = inlined_call_operand.vmem [shape: bf16[512,16], index: 2, kind: output, shape index: {0}]   ;;  %s1820_s3 = inlined_call_operand.vmem [shape: bf16[512,16], index: 3, kind: output, shape index: {1}]   ;;  %s1821_s4 = inlined_call_operand.vmem [shape: f32[1,32], index: 4, kind: output, shape index: {2}]   ;;  %s1822_s5 = inlined_call_operand.vmem [shape: f32[1,32], index: 5, kind: output, shape index: {3}]  }
   0x1 LB: > { %s1079_s19 = sadd.s32 4294967295, %s1244_s18   ;;  %p1083_p0 = scmp.ge.s32.totalorder %s1244_s18, 1  ;;  %s1244_s18 = sphi %s1278_s18, %s16_s18  }
   0x2   : > { %p185_p1 = scmp.lt.s32.totalorder %s1244_s18, 3 }
   0x4   : > { %p186_p2 = pnand %p1083_p0, %p185_p1 }
   0x5   : > { %s1084_s20 = sshll.u32 (!%p186_p2), %s1079_s19, 5  ;;  %p1090_p4 = scmp.ne.s32.totalorder (!%p186_p2), %s1079_s19, 0 }
   0x6   : > { %189 = sbr.rel (%p186_p2) target bundleno = 416 (0x1a0), region = 28  ;;  %p219_p3 = scmp.lt.s32.totalorder (!%p186_p2), %s1084_s20, 63 }
   0xd   : > { %s1824_s20 = smov (!%p219_p3, %s1084_s20), 63  ;;  %240 = sbr.rel (%p1090_p4) target bundleno = 20 (0x14), region = 32 }
   0xe   : > { %s1085_s21 = sshll.u32 %s1824_s20, 3  ;;  %s1087_s22 = sshll.u32 %s1824_s20, 2  ;;  %vm241_vm0 = vcmask (!%p1090_p4), 253952   ;;  %v1246_v0 = vmov (!%p1090_p4), 0.0  }
   0xf   : > { %s1289_s25 = scalar_lea.vmem %s1817_s0, %s1085_s21  ;;  %s1294_s28 = scalar_lea.vmem %s1819_s2, %s1087_s22  ;;  %242 = vst.msk [vmem:[%s1821_s4] sm:$0x1] (!%p1090_p4), %vm241_vm0, %v1246_v0  ;;  %243 = vst.msk [vmem:[%s1822_s5] sm:$0x1] (!%p1090_p4), %vm241_vm0, %v1246_v0 }
  0x10   : > { %s1299_s6 = scalar_lea.vmem %s1820_s3, %s1087_s22 }
  0x14 PF: > { %v1237_v1 = vld [vmem:[%s1818_s1] sm:$0xff]   ;;  %v245_v3 = vld [vmem:[%s1289_s25 + $0x8] sm:$0xff]  ;;  %vm300_vm1 = vcmask 130048   ;;  %v246_v7 = vld [vmem:[%s1289_s25 + $0x10] sm:$0xff]  ;;  %vm638_vm2 = vcmask 125952   ;;  %vm800_vm3 = vcmask 261120  }
  0x15   : > { %v244_v2 = vld [vmem:[%s1289_s25] sm:$0xff]  ;;  %1191 = vmatprep.subr.bf16.mxu0 %v1237_v1  ;;  %1225 = vmatprep.subr.bf16.mxu1 %v1237_v1  ;;  %v261_v6 = vld [vmem:[%s1289_s25 + $0x88] sm:$0xff]  ;;  %v247_v8 = vld [vmem:[%s1289_s25 + $0x18] sm:$0xff]  ;;  %s1247_s13 = smov 112   ;;  %vm871_vm4 = vcmask 253952  }
  0x16   : > { %v260_v4 = vld [vmem:[%s1289_s25 + $0x80] sm:$0xff]  ;;  %v276_v5 = vpack.c.bf16 %v245_v3, %v244_v2  ;;  %1192 = vmatpush3.bf16.msra.mxu0 %v1237_v1  ;;  %1226 = vmatpush3.bf16.msra.mxu1 %v1237_v1  ;;  %v277_v10 = vpack.c.bf16 %v247_v8, %v246_v7  ;;  %v262_v11 = vld [vmem:[%s1289_s25 + $0x90] sm:$0xff]  ;;  %v263_v12 = vld [vmem:[%s1289_s25 + $0x98] sm:$0xff] }
  0x17   : > { %v284_v9 = vpack.c.bf16 %v261_v6, %v260_v4  ;;  %v248_v13 = vld [vmem:[%s1289_s25 + $0x20] sm:$0xff]  ;;  %v285_v14 = vpack.c.bf16 %v263_v12, %v262_v11  ;;  %v249_v15 = vld [vmem:[%s1289_s25 + $0x28] sm:$0xff]  ;;  %v250_v19 = vld [vmem:[%s1289_s25 + $0x30] sm:$0xff] }
  0x18   : > { %1193 = vmatprep.mubr.msk.bf16.mxu0 %vm300_vm1, %v276_v5  ;;  %v278_v16 = vpack.c.bf16 %v249_v15, %v248_v13  ;;  %v264_v17 = vld [vmem:[%s1289_s25 + $0xa0] sm:$0xff]  ;;  %v265_v18 = vld [vmem:[%s1289_s25 + $0xa8] sm:$0xff]  ;;  %v251_v21 = vld [vmem:[%s1289_s25 + $0x38] sm:$0xff] }
  0x19   : > { %1209 = vmatprep.mubr.msk.bf16.mxu1 %vm300_vm1, %v284_v9  ;;  %1194 = vmatmul.mubr.msk.bf16.vlgmr.msra.gmra.mrb[0].mxu0 %vm300_vm1, %v277_v10  ;;  %v286_v20 = vpack.c.bf16 %v265_v18, %v264_v17  ;;  %v266_v22 = vld [vmem:[%s1289_s25 + $0xb0] sm:$0xff]  ;;  %v267_v23 = vld [vmem:[%s1289_s25 + $0xb8] sm:$0xff]  ;;  %v252_v24 = vld [vmem:[%s1289_s25 + $0x40] sm:$0xff]  ;;  %v279_v28 = vpack.c.bf16 %v251_v21, %v250_v19 }
  0x1a   : > { %1210 = vmatmul.mubr.msk.bf16.vlgmr.msra.gmra.mrb[0].mxu1 %vm300_vm1, %v285_v14  ;;  %1197 = vmatprep.mubr.msk.bf16.mxu0 %vm300_vm1, %v278_v16  ;;  %v253_v25 = vld [vmem:[%s1289_s25 + $0x48] sm:$0xff]  ;;  %v268_v26 = vld [vmem:[%s1289_s25 + $0xc0] sm:$0xff]  ;;  %v287_v29 = vpack.c.bf16 %v267_v23, %v266_v22  ;;  %v254_v32 = vld [vmem:[%s1289_s25 + $0x50] sm:$0xff] }
  0x1b   : > { %1213 = vmatprep.mubr.msk.bf16.mxu1 %vm300_vm1, %v286_v20  ;;  %v269_v27 = vld [vmem:[%s1289_s25 + $0xc8] sm:$0xff]  ;;  %v280_v30 = vpack.c.bf16 %v253_v25, %v252_v24  ;;  %v255_v33 = vld [vmem:[%s1289_s25 + $0x58] sm:$0xff]  ;;  %v256_v34 = vld [vmem:[%s1289_s25 + $0x60] sm:$0xff] }
  0x1c   : > { %v288_v31 = vpack.c.bf16 %v269_v27, %v268_v26  ;;  %v270_v35 = vld [vmem:[%s1289_s25 + $0xd0] sm:$0xff]  ;;  %v271_v36 = vld [vmem:[%s1289_s25 + $0xd8] sm:$0xff]  ;;  %v257_v37 = vld [vmem:[%s1289_s25 + $0x68] sm:$0xff]  ;;  %v281_v40 = vpack.c.bf16 %v255_v33, %v254_v32 }
  0x1d   : > { %v272_v38 = vld [vmem:[%s1289_s25 + $0xe0] sm:$0xff]  ;;  %v273_v39 = vld [vmem:[%s1289_s25 + $0xe8] sm:$0xff]  ;;  %v289_v41 = vpack.c.bf16 %v271_v36, %v270_v35  ;;  %v282_v42 = vpack.c.bf16 %v257_v37, %v256_v34  ;;  %v258_v44 = vld [vmem:[%s1289_s25 + $0x70] sm:$0xff] }
  0x1e   : > { %v290_v43 = vpack.c.bf16 %v273_v39, %v272_v38  ;;  %v259_v45 = vld [vmem:[%s1289_s25 + $0x78] sm:$0xff]  ;;  %v274_v46 = vld [vmem:[%s1289_s25 + $0xf0] sm:$0xff] }
  0x1f   : > { %v275_v47 = vld [vmem:[%s1289_s25 + $0xf8] sm:$0xff]  ;;  %v283_v48 = vpack.c.bf16 %v259_v45, %v258_v44 }
  0x20   : > { %v291_v49 = vpack.c.bf16 %v275_v47, %v274_v46 }
  0x21   : > { %1198 = vmatmul.mubr.msk.bf16.gmra.mrb[4].mxu0 %vm300_vm1, %v279_v28 }
  0x22   : > { %1214 = vmatmul.mubr.msk.bf16.gmra.mrb[4].mxu1 %vm300_vm1, %v287_v29  ;;  %1201 = vmatprep.mubr.msk.bf16.mxu0 %vm300_vm1, %v280_v30 }
  0x23   : > { %1217 = vmatprep.mubr.msk.bf16.mxu1 %vm300_vm1, %v288_v31 }
  0x29   : > { %1202 = vmatmul.mubr.msk.bf16.gmra.mrb[8].mxu0 %vm300_vm1, %v281_v40 }
  0x2a   : > { %1218 = vmatmul.mubr.msk.bf16.gmra.mrb[8].mxu1 %vm300_vm1, %v289_v41  ;;  %1205 = vmatprep.mubr.msk.bf16.mxu0 %vm300_vm1, %v282_v42 }
  0x2b   : > { %1221 = vmatprep.mubr.msk.bf16.mxu1 %vm300_vm1, %v290_v43 }
  0x31   : > { %1206 = vmatmul.mubr.msk.bf16.gmra.mrb[12].mxu0 %vm300_vm1, %v283_v48 }
  0x32   : > { %1222 = vmatmul.mubr.msk.bf16.gmra.mrb[12].mxu1 %vm300_vm1, %v291_v49 }
  0xec   : > { %v1195_v50 = vpop.f32.mrb[0].mxu0 }
  0xed   : > { %v1358_v51 = vpop.f32.mrb[0].mxu1  ;;  %v383_v52 = vpop.f32.mrb[1].mxu0  ;;  %v1144_v1 = vpack.c.bf16 %v1195_v50, %v1195_v50  ;;  %v876_v3 = vmul.f32 %v1195_v50, %v1195_v50  ;;  %v804_v14 = vsel %vm800_vm3, %v1195_v50, 0.0 }
  0xee   : > { %v1360_v53 = vpop.f32.mrb[1].mxu1  ;;  %v1142_v54 = vpack.c.bf16 %v383_v52, %v383_v52  ;;  %v1196_v56 = vpop.f32.mrb[2].mxu0  ;;  %v874_v62 = vmul.f32 %v383_v52, %v383_v52  ;;  %v1160_v63 = vpack.c.bf16 %v1358_v51, %v1358_v51  ;;  %v801_v4 = vsel %vm800_vm3, %v383_v52, 0.0 }
  0xef   : > { %v1364_v55 = vpack.c.bf16 %v1360_v53, %v1360_v53  ;;  %v1366_v57 = vpop.f32.mrb[2].mxu1  ;;  %v386_v59 = vpop.f32.mrb[3].mxu0  ;;  %v1145_v60 = vpack.c.bf16 %v1196_v56, %v1196_v56  ;;  %v877_v9 = vmul.f32 %v1196_v56, %v1196_v56  ;;  %675 = vrot.lane.b32.xlu1 %v1144_v1, %s1247_s13  ;;  %641 = vst.msk [vmem:[%s1294_s28 + $0x8] sm:$0xf] %vm638_vm2, %v1144_v1  ;;  %v909_v26 = vsel %vm800_vm3, %v876_v3, 0.0 }
  0xf0   : > { %v1368_v58 = vpop.f32.mrb[3].mxu1  ;;  %639 = vst.msk [vmem:[%s1294_s28] sm:$0xf] %vm638_vm2, %v1142_v54  ;;  %v1377_v61 = vpack.c.bf16 %v1366_v57, %v1366_v57  ;;  %v1390_v2 = vpack.c.bf16 %v386_v59, %v386_v59  ;;  %707 = vrot.lane.b32.xlu0 %v1160_v63, %s1247_s13  ;;  %657 = vst.msk [vmem:[%s1294_s28 + $0x48] sm:$0xf] %vm638_vm2, %v1160_v63  ;;  %v802_v5 = vsel %vm800_vm3, %v386_v59, 0.0 }
  0xf1   : > { %655 = vst.msk [vmem:[%s1294_s28 + $0x40] sm:$0xf] %vm638_vm2, %v1364_v55  ;;  %642 = vst.msk [vmem:[%s1294_s28 + $0xc] sm:$0xf] %vm638_vm2, %v1145_v60  ;;  %v1385_v0 = vpack.c.bf16 %v1368_v58, %v1368_v58  ;;  %v875_v6 = vmul.f32 %v386_v59, %v386_v59  ;;  %v803_v10 = vadd.f32 %v802_v5, %v801_v4  ;;  %v906_v15 = vsel %vm800_vm3, %v874_v62, 0.0 }
  0xf2   : > { %658 = vst.msk [vmem:[%s1294_s28 + $0x4c] sm:$0xf] %vm638_vm2, %v1377_v61  ;;  %640 = vst.msk [vmem:[%s1294_s28 + $0x4] sm:$0xf] %vm638_vm2, %v1390_v2  ;;  %v806_v27 = vsel %vm800_vm3, %v1196_v56, 0.0  ;;  %v911_v30 = vsel %vm800_vm3, %v877_v9, 0.0 }
  0xf3   : > { %656 = vst.msk [vmem:[%s1294_s28 + $0x44] sm:$0xf] %vm638_vm2, %v1385_v0  ;;  %v907_v16 = vsel %vm800_vm3, %v875_v6, 0.0  ;;  %v805_v20 = vadd.f32 %v804_v14, %v803_v10  ;;  %677 = vrot.lane.b32.xlu1 %v1145_v60, %s1247_s13 }
  0xf4   : > { %v1199_v7 = vpop.f32.mrb[4].mxu0  ;;  %v908_v21 = vadd.f32 %v907_v16, %v906_v15  ;;  %671 = vrot.lane.b32.xlu0 %v1142_v54, %s1247_s13 }
  0xf5   : > { %v1400_v8 = vpop.f32.mrb[4].mxu1  ;;  %v1408_v11 = vpack.c.bf16 %v1199_v7, %v1199_v7  ;;  %v399_v12 = vpop.f32.mrb[5].mxu0  ;;  %v880_v32 = vmul.f32 %v1199_v7, %v1199_v7  ;;  %v807_v33 = vadd.f32 %v806_v27, %v805_v20  ;;  %v812_v41 = vsel %vm800_vm3, %v1199_v7, 0.0 }
  0xf6   : > { %v1410_v13 = vpop.f32.mrb[5].mxu1  ;;  %v1415_v17 = vpack.c.bf16 %v399_v12, %v399_v12  ;;  %v1200_v18 = vpop.f32.mrb[6].mxu0  ;;  %v878_v22 = vmul.f32 %v399_v12, %v399_v12  ;;  %v808_v28 = vsel %vm800_vm3, %v399_v12, 0.0  ;;  %v910_v31 = vadd.f32 %v909_v26, %v908_v21 }
  0xf7   : > { %v1417_v19 = vpop.f32.mrb[6].mxu1  ;;  %645 = vst.msk [vmem:[%s1294_s28 + $0x18] sm:$0xf] %vm638_vm2, %v1408_v11  ;;  %v1422_v23 = vpack.c.bf16 %v1200_v18, %v1200_v18  ;;  %v402_v24 = vpop.f32.mrb[7].mxu0  ;;  %v1447_v37 = vpack.c.bf16 %v1400_v8, %v1400_v8  ;;  %v809_v38 = vadd.f32 %v808_v28, %v807_v33  ;;  %v1451_v40 = vpack.c.bf16 %v1410_v13, %v1410_v13 }
  0xf8   : > { %v1424_v25 = vpop.f32.mrb[7].mxu1  ;;  %643 = vst.msk [vmem:[%s1294_s28 + $0x10] sm:$0xf] %vm638_vm2, %v1415_v17  ;;  %v1433_v29 = vpack.c.bf16 %v402_v24, %v402_v24  ;;  %v913_v34 = vsel %vm800_vm3, %v878_v22, 0.0  ;;  %v810_v35 = vsel %vm800_vm3, %v402_v24, 0.0  ;;  %v879_v36 = vmul.f32 %v402_v24, %v402_v24  ;;  %703 = vrot.lane.b32.xlu0 %v1364_v55, %s1247_s13  ;;  %709 = vrot.lane.b32.xlu1 %v1377_v61, %s1247_s13 }
  0xf9   : > { %646 = vst.msk [vmem:[%s1294_s28 + $0x1c] sm:$0xf] %vm638_vm2, %v1422_v23  ;;  %v912_v39 = vadd.f32 %v911_v30, %v910_v31  ;;  %v881_v42 = vmul.f32 %v1200_v18, %v1200_v18  ;;  %661 = vst.msk [vmem:[%s1294_s28 + $0x58] sm:$0xf] %vm638_vm2, %v1447_v37  ;;  %v1462_v45 = vpack.c.bf16 %v1417_v19, %v1417_v19  ;;  %v917_v54 = vsel %vm800_vm3, %v880_v32, 0.0 }
  0xfa   : > { %644 = vst.msk [vmem:[%s1294_s28 + $0x14] sm:$0xf] %vm638_vm2, %v1433_v29  ;;  %v915_v43 = vsel %vm800_vm3, %v879_v36, 0.0  ;;  %v811_v48 = vadd.f32 %v810_v35, %v809_v38  ;;  %659 = vst.msk [vmem:[%s1294_s28 + $0x50] sm:$0xf] %vm638_vm2, %v1451_v40  ;;  %v814_v55 = vsel %vm800_vm3, %v1200_v18, 0.0 }
  0xfb   : > { %v914_v47 = vadd.f32 %v913_v34, %v912_v39  ;;  %662 = vst.msk [vmem:[%s1294_s28 + $0x5c] sm:$0xf] %vm638_vm2, %v1462_v45  ;;  %v919_v4 = vsel %vm800_vm3, %v881_v42, 0.0 }
  0xfc   : > { %v1203_v44 = vpop.f32.mrb[8].mxu0  ;;  %v813_v61 = vadd.f32 %v812_v41, %v811_v48  ;;  %673 = vrot.lane.b32.xlu0 %v1390_v2, %s1247_s13  ;;  %705 = vrot.lane.b32.xlu1 %v1385_v0, %s1247_s13  ;;  %v1506_v2 = vpack.c.bf16 %v1424_v25, %v1424_v25 }
  0xfd   : > { %v1464_v46 = vpop.f32.mrb[8].mxu1  ;;  %v1468_v49 = vpack.c.bf16 %v1203_v44, %v1203_v44  ;;  %v415_v50 = vpop.f32.mrb[9].mxu0  ;;  %v916_v62 = vadd.f32 %v915_v43, %v914_v47  ;;  %v884_v10 = vmul.f32 %v1203_v44, %v1203_v44  ;;  %v820_v14 = vsel %vm800_vm3, %v1203_v44, 0.0 }
  0xfe   : > { %v1473_v52 = vpop.f32.mrb[9].mxu1  ;;  %v1477_v56 = vpack.c.bf16 %v415_v50, %v415_v50  ;;  %v1204_v59 = vpop.f32.mrb[10].mxu0  ;;  %v882_v63 = vmul.f32 %v415_v50, %v415_v50  ;;  %v816_v5 = vsel %vm800_vm3, %v415_v50, 0.0  ;;  %v815_v9 = vadd.f32 %v814_v55, %v813_v61  ;;  %660 = vst.msk [vmem:[%s1294_s28 + $0x54] sm:$0xf] %vm638_vm2, %v1506_v2 }
  0xff   : > { %v1482_v60 = vpop.f32.mrb[10].mxu1  ;;  %649 = vst.msk [vmem:[%s1294_s28 + $0x28] sm:$0xf] %vm638_vm2, %v1468_v49  ;;  %v418_v1 = vpop.f32.mrb[11].mxu0  ;;  %v1496_v6 = vpack.c.bf16 %v1204_v59, %v1204_v59  ;;  %v918_v7 = vadd.f32 %v917_v54, %v916_v62  ;;  %v885_v20 = vmul.f32 %v1204_v59, %v1204_v59  ;;  %v1519_v24 = vpack.c.bf16 %v1464_v46, %v1464_v46 }
 0x100   : > { %v1487_v3 = vpop.f32.mrb[11].mxu1  ;;  %647 = vst.msk [vmem:[%s1294_s28 + $0x20] sm:$0xf] %vm638_vm2, %v1477_v56  ;;  %v921_v12 = vsel %vm800_vm3, %v882_v63, 0.0  ;;  %v817_v15 = vadd.f32 %v816_v5, %v815_v9  ;;  %v1509_v18 = vpack.c.bf16 %v418_v1, %v418_v1  ;;  %683 = vrot.lane.b32.xlu0 %v1408_v11, %s1247_s13  ;;  %v818_v0 = vsel %vm800_vm3, %v418_v1, 0.0  ;;  %685 = vrot.lane.b32.xlu1 %v1422_v23, %s1247_s13 }
 0x101   : > { %650 = vst.msk [vmem:[%s1294_s28 + $0x2c] sm:$0xf] %vm638_vm2, %v1496_v6  ;;  %v920_v16 = vadd.f32 %v919_v4, %v918_v7  ;;  %v883_v21 = vmul.f32 %v418_v1, %v418_v1  ;;  %v925_v32 = vsel %vm800_vm3, %v884_v10, 0.0  ;;  %v822_v33 = vsel %vm800_vm3, %v1204_v59, 0.0  ;;  %665 = vst.msk [vmem:[%s1294_s28 + $0x68] sm:$0xf] %vm638_vm2, %v1519_v24 }
 0x102   : > { %648 = vst.msk [vmem:[%s1294_s28 + $0x24] sm:$0xf] %vm638_vm2, %v1509_v18  ;;  %v819_v11 = vadd.f32 %v818_v0, %v817_v15  ;;  %v927_v44 = vsel %vm800_vm3, %v885_v20, 0.0  ;;  %v1169_v9 = vpack.c.bf16 %v1482_v60, %v1482_v60  ;;  %v890_v0 = vmul.f32 %v1360_v53, %v1360_v53 }
 0x103   : > { %v922_v27 = vadd.f32 %v921_v12, %v920_v16  ;;  %v923_v34 = vsel %vm800_vm3, %v883_v21, 0.0 }
 0x104   : > { %v1207_v22 = vpop.f32.mrb[12].mxu0  ;;  %v821_v38 = vadd.f32 %v820_v14, %v819_v11  ;;  %715 = vrot.lane.b32.xlu0 %v1447_v37, %s1247_s13  ;;  %717 = vrot.lane.b32.xlu1 %v1462_v45, %s1247_s13  ;;  %v1570_v45 = vpack.c.bf16 %v1473_v52, %v1473_v52  ;;  %666 = vst.msk [vmem:[%s1294_s28 + $0x6c] sm:$0xf] %vm638_vm2, %v1169_v9 }
 0x105   : > { %v1521_v26 = vpop.f32.mrb[12].mxu1  ;;  %v1528_v28 = vpack.c.bf16 %v1207_v22, %v1207_v22  ;;  %v431_v30 = vpop.f32.mrb[13].mxu0  ;;  %v924_v39 = vadd.f32 %v923_v34, %v922_v27  ;;  %v888_v59 = vmul.f32 %v1207_v22, %v1207_v22  ;;  %v828_v4 = vsel %vm800_vm3, %v1207_v22, 0.0 }
 0x106   : > { %v1530_v31 = vpop.f32.mrb[13].mxu1  ;;  %v1535_v35 = vpack.c.bf16 %v431_v30, %v431_v30  ;;  %v1208_v36 = vpop.f32.mrb[14].mxu0  ;;  %v886_v41 = vmul.f32 %v431_v30, %v431_v30  ;;  %v824_v47 = vsel %vm800_vm3, %v431_v30, 0.0  ;;  %v823_v54 = vadd.f32 %v822_v33, %v821_v38  ;;  %663 = vst.msk [vmem:[%s1294_s28 + $0x60] sm:$0xf] %vm638_vm2, %v1570_v45 }
 0x107   : > { %v1540_v23 = vpop.f32.mrb[14].mxu1  ;;  %653 = vst.msk [vmem:[%s1294_s28 + $0x38] sm:$0xf] %vm638_vm2, %v1528_v28  ;;  %v434_v42 = vpop.f32.mrb[15].mxu0  ;;  %v1554_v48 = vpack.c.bf16 %v1208_v36, %v1208_v36  ;;  %v926_v50 = vadd.f32 %v925_v32, %v924_v39  ;;  %v889_v5 = vmul.f32 %v1208_v36, %v1208_v36  ;;  %v933_v14 = vsel %vm800_vm3, %v888_v59, 0.0 }
 0x108   : > { %v1545_v43 = vpop.f32.mrb[15].mxu1  ;;  %651 = vst.msk [vmem:[%s1294_s28 + $0x30] sm:$0xf] %vm638_vm2, %v1535_v35  ;;  %v1558_v55 = vpack.c.bf16 %v434_v42, %v434_v42  ;;  %v929_v61 = vsel %vm800_vm3, %v886_v41, 0.0  ;;  %v826_v37 = vsel %vm800_vm3, %v434_v42, 0.0  ;;  %v887_v62 = vmul.f32 %v434_v42, %v434_v42  ;;  %679 = vrot.lane.b32.xlu0 %v1415_v17, %s1247_s13  ;;  %681 = vrot.lane.b32.xlu1 %v1433_v29, %s1247_s13 }
 0x109   : > { %654 = vst.msk [vmem:[%s1294_s28 + $0x3c] sm:$0xf] %vm638_vm2, %v1554_v48  ;;  %v825_v63 = vadd.f32 %v824_v47, %v823_v54  ;;  %v928_v1 = vadd.f32 %v927_v44, %v926_v50  ;;  %v830_v15 = vsel %vm800_vm3, %v1208_v36, 0.0  ;;  %v1589_v17 = vpack.c.bf16 %v1487_v3, %v1487_v3 }
 0x10a   : > { %652 = vst.msk [vmem:[%s1294_s28 + $0x34] sm:$0xf] %vm638_vm2, %v1558_v55  ;;  %v931_v7 = vsel %vm800_vm3, %v887_v62, 0.0  ;;  %v1593_v29 = vpack.c.bf16 %v1521_v26, %v1521_v26  ;;  %v935_v21 = vsel %vm800_vm3, %v889_v5, 0.0  ;;  %v1605_v22 = vpack.c.bf16 %v1530_v31, %v1530_v31 }
 0x10b   : > { %v930_v10 = vadd.f32 %v929_v61, %v928_v1  ;;  %v827_v12 = vadd.f32 %v826_v37, %v825_v63  ;;  %664 = vst.msk [vmem:[%s1294_s28 + $0x64] sm:$0xf] %vm638_vm2, %v1589_v17  ;;  %v891_v30 = vmul.f32 %v1368_v58, %v1368_v58  ;;  %v1621_v32 = vpack.c.bf16 %v1540_v23, %v1540_v23 }
 0x10c   : > { %711 = vrot.lane.b32.xlu0 %v1451_v40, %s1247_s13  ;;  %713 = vrot.lane.b32.xlu1 %v1506_v2, %s1247_s13  ;;  %669 = vst.msk [vmem:[%s1294_s28 + $0x78] sm:$0xf] %vm638_vm2, %v1593_v29  ;;  %v832_v40 = vsel %vm800_vm3, %v1360_v53, 0.0  ;;  %667 = vst.msk [vmem:[%s1294_s28 + $0x70] sm:$0xf] %vm638_vm2, %v1605_v22  ;;  %v1625_v2 = vpack.c.bf16 %v1545_v43, %v1545_v43  ;;  %v892_v36 = vmul.f32 %v1358_v51, %v1358_v51 }
 0x10d   : > { %v829_v16 = vadd.f32 %v828_v4, %v827_v12  ;;  %v932_v20 = vadd.f32 %v931_v7, %v930_v10  ;;  %v937_v53 = vsel %vm800_vm3, %v890_v0, 0.0  ;;  %v834_v38 = vsel %vm800_vm3, %v1368_v58, 0.0  ;;  %670 = vst.msk [vmem:[%s1294_s28 + $0x7c] sm:$0xf] %vm638_vm2, %v1621_v32 }
 0x10e   : > { %668 = vst.msk [vmem:[%s1294_s28 + $0x74] sm:$0xf] %vm638_vm2, %v1625_v2  ;;  %v836_v42 = vsel %vm800_vm3, %v1358_v51, 0.0  ;;  %v893_v58 = vmul.f32 %v1366_v57, %v1366_v57  ;;  %v939_v44 = vsel %vm800_vm3, %v891_v30, 0.0  ;;  %v941_v50 = vsel %vm800_vm3, %v892_v36, 0.0 }
 0x10f   : > { %v831_v27 = vadd.f32 %v830_v15, %v829_v16  ;;  %v934_v11 = vadd.f32 %v933_v14, %v932_v20  ;;  %v838_v54 = vsel %vm800_vm3, %v1366_v57, 0.0  ;;  %v840_v37 = vsel %vm800_vm3, %v1410_v13, 0.0 }
 0x110   : > { %691 = vrot.lane.b32.xlu0 %v1468_v49, %s1247_s13  ;;  %693 = vrot.lane.b32.xlu1 %v1496_v6, %s1247_s13  ;;  %v894_v6 = vmul.f32 %v1410_v13, %v1410_v13  ;;  %v943_v61 = vsel %vm800_vm3, %v893_v58, 0.0  ;;  %v895_v62 = vmul.f32 %v1424_v25, %v1424_v25  ;;  %v896_v1 = vmul.f32 %v1400_v8, %v1400_v8 }
 0x111   : > { %v833_v33 = vadd.f32 %v832_v40, %v831_v27  ;;  %v936_v34 = vadd.f32 %v935_v21, %v934_v11  ;;  %v844_v13 = vsel %vm800_vm3, %v1400_v8, 0.0  ;;  %v898_v15 = vmul.f32 %v1473_v52, %v1473_v52 }
 0x112   : > { %v945_v4 = vsel %vm800_vm3, %v894_v6, 0.0  ;;  %v947_v10 = vsel %vm800_vm3, %v895_v62, 0.0  ;;  %v848_v20 = vsel %vm800_vm3, %v1473_v52, 0.0  ;;  %v899_v0 = vmul.f32 %v1487_v3, %v1487_v3 }
 0x113   : > { %v835_v39 = vadd.f32 %v834_v38, %v833_v33  ;;  %v938_v41 = vadd.f32 %v937_v53, %v936_v34  ;;  %v900_v27 = vmul.f32 %v1464_v46, %v1464_v46  ;;  %v850_v11 = vsel %vm800_vm3, %v1487_v3, 0.0 }
 0x114   : > { %723 = vrot.lane.b32.xlu0 %v1519_v24, %s1247_s13  ;;  %725 = vrot.lane.b32.xlu1 %v1169_v9, %s1247_s13  ;;  %v842_v24 = vsel %vm800_vm3, %v1424_v25, 0.0  ;;  %v897_v9 = vmul.f32 %v1417_v19, %v1417_v19  ;;  %v949_v25 = vsel %vm800_vm3, %v896_v1, 0.0  ;;  %v852_v52 = vsel %vm800_vm3, %v1464_v46, 0.0 }
 0x115   : > { %v837_v49 = vadd.f32 %v836_v42, %v835_v39  ;;  %v940_v47 = vadd.f32 %v939_v44, %v938_v41  ;;  %v901_v30 = vmul.f32 %v1482_v60, %v1482_v60  ;;  %v955_v33 = vsel %vm800_vm3, %v899_v0, 0.0 }
 0x116   : > { %v951_v16 = vsel %vm800_vm3, %v897_v9, 0.0  ;;  %v957_v3 = vsel %vm800_vm3, %v900_v27, 0.0  ;;  %v902_v53 = vmul.f32 %v1530_v31, %v1530_v31  ;;  %v856_v39 = vsel %vm800_vm3, %v1530_v31, 0.0 }
 0x117   : > { %v942_v59 = vadd.f32 %v941_v50, %v940_v47  ;;  %v839_v51 = vadd.f32 %v838_v54, %v837_v49  ;;  %v959_v38 = vsel %vm800_vm3, %v901_v30, 0.0  ;;  %v903_v41 = vmul.f32 %v1545_v43, %v1545_v43 }
 0x118   : > { %687 = vrot.lane.b32.xlu0 %v1477_v56, %s1247_s13  ;;  %689 = vrot.lane.b32.xlu1 %v1509_v18, %s1247_s13  ;;  %v846_v56 = vsel %vm800_vm3, %v1417_v19, 0.0  ;;  %v904_v58 = vmul.f32 %v1521_v26, %v1521_v26  ;;  %v858_v44 = vsel %vm800_vm3, %v1545_v43, 0.0  ;;  %v860_v31 = vsel %vm800_vm3, %v1521_v26, 0.0 }
 0x119   : > { %v841_v63 = vadd.f32 %v840_v37, %v839_v51  ;;  %v944_v57 = vadd.f32 %v943_v61, %v942_v59  ;;  %v905_v47 = vmul.f32 %v1540_v23, %v1540_v23  ;;  %v963_v50 = vsel %vm800_vm3, %v903_v41, 0.0 }
 0x11a   : > { %v965_v43 = vsel %vm800_vm3, %v904_v58, 0.0 }
 0x11b   : > { %v843_v5 = vadd.f32 %v842_v24, %v841_v63  ;;  %v946_v7 = vadd.f32 %v945_v4, %v944_v57  ;;  %v967_v26 = vsel %vm800_vm3, %v905_v47, 0.0 }
 0x11c   : > { %719 = vrot.lane.b32.xlu0 %v1570_v45, %s1247_s13  ;;  %721 = vrot.lane.b32.xlu1 %v1589_v17, %s1247_s13  ;;  %v953_v45 = vsel %vm800_vm3, %v898_v15, 0.0 }
 0x11d   : > { %v845_v12 = vadd.f32 %v844_v13, %v843_v5  ;;  %v948_v14 = vadd.f32 %v947_v10, %v946_v7  ;;  %v873_v7 = vld [vmem:[%s1822_s5] sm:$0x1] }
 0x11f   : > { %v847_v18 = vadd.f32 %v846_v56, %v845_v12  ;;  %v950_v8 = vadd.f32 %v949_v25, %v948_v14 }
 0x120   : > { %699 = vrot.lane.b32.xlu0 %v1528_v28, %s1247_s13  ;;  %701 = vrot.lane.b32.xlu1 %v1554_v48, %s1247_s13  ;;  %v854_v28 = vsel %vm800_vm3, %v1482_v60, 0.0 }
 0x121   : > { %v849_v19 = vadd.f32 %v848_v20, %v847_v18  ;;  %v952_v21 = vadd.f32 %v951_v16, %v950_v8 }
 0x123   : > { %v954_v17 = vadd.f32 %v953_v45, %v952_v21  ;;  %v851_v40 = vadd.f32 %v850_v11, %v849_v19 }
 0x124   : > { %695 = vrot.lane.b32.xlu0 %v1535_v35, %s1247_s13  ;;  %697 = vrot.lane.b32.xlu1 %v1558_v55, %s1247_s13  ;;  %v961_v35 = vsel %vm800_vm3, %v902_v53, 0.0 }
 0x125   : > { %v853_v34 = vadd.f32 %v852_v52, %v851_v40  ;;  %v956_v36 = vadd.f32 %v955_v33, %v954_v17 }
 0x127   : > { %v958_v48 = vadd.f32 %v957_v3, %v956_v36  ;;  %v855_v46 = vadd.f32 %v854_v28, %v853_v34 }
 0x128   : > { %727 = vrot.lane.b32.xlu0 %v1605_v22, %s1247_s13  ;;  %729 = vrot.lane.b32.xlu1 %v1625_v2, %s1247_s13  ;;  %v862_v22 = vsel %vm800_vm3, %v1540_v23, 0.0 }
 0x129   : > { %v857_v60 = vadd.f32 %v856_v39, %v855_v46  ;;  %v960_v42 = vadd.f32 %v959_v38, %v958_v48 }
 0x12b   : > { %v962_v55 = vadd.f32 %v961_v35, %v960_v42  ;;  %v859_v49 = vadd.f32 %v858_v44, %v857_v60 }
 0x12c   : > { %731 = vrot.lane.b32.xlu0 %v1593_v29, %s1247_s13  ;;  %733 = vrot.lane.b32.xlu1 %v1621_v32, %s1247_s13  ;;  %v799_v29 = vld [vmem:[%s1821_s4] sm:$0x1] }
 0x12d   : > { %v861_v54 = vadd.f32 %v860_v31, %v859_v49  ;;  %v964_v6 = vadd.f32 %v963_v50, %v962_v55 }
 0x12f   : > { %v863_v59 = vadd.f32 %v862_v22, %v861_v54  ;;  %v966_v2 = vadd.f32 %v965_v43, %v964_v6 }
 0x131   : > { %v864_v51 = vrot.slane %v863_v59, 4  ;;  %v968_v61 = vadd.f32 %v967_v26, %v966_v2 }
 0x133   : > { %v865_v37 = vadd.f32 %v864_v51, %v863_v59  ;;  %v969_v62 = vrot.slane %v968_v61, 4 }
 0x135   : > { %v866_v63 = vrot.slane %v865_v37, 2  ;;  %v970_v57 = vadd.f32 %v969_v62, %v968_v61 }
 0x137   : > { %v867_v1 = vadd.f32 %v866_v63, %v865_v37  ;;  %v971_v4 = vrot.slane %v970_v57, 2 }
 0x139   : > { %v868_v23 = vrot.slane %v867_v1, 1  ;;  %v972_v24 = vadd.f32 %v971_v4, %v970_v57 }
 0x13b   : > { %v869_v32 = vadd.f32 %v868_v23, %v867_v1  ;;  %v973_v5 = vrot.slane %v972_v24, 1 }
 0x13d   : > { %v870_v13 = vadd.f32 %v869_v32, %v799_v29  ;;  %v974_v9 = vadd.f32 %v973_v5, %v972_v24 }
 0x13f   : > { %872 = vst.msk [vmem:[%s1821_s4] sm:$0x1] %vm871_vm4, %v870_v13  ;;  %v975_v10 = vadd.f32 %v974_v9, %v873_v7 }
 0x141   : > { %976 = vst.msk [vmem:[%s1822_s5] sm:$0x1] %vm871_vm4, %v975_v10 }
 0x161   : > { %v676_v14 = vpop.permute.xlu1 %675 }
 0x162   : > { %v708_v12 = vpop.permute.xlu0 %707  ;;  %769 = vst.msk [vmem:[%s1299_s6 + $0x8] sm:$0xf] %vm638_vm2, %v676_v14 }
 0x163   : > { %785 = vst.msk [vmem:[%s1299_s6 + $0x48] sm:$0xf] %vm638_vm2, %v708_v12 }
 0x165   : > { %v678_v56 = vpop.permute.xlu1 %677 }
 0x166   : > { %v672_v25 = vpop.permute.xlu0 %671  ;;  %770 = vst.msk [vmem:[%s1299_s6 + $0xc] sm:$0xf] %vm638_vm2, %v678_v56 }
 0x167   : > { %767 = vst.msk [vmem:[%s1299_s6] sm:$0xf] %vm638_vm2, %v672_v25 }
 0x16a   : > { %v704_v15 = vpop.permute.xlu0 %703  ;;  %v710_v18 = vpop.permute.xlu1 %709 }
 0x16b   : > { %783 = vst.msk [vmem:[%s1299_s6 + $0x40] sm:$0xf] %vm638_vm2, %v704_v15  ;;  %786 = vst.msk [vmem:[%s1299_s6 + $0x4c] sm:$0xf] %vm638_vm2, %v710_v18 }
 0x16e   : > { %v674_v8 = vpop.permute.xlu0 %673  ;;  %v706_v16 = vpop.permute.xlu1 %705 }
 0x16f   : > { %768 = vst.msk [vmem:[%s1299_s6 + $0x4] sm:$0xf] %vm638_vm2, %v674_v8  ;;  %784 = vst.msk [vmem:[%s1299_s6 + $0x44] sm:$0xf] %vm638_vm2, %v706_v16 }
 0x172   : > { %v684_v20 = vpop.permute.xlu0 %683  ;;  %v686_v0 = vpop.permute.xlu1 %685 }
 0x173   : > { %773 = vst.msk [vmem:[%s1299_s6 + $0x18] sm:$0xf] %vm638_vm2, %v684_v20  ;;  %774 = vst.msk [vmem:[%s1299_s6 + $0x1c] sm:$0xf] %vm638_vm2, %v686_v0 }
 0x176   : > { %v716_v19 = vpop.permute.xlu0 %715  ;;  %v718_v21 = vpop.permute.xlu1 %717 }
 0x177   : > { %789 = vst.msk [vmem:[%s1299_s6 + $0x58] sm:$0xf] %vm638_vm2, %v716_v19  ;;  %790 = vst.msk [vmem:[%s1299_s6 + $0x5c] sm:$0xf] %vm638_vm2, %v718_v21 }
 0x17a   : > { %v680_v27 = vpop.permute.xlu0 %679  ;;  %v682_v45 = vpop.permute.xlu1 %681 }
 0x17b   : > { %771 = vst.msk [vmem:[%s1299_s6 + $0x10] sm:$0xf] %vm638_vm2, %v680_v27  ;;  %772 = vst.msk [vmem:[%s1299_s6 + $0x14] sm:$0xf] %vm638_vm2, %v682_v45 }
 0x17e   : > { %v712_v11 = vpop.permute.xlu0 %711  ;;  %v714_v17 = vpop.permute.xlu1 %713 }
 0x17f   : > { %787 = vst.msk [vmem:[%s1299_s6 + $0x50] sm:$0xf] %vm638_vm2, %v712_v11  ;;  %788 = vst.msk [vmem:[%s1299_s6 + $0x54] sm:$0xf] %vm638_vm2, %v714_v17 }
 0x182   : > { %v692_v40 = vpop.permute.xlu0 %691  ;;  %v694_v52 = vpop.permute.xlu1 %693 }
 0x183   : > { %777 = vst.msk [vmem:[%s1299_s6 + $0x28] sm:$0xf] %vm638_vm2, %v692_v40  ;;  %778 = vst.msk [vmem:[%s1299_s6 + $0x2c] sm:$0xf] %vm638_vm2, %v694_v52 }
 0x186   : > { %v724_v30 = vpop.permute.xlu0 %723  ;;  %v726_v33 = vpop.permute.xlu1 %725 }
 0x187   : > { %793 = vst.msk [vmem:[%s1299_s6 + $0x68] sm:$0xf] %vm638_vm2, %v724_v30  ;;  %794 = vst.msk [vmem:[%s1299_s6 + $0x6c] sm:$0xf] %vm638_vm2, %v726_v33 }
 0x18a   : > { %v688_v34 = vpop.permute.xlu0 %687  ;;  %v690_v36 = vpop.permute.xlu1 %689 }
 0x18b   : > { %775 = vst.msk [vmem:[%s1299_s6 + $0x20] sm:$0xf] %vm638_vm2, %v688_v34  ;;  %776 = vst.msk [vmem:[%s1299_s6 + $0x24] sm:$0xf] %vm638_vm2, %v690_v36 }
 0x18e   : > { %v720_v3 = vpop.permute.xlu0 %719  ;;  %v722_v28 = vpop.permute.xlu1 %721 }
 0x18f   : > { %791 = vst.msk [vmem:[%s1299_s6 + $0x60] sm:$0xf] %vm638_vm2, %v720_v3  ;;  %792 = vst.msk [vmem:[%s1299_s6 + $0x64] sm:$0xf] %vm638_vm2, %v722_v28 }
 0x192   : > { %v700_v53 = vpop.permute.xlu0 %699  ;;  %v702_v48 = vpop.permute.xlu1 %701 }
 0x193   : > { %781 = vst.msk [vmem:[%s1299_s6 + $0x38] sm:$0xf] %vm638_vm2, %v700_v53  ;;  %782 = vst.msk [vmem:[%s1299_s6 + $0x3c] sm:$0xf] %vm638_vm2, %v702_v48 }
 0x196   : > { %v696_v46 = vpop.permute.xlu0 %695  ;;  %v698_v38 = vpop.permute.xlu1 %697 }
 0x197   : > { %779 = vst.msk [vmem:[%s1299_s6 + $0x30] sm:$0xf] %vm638_vm2, %v696_v46  ;;  %780 = vst.msk [vmem:[%s1299_s6 + $0x34] sm:$0xf] %vm638_vm2, %v698_v38 }
 0x19a   : > { %v728_v39 = vpop.permute.xlu0 %727  ;;  %v730_v41 = vpop.permute.xlu1 %729 }
 0x19b   : > { %795 = vst.msk [vmem:[%s1299_s6 + $0x70] sm:$0xf] %vm638_vm2, %v728_v39  ;;  %796 = vst.msk [vmem:[%s1299_s6 + $0x74] sm:$0xf] %vm638_vm2, %v730_v41 }
 0x19e   : > { %v732_v60 = vpop.permute.xlu0 %731  ;;  %v734_v42 = vpop.permute.xlu1 %733 }
 0x19f   : > { %797 = vst.msk [vmem:[%s1299_s6 + $0x78] sm:$0xf] %vm638_vm2, %v732_v60  ;;  %798 = vst.msk [vmem:[%s1299_s6 + $0x7c] sm:$0xf] %vm638_vm2, %v734_v42 }
 0x1a0 PF: > { %s16_s18 = sadd.s32 1, %s1244_s18  }
 0x1a1   : > { %p13_p5 = scmp.ge.s32.totalorder %s16_s18, 4  }
 0x1a3   :  { %15 = sbr.rel (!%p13_p5) target bundleno = 1 (0x1), region = 90 }

// kernel: bottleneck_csp_forward.7
= control target key start
LH: loop header
LB: loop body
LE: loop exit
PB: predicated region body
PF: predicated region fallthrough
CT: control target
= control target key end

     0   :  { %s1994_s24 = smov 0   ;;  %s2509_s0 = inlined_call_operand.vmem [shape: bf16[512,16], index: 0, kind: input, shape index: {}]   ;;  %s2510_s1 = inlined_call_operand.vmem [shape: f32[1,16], index: 1, kind: input, shape index: {}]   ;;  %s2511_s2 = inlined_call_operand.vmem [shape: f32[1,16], index: 2, kind: input, shape index: {}]   ;;  %s2512_s3 = inlined_call_operand.vmem [shape: bf16[16,16], index: 3, kind: input, shape index: {}]   ;;  %s2513_s4 = inlined_call_operand.vmem [shape: bf16[512,16], index: 4, kind: output, shape index: {0}]   ;;  %s2514_s5 = inlined_call_operand.vmem [shape: bf16[512,16], index: 5, kind: output, shape index: {1}]   ;;  %s2515_s6 = inlined_call_operand.vmem [shape: f32[1,16], index: 6, kind: output, shape index: {2}]   ;;  %s2516_s7 = inlined_call_operand.vmem [shape: f32[1,16], index: 7, kind: output, shape index: {3}]  }
   0x1 LB: > { %s1482_s25 = sadd.s32 4294967295, %s1951_s24   ;;  %p1486_p0 = scmp.ge.s32.totalorder %s1951_s24, 1  ;;  %s1951_s24 = sphi %s1994_s24, %s18_s24  }
   0x2   : > { %p235_p1 = scmp.lt.s32.totalorder %s1951_s24, 3 }
   0x4   : > { %p236_p2 = pnand %p1486_p0, %p235_p1 }
   0x5   : > { %s1487_s26 = sshll.u32 (!%p236_p2), %s1482_s25, 5  ;;  %p1493_p4 = scmp.ne.s32.totalorder (!%p236_p2), %s1482_s25, 0 }
   0x6   : > { %239 = sbr.rel (%p236_p2) target bundleno = 358 (0x166), region = 36  ;;  %p273_p3 = scmp.lt.s32.totalorder (!%p236_p2), %s1487_s26, 63 }
   0xd   : > { %s2518_s26 = smov (!%p273_p3, %s1487_s26), 63  ;;  %294 = sbr.rel (%p1493_p4) target bundleno = 20 (0x14), region = 40 }
   0xe   : > { %s1488_s27 = sshll.u32 %s2518_s26, 2  ;;  %vm295_vm0 = vcmask (!%p1493_p4), 122880   ;;  %v1953_v0 = vmov (!%p1493_p4), 0.0  }
   0xf   : > { %s2005_s30 = scalar_lea.vmem %s2509_s0, %s1488_s27  ;;  %s2010_s10 = scalar_lea.vmem %s2513_s4, %s1488_s27  ;;  %296 = vst.msk [vmem:[%s2515_s6] sm:$0x1] (!%p1493_p4), %vm295_vm0, %v1953_v0  ;;  %297 = vst.msk [vmem:[%s2516_s7] sm:$0x1] (!%p1493_p4), %vm295_vm0, %v1953_v0 }
  0x10   : > { %s2015_s13 = scalar_lea.vmem %s2514_s5, %s1488_s27 }
  0x14 PF: > { %v1816_v1 = vld [vmem:[%s2512_s3] sm:$0xff]   ;;  %v1739_v6 = vld [vmem:[%s2005_s30 + $0x8] sm:$0xff]   ;;  %v1740_v7 = vld [vmem:[%s2005_s30 + $0x10] sm:$0xff]   ;;  %vm833_vm1 = vcmask 130048   ;;  %vm792_vm2 = vcmask 125952   ;;  %vm1274_vm3 = vcmask 122880  }
  0x15   : > { %v1676_v2 = vld [vmem:[%s2005_s30] sm:$0xff]   ;;  %1771 = vmatprep.subr.bf16.mxu0 %v1816_v1  ;;  %v1741_v8 = vld [vmem:[%s2005_s30 + $0x18] sm:$0xff]   ;;  %1805 = vmatprep.subr.bf16.mxu1 %v1816_v1  ;;  %v1681_v10 = vunpack.c.l.bf16 %v1739_v6  ;;  %v1682_v11 = vunpack.c.h.bf16 %v1739_v6  ;;  %v1685_v12 = vunpack.c.l.bf16 %v1740_v7  ;;  %v1686_v13 = vunpack.c.h.bf16 %v1740_v7  ;;  %v1743_v35 = vld [vmem:[%s2005_s30 + $0x28] sm:$0xff]  }
  0x16   : > { %v2030_v3 = vld [vmem:[%s2510_s1] ss:$0 sm:$0xff]  ;;  %v1677_v4 = vunpack.c.l.bf16 %v1676_v2  ;;  %v1678_v5 = vunpack.c.h.bf16 %v1676_v2  ;;  %1772 = vmatpush3.bf16.msra.mxu0 %v1816_v1  ;;  %1806 = vmatpush3.bf16.msra.mxu1 %v1816_v1  ;;  %v1689_v16 = vunpack.c.l.bf16 %v1741_v8  ;;  %v1690_v17 = vunpack.c.h.bf16 %v1741_v8  ;;  %v1744_v36 = vld [vmem:[%s2005_s30 + $0x30] sm:$0xff]   ;;  %v1745_v56 = vld [vmem:[%s2005_s30 + $0x38] sm:$0xff]  }
  0x17   : > { %v2038_v9 = vld [vmem:[%s2511_s2] ss:$0 sm:$0xff]  ;;  %v371_v18 = vmul.f32 %v1681_v10, %v2030_v3  ;;  %v372_v19 = vmul.f32 %v1682_v11, %v2030_v3  ;;  %v373_v20 = vmul.f32 %v1685_v12, %v2030_v3  ;;  %v374_v21 = vmul.f32 %v1686_v13, %v2030_v3 }
  0x18   : > { %v369_v14 = vmul.f32 %v1677_v4, %v2030_v3  ;;  %v370_v15 = vmul.f32 %v1678_v5, %v2030_v3  ;;  %v375_v24 = vmul.f32 %v1689_v16, %v2030_v3  ;;  %v376_v25 = vmul.f32 %v1690_v17, %v2030_v3  ;;  %v1742_v26 = vld [vmem:[%s2005_s30 + $0x20] sm:$0xff]   ;;  %v1747_v4 = vld [vmem:[%s2005_s30 + $0x48] sm:$0xff]  }
  0x19   : > { %v2056_v27 = vadd.f32 %v2038_v9, %v371_v18  ;;  %v2059_v28 = vadd.f32 %v2038_v9, %v372_v19  ;;  %v2062_v29 = vadd.f32 %v2038_v9, %v373_v20  ;;  %v2065_v30 = vadd.f32 %v2038_v9, %v374_v21  ;;  %v1746_v63 = vld [vmem:[%s2005_s30 + $0x40] sm:$0xff]  }
  0x1a   : > { %v2047_v22 = vadd.f32 %v2038_v9, %v369_v14  ;;  %v2050_v23 = vadd.f32 %v2038_v9, %v370_v15  ;;  %v2070_v33 = vadd.f32 %v2038_v9, %v375_v24  ;;  %v2073_v34 = vadd.f32 %v2038_v9, %v376_v25 }
  0x1b   : > { %v1498_v37 = vmul.f32 -1.442695, %v2056_v27  ;;  %v1499_v38 = vmul.f32 -1.442695, %v2059_v28  ;;  %v1500_v39 = vmul.f32 -1.442695, %v2062_v29  ;;  %v1693_v40 = vunpack.c.l.bf16 %v1742_v26 }
  0x1c   : > { %v1496_v31 = vmul.f32 -1.442695, %v2047_v22  ;;  %v1497_v32 = vmul.f32 -1.442695, %v2050_v23  ;;  %v1501_v41 = vmul.f32 -1.442695, %v2065_v30  ;;  %v1694_v44 = vunpack.c.h.bf16 %v1742_v26 }
  0x1d   : > { %v1502_v42 = vmul.f32 -1.442695, %v2070_v33  ;;  %v1503_v43 = vmul.f32 -1.442695, %v2073_v34  ;;  %v377_v45 = vmul.f32 %v1693_v40, %v2030_v3  ;;  %v1697_v46 = vunpack.c.l.bf16 %v1743_v35 }
  0x1e   : > { %1817 = vpow2.f32 %v1496_v31  ;;  %v1698_v47 = vunpack.c.h.bf16 %v1743_v35  ;;  %v1701_v48 = vunpack.c.l.bf16 %v1744_v36  ;;  %v1702_v49 = vunpack.c.h.bf16 %v1744_v36 }
  0x1f   : > { %1819 = vpow2.f32 %v1497_v32  ;;  %v378_v50 = vmul.f32 %v1694_v44, %v2030_v3  ;;  %v2086_v51 = vadd.f32 %v2038_v9, %v377_v45  ;;  %v379_v52 = vmul.f32 %v1697_v46, %v2030_v3  ;;  %v1748_v44 = vld [vmem:[%s2005_s30 + $0x50] sm:$0xff]  }
  0x20   : > { %1821 = vpow2.f32 %v1498_v37  ;;  %v380_v53 = vmul.f32 %v1698_v47, %v2030_v3  ;;  %v381_v54 = vmul.f32 %v1701_v48, %v2030_v3  ;;  %v382_v55 = vmul.f32 %v1702_v49, %v2030_v3 }
  0x21   : > { %1823 = vpow2.f32 %v1499_v38  ;;  %v2094_v57 = vadd.f32 %v2038_v9, %v378_v50  ;;  %v1504_v58 = vmul.f32 -1.442695, %v2086_v51  ;;  %v2098_v59 = vadd.f32 %v2038_v9, %v379_v52 }
  0x22   : > { %1825 = vpow2.f32 %v1500_v39  ;;  %v2101_v60 = vadd.f32 %v2038_v9, %v380_v53  ;;  %v2104_v61 = vadd.f32 %v2038_v9, %v381_v54  ;;  %v2107_v62 = vadd.f32 %v2038_v9, %v382_v55 }
  0x23   : > { %1827 = vpow2.f32 %v1501_v41  ;;  %v1505_v0 = vmul.f32 -1.442695, %v2094_v57  ;;  %v1506_v1 = vmul.f32 -1.442695, %v2098_v59  ;;  %v1705_v2 = vunpack.c.l.bf16 %v1745_v56 }
  0x24   : > { %1829 = vpow2.f32 %v1502_v42  ;;  %v1507_v5 = vmul.f32 -1.442695, %v2101_v60  ;;  %v1508_v6 = vmul.f32 -1.442695, %v2104_v61  ;;  %v2116_v7 = vmul.f32 -1.442695, %v2107_v62 }
  0x25   : > { %1831 = vpow2.f32 %v1503_v43  ;;  %v1706_v8 = vunpack.c.h.bf16 %v1745_v56  ;;  %v383_v10 = vmul.f32 %v1705_v2, %v2030_v3  ;;  %v1709_v11 = vunpack.c.l.bf16 %v1746_v63 }
  0x26   : > { %1833 = vpow2.f32 %v1504_v58  ;;  %v1710_v13 = vunpack.c.h.bf16 %v1746_v63  ;;  %v1713_v14 = vunpack.c.l.bf16 %v1747_v4  ;;  %v1714_v15 = vunpack.c.h.bf16 %v1747_v4  ;;  %v1749_v63 = vld [vmem:[%s2005_s30 + $0x58] sm:$0xff]  }
  0x27   : > { %1835 = vpow2.f32 %v1505_v0  ;;  %v384_v18 = vmul.f32 %v1706_v8, %v2030_v3  ;;  %v2121_v19 = vadd.f32 %v2038_v9, %v383_v10  ;;  %v385_v24 = vmul.f32 %v1709_v11, %v2030_v3 }
  0x28   : > { %v1818_v12 = vpop.eup %1817  ;;  %1837 = vpow2.f32 %v1506_v1  ;;  %v386_v25 = vmul.f32 %v1710_v13, %v2030_v3  ;;  %v387_v43 = vmul.f32 %v1713_v14, %v2030_v3  ;;  %v388_v52 = vmul.f32 %v1714_v15, %v2030_v3 }
  0x29   : > { %v1820_v16 = vpop.eup %1819  ;;  %v536_v17 = vadd.f32 1.0, %v1818_v12  ;;  %1839 = vpow2.f32 %v1507_v5  ;;  %v2126_v32 = vadd.f32 %v2038_v9, %v384_v18  ;;  %v2129_v35 = vmul.f32 -1.442695, %v2121_v19 }
  0x2a   : > { %v1822_v20 = vpop.eup %1821  ;;  %v537_v21 = vadd.f32 1.0, %v1820_v16  ;;  %1841 = vpow2.f32 %v1508_v6  ;;  %v2132_v38 = vadd.f32 %v2038_v9, %v385_v24  ;;  %v2135_v39 = vadd.f32 %v2038_v9, %v386_v25 }
  0x2b   : > { %v1824_v26 = vpop.eup %1823  ;;  %1843 = vrcp.f32 %v536_v17  ;;  %v538_v31 = vadd.f32 1.0, %v1822_v20  ;;  %v2138_v42 = vmul.f32 -1.442695, %v2126_v32  ;;  %v2150_v53 = vadd.f32 %v2038_v9, %v387_v43 }
  0x2c   : > { %v1826_v36 = vpop.eup %1825  ;;  %1845 = vrcp.f32 %v537_v21  ;;  %v539_v37 = vadd.f32 1.0, %v1824_v26  ;;  %v2143_v47 = vmul.f32 -1.442695, %v2132_v38  ;;  %v2146_v48 = vmul.f32 -1.442695, %v2135_v39  ;;  %v2172_v26 = vld [vmem:[%s2005_s30 + $0x60] sm:$0xff]  }
  0x2d   : > { %v1828_v40 = vpop.eup %1827  ;;  %1847 = vrcp.f32 %v538_v31  ;;  %v540_v41 = vadd.f32 1.0, %v1826_v36  ;;  %v1717_v56 = vunpack.c.l.bf16 %v1748_v44  ;;  %v1718_v58 = vunpack.c.h.bf16 %v1748_v44 }
  0x2e   : > { %v1830_v45 = vpop.eup %1829  ;;  %1849 = vrcp.f32 %v539_v37  ;;  %v541_v46 = vadd.f32 1.0, %v1828_v40  ;;  %v2154_v2 = vadd.f32 %v2038_v9, %v388_v52  ;;  %v2157_v4 = vmul.f32 -1.442695, %v2150_v53 }
  0x2f   : > { %v1832_v49 = vpop.eup %1831  ;;  %1851 = vrcp.f32 %v540_v41  ;;  %v542_v50 = vadd.f32 1.0, %v1830_v45  ;;  %v389_v8 = vmul.f32 %v1717_v56, %v2030_v3  ;;  %v390_v10 = vmul.f32 %v1718_v58, %v2030_v3 }
  0x30   : > { %v1834_v54 = vpop.eup %1833  ;;  %1853 = vrcp.f32 %v541_v46  ;;  %v543_v55 = vadd.f32 1.0, %v1832_v49  ;;  %v2162_v13 = vmul.f32 -1.442695, %v2154_v2  ;;  %v1721_v14 = vunpack.c.l.bf16 %v1749_v63 }
  0x31   : > { %v1836_v0 = vpop.eup %1835  ;;  %1855 = vrcp.f32 %v542_v50  ;;  %v544_v1 = vadd.f32 1.0, %v1834_v54  ;;  %v2165_v17 = vadd.f32 %v2038_v9, %v389_v8  ;;  %v2168_v18 = vadd.f32 %v2038_v9, %v390_v10 }
  0x32   : > { %v1838_v5 = vpop.eup %1837  ;;  %1857 = vrcp.f32 %v543_v55  ;;  %v545_v6 = vadd.f32 1.0, %v1836_v0  ;;  %v1722_v24 = vunpack.c.h.bf16 %v1749_v63  ;;  %v391_v25 = vmul.f32 %v1721_v14, %v2030_v3 }
  0x33   : > { %v1840_v11 = vpop.eup %1839  ;;  %1859 = vrcp.f32 %v544_v1  ;;  %v546_v12 = vadd.f32 1.0, %v1838_v5  ;;  %v1516_v37 = vmul.f32 -1.442695, %v2165_v17  ;;  %v1517_v40 = vmul.f32 -1.442695, %v2168_v18 }
  0x34   : > { %v1842_v15 = vpop.eup %1841  ;;  %1861 = vrcp.f32 %v545_v6  ;;  %v547_v16 = vadd.f32 1.0, %v1840_v11  ;;  %v392_v44 = vmul.f32 %v1722_v24, %v2030_v3  ;;  %v2181_v45 = vadd.f32 %v2038_v9, %v391_v25  ;;  %v1751_v25 = vld [vmem:[%s2005_s30 + $0x68] sm:$0xff]  }
  0x35   : > { %v1844_v20 = vpop.eup %1843  ;;  %1863 = vrcp.f32 %v546_v12  ;;  %v548_v21 = vadd.f32 1.0, %v1842_v15  ;;  %v1725_v50 = vunpack.c.l.bf16 %v2172_v26 }
  0x36   : > { %v1846_v31 = vpop.eup %1845  ;;  %v632_v36 = vmul.f32 %v1844_v20, %v2047_v22  ;;  %1865 = vrcp.f32 %v547_v16  ;;  %v1518_v5 = vmul.f32 -1.442695, %v2181_v45  ;;  %v1726_v16 = vunpack.c.h.bf16 %v2172_v26 }
  0x37   : > { %v1848_v41 = vpop.eup %1847  ;;  %v633_v43 = vmul.f32 %v1846_v31, %v2050_v23  ;;  %1867 = vpow2.f32 %v2116_v7 }
  0x38   : > { %v1850_v46 = vpop.eup %1849  ;;  %v1611_v49 = vpack.c.bf16 %v632_v36, %v632_v36  ;;  %v634_v22 = vmul.f32 %v1848_v41, %v2056_v27  ;;  %1869 = vrcp.f32 %v548_v21  ;;  %v2192_v27 = vadd.f32 %v2038_v9, %v392_v44 }
  0x39   : > { %v1852_v52 = vpop.eup %1851  ;;  %v664_v54 = vpack.c.bf16 %v633_v43, %v632_v36  ;;  %v1612_v55 = vpack.c.bf16 %v633_v43, %v633_v43  ;;  %v635_v23 = vmul.f32 %v1850_v46, %v2059_v28  ;;  %1871 = vpow2.f32 %v2129_v35 }
  0x3a   : > { %v1854_v7 = vpop.eup %1853  ;;  %793 = vst.msk [vmem:[%s2010_s10] sm:$0xf] %vm792_vm2, %v1611_v49  ;;  %v1613_v56 = vpack.c.bf16 %v634_v22, %v634_v22  ;;  %v636_v58 = vmul.f32 %v1852_v52, %v2062_v29  ;;  %1873 = vpow2.f32 %v2138_v42  ;;  %v1519_v11 = vmul.f32 -1.442695, %v2192_v27 }
  0x3b   : > { %v1856_v63 = vpop.eup %1855  ;;  %794 = vst.msk [vmem:[%s2010_s10 + $0x4] sm:$0xf] %vm792_vm2, %v1612_v55  ;;  %1773 = vmatprep.mubr.msk.bf16.mxu0 %vm833_vm1, %v664_v54  ;;  %v665_v28 = vpack.c.bf16 %v635_v23, %v634_v22  ;;  %v1614_v0 = vpack.c.bf16 %v635_v23, %v635_v23  ;;  %v637_v35 = vmul.f32 %v1854_v7, %v2065_v30  ;;  %1875 = vpow2.f32 %v2143_v47  ;;  %v1752_v55 = vld [vmem:[%s2005_s30 + $0x70] sm:$0xff]  }
  0x3c   : > { %v1858_v1 = vpop.eup %1857  ;;  %795 = vst.msk [vmem:[%s2010_s10 + $0x8] sm:$0xf] %vm792_vm2, %v1613_v56  ;;  %v1615_v29 = vpack.c.bf16 %v636_v58, %v636_v58  ;;  %v638_v42 = vmul.f32 %v1856_v63, %v2070_v33  ;;  %1877 = vpow2.f32 %v2146_v48  ;;  %v394_v43 = vmul.f32 %v1726_v16, %v2030_v3 }
  0x3d   : > { %v1860_v6 = vpop.eup %1859  ;;  %796 = vst.msk [vmem:[%s2010_s10 + $0xc] sm:$0xf] %vm792_vm2, %v1614_v0  ;;  %1774 = vmatmul.mubr.msk.bf16.vlgmr.msra.gmra.mrb[0].mxu0 %vm833_vm1, %v665_v28  ;;  %v666_v30 = vpack.c.bf16 %v637_v35, %v636_v58  ;;  %v1616_v8 = vpack.c.bf16 %v637_v35, %v637_v35  ;;  %v639_v47 = vmul.f32 %v1858_v1, %v2073_v34  ;;  %1879 = vpow2.f32 %v2157_v4 }
  0x3e   : > { %v1862_v10 = vpop.eup %1861  ;;  %797 = vst.msk [vmem:[%s2010_s10 + $0x10] sm:$0xf] %vm792_vm2, %v1615_v29  ;;  %v1617_v33 = vpack.c.bf16 %v638_v42, %v638_v42  ;;  %v640_v48 = vmul.f32 %v1860_v6, %v2086_v51  ;;  %1881 = vpow2.f32 %v2162_v13  ;;  %v1729_v49 = vunpack.c.l.bf16 %v1751_v25 }
  0x3f   : > { %v1864_v12 = vpop.eup %1863  ;;  %798 = vst.msk [vmem:[%s2010_s10 + $0x14] sm:$0xf] %vm792_vm2, %v1616_v8  ;;  %1777 = vmatprep.mubr.msk.bf16.mxu0 %vm833_vm1, %v666_v30  ;;  %v667_v34 = vpack.c.bf16 %v639_v47, %v638_v42  ;;  %v1618_v14 = vpack.c.bf16 %v639_v47, %v639_v47  ;;  %v641_v4 = vmul.f32 %v1862_v10, %v2094_v57  ;;  %1883 = vpow2.f32 %v1516_v37  ;;  %v1753_v47 = vld [vmem:[%s2005_s30 + $0x78] sm:$0xff]  }
  0x40   : > { %v1866_v15 = vpop.eup %1865  ;;  %799 = vst.msk [vmem:[%s2010_s10 + $0x18] sm:$0xf] %vm792_vm2, %v1617_v33  ;;  %v1619_v51 = vpack.c.bf16 %v640_v48, %v640_v48  ;;  %v2221_v13 = vmul.f32 %v1864_v12, %v2098_v59  ;;  %1885 = vpow2.f32 %v1517_v40  ;;  %v393_v37 = vmul.f32 %v1725_v50, %v2030_v3 }
  0x41   : > { %v1868_v20 = vpop.eup %1867  ;;  %800 = vst.msk [vmem:[%s2010_s10 + $0x1c] sm:$0xf] %vm792_vm2, %v1618_v14  ;;  %v668_v21 = vpack.c.bf16 %v641_v4, %v640_v48  ;;  %v1620_v24 = vpack.c.bf16 %v641_v4, %v641_v4  ;;  %v2227_v57 = vmul.f32 %v1866_v15, %v2101_v60  ;;  %1887 = vpow2.f32 %v1518_v5 }
  0x42   : > { %v1870_v31 = vpop.eup %1869  ;;  %801 = vst.msk [vmem:[%s2010_s10 + $0x20] sm:$0xf] %vm792_vm2, %v1619_v51  ;;  %v1621_v59 = vpack.c.bf16 %v2221_v13, %v2221_v13  ;;  %v549_v36 = vadd.f32 1.0, %v1868_v20  ;;  %1889 = vpow2.f32 %v1519_v11  ;;  %v2248_v26 = vadd.f32 %v2038_v9, %v393_v37 }
  0x43   : > { %v1872_v40 = vpop.eup %1871  ;;  %802 = vst.msk [vmem:[%s2010_s10 + $0x24] sm:$0xf] %vm792_vm2, %v1620_v24  ;;  %v1622_v60 = vpack.c.bf16 %v2227_v57, %v2227_v57  ;;  %v2242_v41 = vmul.f32 %v1870_v31, %v2104_v61  ;;  %v2256_v52 = vadd.f32 %v2038_v9, %v394_v43  ;;  %v1730_v54 = vunpack.c.h.bf16 %v1751_v25 }
  0x44   : > { %v1874_v44 = vpop.eup %1873  ;;  %803 = vst.msk [vmem:[%s2010_s10 + $0x28] sm:$0xf] %vm792_vm2, %v1621_v59  ;;  %1891 = vrcp.f32 %v549_v36  ;;  %v550_v46 = vadd.f32 1.0, %v1872_v40  ;;  %v395_v56 = vmul.f32 %v1729_v49, %v2030_v3  ;;  %v669_v63 = vpack.c.bf16 %v2227_v57, %v2221_v13 }
  0x45   : > { %v1876_v22 = vpop.eup %1875  ;;  %1778 = vmatmul.mubr.msk.bf16.gmra.mrb[4].mxu0 %vm833_vm1, %v667_v34  ;;  %804 = vst.msk [vmem:[%s2010_s10 + $0x2c] sm:$0xf] %vm792_vm2, %v1622_v60  ;;  %v1623_v61 = vpack.c.bf16 %v2242_v41, %v2242_v41  ;;  %v551_v50 = vadd.f32 1.0, %v1874_v44  ;;  %v396_v0 = vmul.f32 %v1730_v54, %v2030_v3  ;;  %v1520_v29 = vmul.f32 -1.442695, %v2248_v26 }
  0x46   : > { %v1878_v23 = vpop.eup %1877  ;;  %1781 = vmatprep.mubr.msk.bf16.mxu0 %vm833_vm1, %v668_v21  ;;  %1893 = vrcp.f32 %v550_v46  ;;  %v552_v7 = vadd.f32 1.0, %v1876_v22  ;;  %v1733_v42 = vunpack.c.l.bf16 %v1752_v55  ;;  %v1521_v30 = vmul.f32 -1.442695, %v2256_v52 }
  0x47   : > { %v1880_v58 = vpop.eup %1879  ;;  %805 = vst.msk [vmem:[%s2010_s10 + $0x30] sm:$0xf] %vm792_vm2, %v1623_v61  ;;  %1895 = vrcp.f32 %v551_v50  ;;  %v553_v28 = vadd.f32 1.0, %v1878_v23  ;;  %v1734_v8 = vunpack.c.h.bf16 %v1752_v55  ;;  %v2270_v48 = vadd.f32 %v2038_v9, %v395_v56 }
  0x48   : > { %v1882_v35 = vpop.eup %1881  ;;  %1897 = vrcp.f32 %v552_v7  ;;  %v554_v1 = vadd.f32 1.0, %v1880_v58  ;;  %v397_v11 = vmul.f32 %v1733_v42, %v2030_v3  ;;  %v2274_v14 = vadd.f32 %v2038_v9, %v396_v0 }
  0x49   : > { %v1884_v5 = vpop.eup %1883  ;;  %1899 = vrcp.f32 %v553_v28  ;;  %v555_v6 = vadd.f32 1.0, %v1882_v35  ;;  %v398_v4 = vmul.f32 %v1734_v8, %v2030_v3  ;;  %v1737_v16 = vunpack.c.l.bf16 %v1753_v47 }
  0x4a   : > { %v1886_v10 = vpop.eup %1885  ;;  %1901 = vrcp.f32 %v554_v1  ;;  %v556_v33 = vadd.f32 1.0, %v1884_v5  ;;  %v2278_v13 = vadd.f32 %v2038_v9, %v397_v11  ;;  %v1738_v24 = vunpack.c.h.bf16 %v1753_v47 }
  0x4b   : > { %v1888_v12 = vpop.eup %1887  ;;  %1903 = vrcp.f32 %v555_v6  ;;  %v557_v34 = vadd.f32 1.0, %v1886_v10  ;;  %v2282_v21 = vadd.f32 %v2038_v9, %v398_v4  ;;  %v1522_v25 = vmul.f32 -1.442695, %v2270_v48 }
  0x4c   : > { %v1890_v15 = vpop.eup %1889  ;;  %1905 = vrcp.f32 %v556_v33  ;;  %v558_v51 = vadd.f32 1.0, %v1888_v12  ;;  %v399_v31 = vmul.f32 %v1737_v16, %v2030_v3  ;;  %v1523_v36 = vmul.f32 -1.442695, %v2274_v14 }
  0x4d   : > { %1782 = vmatmul.mubr.msk.bf16.gmra.mrb[8].mxu0 %vm833_vm1, %v669_v63  ;;  %1907 = vrcp.f32 %v557_v34  ;;  %v559_v20 = vadd.f32 1.0, %v1890_v15  ;;  %v400_v37 = vmul.f32 %v1738_v24, %v2030_v3  ;;  %v1524_v60 = vmul.f32 -1.442695, %v2278_v13 }
  0x4e   : > { %v1892_v57 = vpop.eup %1891  ;;  %1909 = vrcp.f32 %v558_v51  ;;  %v1525_v43 = vmul.f32 -1.442695, %v2282_v21  ;;  %v2292_v44 = vadd.f32 %v2038_v9, %v399_v31 }
  0x4f   : > { %v645_v59 = vmul.f32 %v1892_v57, %v2107_v62  ;;  %1911 = vrcp.f32 %v559_v20  ;;  %v2298_v50 = vadd.f32 %v2038_v9, %v400_v37 }
  0x50   : > { %v1894_v40 = vpop.eup %1893  ;;  %1913 = vpow2.f32 %v1520_v29  ;;  %v1526_v54 = vmul.f32 -1.442695, %v2292_v44 }
  0x51   : > { %v1896_v46 = vpop.eup %1895  ;;  %v670_v49 = vpack.c.bf16 %v645_v59, %v2242_v41  ;;  %v1624_v22 = vpack.c.bf16 %v645_v59, %v645_v59  ;;  %v646_v62 = vmul.f32 %v1894_v40, %v2121_v19  ;;  %1915 = vpow2.f32 %v1521_v30 }
  0x52   : > { %v1898_v61 = vpop.eup %1897  ;;  %v647_v3 = vmul.f32 %v1896_v46, %v2126_v32  ;;  %1917 = vpow2.f32 %v1522_v25  ;;  %v1527_v28 = vmul.f32 -1.442695, %v2298_v50 }
  0x53   : > { %v1900_v55 = vpop.eup %1899  ;;  %806 = vst.msk [vmem:[%s2010_s10 + $0x34] sm:$0xf] %vm792_vm2, %v1624_v22  ;;  %1785 = vmatprep.mubr.msk.bf16.mxu0 %vm833_vm1, %v670_v49  ;;  %v1625_v41 = vpack.c.bf16 %v646_v62, %v646_v62  ;;  %v648_v19 = vmul.f32 %v1898_v61, %v2132_v38  ;;  %1919 = vpow2.f32 %v1523_v36 }
  0x54   : > { %v1902_v23 = vpop.eup %1901  ;;  %v671_v7 = vpack.c.bf16 %v647_v3, %v646_v62  ;;  %v1626_v32 = vpack.c.bf16 %v647_v3, %v647_v3  ;;  %v649_v56 = vmul.f32 %v1900_v55, %v2135_v39  ;;  %1921 = vpow2.f32 %v1524_v60 }
  0x55   : > { %v1904_v9 = vpop.eup %1903  ;;  %807 = vst.msk [vmem:[%s2010_s10 + $0x38] sm:$0xf] %vm792_vm2, %v1625_v41  ;;  %v1627_v58 = vpack.c.bf16 %v648_v19, %v648_v19  ;;  %v650_v63 = vmul.f32 %v1902_v23, %v2150_v53  ;;  %1923 = vpow2.f32 %v1525_v43 }
  0x56   : > { %v1906_v0 = vpop.eup %1905  ;;  %808 = vst.msk [vmem:[%s2010_s10 + $0x3c] sm:$0xf] %vm792_vm2, %v1626_v32  ;;  %1786 = vmatmul.mubr.msk.bf16.gmra.mrb[12].mxu0 %vm833_vm1, %v671_v7  ;;  %v672_v38 = vpack.c.bf16 %v649_v56, %v648_v19  ;;  %v1628_v39 = vpack.c.bf16 %v649_v56, %v649_v56  ;;  %v651_v35 = vmul.f32 %v1904_v9, %v2154_v2  ;;  %1925 = vpow2.f32 %v1526_v54 }
  0x57   : > { %v1908_v1 = vpop.eup %1907  ;;  %809 = vst.msk [vmem:[%s2010_s10 + $0x40] sm:$0xf] %vm792_vm2, %v1627_v58  ;;  %v1629_v53 = vpack.c.bf16 %v650_v63, %v650_v63  ;;  %v652_v29 = vmul.f32 %v1906_v0, %v2165_v17  ;;  %1927 = vpow2.f32 %v1527_v28 }
  0x58   : > { %v1910_v42 = vpop.eup %1909  ;;  %810 = vst.msk [vmem:[%s2010_s10 + $0x44] sm:$0xf] %vm792_vm2, %v1628_v39  ;;  %1789 = vmatprep.mubr.msk.bf16.mxu1 %vm833_vm1, %v672_v38  ;;  %v673_v5 = vpack.c.bf16 %v651_v35, %v650_v63  ;;  %v1630_v6 = vpack.c.bf16 %v651_v35, %v651_v35  ;;  %v653_v30 = vmul.f32 %v1908_v1, %v2168_v18 }
  0x59   : > { %v1912_v2 = vpop.eup %1911  ;;  %811 = vst.msk [vmem:[%s2010_s10 + $0x48] sm:$0xf] %vm792_vm2, %v1629_v53  ;;  %v1631_v8 = vpack.c.bf16 %v652_v29, %v652_v29  ;;  %v654_v47 = vmul.f32 %v1910_v42, %v2181_v45 }
  0x5a   : > { %v1914_v10 = vpop.eup %1913  ;;  %812 = vst.msk [vmem:[%s2010_s10 + $0x4c] sm:$0xf] %vm792_vm2, %v1630_v6  ;;  %1790 = vmatmul.mubr.msk.bf16.vlgmr.msra.gmra.mrb[0].mxu1 %vm833_vm1, %v673_v5  ;;  %v674_v17 = vpack.c.bf16 %v653_v30, %v652_v29  ;;  %v1632_v33 = vpack.c.bf16 %v653_v30, %v653_v30  ;;  %v655_v11 = vmul.f32 %v1912_v2, %v2192_v27 }
  0x5b   : > { %v1916_v12 = vpop.eup %1915  ;;  %813 = vst.msk [vmem:[%s2010_s10 + $0x50] sm:$0xf] %vm792_vm2, %v1631_v8  ;;  %v1633_v18 = vpack.c.bf16 %v654_v47, %v654_v47  ;;  %v560_v34 = vadd.f32 1.0, %v1914_v10 }
  0x5c   : > { %v1918_v4 = vpop.eup %1917  ;;  %814 = vst.msk [vmem:[%s2010_s10 + $0x54] sm:$0xf] %vm792_vm2, %v1632_v33  ;;  %1793 = vmatprep.mubr.msk.bf16.mxu1 %vm833_vm1, %v674_v17  ;;  %v1634_v45 = vpack.c.bf16 %v655_v11, %v655_v11  ;;  %v561_v15 = vadd.f32 1.0, %v1916_v12  ;;  %v675_v27 = vpack.c.bf16 %v655_v11, %v654_v47 }
  0x5d   : > { %v1920_v51 = vpop.eup %1919  ;;  %815 = vst.msk [vmem:[%s2010_s10 + $0x58] sm:$0xf] %vm792_vm2, %v1633_v18  ;;  %1929 = vrcp.f32 %v560_v34  ;;  %v562_v16 = vadd.f32 1.0, %v1918_v4 }
  0x5e   : > { %v1922_v20 = vpop.eup %1921  ;;  %816 = vst.msk [vmem:[%s2010_s10 + $0x5c] sm:$0xf] %vm792_vm2, %v1634_v45  ;;  %1931 = vrcp.f32 %v561_v15  ;;  %v563_v24 = vadd.f32 1.0, %v1920_v51 }
  0x5f   : > { %v1924_v57 = vpop.eup %1923  ;;  %1933 = vrcp.f32 %v562_v16  ;;  %v564_v25 = vadd.f32 1.0, %v1922_v20 }
  0x60   : > { %v1926_v31 = vpop.eup %1925  ;;  %1935 = vrcp.f32 %v563_v24  ;;  %v565_v59 = vadd.f32 1.0, %v1924_v57 }
  0x61   : > { %v1928_v36 = vpop.eup %1927  ;;  %1937 = vrcp.f32 %v564_v25  ;;  %v566_v37 = vadd.f32 1.0, %v1926_v31 }
  0x62   : > { %1794 = vmatmul.mubr.msk.bf16.gmra.mrb[4].mxu1 %vm833_vm1, %v675_v27  ;;  %1939 = vrcp.f32 %v565_v59  ;;  %v567_v40 = vadd.f32 1.0, %v1928_v36 }
  0x63   : > { %1941 = vrcp.f32 %v566_v37 }
  0x64   : > { %1943 = vrcp.f32 %v567_v40 }
  0x67   : > { %v1930_v60 = vpop.eup %1929 }
  0x68   : > { %v1932_v43 = vpop.eup %1931  ;;  %v656_v46 = vmul.f32 %v1930_v60, %v2248_v26 }
  0x69   : > { %v1934_v49 = vpop.eup %1933  ;;  %v657_v22 = vmul.f32 %v1932_v43, %v2256_v52 }
  0x6a   : > { %v1936_v62 = vpop.eup %1935  ;;  %v1635_v61 = vpack.c.bf16 %v656_v46, %v656_v46  ;;  %v658_v3 = vmul.f32 %v1934_v49, %v2270_v48 }
  0x6b   : > { %v1938_v54 = vpop.eup %1937  ;;  %v676_v55 = vpack.c.bf16 %v657_v22, %v656_v46  ;;  %v1636_v41 = vpack.c.bf16 %v657_v22, %v657_v22  ;;  %v659_v19 = vmul.f32 %v1936_v62, %v2274_v14 }
  0x6c   : > { %v1940_v23 = vpop.eup %1939  ;;  %817 = vst.msk [vmem:[%s2010_s10 + $0x60] sm:$0xf] %vm792_vm2, %v1635_v61  ;;  %v1637_v7 = vpack.c.bf16 %v658_v3, %v658_v3  ;;  %v660_v26 = vmul.f32 %v1938_v54, %v2278_v13 }
  0x6d   : > { %v1942_v32 = vpop.eup %1941  ;;  %818 = vst.msk [vmem:[%s2010_s10 + $0x64] sm:$0xf] %vm792_vm2, %v1636_v41  ;;  %1797 = vmatprep.mubr.msk.bf16.mxu1 %vm833_vm1, %v676_v55  ;;  %v677_v52 = vpack.c.bf16 %v659_v19, %v658_v3  ;;  %v1638_v48 = vpack.c.bf16 %v659_v19, %v659_v19  ;;  %v661_v56 = vmul.f32 %v1940_v23, %v2282_v21 }
  0x6e   : > { %v1944_v9 = vpop.eup %1943  ;;  %819 = vst.msk [vmem:[%s2010_s10 + $0x68] sm:$0xf] %vm792_vm2, %v1637_v7  ;;  %v1639_v14 = vpack.c.bf16 %v660_v26, %v660_v26  ;;  %v662_v58 = vmul.f32 %v1942_v32, %v2292_v44 }
  0x6f   : > { %820 = vst.msk [vmem:[%s2010_s10 + $0x6c] sm:$0xf] %vm792_vm2, %v1638_v48  ;;  %1798 = vmatmul.mubr.msk.bf16.gmra.mrb[8].mxu1 %vm833_vm1, %v677_v52  ;;  %v678_v13 = vpack.c.bf16 %v661_v56, %v660_v26  ;;  %v1640_v63 = vpack.c.bf16 %v661_v56, %v661_v56  ;;  %v663_v28 = vmul.f32 %v1944_v9, %v2298_v50 }
  0x70   : > { %821 = vst.msk [vmem:[%s2010_s10 + $0x70] sm:$0xf] %vm792_vm2, %v1639_v14  ;;  %v1641_v0 = vpack.c.bf16 %v662_v58, %v662_v58 }
  0x71   : > { %822 = vst.msk [vmem:[%s2010_s10 + $0x74] sm:$0xf] %vm792_vm2, %v1640_v63  ;;  %1801 = vmatprep.mubr.msk.bf16.mxu1 %vm833_vm1, %v678_v13  ;;  %v1642_v21 = vpack.c.bf16 %v663_v28, %v663_v28  ;;  %v679_v44 = vpack.c.bf16 %v663_v28, %v662_v58 }
  0x72   : > { %823 = vst.msk [vmem:[%s2010_s10 + $0x78] sm:$0xf] %vm792_vm2, %v1641_v0 }
  0x73   : > { %824 = vst.msk [vmem:[%s2010_s10 + $0x7c] sm:$0xf] %vm792_vm2, %v1642_v21 }
  0x77   : > { %1802 = vmatmul.mubr.msk.bf16.gmra.mrb[12].mxu1 %vm833_vm1, %v679_v44 }
 0x110   : > { %v1775_v38 = vpop.f32.mrb[0].mxu0 }
 0x111   : > { %v1645_v50 = vpack.c.bf16 %v1775_v38, %v1775_v38  ;;  %v916_v39 = vpop.f32.mrb[1].mxu0  ;;  %v1279_v29 = vmul.f32 %v1775_v38, %v1775_v38  ;;  %v1207_v17 = vsel %vm833_vm1, %v1775_v38, 0.0 }
 0x112   : > { %v1643_v35 = vpack.c.bf16 %v916_v39, %v916_v39  ;;  %v1277_v1 = vmul.f32 %v916_v39, %v916_v39  ;;  %v1776_v53 = vpop.f32.mrb[2].mxu0  ;;  %v1204_v6 = vsel %vm833_vm1, %v916_v39, 0.0 }
 0x113   : > { %1173 = vst.msk [vmem:[%s2015_s13 + $0x8] sm:$0xf] %vm792_vm2, %v1645_v50  ;;  %v1646_v42 = vpack.c.bf16 %v1776_v53, %v1776_v53  ;;  %v919_v5 = vpop.f32.mrb[3].mxu0  ;;  %v1280_v47 = vmul.f32 %v1776_v53, %v1776_v53  ;;  %v1312_v34 = vsel %vm833_vm1, %v1279_v29, 0.0  ;;  %v1209_v45 = vsel %vm833_vm1, %v1776_v53, 0.0 }
 0x114   : > { %1171 = vst.msk [vmem:[%s2015_s13] sm:$0xf] %vm792_vm2, %v1643_v35  ;;  %v1644_v30 = vpack.c.bf16 %v919_v5, %v919_v5  ;;  %v1205_v2 = vsel %vm833_vm1, %v919_v5, 0.0  ;;  %v1278_v8 = vmul.f32 %v919_v5, %v919_v5  ;;  %v1309_v33 = vsel %vm833_vm1, %v1277_v1, 0.0 }
 0x115   : > { %1174 = vst.msk [vmem:[%s2015_s13 + $0xc] sm:$0xf] %vm792_vm2, %v1646_v42  ;;  %v1206_v10 = vadd.f32 %v1205_v2, %v1204_v6  ;;  %v1314_v15 = vsel %vm833_vm1, %v1280_v47, 0.0 }
 0x116   : > { %1172 = vst.msk [vmem:[%s2015_s13 + $0x4] sm:$0xf] %vm792_vm2, %v1644_v30  ;;  %v1310_v11 = vsel %vm833_vm1, %v1278_v8, 0.0 }
 0x117   : > { %v1208_v12 = vadd.f32 %v1207_v17, %v1206_v10  ;;  %v1311_v18 = vadd.f32 %v1310_v11, %v1309_v33 }
 0x118   : > { %v1779_v4 = vpop.f32.mrb[4].mxu0 }
 0x119   : > { %v1313_v51 = vadd.f32 %v1312_v34, %v1311_v18  ;;  %v1649_v16 = vpack.c.bf16 %v1779_v4, %v1779_v4  ;;  %v932_v20 = vpop.f32.mrb[5].mxu0  ;;  %v1210_v24 = vadd.f32 %v1209_v45, %v1208_v12  ;;  %v1283_v46 = vmul.f32 %v1779_v4, %v1779_v4 }
 0x11a   : > { %v1647_v27 = vpack.c.bf16 %v932_v20, %v932_v20  ;;  %v1211_v57 = vsel %vm833_vm1, %v932_v20, 0.0  ;;  %v1281_v25 = vmul.f32 %v932_v20, %v932_v20  ;;  %v1780_v31 = vpop.f32.mrb[6].mxu0  ;;  %v1215_v3 = vsel %vm833_vm1, %v1779_v4, 0.0 }
 0x11b   : > { %1177 = vst.msk [vmem:[%s2015_s13 + $0x18] sm:$0xf] %vm792_vm2, %v1649_v16  ;;  %v1315_v59 = vadd.f32 %v1314_v15, %v1313_v51  ;;  %v1650_v36 = vpack.c.bf16 %v1780_v31, %v1780_v31  ;;  %v935_v37 = vpop.f32.mrb[7].mxu0  ;;  %v1212_v40 = vadd.f32 %v1211_v57, %v1210_v24  ;;  %v1284_v54 = vmul.f32 %v1780_v31, %v1780_v31 }
 0x11c   : > { %1175 = vst.msk [vmem:[%s2015_s13 + $0x10] sm:$0xf] %vm792_vm2, %v1647_v27  ;;  %v1316_v60 = vsel %vm833_vm1, %v1281_v25, 0.0  ;;  %v1648_v43 = vpack.c.bf16 %v935_v37, %v935_v37  ;;  %v1213_v22 = vsel %vm833_vm1, %v935_v37, 0.0  ;;  %v1282_v62 = vmul.f32 %v935_v37, %v935_v37 }
 0x11d   : > { %v1317_v49 = vadd.f32 %v1316_v60, %v1315_v59  ;;  %1178 = vst.msk [vmem:[%s2015_s13 + $0x1c] sm:$0xf] %vm792_vm2, %v1650_v36  ;;  %v1214_v61 = vadd.f32 %v1213_v22, %v1212_v40  ;;  %v1320_v7 = vsel %vm833_vm1, %v1283_v46, 0.0  ;;  %v1217_v26 = vsel %vm833_vm1, %v1780_v31, 0.0 }
 0x11e   : > { %1176 = vst.msk [vmem:[%s2015_s13 + $0x14] sm:$0xf] %vm792_vm2, %v1648_v43  ;;  %v1318_v55 = vsel %vm833_vm1, %v1282_v62, 0.0  ;;  %v1322_v13 = vsel %vm833_vm1, %v1284_v54, 0.0 }
 0x11f   : > { %v1216_v41 = vadd.f32 %v1215_v3, %v1214_v61  ;;  %v1319_v19 = vadd.f32 %v1318_v55, %v1317_v49 }
 0x120   : > { %v1783_v23 = vpop.f32.mrb[8].mxu0 }
 0x121   : > { %v1653_v32 = vpack.c.bf16 %v1783_v23, %v1783_v23  ;;  %v948_v52 = vpop.f32.mrb[9].mxu0  ;;  %v1321_v48 = vadd.f32 %v1320_v7, %v1319_v19  ;;  %v1218_v9 = vadd.f32 %v1217_v26, %v1216_v41  ;;  %v1287_v50 = vmul.f32 %v1783_v23, %v1783_v23 }
 0x122   : > { %v1651_v56 = vpack.c.bf16 %v948_v52, %v948_v52  ;;  %v1219_v14 = vsel %vm833_vm1, %v948_v52, 0.0  ;;  %v1784_v58 = vpop.f32.mrb[10].mxu0  ;;  %v1285_v63 = vmul.f32 %v948_v52, %v948_v52  ;;  %v1223_v5 = vsel %vm833_vm1, %v1783_v23, 0.0 }
 0x123   : > { %1181 = vst.msk [vmem:[%s2015_s13 + $0x28] sm:$0xf] %vm792_vm2, %v1653_v32  ;;  %v1654_v28 = vpack.c.bf16 %v1784_v58, %v1784_v58  ;;  %v951_v0 = vpop.f32.mrb[11].mxu0  ;;  %v1220_v21 = vadd.f32 %v1219_v14, %v1218_v9  ;;  %v1323_v44 = vadd.f32 %v1322_v13, %v1321_v48  ;;  %v1288_v29 = vmul.f32 %v1784_v58, %v1784_v58 }
 0x124   : > { %1179 = vst.msk [vmem:[%s2015_s13 + $0x20] sm:$0xf] %vm792_vm2, %v1651_v56  ;;  %v1652_v38 = vpack.c.bf16 %v951_v0, %v951_v0  ;;  %v1324_v39 = vsel %vm833_vm1, %v1285_v63, 0.0  ;;  %v1221_v35 = vsel %vm833_vm1, %v951_v0, 0.0  ;;  %v1286_v1 = vmul.f32 %v951_v0, %v951_v0 }
 0x125   : > { %1182 = vst.msk [vmem:[%s2015_s13 + $0x2c] sm:$0xf] %vm792_vm2, %v1654_v28  ;;  %v1325_v53 = vadd.f32 %v1324_v39, %v1323_v44  ;;  %v1222_v42 = vadd.f32 %v1221_v35, %v1220_v21  ;;  %v1328_v8 = vsel %vm833_vm1, %v1287_v50, 0.0  ;;  %v1225_v10 = vsel %vm833_vm1, %v1784_v58, 0.0 }
 0x126   : > { %1180 = vst.msk [vmem:[%s2015_s13 + $0x24] sm:$0xf] %vm792_vm2, %v1652_v38  ;;  %v1326_v6 = vsel %vm833_vm1, %v1286_v1, 0.0  ;;  %v1330_v17 = vsel %vm833_vm1, %v1288_v29, 0.0 }
 0x127   : > { %v1224_v30 = vadd.f32 %v1223_v5, %v1222_v42  ;;  %v1327_v2 = vadd.f32 %v1326_v6, %v1325_v53 }
 0x129   : > { %v1787_v47 = vpop.f32.mrb[12].mxu0  ;;  %v1329_v33 = vadd.f32 %v1328_v8, %v1327_v2  ;;  %v1226_v34 = vadd.f32 %v1225_v10, %v1224_v30 }
 0x12a   : > { %v1657_v11 = vpack.c.bf16 %v1787_v47, %v1787_v47  ;;  %v964_v12 = vpop.f32.mrb[13].mxu0  ;;  %v1291_v27 = vmul.f32 %v1787_v47, %v1787_v47  ;;  %v1231_v43 = vsel %vm833_vm1, %v1787_v47, 0.0 }
 0x12b   : > { %v1655_v18 = vpack.c.bf16 %v964_v12, %v964_v12  ;;  %v1227_v4 = vsel %vm833_vm1, %v964_v12, 0.0  ;;  %v1289_v45 = vmul.f32 %v964_v12, %v964_v12  ;;  %v1788_v15 = vpop.f32.mrb[14].mxu0  ;;  %v1331_v51 = vadd.f32 %v1330_v17, %v1329_v33 }
 0x12c   : > { %1185 = vst.msk [vmem:[%s2015_s13 + $0x38] sm:$0xf] %vm792_vm2, %v1657_v11  ;;  %v1658_v16 = vpack.c.bf16 %v1788_v15, %v1788_v15  ;;  %v967_v20 = vpop.f32.mrb[15].mxu0  ;;  %v1228_v24 = vadd.f32 %v1227_v4, %v1226_v34  ;;  %v1292_v22 = vmul.f32 %v1788_v15, %v1788_v15  ;;  %v1336_v23 = vsel %vm833_vm1, %v1291_v27, 0.0 }
 0x12d   : > { %1183 = vst.msk [vmem:[%s2015_s13 + $0x30] sm:$0xf] %vm792_vm2, %v1655_v18  ;;  %v1332_v57 = vsel %vm833_vm1, %v1289_v45, 0.0  ;;  %v1656_v25 = vpack.c.bf16 %v967_v20, %v967_v20  ;;  %v1791_v31 = vpop.f32.mrb[0].mxu1  ;;  %v1229_v36 = vsel %vm833_vm1, %v967_v20, 0.0  ;;  %v1290_v37 = vmul.f32 %v967_v20, %v967_v20 }
 0x12e   : > { %v1333_v59 = vadd.f32 %v1332_v57, %v1331_v51  ;;  %1186 = vst.msk [vmem:[%s2015_s13 + $0x3c] sm:$0xf] %vm792_vm2, %v1658_v16  ;;  %v1661_v40 = vpack.c.bf16 %v1791_v31, %v1791_v31  ;;  %v980_v60 = vpop.f32.mrb[1].mxu1  ;;  %v1230_v46 = vadd.f32 %v1229_v36, %v1228_v24  ;;  %v1233_v7 = vsel %vm833_vm1, %v1788_v15, 0.0 }
 0x12f   : > { %1184 = vst.msk [vmem:[%s2015_s13 + $0x34] sm:$0xf] %vm792_vm2, %v1656_v25  ;;  %v1792_v49 = vpop.f32.mrb[2].mxu1  ;;  %v1334_v62 = vsel %vm833_vm1, %v1290_v37, 0.0  ;;  %v1659_v61 = vpack.c.bf16 %v980_v60, %v980_v60  ;;  %v1293_v3 = vmul.f32 %v980_v60, %v980_v60  ;;  %v1235_v26 = vsel %vm833_vm1, %v980_v60, 0.0 }
 0x130   : > { %1189 = vst.msk [vmem:[%s2015_s13 + $0x48] sm:$0xf] %vm792_vm2, %v1661_v40  ;;  %v983_v54 = vpop.f32.mrb[3].mxu1  ;;  %v1232_v55 = vadd.f32 %v1231_v43, %v1230_v46  ;;  %v1335_v41 = vadd.f32 %v1334_v62, %v1333_v59  ;;  %v1662_v19 = vpack.c.bf16 %v1792_v49, %v1792_v49  ;;  %v1338_v56 = vsel %vm833_vm1, %v1292_v22, 0.0 }
 0x131   : > { %1187 = vst.msk [vmem:[%s2015_s13 + $0x40] sm:$0xf] %vm792_vm2, %v1659_v61  ;;  %v1660_v32 = vpack.c.bf16 %v983_v54, %v983_v54  ;;  %v1340_v9 = vsel %vm833_vm1, %v1293_v3, 0.0  ;;  %v1294_v14 = vmul.f32 %v983_v54, %v983_v54  ;;  %v1295_v28 = vmul.f32 %v1791_v31, %v1791_v31 }
 0x132   : > { %v1337_v52 = vadd.f32 %v1336_v23, %v1335_v41  ;;  %v1234_v48 = vadd.f32 %v1233_v7, %v1232_v55  ;;  %1190 = vst.msk [vmem:[%s2015_s13 + $0x4c] sm:$0xf] %vm792_vm2, %v1662_v19  ;;  %v1237_v0 = vsel %vm833_vm1, %v983_v54, 0.0  ;;  %v1239_v38 = vsel %vm833_vm1, %v1791_v31, 0.0 }
 0x133   : > { %1188 = vst.msk [vmem:[%s2015_s13 + $0x44] sm:$0xf] %vm792_vm2, %v1660_v32  ;;  %v1296_v53 = vmul.f32 %v1792_v49, %v1792_v49  ;;  %v1342_v29 = vsel %vm833_vm1, %v1294_v14, 0.0  ;;  %v1344_v47 = vsel %vm833_vm1, %v1295_v28, 0.0  ;;  %v1241_v10 = vsel %vm833_vm1, %v1792_v49, 0.0 }
 0x134   : > { %v1236_v58 = vadd.f32 %v1235_v26, %v1234_v48  ;;  %v1339_v13 = vadd.f32 %v1338_v56, %v1337_v52 }
 0x135   : > { %v1795_v63 = vpop.f32.mrb[4].mxu1  ;;  %v1346_v12 = vsel %vm833_vm1, %v1296_v53, 0.0 }
 0x136   : > { %v1665_v21 = vpack.c.bf16 %v1795_v63, %v1795_v63  ;;  %v996_v44 = vpop.f32.mrb[5].mxu1  ;;  %v1341_v50 = vadd.f32 %v1340_v9, %v1339_v13  ;;  %v1238_v39 = vadd.f32 %v1237_v0, %v1236_v58  ;;  %v1299_v15 = vmul.f32 %v1795_v63, %v1795_v63 }
 0x137   : > { %v1663_v35 = vpack.c.bf16 %v996_v44, %v996_v44  ;;  %v1796_v1 = vpop.f32.mrb[6].mxu1  ;;  %v1297_v42 = vmul.f32 %v996_v44, %v996_v44  ;;  %v1243_v17 = vsel %vm833_vm1, %v996_v44, 0.0  ;;  %v1247_v24 = vsel %vm833_vm1, %v1795_v63, 0.0 }
 0x138   : > { %1193 = vst.msk [vmem:[%s2015_s13 + $0x58] sm:$0xf] %vm792_vm2, %v1665_v21  ;;  %v1666_v5 = vpack.c.bf16 %v1796_v1, %v1796_v1  ;;  %v999_v6 = vpop.f32.mrb[7].mxu1  ;;  %v1240_v30 = vadd.f32 %v1239_v38, %v1238_v39  ;;  %v1343_v2 = vadd.f32 %v1342_v29, %v1341_v50  ;;  %v1300_v20 = vmul.f32 %v1796_v1, %v1796_v1 }
 0x139   : > { %1191 = vst.msk [vmem:[%s2015_s13 + $0x50] sm:$0xf] %vm792_vm2, %v1663_v35  ;;  %v1664_v8 = vpack.c.bf16 %v999_v6, %v999_v6  ;;  %v1348_v18 = vsel %vm833_vm1, %v1297_v42, 0.0  ;;  %v1298_v34 = vmul.f32 %v999_v6, %v999_v6  ;;  %v1245_v51 = vsel %vm833_vm1, %v999_v6, 0.0 }
 0x13a   : > { %1194 = vst.msk [vmem:[%s2015_s13 + $0x5c] sm:$0xf] %vm792_vm2, %v1666_v5  ;;  %v1345_v33 = vadd.f32 %v1344_v47, %v1343_v2  ;;  %v1242_v11 = vadd.f32 %v1241_v10, %v1240_v30  ;;  %v1352_v59 = vsel %vm833_vm1, %v1299_v15, 0.0  ;;  %v1249_v37 = vsel %vm833_vm1, %v1796_v1, 0.0 }
 0x13b   : > { %1192 = vst.msk [vmem:[%s2015_s13 + $0x54] sm:$0xf] %vm792_vm2, %v1664_v8  ;;  %v1350_v57 = vsel %vm833_vm1, %v1298_v34, 0.0  ;;  %v1354_v40 = vsel %vm833_vm1, %v1300_v20, 0.0 }
 0x13c   : > { %v1244_v4 = vadd.f32 %v1243_v17, %v1242_v11  ;;  %v1347_v45 = vadd.f32 %v1346_v12, %v1345_v33 }
 0x13e   : > { %v1349_v16 = vadd.f32 %v1348_v18, %v1347_v45  ;;  %v1246_v27 = vadd.f32 %v1245_v51, %v1244_v4 }
 0x140   : > { %v1248_v25 = vadd.f32 %v1247_v24, %v1246_v27  ;;  %v1351_v31 = vadd.f32 %v1350_v57, %v1349_v16 }
 0x142   : > { %v1799_v36 = vpop.f32.mrb[8].mxu1  ;;  %v1353_v60 = vadd.f32 %v1352_v59, %v1351_v31  ;;  %v1250_v22 = vadd.f32 %v1249_v37, %v1248_v25 }
 0x143   : > { %v1669_v43 = vpack.c.bf16 %v1799_v36, %v1799_v36  ;;  %v1012_v46 = vpop.f32.mrb[9].mxu1  ;;  %v1303_v26 = vmul.f32 %v1799_v36, %v1799_v36  ;;  %v1255_v9 = vsel %vm833_vm1, %v1799_v36, 0.0 }
 0x144   : > { %v1667_v49 = vpack.c.bf16 %v1012_v46, %v1012_v46  ;;  %v1251_v62 = vsel %vm833_vm1, %v1012_v46, 0.0  ;;  %v1301_v61 = vmul.f32 %v1012_v46, %v1012_v46  ;;  %v1800_v3 = vpop.f32.mrb[10].mxu1  ;;  %v1355_v54 = vadd.f32 %v1354_v40, %v1353_v60 }
 0x145   : > { %1197 = vst.msk [vmem:[%s2015_s13 + $0x68] sm:$0xf] %vm792_vm2, %v1669_v43  ;;  %v1670_v55 = vpack.c.bf16 %v1800_v3, %v1800_v3  ;;  %v1015_v41 = vpop.f32.mrb[11].mxu1  ;;  %v1252_v19 = vadd.f32 %v1251_v62, %v1250_v22  ;;  %v1304_v14 = vmul.f32 %v1800_v3, %v1800_v3  ;;  %v1360_v0 = vsel %vm833_vm1, %v1303_v26, 0.0 }
 0x146   : > { %1195 = vst.msk [vmem:[%s2015_s13 + $0x60] sm:$0xf] %vm792_vm2, %v1667_v49  ;;  %v1356_v23 = vsel %vm833_vm1, %v1301_v61, 0.0  ;;  %v1668_v7 = vpack.c.bf16 %v1015_v41, %v1015_v41  ;;  %v1253_v52 = vsel %vm833_vm1, %v1015_v41, 0.0  ;;  %v1302_v48 = vmul.f32 %v1015_v41, %v1015_v41  ;;  %v1203_v49 = vld [vmem:[%s2515_s6] sm:$0x1] }
 0x147   : > { %v1357_v32 = vadd.f32 %v1356_v23, %v1355_v54  ;;  %1198 = vst.msk [vmem:[%s2015_s13 + $0x6c] sm:$0xf] %vm792_vm2, %v1670_v55  ;;  %v1254_v56 = vadd.f32 %v1253_v52, %v1252_v19  ;;  %v1257_v21 = vsel %vm833_vm1, %v1800_v3, 0.0  ;;  %v1362_v29 = vsel %vm833_vm1, %v1304_v14, 0.0  ;;  %v1276_v61 = vld [vmem:[%s2516_s7] sm:$0x1] }
 0x148   : > { %1196 = vst.msk [vmem:[%s2015_s13 + $0x64] sm:$0xf] %vm792_vm2, %v1668_v7  ;;  %v1358_v58 = vsel %vm833_vm1, %v1302_v48, 0.0 }
 0x149   : > { %v1256_v13 = vadd.f32 %v1255_v9, %v1254_v56  ;;  %v1359_v63 = vadd.f32 %v1358_v58, %v1357_v32 }
 0x14a   : > { %v1803_v28 = vpop.f32.mrb[12].mxu1 }
 0x14b   : > { %v1673_v44 = vpack.c.bf16 %v1803_v28, %v1803_v28  ;;  %v1028_v38 = vpop.f32.mrb[13].mxu1  ;;  %v1361_v50 = vadd.f32 %v1360_v0, %v1359_v63  ;;  %v1258_v35 = vadd.f32 %v1257_v21, %v1256_v13  ;;  %v1307_v47 = vmul.f32 %v1803_v28, %v1803_v28 }
 0x14c   : > { %v1671_v39 = vpack.c.bf16 %v1028_v38, %v1028_v38  ;;  %v1259_v1 = vsel %vm833_vm1, %v1028_v38, 0.0  ;;  %v1804_v53 = vpop.f32.mrb[14].mxu1  ;;  %v1305_v42 = vmul.f32 %v1028_v38, %v1028_v38  ;;  %v1263_v18 = vsel %vm833_vm1, %v1803_v28, 0.0 }
 0x14d   : > { %1201 = vst.msk [vmem:[%s2015_s13 + $0x78] sm:$0xf] %vm792_vm2, %v1673_v44  ;;  %v1674_v5 = vpack.c.bf16 %v1804_v53, %v1804_v53  ;;  %v1031_v6 = vpop.f32.mrb[15].mxu1  ;;  %v1260_v30 = vadd.f32 %v1259_v1, %v1258_v35  ;;  %v1363_v2 = vadd.f32 %v1362_v29, %v1361_v50  ;;  %v1308_v34 = vmul.f32 %v1804_v53, %v1804_v53 }
 0x14e   : > { %1199 = vst.msk [vmem:[%s2015_s13 + $0x70] sm:$0xf] %vm792_vm2, %v1671_v39  ;;  %v1672_v8 = vpack.c.bf16 %v1031_v6, %v1031_v6  ;;  %v1364_v10 = vsel %vm833_vm1, %v1305_v42, 0.0  ;;  %v1261_v17 = vsel %vm833_vm1, %v1031_v6, 0.0  ;;  %v1306_v33 = vmul.f32 %v1031_v6, %v1031_v6 }
 0x14f   : > { %1202 = vst.msk [vmem:[%s2015_s13 + $0x7c] sm:$0xf] %vm792_vm2, %v1674_v5  ;;  %v1365_v11 = vadd.f32 %v1364_v10, %v1363_v2  ;;  %v1262_v12 = vadd.f32 %v1261_v17, %v1260_v30  ;;  %v1368_v51 = vsel %vm833_vm1, %v1307_v47, 0.0  ;;  %v1265_v16 = vsel %vm833_vm1, %v1804_v53, 0.0 }
 0x150   : > { %1200 = vst.msk [vmem:[%s2015_s13 + $0x74] sm:$0xf] %vm792_vm2, %v1672_v8  ;;  %v1366_v4 = vsel %vm833_vm1, %v1306_v33, 0.0  ;;  %v1370_v24 = vsel %vm833_vm1, %v1308_v34, 0.0 }
 0x151   : > { %v1264_v45 = vadd.f32 %v1263_v18, %v1262_v12  ;;  %v1367_v15 = vadd.f32 %v1366_v4, %v1365_v11 }
 0x153   : > { %v1266_v20 = vadd.f32 %v1265_v16, %v1264_v45  ;;  %v1369_v27 = vadd.f32 %v1368_v51, %v1367_v15 }
 0x155   : > { %v1267_v57 = vrot.slane %v1266_v20, 4  ;;  %v1371_v25 = vadd.f32 %v1370_v24, %v1369_v27 }
 0x157   : > { %v1268_v31 = vadd.f32 %v1267_v57, %v1266_v20  ;;  %v1372_v59 = vrot.slane %v1371_v25, 4 }
 0x159   : > { %v1269_v36 = vrot.slane %v1268_v31, 2  ;;  %v1373_v37 = vadd.f32 %v1372_v59, %v1371_v25 }
 0x15b   : > { %v1270_v40 = vadd.f32 %v1269_v36, %v1268_v31  ;;  %v1374_v60 = vrot.slane %v1373_v37, 2 }
 0x15d   : > { %v1271_v43 = vrot.slane %v1270_v40, 1  ;;  %v1375_v46 = vadd.f32 %v1374_v60, %v1373_v37 }
 0x15f   : > { %v1272_v22 = vadd.f32 %v1271_v43, %v1270_v40  ;;  %v1376_v62 = vrot.slane %v1375_v46, 1 }
 0x161   : > { %v1273_v3 = vadd.f32 %v1272_v22, %v1203_v49  ;;  %v1377_v54 = vadd.f32 %v1376_v62, %v1375_v46 }
 0x163   : > { %1275 = vst.msk [vmem:[%s2515_s6] sm:$0x1] %vm1274_vm3, %v1273_v3  ;;  %v1378_v55 = vadd.f32 %v1377_v54, %v1276_v61 }
 0x165   : > { %1379 = vst.msk [vmem:[%s2516_s7] sm:$0x1] %vm1274_vm3, %v1378_v55 }
 0x166 PF: > { %s18_s24 = sadd.s32 1, %s1951_s24  }
 0x167   : > { %p15_p5 = scmp.ge.s32.totalorder %s18_s24, 4  }
 0x169   :  { %17 = sbr.rel (!%p15_p5) target bundleno = 1 (0x1), region = 98 }

// kernel: bottleneck_csp_forward.9
= control target key start
LH: loop header
LB: loop body
LE: loop exit
PB: predicated region body
PF: predicated region fallthrough
CT: control target
= control target key end

     0   :  { %s1948_s24 = smov 0   ;;  %s2441_s0 = inlined_call_operand.vmem [shape: bf16[512,16], index: 0, kind: input, shape index: {}]   ;;  %s2442_s1 = inlined_call_operand.vmem [shape: f32[1,16], index: 1, kind: input, shape index: {}]   ;;  %s2443_s2 = inlined_call_operand.vmem [shape: f32[1,16], index: 2, kind: input, shape index: {}]   ;;  %s2444_s3 = inlined_call_operand.vmem [shape: bf16[512,16], index: 3, kind: input, shape index: {}]   ;;  %s2445_s4 = inlined_call_operand.vmem [shape: bf16[16,16], index: 4, kind: input, shape index: {}]   ;;  %s2446_s5 = inlined_call_operand.vmem [shape: bf16[512,16], index: 5, kind: output, shape index: {0}]   ;;  %s2447_s6 = inlined_call_operand.vmem [shape: f32[1,16], index: 6, kind: output, shape index: {1}]   ;;  %s2448_s7 = inlined_call_operand.vmem [shape: f32[1,16], index: 7, kind: output, shape index: {2}]  }
   0x1 LB: > { %s1421_s25 = sadd.s32 4294967295, %s1905_s24   ;;  %p1425_p0 = scmp.ge.s32.totalorder %s1905_s24, 1  ;;  %s1905_s24 = sphi %s1948_s24, %s18_s24  }
   0x2   : > { %p244_p1 = scmp.lt.s32.totalorder %s1905_s24, 3 }
   0x4   : > { %p245_p2 = pnand %p1425_p0, %p244_p1 }
   0x5   : > { %s1426_s26 = sshll.u32 (!%p245_p2), %s1421_s25, 5  ;;  %p1432_p4 = scmp.ne.s32.totalorder (!%p245_p2), %s1421_s25, 0 }
   0x6   : > { %248 = sbr.rel (%p245_p2) target bundleno = 369 (0x171), region = 40  ;;  %p282_p3 = scmp.lt.s32.totalorder (!%p245_p2), %s1426_s26, 63 }
   0xd   : > { %s2450_s26 = smov (!%p282_p3, %s1426_s26), 63  ;;  %303 = sbr.rel (%p1432_p4) target bundleno = 20 (0x14), region = 44 }
   0xe   : > { %s1427_s27 = sshll.u32 %s2450_s26, 2  ;;  %vm304_vm0 = vcmask (!%p1432_p4), 122880   ;;  %v1907_v0 = vmov (!%p1432_p4), 0.0  }
   0xf   : > { %s1959_s30 = scalar_lea.vmem %s2441_s0, %s1427_s27  ;;  %s1964_s10 = scalar_lea.vmem %s2444_s3, %s1427_s27  ;;  %305 = vst.msk [vmem:[%s2447_s6] sm:$0x1] (!%p1432_p4), %vm304_vm0, %v1907_v0  ;;  %306 = vst.msk [vmem:[%s2448_s7] sm:$0x1] (!%p1432_p4), %vm304_vm0, %v1907_v0 }
  0x10   : > { %s1969_s13 = scalar_lea.vmem %s2446_s5, %s1427_s27 }
  0x14 PF: > { %v1770_v1 = vld [vmem:[%s2445_s4] sm:$0xff]   ;;  %v1678_v6 = vld [vmem:[%s1959_s30 + $0x8] sm:$0xff]   ;;  %v1679_v10 = vld [vmem:[%s1959_s30 + $0x10] sm:$0xff]   ;;  %vm793_vm1 = vcmask 130048   ;;  %vm1131_vm2 = vcmask 125952   ;;  %vm1235_vm3 = vcmask 122880  }
  0x15   : > { %v1551_v2 = vld [vmem:[%s1959_s30] sm:$0xff]   ;;  %1725 = vmatprep.subr.bf16.mxu0 %v1770_v1  ;;  %1759 = vmatprep.subr.bf16.mxu1 %v1770_v1  ;;  %v1556_v8 = vunpack.c.l.bf16 %v1678_v6  ;;  %v1557_v9 = vunpack.c.h.bf16 %v1678_v6  ;;  %v1560_v15 = vunpack.c.l.bf16 %v1679_v10  ;;  %v1561_v16 = vunpack.c.h.bf16 %v1679_v10  ;;  %v1680_v17 = vld [vmem:[%s1959_s30 + $0x18] sm:$0xff]   ;;  %v1682_v41 = vld [vmem:[%s1959_s30 + $0x28] sm:$0xff]  }
  0x16   : > { %v1984_v3 = vld [vmem:[%s2442_s1] ss:$0 sm:$0xff]  ;;  %v1552_v4 = vunpack.c.l.bf16 %v1551_v2  ;;  %v1553_v5 = vunpack.c.h.bf16 %v1551_v2  ;;  %1726 = vmatpush3.bf16.msra.mxu0 %v1770_v1  ;;  %1760 = vmatpush3.bf16.msra.mxu1 %v1770_v1  ;;  %v1564_v26 = vunpack.c.l.bf16 %v1680_v17  ;;  %v1565_v27 = vunpack.c.h.bf16 %v1680_v17  ;;  %v2040_v44 = vld [vmem:[%s1964_s10 + $0x8] sm:$0xff]   ;;  %v2043_v46 = vld [vmem:[%s1964_s10 + $0x10] sm:$0xff]  }
  0x17   : > { %v1990_v7 = vld [vmem:[%s2443_s2] ss:$0 sm:$0xff]  ;;  %v380_v13 = vmul.f32 %v1556_v8, %v1984_v3  ;;  %v381_v14 = vmul.f32 %v1557_v9, %v1984_v3  ;;  %v382_v22 = vmul.f32 %v1560_v15, %v1984_v3  ;;  %v383_v23 = vmul.f32 %v1561_v16, %v1984_v3  ;;  %v1683_v53 = vld [vmem:[%s1959_s30 + $0x30] sm:$0xff]   ;;  %v2053_v56 = vld [vmem:[%s1964_s10 + $0x18] sm:$0xff]  }
  0x18   : > { %v378_v11 = vmul.f32 %v1552_v4, %v1984_v3  ;;  %v379_v12 = vmul.f32 %v1553_v5, %v1984_v3  ;;  %v1681_v32 = vld [vmem:[%s1959_s30 + $0x20] sm:$0xff]   ;;  %v384_v34 = vmul.f32 %v1564_v26, %v1984_v3  ;;  %v385_v35 = vmul.f32 %v1565_v27, %v1984_v3  ;;  %v1684_v61 = vld [vmem:[%s1959_s30 + $0x38] sm:$0xff]  }
  0x19   : > { %v2005_v20 = vadd.f32 %v1990_v7, %v380_v13  ;;  %v2008_v21 = vadd.f32 %v1990_v7, %v381_v14  ;;  %v2017_v30 = vadd.f32 %v1990_v7, %v382_v22  ;;  %v2020_v31 = vadd.f32 %v1990_v7, %v383_v23  ;;  %v2024_v33 = vld [vmem:[%s1964_s10] sm:$0xff]  }
  0x1a   : > { %v1999_v18 = vadd.f32 %v1990_v7, %v378_v11  ;;  %v2002_v19 = vadd.f32 %v1990_v7, %v379_v12  ;;  %v2031_v38 = vadd.f32 %v1990_v7, %v384_v34  ;;  %v2034_v39 = vadd.f32 %v1990_v7, %v385_v35  ;;  %v2066_v63 = vld [vmem:[%s1964_s10 + $0x20] sm:$0xff]   ;;  %v2077_v11 = vld [vmem:[%s1964_s10 + $0x28] sm:$0xff]  }
  0x1b   : > { %v1437_v28 = vmul.f32 -1.442695, %v2005_v20  ;;  %v1438_v29 = vmul.f32 -1.442695, %v2008_v21  ;;  %v1439_v36 = vmul.f32 -1.442695, %v2017_v30  ;;  %v1568_v40 = vunpack.c.l.bf16 %v1681_v32 }
  0x1c   : > { %v1435_v24 = vmul.f32 -1.442695, %v1999_v18  ;;  %v1436_v25 = vmul.f32 -1.442695, %v2002_v19  ;;  %v1440_v37 = vmul.f32 -1.442695, %v2020_v31  ;;  %v1616_v42 = vunpack.c.l.bf16 %v2024_v33 }
  0x1d   : > { %v1617_v43 = vunpack.c.h.bf16 %v2024_v33  ;;  %v1569_v45 = vunpack.c.h.bf16 %v1681_v32  ;;  %v1441_v47 = vmul.f32 -1.442695, %v2031_v38  ;;  %v1442_v48 = vmul.f32 -1.442695, %v2034_v39  ;;  %v1685_v34 = vld [vmem:[%s1959_s30 + $0x40] sm:$0xff]  }
  0x1e   : > { %1771 = vpow2.f32 %v1435_v24  ;;  %v386_v49 = vmul.f32 %v1568_v40, %v1984_v3  ;;  %v1572_v51 = vunpack.c.l.bf16 %v1682_v41  ;;  %v1573_v52 = vunpack.c.h.bf16 %v1682_v41 }
  0x1f   : > { %1773 = vpow2.f32 %v1436_v25  ;;  %v387_v50 = vmul.f32 %v1569_v45, %v1984_v3  ;;  %v1620_v54 = vunpack.c.l.bf16 %v2040_v44  ;;  %v1621_v55 = vunpack.c.h.bf16 %v2040_v44 }
  0x20   : > { %1775 = vpow2.f32 %v1437_v28  ;;  %v2056_v57 = vadd.f32 %v1990_v7, %v386_v49  ;;  %v1624_v58 = vunpack.c.l.bf16 %v2043_v46  ;;  %v388_v60 = vmul.f32 %v1572_v51, %v1984_v3 }
  0x21   : > { %1777 = vpow2.f32 %v1438_v29  ;;  %v2060_v59 = vadd.f32 %v1990_v7, %v387_v50  ;;  %v389_v0 = vmul.f32 %v1573_v52, %v1984_v3  ;;  %v1576_v1 = vunpack.c.l.bf16 %v1683_v53 }
  0x22   : > { %1779 = vpow2.f32 %v1439_v36  ;;  %v1443_v62 = vmul.f32 -1.442695, %v2056_v57  ;;  %v1577_v2 = vunpack.c.h.bf16 %v1683_v53  ;;  %v1625_v4 = vunpack.c.h.bf16 %v2043_v46 }
  0x23   : > { %1781 = vpow2.f32 %v1440_v37  ;;  %v1628_v5 = vunpack.c.l.bf16 %v2053_v56  ;;  %v1629_v6 = vunpack.c.h.bf16 %v2053_v56  ;;  %v1444_v8 = vmul.f32 -1.442695, %v2060_v59 }
  0x24   : > { %1783 = vpow2.f32 %v1441_v47  ;;  %v2074_v10 = vadd.f32 %v1990_v7, %v388_v60  ;;  %v390_v12 = vmul.f32 %v1576_v1, %v1984_v3  ;;  %v1580_v13 = vunpack.c.l.bf16 %v1684_v61 }
  0x25   : > { %1785 = vpow2.f32 %v1442_v48  ;;  %v1632_v16 = vunpack.c.l.bf16 %v2066_v63  ;;  %v391_v17 = vmul.f32 %v1577_v2, %v1984_v3  ;;  %v1633_v24 = vunpack.c.h.bf16 %v2066_v63 }
  0x26   : > { %1787 = vpow2.f32 %v1443_v62  ;;  %v2084_v25 = vadd.f32 %v1990_v7, %v389_v0  ;;  %v1581_v26 = vunpack.c.h.bf16 %v1684_v61  ;;  %v1636_v29 = vunpack.c.l.bf16 %v2077_v11  ;;  %v1686_v0 = vld [vmem:[%s1959_s30 + $0x48] sm:$0xff]  }
  0x27   : > { %1789 = vpow2.f32 %v1444_v8  ;;  %v392_v32 = vmul.f32 %v1580_v13, %v1984_v3  ;;  %v1445_v37 = vmul.f32 -1.442695, %v2074_v10  ;;  %v2091_v40 = vadd.f32 %v1990_v7, %v390_v12 }
  0x28   : > { %v1772_v9 = vpop.eup %1771  ;;  %v2094_v47 = vadd.f32 %v1990_v7, %v391_v17  ;;  %v393_v48 = vmul.f32 %v1581_v26, %v1984_v3  ;;  %v1446_v51 = vmul.f32 -1.442695, %v2084_v25  ;;  %v1584_v52 = vunpack.c.l.bf16 %v1685_v34 }
  0x29   : > { %v1774_v14 = vpop.eup %1773  ;;  %v545_v15 = vadd.f32 1.0, %v1772_v9  ;;  %v2099_v61 = vadd.f32 %v1990_v7, %v392_v32  ;;  %v1585_v2 = vunpack.c.h.bf16 %v1685_v34  ;;  %v1637_v9 = vunpack.c.h.bf16 %v2077_v11  ;;  %v1687_v32 = vld [vmem:[%s1959_s30 + $0x50] sm:$0xff]  }
  0x2a   : > { %v1776_v22 = vpop.eup %1775  ;;  %v546_v23 = vadd.f32 1.0, %v1774_v14  ;;  %v2102_v62 = vadd.f32 %v1990_v7, %v393_v48  ;;  %v394_v8 = vmul.f32 %v1584_v52, %v1984_v3  ;;  %v1447_v12 = vmul.f32 -1.442695, %v2091_v40  ;;  %v1691_v11 = vld [vmem:[%s1959_s30 + $0x70] sm:$0xff]  }
  0x2b   : > { %v1778_v27 = vpop.eup %1777  ;;  %1791 = vrcp.f32 %v545_v15  ;;  %v547_v28 = vadd.f32 1.0, %v1776_v22  ;;  %v1448_v13 = vmul.f32 -1.442695, %v2094_v47  ;;  %v395_v15 = vmul.f32 %v1585_v2, %v1984_v3 }
  0x2c   : > { %v1780_v35 = vpop.eup %1779  ;;  %1793 = vrcp.f32 %v546_v23  ;;  %v548_v36 = vadd.f32 1.0, %v1778_v27  ;;  %v2111_v17 = vadd.f32 %v1990_v7, %v394_v8  ;;  %v1588_v22 = vunpack.c.l.bf16 %v1686_v0 }
  0x2d   : > { %v1782_v41 = vpop.eup %1781  ;;  %1795 = vrcp.f32 %v547_v28  ;;  %v549_v45 = vadd.f32 1.0, %v1780_v35  ;;  %v1449_v27 = vmul.f32 -1.442695, %v2099_v61  ;;  %v1589_v28 = vunpack.c.h.bf16 %v1686_v0 }
  0x2e   : > { %v1784_v49 = vpop.eup %1783  ;;  %1797 = vrcp.f32 %v548_v36  ;;  %v550_v50 = vadd.f32 1.0, %v1782_v41  ;;  %v1450_v35 = vmul.f32 -1.442695, %v2102_v62  ;;  %v2117_v36 = vadd.f32 %v1990_v7, %v395_v15 }
  0x2f   : > { %v1786_v53 = vpop.eup %1785  ;;  %1799 = vrcp.f32 %v549_v45  ;;  %v551_v60 = vadd.f32 1.0, %v1784_v49  ;;  %v1451_v45 = vmul.f32 -1.442695, %v2111_v17  ;;  %v396_v48 = vmul.f32 %v1588_v22, %v1984_v3 }
  0x30   : > { %1801 = vrcp.f32 %v550_v50  ;;  %v552_v1 = vadd.f32 1.0, %v1786_v53  ;;  %v1788_v14 = vpop.eup %1787  ;;  %v397_v49 = vmul.f32 %v1589_v28, %v1984_v3  ;;  %v1452_v52 = vmul.f32 -1.442695, %v2117_v36 }
  0x31   : > { %1803 = vrcp.f32 %v551_v60  ;;  %v1790_v23 = vpop.eup %1789  ;;  %v553_v26 = vadd.f32 1.0, %v1788_v14  ;;  %v2126_v0 = vadd.f32 %v1990_v7, %v396_v48  ;;  %v1593_v14 = vunpack.c.h.bf16 %v1687_v32 }
  0x32   : > { %1805 = vrcp.f32 %v552_v1  ;;  %v554_v34 = vadd.f32 1.0, %v1790_v23  ;;  %v2129_v1 = vadd.f32 %v1990_v7, %v397_v49 }
  0x33   : > { %1807 = vpow2.f32 %v1445_v37 }
  0x34   : > { %1809 = vpow2.f32 %v1446_v51  ;;  %v1592_v51 = vunpack.c.l.bf16 %v1687_v32 }
  0x35   : > { %v1792_v41 = vpop.eup %1791  ;;  %1811 = vrcp.f32 %v553_v26 }
  0x36   : > { %v1794_v37 = vpop.eup %1793  ;;  %v641_v50 = vmul.f32 %v1792_v41, %v1999_v18  ;;  %1813 = vrcp.f32 %v554_v34  ;;  %v2159_v41 = vld [vmem:[%s1964_s10 + $0x38] sm:$0xff]  }
  0x37   : > { %v1796_v53 = vpop.eup %1795  ;;  %v642_v60 = vmul.f32 %v1794_v37, %v2002_v19  ;;  %1815 = vpow2.f32 %v1447_v12  ;;  %v1453_v12 = vmul.f32 -1.442695, %v2126_v0  ;;  %v1644_v56 = vunpack.c.l.bf16 %v2159_v41 }
  0x38   : > { %v1798_v2 = vpop.eup %1797  ;;  %v737_v8 = vadd.f32 %v1616_v42, %v641_v50  ;;  %v643_v18 = vmul.f32 %v1796_v53, %v2005_v20  ;;  %1817 = vpow2.f32 %v1448_v13  ;;  %v1454_v20 = vmul.f32 -1.442695, %v2129_v1 }
  0x39   : > { %v1800_v15 = vpop.eup %1799  ;;  %v738_v22 = vadd.f32 %v1617_v43, %v642_v60  ;;  %v644_v19 = vmul.f32 %v1798_v2, %v2008_v21  ;;  %1819 = vpow2.f32 %v1449_v27 }
  0x3a   : > { %v1802_v23 = vpop.eup %1801  ;;  %v739_v26 = vadd.f32 %v1620_v54, %v643_v18  ;;  %v645_v28 = vmul.f32 %v1800_v15, %v2017_v30  ;;  %1821 = vpow2.f32 %v1450_v35  ;;  %v398_v30 = vmul.f32 %v1592_v51, %v1984_v3  ;;  %v1688_v51 = vld [vmem:[%s1959_s30 + $0x58] sm:$0xff]  }
  0x3b   : > { %v1804_v42 = vpop.eup %1803  ;;  %v769_v13 = vpack.c.bf16 %v738_v22, %v737_v8  ;;  %v740_v33 = vadd.f32 %v1621_v55, %v644_v19  ;;  %v646_v21 = vmul.f32 %v1802_v23, %v2020_v31  ;;  %1823 = vpow2.f32 %v1451_v45  ;;  %v2154_v55 = vld [vmem:[%s1964_s10 + $0x30] sm:$0xff]  }
  0x3c   : > { %v1806_v43 = vpop.eup %1805  ;;  %v741_v27 = vadd.f32 %v1624_v58, %v645_v28  ;;  %v647_v54 = vmul.f32 %v1804_v42, %v2031_v38  ;;  %1825 = vpow2.f32 %v1452_v52  ;;  %v399_v45 = vmul.f32 %v1593_v14, %v1984_v3 }
  0x3d   : > { %v1808_v32 = vpop.eup %1807  ;;  %1727 = vmatprep.mubr.msk.bf16.mxu0 %vm793_vm1, %v769_v13  ;;  %v770_v34 = vpack.c.bf16 %v740_v33, %v739_v26  ;;  %v742_v44 = vadd.f32 %v1625_v4, %v646_v21  ;;  %v648_v31 = vmul.f32 %v1806_v43, %v2034_v39  ;;  %1827 = vpow2.f32 %v1453_v12 }
  0x3e   : > { %v1810_v35 = vpop.eup %1809  ;;  %v743_v58 = vadd.f32 %v1628_v5, %v647_v54  ;;  %v555_v38 = vadd.f32 1.0, %v1808_v32  ;;  %1829 = vpow2.f32 %v1454_v20  ;;  %v2166_v49 = vadd.f32 %v1990_v7, %v398_v30  ;;  %v1689_v20 = vld [vmem:[%s1959_s30 + $0x60] sm:$0xff]  }
  0x3f   : > { %v1812_v48 = vpop.eup %1811  ;;  %1728 = vmatmul.mubr.msk.bf16.vlgmr.msra.gmra.mrb[0].mxu0 %vm793_vm1, %v770_v34  ;;  %v771_v46 = vpack.c.bf16 %v742_v44, %v741_v27  ;;  %v744_v39 = vadd.f32 %v1629_v6, %v648_v31  ;;  %v556_v4 = vadd.f32 1.0, %v1810_v35  ;;  %v1640_v50 = vunpack.c.l.bf16 %v2154_v55  ;;  %v2190_v30 = vld [vmem:[%s1964_s10 + $0x40] sm:$0xff]  }
  0x40   : > { %v1814_v37 = vpop.eup %1813  ;;  %v649_v5 = vmul.f32 %v1812_v48, %v2056_v57  ;;  %1831 = vrcp.f32 %v555_v38  ;;  %v1641_v52 = vunpack.c.h.bf16 %v2154_v55  ;;  %v1455_v6 = vmul.f32 -1.442695, %v2166_v49 }
  0x41   : > { %v1816_v53 = vpop.eup %1815  ;;  %1731 = vmatprep.mubr.msk.bf16.mxu0 %vm793_vm1, %v771_v46  ;;  %v650_v60 = vmul.f32 %v1814_v37, %v2060_v59  ;;  %1833 = vrcp.f32 %v556_v4  ;;  %v772_v8 = vpack.c.bf16 %v744_v39, %v743_v58  ;;  %v2179_v14 = vadd.f32 %v1990_v7, %v399_v45  ;;  %v1690_v46 = vld [vmem:[%s1959_s30 + $0x68] sm:$0xff]  }
  0x42   : > { %v1818_v2 = vpop.eup %1817  ;;  %v745_v57 = vadd.f32 %v1632_v16, %v649_v5  ;;  %v557_v18 = vadd.f32 1.0, %v1816_v53  ;;  %1835 = vpow2.f32 %v1455_v6  ;;  %v1596_v19 = vunpack.c.l.bf16 %v1688_v51 }
  0x43   : > { %v1820_v15 = vpop.eup %1819  ;;  %v746_v22 = vadd.f32 %v1633_v24, %v650_v60  ;;  %v558_v59 = vadd.f32 1.0, %v1818_v2  ;;  %v1645_v26 = vunpack.c.h.bf16 %v2159_v41  ;;  %v1597_v28 = vunpack.c.h.bf16 %v1688_v51 }
  0x44   : > { %v1822_v12 = vpop.eup %1821  ;;  %1837 = vrcp.f32 %v557_v18  ;;  %v559_v23 = vadd.f32 1.0, %v1820_v15  ;;  %v400_v33 = vmul.f32 %v1596_v19, %v1984_v3  ;;  %v1456_v24 = vmul.f32 -1.442695, %v2179_v14 }
  0x45   : > { %v1824_v16 = vpop.eup %1823  ;;  %v773_v42 = vpack.c.bf16 %v746_v22, %v745_v57  ;;  %1839 = vrcp.f32 %v558_v59  ;;  %v560_v13 = vadd.f32 1.0, %v1822_v12  ;;  %v401_v43 = vmul.f32 %v1597_v28, %v1984_v3  ;;  %v1701_v22 = vld [vmem:[%s1964_s10 + $0x48] sm:$0xff]  }
  0x46   : > { %v1826_v21 = vpop.eup %1825  ;;  %1841 = vrcp.f32 %v559_v23  ;;  %v561_v63 = vadd.f32 1.0, %v1824_v16  ;;  %v2193_v32 = vadd.f32 %v1990_v7, %v400_v33  ;;  %v1600_v34 = vunpack.c.l.bf16 %v1689_v20 }
  0x47   : > { %v1828_v27 = vpop.eup %1827  ;;  %1732 = vmatmul.mubr.msk.bf16.gmra.mrb[4].mxu0 %vm793_vm1, %v772_v8  ;;  %1843 = vrcp.f32 %v560_v13  ;;  %v562_v54 = vadd.f32 1.0, %v1826_v21  ;;  %v2197_v35 = vadd.f32 %v1990_v7, %v401_v43  ;;  %v1601_v58 = vunpack.c.h.bf16 %v1689_v20 }
  0x48   : > { %v1830_v44 = vpop.eup %1829  ;;  %1735 = vmatprep.mubr.msk.bf16.mxu0 %vm793_vm1, %v773_v42  ;;  %1845 = vrcp.f32 %v561_v63  ;;  %v563_v31 = vadd.f32 1.0, %v1828_v27  ;;  %v1457_v45 = vmul.f32 -1.442695, %v2193_v32  ;;  %v402_v48 = vmul.f32 %v1600_v34, %v1984_v3 }
  0x49   : > { %1847 = vrcp.f32 %v562_v54  ;;  %v564_v38 = vadd.f32 1.0, %v1830_v44  ;;  %v1648_v4 = vunpack.c.l.bf16 %v2190_v30  ;;  %v1458_v37 = vmul.f32 -1.442695, %v2197_v35 }
  0x4a   : > { %v1832_v39 = vpop.eup %1831  ;;  %1849 = vrcp.f32 %v563_v31  ;;  %v403_v5 = vmul.f32 %v1601_v58, %v1984_v3  ;;  %v1649_v60 = vunpack.c.h.bf16 %v2190_v30  ;;  %v2208_v6 = vadd.f32 %v1990_v7, %v402_v48 }
  0x4b   : > { %v1834_v51 = vpop.eup %1833  ;;  %v651_v53 = vmul.f32 %v1832_v39, %v2074_v10  ;;  %1851 = vrcp.f32 %v564_v38  ;;  %v1604_v57 = vunpack.c.l.bf16 %v1690_v46  ;;  %v1605_v59 = vunpack.c.h.bf16 %v1690_v46 }
  0x4c   : > { %v652_v2 = vmul.f32 %v1834_v51, %v2084_v25  ;;  %1853 = vpow2.f32 %v1456_v24  ;;  %v2212_v8 = vadd.f32 %v1990_v7, %v403_v5  ;;  %v1836_v18 = vpop.eup %1835  ;;  %v1459_v10 = vmul.f32 -1.442695, %v2208_v6 }
  0x4d   : > { %v747_v15 = vadd.f32 %v1636_v29, %v651_v53  ;;  %1855 = vpow2.f32 %v1457_v45  ;;  %v565_v25 = vadd.f32 1.0, %v1836_v18  ;;  %v404_v29 = vmul.f32 %v1604_v57, %v1984_v3 }
  0x4e   : > { %v1838_v19 = vpop.eup %1837  ;;  %v748_v12 = vadd.f32 %v1637_v9, %v652_v2  ;;  %1857 = vpow2.f32 %v1458_v37  ;;  %v1460_v23 = vmul.f32 -1.442695, %v2212_v8  ;;  %v405_v16 = vmul.f32 %v1605_v59, %v1984_v3 }
  0x4f   : > { %v1840_v28 = vpop.eup %1839  ;;  %v653_v20 = vmul.f32 %v1838_v19, %v2091_v40  ;;  %1859 = vpow2.f32 %v1459_v10  ;;  %v1652_v21 = vunpack.c.l.bf16 %v1701_v22  ;;  %v1653_v63 = vunpack.c.h.bf16 %v1701_v22  ;;  %v1692_v22 = vld [vmem:[%s1959_s30 + $0x78] sm:$0xff]  }
  0x50   : > { %v1842_v42 = vpop.eup %1841  ;;  %v774_v13 = vpack.c.bf16 %v748_v12, %v747_v15  ;;  %v654_v33 = vmul.f32 %v1840_v28, %v2094_v47  ;;  %1861 = vpow2.f32 %v1460_v23  ;;  %v2230_v40 = vadd.f32 %v1990_v7, %v404_v29  ;;  %v1702_v28 = vld [vmem:[%s1964_s10 + $0x50] sm:$0xff]  }
  0x51   : > { %v1844_v9 = vpop.eup %1843  ;;  %v749_v24 = vadd.f32 %v1640_v50, %v653_v20  ;;  %v655_v43 = vmul.f32 %v1842_v42, %v2099_v61  ;;  %1863 = vrcp.f32 %v565_v25  ;;  %v2237_v30 = vadd.f32 %v1990_v7, %v405_v16 }
  0x52   : > { %v1846_v27 = vpop.eup %1845  ;;  %1736 = vmatmul.mubr.msk.bf16.gmra.mrb[8].mxu0 %vm793_vm1, %v774_v13  ;;  %v750_v54 = vadd.f32 %v1641_v52, %v654_v33  ;;  %v656_v47 = vmul.f32 %v1844_v9, %v2102_v62  ;;  %v1461_v44 = vmul.f32 -1.442695, %v2230_v40  ;;  %v1608_v31 = vunpack.c.l.bf16 %v1691_v11  ;;  %v1703_v9 = vld [vmem:[%s1964_s10 + $0x58] sm:$0xff]  }
  0x53   : > { %v1848_v34 = vpop.eup %1847  ;;  %v751_v61 = vadd.f32 %v1644_v56, %v655_v43  ;;  %v657_v50 = vmul.f32 %v1846_v27, %v2111_v17  ;;  %v1462_v52 = vmul.f32 -1.442695, %v2237_v30  ;;  %v1609_v56 = vunpack.c.h.bf16 %v1691_v11 }
  0x54   : > { %v1850_v58 = vpop.eup %1849  ;;  %v775_v38 = vpack.c.bf16 %v750_v54, %v749_v24  ;;  %v752_v55 = vadd.f32 %v1645_v26, %v656_v47  ;;  %v658_v62 = vmul.f32 %v1848_v34, %v2117_v36  ;;  %1865 = vpow2.f32 %v1461_v44  ;;  %v1704_v34 = vld [vmem:[%s1964_s10 + $0x60] sm:$0xff]  }
  0x55   : > { %v1852_v45 = vpop.eup %1851  ;;  %v753_v48 = vadd.f32 %v1648_v4, %v657_v50  ;;  %v659_v46 = vmul.f32 %v1850_v58, %v2126_v0  ;;  %1867 = vpow2.f32 %v1462_v52  ;;  %v406_v51 = vmul.f32 %v1608_v31, %v1984_v3 }
  0x56   : > { %v1854_v39 = vpop.eup %1853  ;;  %1739 = vmatprep.mubr.msk.bf16.mxu0 %vm793_vm1, %v775_v38  ;;  %v776_v17 = vpack.c.bf16 %v752_v55, %v751_v61  ;;  %v754_v37 = vadd.f32 %v1649_v60, %v658_v62  ;;  %v660_v5 = vmul.f32 %v1852_v45, %v2129_v1  ;;  %v407_v4 = vmul.f32 %v1609_v56, %v1984_v3 }
  0x57   : > { %v1856_v41 = vpop.eup %1855  ;;  %v755_v26 = vadd.f32 %v1652_v21, %v659_v46  ;;  %v566_v36 = vadd.f32 1.0, %v1854_v39  ;;  %v2253_v60 = vadd.f32 %v1990_v7, %v406_v51  ;;  %v1612_v29 = vunpack.c.l.bf16 %v1692_v22 }
  0x58   : > { %v1858_v53 = vpop.eup %1857  ;;  %v777_v0 = vpack.c.bf16 %v754_v37, %v753_v48  ;;  %v756_v2 = vadd.f32 %v1653_v63, %v660_v5  ;;  %v567_v57 = vadd.f32 1.0, %v1856_v41  ;;  %v2256_v1 = vadd.f32 %v1990_v7, %v407_v4  ;;  %v1705_v41 = vld [vmem:[%s1964_s10 + $0x68] sm:$0xff]  }
  0x59   : > { %v1860_v18 = vpop.eup %1859  ;;  %1869 = vrcp.f32 %v566_v36  ;;  %v568_v15 = vadd.f32 1.0, %v1858_v53  ;;  %v1463_v12 = vmul.f32 -1.442695, %v2253_v60  ;;  %v1613_v16 = vunpack.c.h.bf16 %v1692_v22 }
  0x5a   : > { %1740 = vmatmul.mubr.msk.bf16.gmra.mrb[12].mxu0 %vm793_vm1, %v776_v17  ;;  %1743 = vmatprep.mubr.msk.bf16.mxu1 %vm793_vm1, %v777_v0  ;;  %v778_v10 = vpack.c.bf16 %v756_v2, %v755_v26  ;;  %1871 = vrcp.f32 %v567_v57  ;;  %v569_v59 = vadd.f32 1.0, %v1860_v18  ;;  %v1862_v19 = vpop.eup %1861  ;;  %v1464_v25 = vmul.f32 -1.442695, %v2256_v1 }
  0x5b   : > { %1873 = vrcp.f32 %v568_v15  ;;  %v1864_v23 = vpop.eup %1863  ;;  %v570_v20 = vadd.f32 1.0, %v1862_v19  ;;  %v408_v42 = vmul.f32 %v1612_v29, %v1984_v3  ;;  %v409_v13 = vmul.f32 %v1613_v16, %v1984_v3 }
  0x5c   : > { %1744 = vmatmul.mubr.msk.bf16.vlgmr.msra.gmra.mrb[0].mxu1 %vm793_vm1, %v778_v10  ;;  %1875 = vrcp.f32 %v569_v59  ;;  %v1656_v21 = vunpack.c.l.bf16 %v1702_v28  ;;  %v661_v11 = vmul.f32 %v1864_v23, %v2166_v49  ;;  %v1657_v47 = vunpack.c.h.bf16 %v1702_v28 }
  0x5d   : > { %1877 = vpow2.f32 %v1463_v12  ;;  %v2270_v43 = vadd.f32 %v1990_v7, %v408_v42  ;;  %v2273_v27 = vadd.f32 %v1990_v7, %v409_v13  ;;  %v1660_v44 = vunpack.c.l.bf16 %v1703_v9 }
  0x5e   : > { %1879 = vrcp.f32 %v570_v20  ;;  %v1866_v33 = vpop.eup %1865  ;;  %v757_v58 = vadd.f32 %v1656_v21, %v661_v11  ;;  %v1661_v38 = vunpack.c.h.bf16 %v1703_v9  ;;  %v1664_v62 = vunpack.c.l.bf16 %v1704_v34 }
  0x5f   : > { %1881 = vpow2.f32 %v1464_v25  ;;  %v1868_v63 = vpop.eup %1867  ;;  %v571_v24 = vadd.f32 1.0, %v1866_v33  ;;  %v1465_v3 = vmul.f32 -1.442695, %v2270_v43  ;;  %v1466_v61 = vmul.f32 -1.442695, %v2273_v27  ;;  %v1706_v25 = vld [vmem:[%s1964_s10 + $0x70] sm:$0xff]  }
  0x60   : > { %v572_v54 = vadd.f32 1.0, %v1868_v63  ;;  %v1665_v17 = vunpack.c.h.bf16 %v1704_v34  ;;  %v1668_v0 = vunpack.c.l.bf16 %v1705_v41  ;;  %v1672_v20 = vunpack.c.l.bf16 %v1706_v25  ;;  %v1707_v33 = vld [vmem:[%s1964_s10 + $0x78] sm:$0xff]  }
  0x61   : > { %1883 = vrcp.f32 %v571_v24  ;;  %v1673_v16 = vunpack.c.h.bf16 %v1706_v25  ;;  %v1676_v63 = vunpack.c.l.bf16 %v1707_v33  ;;  %v1677_v24 = vunpack.c.h.bf16 %v1707_v33 }
  0x62   : > { %1885 = vrcp.f32 %v572_v54 }
  0x63   : > { %v1870_v50 = vpop.eup %1869  ;;  %1887 = vpow2.f32 %v1465_v3 }
  0x64   : > { %v1872_v49 = vpop.eup %1871  ;;  %v662_v31 = vmul.f32 %v1870_v50, %v2179_v14  ;;  %1889 = vpow2.f32 %v1466_v61 }
  0x65   : > { %v1874_v7 = vpop.eup %1873  ;;  %v663_v55 = vmul.f32 %v1872_v49, %v2193_v32 }
  0x66   : > { %v1876_v52 = vpop.eup %1875  ;;  %v758_v45 = vadd.f32 %v1657_v47, %v662_v31  ;;  %v664_v48 = vmul.f32 %v1874_v7, %v2197_v35 }
  0x67   : > { %v1878_v46 = vpop.eup %1877  ;;  %v759_v56 = vadd.f32 %v1660_v44, %v663_v55  ;;  %v665_v39 = vmul.f32 %v1876_v52, %v2208_v6  ;;  %v1669_v6 = vunpack.c.h.bf16 %v1705_v41 }
  0x68   : > { %v1880_v37 = vpop.eup %1879  ;;  %v779_v14 = vpack.c.bf16 %v758_v45, %v757_v58  ;;  %v760_v5 = vadd.f32 %v1661_v38, %v664_v48  ;;  %v573_v26 = vadd.f32 1.0, %v1878_v46 }
  0x69   : > { %v1882_v36 = vpop.eup %1881  ;;  %v666_v51 = vmul.f32 %v1880_v37, %v2212_v8  ;;  %v761_v32 = vadd.f32 %v1664_v62, %v665_v39 }
  0x6a   : > { %1747 = vmatprep.mubr.msk.bf16.mxu1 %vm793_vm1, %v779_v14  ;;  %v780_v4 = vpack.c.bf16 %v760_v5, %v759_v56  ;;  %v574_v53 = vadd.f32 1.0, %v1882_v36  ;;  %1891 = vrcp.f32 %v573_v26 }
  0x6b   : > { %v762_v35 = vadd.f32 %v1665_v17, %v666_v51  ;;  %v1884_v2 = vpop.eup %1883 }
  0x6c   : > { %1748 = vmatmul.mubr.msk.bf16.gmra.mrb[4].mxu1 %vm793_vm1, %v780_v4  ;;  %1893 = vrcp.f32 %v574_v53  ;;  %v1886_v57 = vpop.eup %1885  ;;  %v667_v15 = vmul.f32 %v1884_v2, %v2230_v40 }
  0x6d   : > { %v781_v18 = vpack.c.bf16 %v762_v35, %v761_v32  ;;  %v1888_v22 = vpop.eup %1887  ;;  %v668_v8 = vmul.f32 %v1886_v57, %v2237_v30 }
  0x6e   : > { %v1890_v10 = vpop.eup %1889  ;;  %v763_v59 = vadd.f32 %v1668_v0, %v667_v15  ;;  %v575_v19 = vadd.f32 1.0, %v1888_v22 }
  0x6f   : > { %1751 = vmatprep.mubr.msk.bf16.mxu1 %vm793_vm1, %v781_v18  ;;  %v764_v12 = vadd.f32 %v1669_v6, %v668_v8  ;;  %v576_v23 = vadd.f32 1.0, %v1890_v10 }
  0x70   : > { %1895 = vrcp.f32 %v575_v19 }
  0x71   : > { %v782_v28 = vpack.c.bf16 %v764_v12, %v763_v59  ;;  %1897 = vrcp.f32 %v576_v23 }
  0x74   : > { %v1892_v29 = vpop.eup %1891  ;;  %1752 = vmatmul.mubr.msk.bf16.gmra.mrb[8].mxu1 %vm793_vm1, %v782_v28 }
  0x75   : > { %v669_v40 = vmul.f32 %v1892_v29, %v2253_v60 }
  0x76   : > { %v1894_v30 = vpop.eup %1893 }
  0x77   : > { %v670_v42 = vmul.f32 %v1894_v30, %v2256_v1  ;;  %v765_v13 = vadd.f32 %v1672_v20, %v669_v40 }
  0x79   : > { %v766_v21 = vadd.f32 %v1673_v16, %v670_v42 }
  0x7a   : > { %v1896_v11 = vpop.eup %1895 }
  0x7b   : > { %v783_v9 = vpack.c.bf16 %v766_v21, %v765_v13  ;;  %v1898_v54 = vpop.eup %1897  ;;  %v671_v47 = vmul.f32 %v1896_v11, %v2270_v43 }
  0x7c   : > { %v672_v34 = vmul.f32 %v1898_v54, %v2273_v27 }
  0x7d   : > { %1755 = vmatprep.mubr.msk.bf16.mxu1 %vm793_vm1, %v783_v9  ;;  %v767_v60 = vadd.f32 %v1676_v63, %v671_v47 }
  0x7e   : > { %v768_v3 = vadd.f32 %v1677_v24, %v672_v34 }
  0x80   : > { %v784_v61 = vpack.c.bf16 %v768_v3, %v767_v60 }
  0x82   : > { %1756 = vmatmul.mubr.msk.bf16.gmra.mrb[12].mxu1 %vm793_vm1, %v784_v61 }
 0x112   : > { %v1729_v1 = vpop.f32.mrb[0].mxu0 }
 0x113   : > { %v1520_v50 = vpack.c.bf16 %v1729_v1, %v1729_v1  ;;  %v876_v44 = vpop.f32.mrb[1].mxu0  ;;  %v1240_v43 = vmul.f32 %v1729_v1, %v1729_v1  ;;  %v1168_v46 = vsel %vm793_vm1, %v1729_v1, 0.0 }
 0x114   : > { %v1518_v49 = vpack.c.bf16 %v876_v44, %v876_v44  ;;  %v1238_v31 = vmul.f32 %v876_v44, %v876_v44  ;;  %v1730_v58 = vpop.f32.mrb[2].mxu0  ;;  %v1165_v7 = vsel %vm793_vm1, %v876_v44, 0.0 }
 0x115   : > { %1134 = vst.msk [vmem:[%s1969_s13 + $0x8] sm:$0xf] %vm1131_vm2, %v1520_v50  ;;  %v1521_v38 = vpack.c.bf16 %v1730_v58, %v1730_v58  ;;  %v879_v27 = vpop.f32.mrb[3].mxu0  ;;  %v1241_v45 = vmul.f32 %v1730_v58, %v1730_v58  ;;  %v1273_v14 = vsel %vm793_vm1, %v1240_v43, 0.0  ;;  %v1170_v41 = vsel %vm793_vm1, %v1730_v58, 0.0 }
 0x116   : > { %1132 = vst.msk [vmem:[%s1969_s13] sm:$0xf] %vm1131_vm2, %v1518_v49  ;;  %v1519_v55 = vpack.c.bf16 %v879_v27, %v879_v27  ;;  %v1166_v62 = vsel %vm793_vm1, %v879_v27, 0.0  ;;  %v1239_v52 = vmul.f32 %v879_v27, %v879_v27  ;;  %v1270_v56 = vsel %vm793_vm1, %v1238_v31, 0.0 }
 0x117   : > { %1135 = vst.msk [vmem:[%s1969_s13 + $0xc] sm:$0xf] %vm1131_vm2, %v1521_v38  ;;  %v1167_v48 = vadd.f32 %v1166_v62, %v1165_v7  ;;  %v1275_v26 = vsel %vm793_vm1, %v1241_v45, 0.0 }
 0x118   : > { %1133 = vst.msk [vmem:[%s1969_s13 + $0x4] sm:$0xf] %vm1131_vm2, %v1519_v55  ;;  %v1271_v39 = vsel %vm793_vm1, %v1239_v52, 0.0 }
 0x119   : > { %v1169_v17 = vadd.f32 %v1168_v46, %v1167_v48  ;;  %v1272_v37 = vadd.f32 %v1271_v39, %v1270_v56 }
 0x11a   : > { %v1733_v5 = vpop.f32.mrb[4].mxu0 }
 0x11b   : > { %v1274_v36 = vadd.f32 %v1273_v14, %v1272_v37  ;;  %v1524_v51 = vpack.c.bf16 %v1733_v5, %v1733_v5  ;;  %v892_v32 = vpop.f32.mrb[5].mxu0  ;;  %v1171_v53 = vadd.f32 %v1170_v41, %v1169_v17  ;;  %v1244_v10 = vmul.f32 %v1733_v5, %v1733_v5 }
 0x11c   : > { %v1522_v4 = vpack.c.bf16 %v892_v32, %v892_v32  ;;  %v1172_v35 = vsel %vm793_vm1, %v892_v32, 0.0  ;;  %v1242_v0 = vmul.f32 %v892_v32, %v892_v32  ;;  %v1734_v2 = vpop.f32.mrb[6].mxu0  ;;  %v1176_v23 = vsel %vm793_vm1, %v1733_v5, 0.0 }
 0x11d   : > { %1138 = vst.msk [vmem:[%s1969_s13 + $0x18] sm:$0xf] %vm1131_vm2, %v1524_v51  ;;  %v1276_v6 = vadd.f32 %v1275_v26, %v1274_v36  ;;  %v1525_v57 = vpack.c.bf16 %v1734_v2, %v1734_v2  ;;  %v895_v18 = vpop.f32.mrb[7].mxu0  ;;  %v1173_v15 = vadd.f32 %v1172_v35, %v1171_v53  ;;  %v1245_v28 = vmul.f32 %v1734_v2, %v1734_v2 }
 0x11e   : > { %1136 = vst.msk [vmem:[%s1969_s13 + $0x10] sm:$0xf] %vm1131_vm2, %v1522_v4  ;;  %v1277_v22 = vsel %vm793_vm1, %v1242_v0, 0.0  ;;  %v1523_v8 = vpack.c.bf16 %v895_v18, %v895_v18  ;;  %v1174_v19 = vsel %vm793_vm1, %v895_v18, 0.0  ;;  %v1243_v12 = vmul.f32 %v895_v18, %v895_v18 }
 0x11f   : > { %v1278_v59 = vadd.f32 %v1277_v22, %v1276_v6  ;;  %1139 = vst.msk [vmem:[%s1969_s13 + $0x1c] sm:$0xf] %vm1131_vm2, %v1525_v57  ;;  %v1175_v25 = vadd.f32 %v1174_v19, %v1173_v15  ;;  %v1281_v16 = vsel %vm793_vm1, %v1244_v10, 0.0  ;;  %v1178_v30 = vsel %vm793_vm1, %v1734_v2, 0.0 }
 0x120   : > { %1137 = vst.msk [vmem:[%s1969_s13 + $0x14] sm:$0xf] %vm1131_vm2, %v1523_v8  ;;  %v1279_v20 = vsel %vm793_vm1, %v1243_v12, 0.0  ;;  %v1283_v33 = vsel %vm793_vm1, %v1245_v28, 0.0 }
 0x121   : > { %v1177_v29 = vadd.f32 %v1176_v23, %v1175_v25  ;;  %v1280_v40 = vadd.f32 %v1279_v20, %v1278_v59 }
 0x123   : > { %v1282_v42 = vadd.f32 %v1281_v16, %v1280_v40  ;;  %v1179_v13 = vadd.f32 %v1178_v30, %v1177_v29 }
 0x125   : > { %v1737_v21 = vpop.f32.mrb[8].mxu0  ;;  %v1284_v9 = vadd.f32 %v1283_v33, %v1282_v42 }
 0x126   : > { %v1528_v63 = vpack.c.bf16 %v1737_v21, %v1737_v21  ;;  %v908_v11 = vpop.f32.mrb[9].mxu0  ;;  %v1248_v49 = vmul.f32 %v1737_v21, %v1737_v21  ;;  %v1184_v38 = vsel %vm793_vm1, %v1737_v21, 0.0 }
 0x127   : > { %v1526_v24 = vpack.c.bf16 %v908_v11, %v908_v11  ;;  %v1180_v54 = vsel %vm793_vm1, %v908_v11, 0.0  ;;  %v1246_v47 = vmul.f32 %v908_v11, %v908_v11  ;;  %v1738_v34 = vpop.f32.mrb[10].mxu0 }
 0x128   : > { %1142 = vst.msk [vmem:[%s1969_s13 + $0x28] sm:$0xf] %vm1131_vm2, %v1528_v63  ;;  %v1181_v60 = vadd.f32 %v1180_v54, %v1179_v13  ;;  %v1529_v3 = vpack.c.bf16 %v1738_v34, %v1738_v34  ;;  %v911_v61 = vpop.f32.mrb[11].mxu0  ;;  %v1249_v27 = vmul.f32 %v1738_v34, %v1738_v34  ;;  %v1186_v62 = vsel %vm793_vm1, %v1738_v34, 0.0 }
 0x129   : > { %1140 = vst.msk [vmem:[%s1969_s13 + $0x20] sm:$0xf] %vm1131_vm2, %v1526_v24  ;;  %v1285_v1 = vsel %vm793_vm1, %v1246_v47, 0.0  ;;  %v1527_v50 = vpack.c.bf16 %v911_v61, %v911_v61  ;;  %v1182_v44 = vsel %vm793_vm1, %v911_v61, 0.0  ;;  %v1247_v43 = vmul.f32 %v911_v61, %v911_v61 }
 0x12a   : > { %v1286_v31 = vadd.f32 %v1285_v1, %v1284_v9  ;;  %1143 = vst.msk [vmem:[%s1969_s13 + $0x2c] sm:$0xf] %vm1131_vm2, %v1529_v3  ;;  %v1183_v58 = vadd.f32 %v1182_v44, %v1181_v60  ;;  %v1289_v48 = vsel %vm793_vm1, %v1248_v49, 0.0  ;;  %v1291_v36 = vsel %vm793_vm1, %v1249_v27, 0.0 }
 0x12b   : > { %1141 = vst.msk [vmem:[%s1969_s13 + $0x24] sm:$0xf] %vm1131_vm2, %v1527_v50  ;;  %v1287_v55 = vsel %vm793_vm1, %v1247_v43, 0.0 }
 0x12c   : > { %v1185_v7 = vadd.f32 %v1184_v38, %v1183_v58  ;;  %v1288_v52 = vadd.f32 %v1287_v55, %v1286_v31 }
 0x12d   : > { %v1741_v45 = vpop.f32.mrb[12].mxu0 }
 0x12e   : > { %v1532_v46 = vpack.c.bf16 %v1741_v45, %v1741_v45  ;;  %v924_v56 = vpop.f32.mrb[13].mxu0  ;;  %v1187_v39 = vadd.f32 %v1186_v62, %v1185_v7  ;;  %v1290_v17 = vadd.f32 %v1289_v48, %v1288_v52  ;;  %v1252_v57 = vmul.f32 %v1741_v45, %v1741_v45 }
 0x12f   : > { %v1530_v37 = vpack.c.bf16 %v924_v56, %v924_v56  ;;  %v1188_v14 = vsel %vm793_vm1, %v924_v56, 0.0  ;;  %v1250_v5 = vmul.f32 %v924_v56, %v924_v56  ;;  %v1742_v41 = vpop.f32.mrb[14].mxu0  ;;  %v1745_v26 = vpop.f32.mrb[0].mxu1  ;;  %v1192_v10 = vsel %vm793_vm1, %v1741_v45, 0.0 }
 0x130   : > { %1146 = vst.msk [vmem:[%s1969_s13 + $0x38] sm:$0xf] %vm1131_vm2, %v1532_v46  ;;  %v1189_v51 = vadd.f32 %v1188_v14, %v1187_v39  ;;  %v1533_v32 = vpack.c.bf16 %v1742_v41, %v1742_v41  ;;  %v927_v4 = vpop.f32.mrb[15].mxu0  ;;  %v940_v53 = vpop.f32.mrb[1].mxu1  ;;  %v1292_v35 = vadd.f32 %v1291_v36, %v1290_v17  ;;  %v1536_v22 = vpack.c.bf16 %v1745_v26, %v1745_v26 }
 0x131   : > { %1144 = vst.msk [vmem:[%s1969_s13 + $0x30] sm:$0xf] %vm1131_vm2, %v1530_v37  ;;  %v1293_v0 = vsel %vm793_vm1, %v1250_v5, 0.0  ;;  %v1531_v2 = vpack.c.bf16 %v927_v4, %v927_v4  ;;  %v1746_v6 = vpop.f32.mrb[2].mxu1  ;;  %v1190_v18 = vsel %vm793_vm1, %v927_v4, 0.0  ;;  %v1251_v15 = vmul.f32 %v927_v4, %v927_v4 }
 0x132   : > { %1147 = vst.msk [vmem:[%s1969_s13 + $0x3c] sm:$0xf] %vm1131_vm2, %v1533_v32  ;;  %v943_v8 = vpop.f32.mrb[3].mxu1  ;;  %v1294_v59 = vadd.f32 %v1293_v0, %v1292_v35  ;;  %v1191_v19 = vadd.f32 %v1190_v18, %v1189_v51  ;;  %v1253_v12 = vmul.f32 %v1742_v41, %v1742_v41  ;;  %1150 = vst.msk [vmem:[%s1969_s13 + $0x48] sm:$0xf] %vm1131_vm2, %v1536_v22  ;;  %v1297_v16 = vsel %vm793_vm1, %v1252_v57, 0.0 }
 0x133   : > { %1145 = vst.msk [vmem:[%s1969_s13 + $0x34] sm:$0xf] %vm1131_vm2, %v1531_v2  ;;  %v1295_v25 = vsel %vm793_vm1, %v1251_v15, 0.0  ;;  %v1534_v23 = vpack.c.bf16 %v940_v53, %v940_v53  ;;  %v1254_v28 = vmul.f32 %v940_v53, %v940_v53  ;;  %v1537_v40 = vpack.c.bf16 %v1746_v6, %v1746_v6 }
 0x134   : > { %v1193_v20 = vadd.f32 %v1192_v10, %v1191_v19  ;;  %v1296_v29 = vadd.f32 %v1295_v25, %v1294_v59  ;;  %v1194_v30 = vsel %vm793_vm1, %v1742_v41, 0.0  ;;  %v1196_v42 = vsel %vm793_vm1, %v940_v53, 0.0 }
 0x135   : > { %1148 = vst.msk [vmem:[%s1969_s13 + $0x40] sm:$0xf] %vm1131_vm2, %v1534_v23  ;;  %v1535_v13 = vpack.c.bf16 %v943_v8, %v943_v8  ;;  %1151 = vst.msk [vmem:[%s1969_s13 + $0x4c] sm:$0xf] %vm1131_vm2, %v1537_v40  ;;  %v1299_v63 = vsel %vm793_vm1, %v1253_v12, 0.0  ;;  %v1301_v11 = vsel %vm793_vm1, %v1254_v28, 0.0  ;;  %v1255_v9 = vmul.f32 %v943_v8, %v943_v8 }
 0x136   : > { %v1298_v33 = vadd.f32 %v1297_v16, %v1296_v29  ;;  %v1195_v21 = vadd.f32 %v1194_v30, %v1193_v20  ;;  %v1256_v47 = vmul.f32 %v1745_v26, %v1745_v26  ;;  %v1198_v34 = vsel %vm793_vm1, %v943_v8, 0.0 }
 0x137   : > { %1149 = vst.msk [vmem:[%s1969_s13 + $0x44] sm:$0xf] %vm1131_vm2, %v1535_v13  ;;  %v1200_v61 = vsel %vm793_vm1, %v1745_v26, 0.0  ;;  %v1257_v1 = vmul.f32 %v1746_v6, %v1746_v6  ;;  %v1303_v50 = vsel %vm793_vm1, %v1255_v9, 0.0  ;;  %v1202_v58 = vsel %vm793_vm1, %v1746_v6, 0.0 }
 0x138   : > { %v1197_v24 = vadd.f32 %v1196_v42, %v1195_v21  ;;  %v1300_v54 = vadd.f32 %v1299_v63, %v1298_v33  ;;  %v1305_v31 = vsel %vm793_vm1, %v1256_v47, 0.0 }
 0x139   : > { %v1307_v7 = vsel %vm793_vm1, %v1257_v1, 0.0 }
 0x13a   : > { %v1302_v60 = vadd.f32 %v1301_v11, %v1300_v54  ;;  %v1199_v3 = vadd.f32 %v1198_v34, %v1197_v24 }
 0x13c   : > { %v1201_v44 = vadd.f32 %v1200_v61, %v1199_v3  ;;  %v1304_v49 = vadd.f32 %v1303_v50, %v1302_v60 }
 0x13e   : > { %v1306_v43 = vadd.f32 %v1305_v31, %v1304_v49  ;;  %v1203_v27 = vadd.f32 %v1202_v58, %v1201_v44 }
 0x13f   : > { %v1749_v38 = vpop.f32.mrb[4].mxu1 }
 0x140   : > { %v1540_v55 = vpack.c.bf16 %v1749_v38, %v1749_v38  ;;  %v956_v62 = vpop.f32.mrb[5].mxu1  ;;  %v1308_v46 = vadd.f32 %v1307_v7, %v1306_v43  ;;  %v1260_v26 = vmul.f32 %v1749_v38, %v1749_v38  ;;  %v1208_v4 = vsel %vm793_vm1, %v1749_v38, 0.0 }
 0x141   : > { %v1538_v52 = vpack.c.bf16 %v956_v62, %v956_v62  ;;  %v1204_v45 = vsel %vm793_vm1, %v956_v62, 0.0  ;;  %v1258_v48 = vmul.f32 %v956_v62, %v956_v62  ;;  %v1750_v56 = vpop.f32.mrb[6].mxu1 }
 0x142   : > { %1154 = vst.msk [vmem:[%s1969_s13 + $0x58] sm:$0xf] %vm1131_vm2, %v1540_v55  ;;  %v1205_v39 = vadd.f32 %v1204_v45, %v1203_v27  ;;  %v1541_v17 = vpack.c.bf16 %v1750_v56, %v1750_v56  ;;  %v959_v37 = vpop.f32.mrb[7].mxu1  ;;  %v1261_v53 = vmul.f32 %v1750_v56, %v1750_v56  ;;  %v1210_v2 = vsel %vm793_vm1, %v1750_v56, 0.0 }
 0x143   : > { %1152 = vst.msk [vmem:[%s1969_s13 + $0x50] sm:$0xf] %vm1131_vm2, %v1538_v52  ;;  %v1309_v14 = vsel %vm793_vm1, %v1258_v48, 0.0  ;;  %v1539_v5 = vpack.c.bf16 %v959_v37, %v959_v37  ;;  %v1206_v41 = vsel %vm793_vm1, %v959_v37, 0.0  ;;  %v1259_v32 = vmul.f32 %v959_v37, %v959_v37 }
 0x144   : > { %v1310_v36 = vadd.f32 %v1309_v14, %v1308_v46  ;;  %1155 = vst.msk [vmem:[%s1969_s13 + $0x5c] sm:$0xf] %vm1131_vm2, %v1541_v17  ;;  %v1207_v51 = vadd.f32 %v1206_v41, %v1205_v39  ;;  %v1313_v18 = vsel %vm793_vm1, %v1260_v26, 0.0  ;;  %v1315_v23 = vsel %vm793_vm1, %v1261_v53, 0.0 }
 0x145   : > { %1153 = vst.msk [vmem:[%s1969_s13 + $0x54] sm:$0xf] %vm1131_vm2, %v1539_v5  ;;  %v1311_v0 = vsel %vm793_vm1, %v1259_v32, 0.0 }
 0x146   : > { %v1209_v35 = vadd.f32 %v1208_v4, %v1207_v51  ;;  %v1312_v6 = vadd.f32 %v1311_v0, %v1310_v36 }
 0x147   : > { %v1753_v57 = vpop.f32.mrb[8].mxu1 }
 0x148   : > { %v1544_v15 = vpack.c.bf16 %v1753_v57, %v1753_v57  ;;  %v972_v22 = vpop.f32.mrb[9].mxu1  ;;  %v1211_v8 = vadd.f32 %v1210_v2, %v1209_v35  ;;  %v1314_v10 = vadd.f32 %v1313_v18, %v1312_v6  ;;  %v1264_v42 = vmul.f32 %v1753_v57, %v1753_v57 }
 0x149   : > { %v1542_v59 = vpack.c.bf16 %v972_v22, %v972_v22  ;;  %v1212_v19 = vsel %vm793_vm1, %v972_v22, 0.0  ;;  %v1262_v12 = vmul.f32 %v972_v22, %v972_v22  ;;  %v1754_v25 = vpop.f32.mrb[10].mxu1  ;;  %v1216_v11 = vsel %vm793_vm1, %v1753_v57, 0.0 }
 0x14a   : > { %1158 = vst.msk [vmem:[%s1969_s13 + $0x68] sm:$0xf] %vm1131_vm2, %v1544_v15  ;;  %v1213_v28 = vadd.f32 %v1212_v19, %v1211_v8  ;;  %v1545_v20 = vpack.c.bf16 %v1754_v25, %v1754_v25  ;;  %v975_v29 = vpop.f32.mrb[11].mxu1  ;;  %v1316_v40 = vadd.f32 %v1315_v23, %v1314_v10  ;;  %v1265_v9 = vmul.f32 %v1754_v25, %v1754_v25  ;;  %v1164_v10 = vld [vmem:[%s2447_s6] sm:$0x1] }
 0x14b   : > { %1156 = vst.msk [vmem:[%s1969_s13 + $0x60] sm:$0xf] %vm1131_vm2, %v1542_v59  ;;  %v1317_v16 = vsel %vm793_vm1, %v1262_v12, 0.0  ;;  %v1543_v30 = vpack.c.bf16 %v975_v29, %v975_v29  ;;  %v1214_v13 = vsel %vm793_vm1, %v975_v29, 0.0  ;;  %v1263_v33 = vmul.f32 %v975_v29, %v975_v29  ;;  %v1237_v23 = vld [vmem:[%s2448_s7] sm:$0x1] }
 0x14c   : > { %1159 = vst.msk [vmem:[%s1969_s13 + $0x6c] sm:$0xf] %vm1131_vm2, %v1545_v20  ;;  %v1318_v21 = vadd.f32 %v1317_v16, %v1316_v40  ;;  %v1215_v63 = vadd.f32 %v1214_v13, %v1213_v28  ;;  %v1321_v34 = vsel %vm793_vm1, %v1264_v42, 0.0  ;;  %v1218_v60 = vsel %vm793_vm1, %v1754_v25, 0.0 }
 0x14d   : > { %1157 = vst.msk [vmem:[%s1969_s13 + $0x64] sm:$0xf] %vm1131_vm2, %v1543_v30  ;;  %v1319_v24 = vsel %vm793_vm1, %v1263_v33, 0.0  ;;  %v1323_v1 = vsel %vm793_vm1, %v1265_v9, 0.0 }
 0x14e   : > { %v1217_v54 = vadd.f32 %v1216_v11, %v1215_v63  ;;  %v1320_v47 = vadd.f32 %v1319_v24, %v1318_v21 }
 0x150   : > { %v1322_v3 = vadd.f32 %v1321_v34, %v1320_v47  ;;  %v1219_v61 = vadd.f32 %v1218_v60, %v1217_v54 }
 0x152   : > { %v1324_v50 = vadd.f32 %v1323_v1, %v1322_v3 }
 0x155   : > { %v1757_v44 = vpop.f32.mrb[12].mxu1 }
 0x156   : > { %v1548_v49 = vpack.c.bf16 %v1757_v44, %v1757_v44  ;;  %v988_v31 = vpop.f32.mrb[13].mxu1  ;;  %v1268_v46 = vmul.f32 %v1757_v44, %v1757_v44  ;;  %v1224_v37 = vsel %vm793_vm1, %v1757_v44, 0.0 }
 0x157   : > { %v1546_v58 = vpack.c.bf16 %v988_v31, %v988_v31  ;;  %v1220_v43 = vsel %vm793_vm1, %v988_v31, 0.0  ;;  %v1266_v38 = vmul.f32 %v988_v31, %v988_v31  ;;  %v1758_v27 = vpop.f32.mrb[14].mxu1 }
 0x158   : > { %1162 = vst.msk [vmem:[%s1969_s13 + $0x78] sm:$0xf] %vm1131_vm2, %v1548_v49  ;;  %v1221_v7 = vadd.f32 %v1220_v43, %v1219_v61  ;;  %v1549_v55 = vpack.c.bf16 %v1758_v27, %v1758_v27  ;;  %v991_v62 = vpop.f32.mrb[15].mxu1  ;;  %v1269_v14 = vmul.f32 %v1758_v27, %v1758_v27  ;;  %v1226_v26 = vsel %vm793_vm1, %v1758_v27, 0.0 }
 0x159   : > { %1160 = vst.msk [vmem:[%s1969_s13 + $0x70] sm:$0xf] %vm1131_vm2, %v1546_v58  ;;  %v1325_v52 = vsel %vm793_vm1, %v1266_v38, 0.0  ;;  %v1547_v45 = vpack.c.bf16 %v991_v62, %v991_v62  ;;  %v1222_v48 = vsel %vm793_vm1, %v991_v62, 0.0  ;;  %v1267_v17 = vmul.f32 %v991_v62, %v991_v62 }
 0x15a   : > { %v1326_v56 = vadd.f32 %v1325_v52, %v1324_v50  ;;  %1163 = vst.msk [vmem:[%s1969_s13 + $0x7c] sm:$0xf] %vm1131_vm2, %v1549_v55  ;;  %v1223_v39 = vadd.f32 %v1222_v48, %v1221_v7  ;;  %v1329_v51 = vsel %vm793_vm1, %v1268_v46, 0.0  ;;  %v1331_v53 = vsel %vm793_vm1, %v1269_v14, 0.0 }
 0x15b   : > { %1161 = vst.msk [vmem:[%s1969_s13 + $0x74] sm:$0xf] %vm1131_vm2, %v1547_v45  ;;  %v1327_v41 = vsel %vm793_vm1, %v1267_v17, 0.0 }
 0x15c   : > { %v1225_v5 = vadd.f32 %v1224_v37, %v1223_v39  ;;  %v1328_v36 = vadd.f32 %v1327_v41, %v1326_v56 }
 0x15e   : > { %v1227_v32 = vadd.f32 %v1226_v26, %v1225_v5  ;;  %v1330_v4 = vadd.f32 %v1329_v51, %v1328_v36 }
 0x160   : > { %v1228_v35 = vrot.slane %v1227_v32, 4  ;;  %v1332_v0 = vadd.f32 %v1331_v53, %v1330_v4 }
 0x162   : > { %v1229_v2 = vadd.f32 %v1228_v35, %v1227_v32  ;;  %v1333_v6 = vrot.slane %v1332_v0, 4 }
 0x164   : > { %v1230_v57 = vrot.slane %v1229_v2, 2  ;;  %v1334_v18 = vadd.f32 %v1333_v6, %v1332_v0 }
 0x166   : > { %v1231_v15 = vadd.f32 %v1230_v57, %v1229_v2  ;;  %v1335_v22 = vrot.slane %v1334_v18, 2 }
 0x168   : > { %v1232_v8 = vrot.slane %v1231_v15, 1  ;;  %v1336_v59 = vadd.f32 %v1335_v22, %v1334_v18 }
 0x16a   : > { %v1233_v19 = vadd.f32 %v1232_v8, %v1231_v15  ;;  %v1337_v12 = vrot.slane %v1336_v59, 1 }
 0x16c   : > { %v1234_v25 = vadd.f32 %v1233_v19, %v1164_v10  ;;  %v1338_v28 = vadd.f32 %v1337_v12, %v1336_v59 }
 0x16e   : > { %1236 = vst.msk [vmem:[%s2447_s6] sm:$0x1] %vm1235_vm3, %v1234_v25  ;;  %v1339_v20 = vadd.f32 %v1338_v28, %v1237_v23 }
 0x170   : > { %1340 = vst.msk [vmem:[%s2448_s7] sm:$0x1] %vm1235_vm3, %v1339_v20 }
 0x171 PF: > { %s18_s24 = sadd.s32 1, %s1905_s24  }
 0x172   : > { %p15_p5 = scmp.ge.s32.totalorder %s18_s24, 4  }
 0x174   :  { %17 = sbr.rel (!%p15_p5) target bundleno = 1 (0x1), region = 93 }

// kernel: bottleneck_csp_forward.11
= control target key start
LH: loop header
LB: loop body
LE: loop exit
PB: predicated region body
PF: predicated region fallthrough
CT: control target
= control target key end

     0   :  { %8 = vsyncpa [#allocation3], 0  ;;  %s1428_s0 = inlined_call_operand.vmem [shape: bf16[512,32], index: 0, kind: input, shape index: {}]   ;;  %s1429_s1 = inlined_call_operand.vmem [shape: f32[1,32], index: 1, kind: input, shape index: {}]   ;;  %s1430_s2 = inlined_call_operand.vmem [shape: f32[1,32], index: 2, kind: input, shape index: {}]   ;;  %s1431_s3 = inlined_call_operand.hbm [shape: f32[512,32], index: 3, kind: output, shape index: {}]  }
   0x1   :  { %10 = vsyncpa [#allocation3 + $0x1], 0  ;;  %s1029_s12 = smov 0   ;;  %s1031_s13 = smov 0  }
   0x2   :  { %s1033_s14 = smov 0   ;;  %s1035_s15 = smov 0  }
   0x3 LB: > { %s1050_s16 = sadd.s32 4294967295, %s1004_s15   ;;  %s647_s17 = sadd.s32 4294967294, %s1004_s15   ;;  %s1004_s15 = sphi %s1035_s15, %s1437_s15   ;;  %s1000_s14 = sphi %s1033_s14, %s1436_s14   ;;  %s996_s13 = sphi %s1031_s13, %s1435_s13   ;;  %s992_s12 = sphi %s1029_s12, %s1434_s12  }
   0x4   : > { %s1054_s18 = sadd.s32 1, %s1004_s15   ;;  %s91_s19 = sadd.s32 1, %s1000_s14 }
   0x5   : > { %s88_s20 = ssub.s32 %s1004_s15, %s1054_s18  ;;  %p101_p0 = scmp.ne.s32.totalorder %s1000_s14, %s996_s13 }
   0x6   : > { %p89_p1 = scmp.eq.s32.totalorder %s88_s20, 0  ;;  %p102_p2 = scmp.eq.s32.totalorder %s1050_s16, 1 }
   0x7   : > { %p107_p3 = scmp.ne.s32.totalorder %s996_s13, %s992_s12  ;;  %p108_p4 = scmp.eq.s32.totalorder %s647_s17, 1 }
   0x8   : > { %s1065_s21 = scalar_select %p89_p1, %s1000_s14, %s91_s19  }
   0x9   : > { %p1067_p5 = por %p102_p2, %p101_p0  ;;  %p1071_p6 = por %p108_p4, %p107_p3 }
   0xa   : > { %p650_p7 = scmp.ge.s32.totalorder %s1004_s15, 1  ;;  %p141_p8 = scmp.lt.s32.totalorder %s1004_s15, 3 }
   0xc   : > { %p142_p9 = pnand %p650_p7, %p141_p8 }
   0xd   : > { %s652_s24 = sshll.u32 (!%p142_p9), %s1050_s16, 5  ;;  %v1086_v0 = vld [vmem:[%s1429_s1] ss:$0 sm:$0xff] (!%p142_p9)  ;;  %vm538_vm0 = vcmask (!%p142_p9), 261120   ;;  %s162_s6 = sand.u32 (!%p142_p9), 1, %s996_s13  }
   0xe   : > { %145 = sbr.rel (%p142_p9) target bundleno = 131 (0x83), region = 32  ;;  %p166_p10 = scmp.lt.s32.totalorder (!%p142_p9), %s652_s24, 63  ;;  %v1095_v9 = vld [vmem:[%s1430_s2] ss:$0 sm:$0xff] (!%p142_p9) }
   0xf   : > { %s1204_s7 = sshll.u32 (!%p142_p9), %s162_s6, 8  ;;  %s693_s9 = sshll.u32 (!%p142_p9), %s1050_s16, 12 }
  0x10   : > { %s1223_s8 = scalar_lea.vmem (!%p142_p9), [#allocation2], %s1204_s7  ;;  %s1374_s17 = scalar_lea.hbm (!%p142_p9), %s1431_s3, %s693_s9 }
  0x11   : > { %s585_s10 = sshll.u32 (!%p142_p9), %s1223_s8, 4  ;;  %s1387_s19 = scalar_lea.sflag (!%p142_p9), [#allocation3], %s162_s6  ;;  %s1376_s10 = int_to_ptr.vmem [resolvable:$true] %s585_s10 }
  0x12   : > { %s942_s20 = scalar_lea.vmem (!%p142_p9), %s1376_s10, 4096 }
  0x13   : > { %p943_p11 = scmp.ne.s32.totalorder (!%p142_p9), %s1376_s10, %s942_s20 }
  0x15   : > { %s1439_s24 = smov (!%p166_p10, %s652_s24), 63  ;;  %p944_p12 = pnand %p943_p11, %p1067_p5 }
  0x16   : > { %s653_s25 = sshll.u32 %s1439_s24, 2  ;;  %s1006_s24 = smov [#allocation2]  }
  0x17   : > { %s1081_s28 = scalar_lea.vmem %s1428_s0, %s653_s25  ;;  %p945_p13 = pneg %p944_p12 }
  0x18   : > { %v695_v1 = vld [vmem:[%s1081_s28] sm:$0xff]   ;;  %v758_v2 = vld [vmem:[%s1081_s28 + $0x8] sm:$0xff]   ;;  %v759_v3 = vld [vmem:[%s1081_s28 + $0x10] sm:$0xff]   ;;  %s946_s25 = sshll.u32 %s1006_s24, 4  ;;  %s947_s25 = int_to_ptr.vmem [resolvable:$false] %s946_s25 }
  0x19   : > { %v696_v4 = vunpack.c.l.bf16 %v695_v1  ;;  %v697_v5 = vunpack.c.h.bf16 %v695_v1  ;;  %v700_v6 = vunpack.c.l.bf16 %v758_v2  ;;  %v701_v7 = vunpack.c.h.bf16 %v758_v2  ;;  %v760_v8 = vld [vmem:[%s1081_s28 + $0x18] sm:$0xff]   ;;  %v761_v22 = vld [vmem:[%s1081_s28 + $0x20] sm:$0xff]   ;;  %v762_v31 = vld [vmem:[%s1081_s28 + $0x28] sm:$0xff]   ;;  %s948_s26 = scalar_lea.vmem %s947_s25, 8192  ;;  %p949_p0 = scmp.lt.s32.totalorder %s1376_s10, %s947_s25 }
  0x1a   : > { %v704_v10 = vunpack.c.l.bf16 %v759_v3  ;;  %v705_v11 = vunpack.c.h.bf16 %v759_v3  ;;  %v708_v12 = vunpack.c.l.bf16 %v760_v8  ;;  %v709_v13 = vunpack.c.h.bf16 %v760_v8  ;;  %v763_v32 = vld [vmem:[%s1081_s28 + $0x30] sm:$0xff]   ;;  %v764_v53 = vld [vmem:[%s1081_s28 + $0x38] sm:$0xff]   ;;  %v765_v62 = vld [vmem:[%s1081_s28 + $0x40] sm:$0xff]   ;;  %p950_p1 = scmp.lt.s32.totalorder %s948_s26, %s942_s20 }
  0x1b   : > { %v243_v14 = vmul.f32 %v696_v4, %v1086_v0  ;;  %v244_v15 = vmul.f32 %v697_v5, %v1086_v0  ;;  %v245_v16 = vmul.f32 %v700_v6, %v1086_v0  ;;  %v246_v17 = vmul.f32 %v701_v7, %v1086_v0  ;;  %v766_v5 = vld [vmem:[%s1081_s28 + $0x48] sm:$0xff]  }
  0x1c   : > { %v247_v18 = vmul.f32 %v704_v10, %v1086_v0  ;;  %v248_v19 = vmul.f32 %v705_v11, %v1086_v0  ;;  %v249_v20 = vmul.f32 %v708_v12, %v1086_v0  ;;  %v250_v21 = vmul.f32 %v709_v13, %v1086_v0  ;;  %p951_p2 = por %p950_p1, %p949_p0 }
  0x1d   : > { %v1107_v23 = vadd.f32 %v1095_v9, %v243_v14  ;;  %v1110_v24 = vadd.f32 %v1095_v9, %v244_v15  ;;  %v1113_v25 = vadd.f32 %v1095_v9, %v245_v16  ;;  %v1116_v26 = vadd.f32 %v1095_v9, %v246_v17 }
  0x1e   : > { %v1119_v27 = vadd.f32 %v1095_v9, %v247_v18  ;;  %v1122_v28 = vadd.f32 %v1095_v9, %v248_v19  ;;  %v1125_v29 = vadd.f32 %v1095_v9, %v249_v20  ;;  %v1128_v30 = vadd.f32 %v1095_v9, %v250_v21  ;;  %p952_p3 = pnand %p951_p2, %p945_p13 }
  0x1f   : > { %v656_v33 = vmul.f32 -1.442695, %v1107_v23  ;;  %v657_v34 = vmul.f32 -1.442695, %v1110_v24  ;;  %v658_v35 = vmul.f32 -1.442695, %v1113_v25  ;;  %v712_v36 = vunpack.c.l.bf16 %v761_v22 }
  0x20   : > { %v659_v37 = vmul.f32 -1.442695, %v1116_v26  ;;  %v660_v38 = vmul.f32 -1.442695, %v1119_v27  ;;  %v661_v39 = vmul.f32 -1.442695, %v1122_v28  ;;  %v713_v40 = vunpack.c.h.bf16 %v761_v22 }
  0x21   : > { %814 = vpow2.f32 %v656_v33  ;;  %v662_v41 = vmul.f32 -1.442695, %v1125_v29  ;;  %v663_v42 = vmul.f32 -1.442695, %v1128_v30  ;;  %v251_v43 = vmul.f32 %v712_v36, %v1086_v0 }
  0x22   : > { %816 = vpow2.f32 %v657_v34  ;;  %v252_v44 = vmul.f32 %v713_v40, %v1086_v0  ;;  %v716_v45 = vunpack.c.l.bf16 %v762_v31  ;;  %v717_v46 = vunpack.c.h.bf16 %v762_v31 }
  0x23   : > { %818 = vpow2.f32 %v658_v35  ;;  %v1143_v47 = vadd.f32 %v1095_v9, %v251_v43  ;;  %v720_v48 = vunpack.c.l.bf16 %v763_v32  ;;  %v721_v49 = vunpack.c.h.bf16 %v763_v32  ;;  %v767_v35 = vld [vmem:[%s1081_s28 + $0x50] sm:$0xff]  }
  0x24   : > { %820 = vpow2.f32 %v659_v37  ;;  %v1146_v50 = vadd.f32 %v1095_v9, %v252_v44  ;;  %v253_v51 = vmul.f32 %v716_v45, %v1086_v0  ;;  %v254_v52 = vmul.f32 %v717_v46, %v1086_v0 }
  0x25   : > { %822 = vpow2.f32 %v660_v38  ;;  %v664_v54 = vmul.f32 -1.442695, %v1143_v47  ;;  %v255_v55 = vmul.f32 %v720_v48, %v1086_v0  ;;  %v256_v60 = vmul.f32 %v721_v49, %v1086_v0  ;;  %v768_v49 = vld [vmem:[%s1081_s28 + $0x58] sm:$0xff]  }
  0x26   : > { %824 = vpow2.f32 %v661_v39  ;;  %v665_v56 = vmul.f32 -1.442695, %v1146_v50  ;;  %v1155_v57 = vadd.f32 %v1095_v9, %v253_v51  ;;  %v1158_v58 = vadd.f32 %v1095_v9, %v254_v52 }
  0x27   : > { %826 = vpow2.f32 %v662_v41  ;;  %v1161_v59 = vadd.f32 %v1095_v9, %v255_v55  ;;  %v724_v61 = vunpack.c.l.bf16 %v764_v53  ;;  %v725_v2 = vunpack.c.h.bf16 %v764_v53 }
  0x28   : > { %828 = vpow2.f32 %v663_v42  ;;  %v666_v63 = vmul.f32 -1.442695, %v1155_v57  ;;  %v667_v1 = vmul.f32 -1.442695, %v1158_v58  ;;  %v728_v7 = vunpack.c.l.bf16 %v765_v62 }
  0x29   : > { %830 = vpow2.f32 %v664_v54  ;;  %v668_v3 = vmul.f32 -1.442695, %v1161_v59  ;;  %v257_v4 = vmul.f32 %v724_v61, %v1086_v0  ;;  %v258_v6 = vmul.f32 %v725_v2, %v1086_v0 }
  0x2a   : > { %832 = vpow2.f32 %v665_v56  ;;  %v1172_v10 = vadd.f32 %v1095_v9, %v256_v60  ;;  %v729_v11 = vunpack.c.h.bf16 %v765_v62  ;;  %v259_v14 = vmul.f32 %v728_v7, %v1086_v0 }
  0x2b   : > { %v815_v8 = vpop.eup %814  ;;  %834 = vpow2.f32 %v666_v63  ;;  %v732_v15 = vunpack.c.l.bf16 %v766_v5  ;;  %v1176_v18 = vadd.f32 %v1095_v9, %v257_v4  ;;  %v733_v19 = vunpack.c.h.bf16 %v766_v5 }
  0x2c   : > { %v817_v12 = vpop.eup %816  ;;  %v410_v13 = vadd.f32 1.0, %v815_v8  ;;  %836 = vpow2.f32 %v667_v1  ;;  %v1179_v22 = vadd.f32 %v1095_v9, %v258_v6  ;;  %v1182_v33 = vmul.f32 -1.442695, %v1172_v10 }
  0x2d   : > { %v819_v16 = vpop.eup %818  ;;  %v411_v17 = vadd.f32 1.0, %v817_v12  ;;  %838 = vpow2.f32 %v668_v3  ;;  %v260_v34 = vmul.f32 %v729_v11, %v1086_v0  ;;  %v1187_v38 = vadd.f32 %v1095_v9, %v259_v14 }
  0x2e   : > { %v821_v20 = vpop.eup %820  ;;  %840 = vrcp.f32 %v410_v13  ;;  %v412_v21 = vadd.f32 1.0, %v819_v16  ;;  %v261_v39 = vmul.f32 %v732_v15, %v1086_v0  ;;  %v670_v42 = vmul.f32 -1.442695, %v1176_v18  ;;  %v769_v13 = vld [vmem:[%s1081_s28 + $0x60] sm:$0xff]  }
  0x2f   : > { %v823_v31 = vpop.eup %822  ;;  %842 = vrcp.f32 %v411_v17  ;;  %v413_v32 = vadd.f32 1.0, %v821_v20  ;;  %v262_v43 = vmul.f32 %v733_v19, %v1086_v0  ;;  %v671_v46 = vmul.f32 -1.442695, %v1179_v22 }
  0x30   : > { %v825_v36 = vpop.eup %824  ;;  %844 = vrcp.f32 %v412_v21  ;;  %v414_v37 = vadd.f32 1.0, %v823_v31  ;;  %v736_v48 = vunpack.c.l.bf16 %v767_v35  ;;  %v1196_v53 = vadd.f32 %v1095_v9, %v260_v34 }
  0x31   : > { %v827_v40 = vpop.eup %826  ;;  %846 = vrcp.f32 %v413_v32  ;;  %v415_v41 = vadd.f32 1.0, %v825_v36  ;;  %v737_v54 = vunpack.c.h.bf16 %v767_v35  ;;  %v672_v60 = vmul.f32 -1.442695, %v1187_v38 }
  0x32   : > { %v829_v44 = vpop.eup %828  ;;  %848 = vrcp.f32 %v414_v37  ;;  %v416_v45 = vadd.f32 1.0, %v827_v40  ;;  %v1200_v61 = vadd.f32 %v1095_v9, %v261_v39  ;;  %v1207_v1 = vadd.f32 %v1095_v9, %v262_v43 }
  0x33   : > { %v831_v51 = vpop.eup %830  ;;  %850 = vrcp.f32 %v415_v41  ;;  %v417_v52 = vadd.f32 1.0, %v829_v44  ;;  %v740_v2 = vunpack.c.l.bf16 %v768_v49  ;;  %v263_v5 = vmul.f32 %v736_v48, %v1086_v0 }
  0x34   : > { %v833_v55 = vpop.eup %832  ;;  %852 = vrcp.f32 %v416_v45  ;;  %v418_v56 = vadd.f32 1.0, %v831_v51  ;;  %v741_v6 = vunpack.c.h.bf16 %v768_v49  ;;  %v673_v11 = vmul.f32 -1.442695, %v1196_v53 }
  0x35   : > { %v835_v62 = vpop.eup %834  ;;  %854 = vrcp.f32 %v417_v52  ;;  %v419_v63 = vadd.f32 1.0, %v833_v55  ;;  %v264_v12 = vmul.f32 %v737_v54, %v1086_v0  ;;  %v674_v16 = vmul.f32 -1.442695, %v1200_v61 }
  0x36   : > { %v837_v3 = vpop.eup %836  ;;  %856 = vrcp.f32 %v418_v56  ;;  %v420_v4 = vadd.f32 1.0, %v835_v62  ;;  %v265_v17 = vmul.f32 %v740_v2, %v1086_v0  ;;  %v675_v21 = vmul.f32 -1.442695, %v1207_v1 }
  0x37   : > { %v839_v7 = vpop.eup %838  ;;  %858 = vrcp.f32 %v419_v63  ;;  %v421_v8 = vadd.f32 1.0, %v837_v3  ;;  %v266_v31 = vmul.f32 %v741_v6, %v1086_v0  ;;  %v1220_v35 = vadd.f32 %v1095_v9, %v263_v5  ;;  %v770_v3 = vld [vmem:[%s1081_s28 + $0x68] sm:$0xff]  }
  0x38   : > { %v841_v14 = vpop.eup %840  ;;  %860 = vrcp.f32 %v420_v4  ;;  %v422_v15 = vadd.f32 1.0, %v839_v7  ;;  %v744_v36 = vunpack.c.l.bf16 %v769_v13  ;;  %v745_v39 = vunpack.c.h.bf16 %v769_v13  ;;  %v771_v7 = vld [vmem:[%s1081_s28 + $0x70] sm:$0xff]  }
  0x39   : > { %v843_v19 = vpop.eup %842  ;;  %v506_v20 = vmul.f32 %v841_v14, %v1107_v23  ;;  %862 = vrcp.f32 %v421_v8  ;;  %v1236_v43 = vadd.f32 %v1095_v9, %v265_v17  ;;  %v1243_v45 = vadd.f32 %v1095_v9, %v266_v31 }
  0x3a   : > { %v845_v32 = vpop.eup %844  ;;  %v507_v34 = vmul.f32 %v843_v19, %v1110_v24  ;;  %864 = vrcp.f32 %v422_v15  ;;  %v1230_v24 = vadd.f32 %v1095_v9, %v264_v12  ;;  %v267_v44 = vmul.f32 %v744_v36, %v1086_v0  ;;  %v772_v15 = vld [vmem:[%s1081_s28 + $0x78] sm:$0xff]  }
  0x3b   : > { %v847_v37 = vpop.eup %846  ;;  %539 = vst.msk [vmem:[%s1223_s8] sm:$0xff] %vm538_vm0, %v506_v20  ;;  %v508_v23 = vmul.f32 %v845_v32, %v1113_v25  ;;  %866 = vpow2.f32 %v1182_v33  ;;  %v268_v48 = vmul.f32 %v745_v39, %v1086_v0  ;;  %v676_v49 = vmul.f32 -1.442695, %v1220_v35 }
  0x3c   : > { %v849_v40 = vpop.eup %848  ;;  %540 = vst.msk [vmem:[%s1223_s8 + $0x8] sm:$0xff] %vm538_vm0, %v507_v34  ;;  %v509_v41 = vmul.f32 %v847_v37, %v1116_v26  ;;  %868 = vpow2.f32 %v670_v42  ;;  %v1251_v51 = vadd.f32 %v1095_v9, %v267_v44  ;;  %v677_v52 = vmul.f32 -1.442695, %v1230_v24 }
  0x3d   : > { %v851_v25 = vpop.eup %850  ;;  %541 = vst.msk [vmem:[%s1223_s8 + $0x10] sm:$0xff] %vm538_vm0, %v508_v23  ;;  %v510_v33 = vmul.f32 %v849_v40, %v1119_v27  ;;  %870 = vpow2.f32 %v671_v46  ;;  %v1258_v54 = vadd.f32 %v1095_v9, %v268_v48  ;;  %v678_v56 = vmul.f32 -1.442695, %v1236_v43 }
  0x3e   : > { %v853_v26 = vpop.eup %852  ;;  %542 = vst.msk [vmem:[%s1223_s8 + $0x18] sm:$0xff] %vm538_vm0, %v509_v41  ;;  %v511_v42 = vmul.f32 %v851_v25, %v1122_v28  ;;  %872 = vpow2.f32 %v672_v60  ;;  %v679_v62 = vmul.f32 -1.442695, %v1243_v45  ;;  %v748_v12 = vunpack.c.l.bf16 %v770_v3 }
  0x3f   : > { %v855_v27 = vpop.eup %854  ;;  %543 = vst.msk [vmem:[%s1223_s8 + $0x20] sm:$0xff] %vm538_vm0, %v510_v33  ;;  %v512_v46 = vmul.f32 %v853_v26, %v1125_v29  ;;  %874 = vpow2.f32 %v673_v11  ;;  %v681_v5 = vmul.f32 -1.442695, %v1258_v54  ;;  %v749_v14 = vunpack.c.h.bf16 %v770_v3 }
  0x40   : > { %v857_v28 = vpop.eup %856  ;;  %544 = vst.msk [vmem:[%s1223_s8 + $0x28] sm:$0xff] %vm538_vm0, %v511_v42  ;;  %v513_v55 = vmul.f32 %v855_v27, %v1128_v30  ;;  %876 = vpow2.f32 %v674_v16  ;;  %v680_v30 = vmul.f32 -1.442695, %v1251_v51  ;;  %v752_v17 = vunpack.c.l.bf16 %v771_v7 }
  0x41   : > { %v859_v60 = vpop.eup %858  ;;  %545 = vst.msk [vmem:[%s1223_s8 + $0x30] sm:$0xff] %vm538_vm0, %v512_v46  ;;  %v514_v29 = vmul.f32 %v857_v28, %v1143_v47  ;;  %878 = vpow2.f32 %v675_v21  ;;  %v753_v21 = vunpack.c.h.bf16 %v771_v7  ;;  %v269_v32 = vmul.f32 %v748_v12, %v1086_v0 }
  0x42   : > { %v861_v63 = vpop.eup %860  ;;  %546 = vst.msk [vmem:[%s1223_s8 + $0x38] sm:$0xff] %vm538_vm0, %v513_v55  ;;  %v515_v2 = vmul.f32 %v859_v60, %v1146_v50  ;;  %880 = vpow2.f32 %v676_v49  ;;  %v756_v34 = vunpack.c.l.bf16 %v772_v15  ;;  %v270_v23 = vmul.f32 %v749_v14, %v1086_v0 }
  0x43   : > { %v863_v4 = vpop.eup %862  ;;  %547 = vst.msk [vmem:[%s1223_s8 + $0x40] sm:$0xff] %vm538_vm0, %v514_v29  ;;  %v516_v47 = vmul.f32 %v861_v63, %v1155_v57  ;;  %882 = vpow2.f32 %v677_v52  ;;  %v757_v39 = vunpack.c.h.bf16 %v772_v15  ;;  %v271_v44 = vmul.f32 %v752_v17, %v1086_v0 }
  0x44   : > { %v865_v6 = vpop.eup %864  ;;  %548 = vst.msk [vmem:[%s1223_s8 + $0x48] sm:$0xff] %vm538_vm0, %v515_v2  ;;  %v517_v50 = vmul.f32 %v863_v4, %v1158_v58  ;;  %884 = vpow2.f32 %v678_v56  ;;  %v272_v48 = vmul.f32 %v753_v21, %v1086_v0  ;;  %v1294_v49 = vadd.f32 %v1095_v9, %v269_v32 }
  0x45   : > { %v867_v8 = vpop.eup %866  ;;  %549 = vst.msk [vmem:[%s1223_s8 + $0x50] sm:$0xff] %vm538_vm0, %v516_v47  ;;  %v518_v11 = vmul.f32 %v865_v6, %v1161_v59  ;;  %886 = vpow2.f32 %v679_v62  ;;  %v273_v27 = vmul.f32 %v756_v34, %v1086_v0  ;;  %v1298_v28 = vadd.f32 %v1095_v9, %v270_v23 }
  0x46   : > { %v869_v57 = vpop.eup %868  ;;  %550 = vst.msk [vmem:[%s1223_s8 + $0x58] sm:$0xff] %vm538_vm0, %v517_v50  ;;  %v423_v13 = vadd.f32 1.0, %v867_v8  ;;  %888 = vpow2.f32 %v680_v30  ;;  %v274_v55 = vmul.f32 %v757_v39, %v1086_v0  ;;  %v1302_v29 = vadd.f32 %v1095_v9, %v271_v44 }
  0x47   : > { %v871_v16 = vpop.eup %870  ;;  %551 = vst.msk [vmem:[%s1223_s8 + $0x60] sm:$0xff] %vm538_vm0, %v518_v11  ;;  %v424_v58 = vadd.f32 1.0, %v869_v57  ;;  %890 = vpow2.f32 %v681_v5  ;;  %v1305_v2 = vadd.f32 %v1095_v9, %v272_v48  ;;  %v682_v4 = vmul.f32 -1.442695, %v1294_v49 }
  0x48   : > { %v873_v19 = vpop.eup %872  ;;  %892 = vrcp.f32 %v423_v13  ;;  %v425_v20 = vadd.f32 1.0, %v871_v16  ;;  %v1309_v0 = vadd.f32 %v1095_v9, %v273_v27  ;;  %v683_v6 = vmul.f32 -1.442695, %v1298_v28 }
  0x49   : > { %v875_v59 = vpop.eup %874  ;;  %894 = vrcp.f32 %v424_v58  ;;  %v426_v31 = vadd.f32 1.0, %v873_v19  ;;  %v1313_v50 = vadd.f32 %v1095_v9, %v274_v55  ;;  %v684_v11 = vmul.f32 -1.442695, %v1302_v29 }
  0x4a   : > { %v877_v36 = vpop.eup %876  ;;  %896 = vrcp.f32 %v425_v20  ;;  %v427_v37 = vadd.f32 1.0, %v875_v59  ;;  %v685_v13 = vmul.f32 -1.442695, %v1305_v2 }
  0x4b   : > { %v879_v40 = vpop.eup %878  ;;  %898 = vrcp.f32 %v426_v31  ;;  %v428_v41 = vadd.f32 1.0, %v877_v36 }
  0x4c   : > { %v881_v25 = vpop.eup %880  ;;  %900 = vrcp.f32 %v427_v37  ;;  %v429_v33 = vadd.f32 1.0, %v879_v40 }
  0x4d   : > { %v883_v26 = vpop.eup %882  ;;  %902 = vrcp.f32 %v428_v41  ;;  %v430_v42 = vadd.f32 1.0, %v881_v25 }
  0x4e   : > { %v885_v46 = vpop.eup %884  ;;  %904 = vrcp.f32 %v429_v33  ;;  %v431_v52 = vadd.f32 1.0, %v883_v26 }
  0x4f   : > { %v887_v56 = vpop.eup %886  ;;  %906 = vrcp.f32 %v430_v42  ;;  %v432_v60 = vadd.f32 1.0, %v885_v46 }
  0x50   : > { %v889_v62 = vpop.eup %888  ;;  %908 = vrcp.f32 %v431_v52  ;;  %v433_v63 = vadd.f32 1.0, %v887_v56 }
  0x51   : > { %v891_v30 = vpop.eup %890  ;;  %910 = vrcp.f32 %v432_v60  ;;  %v434_v3 = vadd.f32 1.0, %v889_v62 }
  0x52   : > { %v893_v47 = vpop.eup %892  ;;  %912 = vrcp.f32 %v433_v63  ;;  %v435_v5 = vadd.f32 1.0, %v891_v30 }
  0x53   : > { %v895_v7 = vpop.eup %894  ;;  %v519_v8 = vmul.f32 %v893_v47, %v1172_v10  ;;  %914 = vrcp.f32 %v434_v3  ;;  %v686_v10 = vmul.f32 -1.442695, %v1309_v0 }
  0x54   : > { %v897_v12 = vpop.eup %896  ;;  %v520_v57 = vmul.f32 %v895_v7, %v1176_v18  ;;  %916 = vrcp.f32 %v435_v5  ;;  %v687_v18 = vmul.f32 -1.442695, %v1313_v50 }
  0x55   : > { %v899_v14 = vpop.eup %898  ;;  %552 = vst.msk [vmem:[%s1223_s8 + $0x68] sm:$0xff] %vm538_vm0, %v519_v8  ;;  %v521_v9 = vmul.f32 %v897_v12, %v1179_v22  ;;  %918 = vpow2.f32 %v682_v4 }
  0x56   : > { %v901_v15 = vpop.eup %900  ;;  %553 = vst.msk [vmem:[%s1223_s8 + $0x70] sm:$0xff] %vm538_vm0, %v520_v57  ;;  %v522_v16 = vmul.f32 %v899_v14, %v1187_v38  ;;  %920 = vpow2.f32 %v683_v6 }
  0x57   : > { %v903_v58 = vpop.eup %902  ;;  %554 = vst.msk [vmem:[%s1223_s8 + $0x78] sm:$0xff] %vm538_vm0, %v521_v9  ;;  %v523_v17 = vmul.f32 %v901_v15, %v1196_v53  ;;  %922 = vpow2.f32 %v684_v11 }
  0x58   : > { %v905_v22 = vpop.eup %904  ;;  %555 = vst.msk [vmem:[%s1223_s8 + $0x80] sm:$0xff] %vm538_vm0, %v522_v16  ;;  %v524_v19 = vmul.f32 %v903_v58, %v1200_v61  ;;  %924 = vpow2.f32 %v685_v13 }
  0x59   : > { %v907_v38 = vpop.eup %906  ;;  %556 = vst.msk [vmem:[%s1223_s8 + $0x88] sm:$0xff] %vm538_vm0, %v523_v17  ;;  %v525_v20 = vmul.f32 %v905_v22, %v1207_v1  ;;  %926 = vpow2.f32 %v686_v10 }
  0x5a   : > { %v909_v21 = vpop.eup %908  ;;  %557 = vst.msk [vmem:[%s1223_s8 + $0x90] sm:$0xff] %vm538_vm0, %v524_v19  ;;  %v526_v53 = vmul.f32 %v907_v38, %v1220_v35  ;;  %928 = vpow2.f32 %v687_v18 }
  0x5b   : > { %v911_v59 = vpop.eup %910  ;;  %558 = vst.msk [vmem:[%s1223_s8 + $0x98] sm:$0xff] %vm538_vm0, %v525_v20  ;;  %v527_v61 = vmul.f32 %v909_v21, %v1230_v24 }
  0x5c   : > { %v913_v31 = vpop.eup %912  ;;  %559 = vst.msk [vmem:[%s1223_s8 + $0xa0] sm:$0xff] %vm538_vm0, %v526_v53  ;;  %v528_v1 = vmul.f32 %v911_v59, %v1236_v43 }
  0x5d   : > { %v915_v32 = vpop.eup %914  ;;  %560 = vst.msk [vmem:[%s1223_s8 + $0xa8] sm:$0xff] %vm538_vm0, %v527_v61  ;;  %v529_v34 = vmul.f32 %v913_v31, %v1243_v45 }
  0x5e   : > { %v917_v36 = vpop.eup %916  ;;  %561 = vst.msk [vmem:[%s1223_s8 + $0xb0] sm:$0xff] %vm538_vm0, %v528_v1  ;;  %v530_v35 = vmul.f32 %v915_v32, %v1251_v51 }
  0x5f   : > { %v919_v37 = vpop.eup %918  ;;  %562 = vst.msk [vmem:[%s1223_s8 + $0xb8] sm:$0xff] %vm538_vm0, %v529_v34  ;;  %v531_v24 = vmul.f32 %v917_v36, %v1258_v54 }
  0x60   : > { %v921_v23 = vpop.eup %920  ;;  %563 = vst.msk [vmem:[%s1223_s8 + $0xc0] sm:$0xff] %vm538_vm0, %v530_v35  ;;  %v436_v39 = vadd.f32 1.0, %v919_v37 }
  0x61   : > { %v923_v43 = vpop.eup %922  ;;  %564 = vst.msk [vmem:[%s1223_s8 + $0xc8] sm:$0xff] %vm538_vm0, %v531_v24  ;;  %v437_v40 = vadd.f32 1.0, %v921_v23 }
  0x62   : > { %v925_v41 = vpop.eup %924  ;;  %930 = vrcp.f32 %v436_v39  ;;  %v438_v45 = vadd.f32 1.0, %v923_v43 }
  0x63   : > { %v927_v44 = vpop.eup %926  ;;  %932 = vrcp.f32 %v437_v40  ;;  %v439_v51 = vadd.f32 1.0, %v925_v41 }
  0x64   : > { %v929_v25 = vpop.eup %928  ;;  %934 = vrcp.f32 %v438_v45  ;;  %v440_v54 = vadd.f32 1.0, %v927_v44 }
  0x65   : > { %936 = vrcp.f32 %v439_v51  ;;  %v441_v33 = vadd.f32 1.0, %v929_v25 }
  0x66   : > { %938 = vrcp.f32 %v440_v54 }
  0x67   : > { %940 = vrcp.f32 %v441_v33 }
  0x6c   : > { %v931_v48 = vpop.eup %930 }
  0x6d   : > { %v933_v26 = vpop.eup %932  ;;  %v532_v42 = vmul.f32 %v931_v48, %v1294_v49 }
  0x6e   : > { %v935_v27 = vpop.eup %934  ;;  %v533_v46 = vmul.f32 %v933_v26, %v1298_v28 }
  0x6f   : > { %v937_v52 = vpop.eup %936  ;;  %565 = vst.msk [vmem:[%s1223_s8 + $0xd0] sm:$0xff] %vm538_vm0, %v532_v42  ;;  %v534_v55 = vmul.f32 %v935_v27, %v1302_v29 }
  0x70   : > { %v939_v56 = vpop.eup %938  ;;  %566 = vst.msk [vmem:[%s1223_s8 + $0xd8] sm:$0xff] %vm538_vm0, %v533_v46  ;;  %v535_v49 = vmul.f32 %v937_v52, %v1305_v2 }
  0x71   : > { %v941_v60 = vpop.eup %940  ;;  %567 = vst.msk [vmem:[%s1223_s8 + $0xe0] sm:$0xff] %vm538_vm0, %v534_v55  ;;  %v536_v28 = vmul.f32 %v939_v56, %v1309_v0 }
  0x72   : > { %568 = vst.msk [vmem:[%s1223_s8 + $0xe8] sm:$0xff] %vm538_vm0, %v535_v49  ;;  %v537_v29 = vmul.f32 %v941_v60, %v1313_v50 }
  0x73   : > { %569 = vst.msk [vmem:[%s1223_s8 + $0xf0] sm:$0xff] %vm538_vm0, %v536_v28 }
  0x74   : > { %570 = vst.msk [vmem:[%s1223_s8 + $0xf8] sm:$0xff] %vm538_vm0, %v537_v29 }
  0x75   : > { %955 = shalt.err (!%p952_p3)
}
  0x76   : > { %s956_s27 = scalar_lea.hbm %s1374_s17, 4096  ;;  %s960_s30 = scalar_lea.hbm %s1431_s3, 8192 }
  0x77   : > { %p957_p4 = scmp.ne.s32.totalorder %s1374_s17, %s956_s27  ;;  %p961_p9 = scmp.lt.u32.totalorder %s1374_s17, %s1431_s3 }
  0x78   : > { %p962_p10 = scmp.lt.u32.totalorder %s960_s30, %s956_s27  ;;  %p964_p12 = scmp.lt.u32.totalorder %s956_s27, %s1374_s17 }
  0x79   : > { %p958_p7 = pnand %p957_p4, %p1067_p5 }
  0x7a   : > { %p963_p11 = por %p962_p10, %p961_p9 }
  0x7b   : > { %p959_p8 = pneg %p958_p7 }
  0x7c   : > { %p965_p13 = por %p964_p12, %p963_p11 }
  0x7e   : > { %p966_p0 = pnand %p965_p13, %p959_p8 }
  0x80   : > { %969 = shalt.err (!%p966_p0)
}
  0x81   : > { %s1007_s6 = smov 128   ;;  %s1008_s7 = smov 8  }
  0x82   : > { %773 = dma.vmem_to_hbm [thread:$0]  (%p1067_p5), %s1376_s10, 4096, %s1374_s17, %s1387_s19, %s1007_s6, %s1007_s6, %s1008_s7  }
  0x83 PF: > { %p779_p1 = scmp.ge.s32.totalorder %s1004_s15, 2  ;;  %s600_s8 = sand.u32 1, %s992_s12  }
  0x84   : > { %s601_s9 = scalar_lea.sflag [#allocation3], %s600_s8 }
  0x85   : > { %p776_p2 = pnand %p779_p1, %p1071_p6 }
  0x87   : > { %987 = dma.done.wait (!%p776_p2), %s601_s9, 4096  }
  0x88   : > { %989 = vsyncadd (!%p776_p2), %s601_s9, 4294963200  ;;  %p13_p3 = scmp.ge.s32.totalorder %s1054_s18, 4   ;;  %s1434_s12 = smov %s996_s13 }
  0x89   : > { %s1435_s13 = smov %s1000_s14  ;;  %s1436_s14 = smov %s1065_s21 }
  0x8a   : > { %s1437_s15 = smov %s1054_s18  ;;  %15 = sbr.rel (!%p13_p3) target bundleno = 3 (0x3), region = 67 }
  0x91   :  { %606 = vsyncpa [#allocation3], 1 }
  0x92   :  { %608 = vsyncpa [#allocation3 + $0x1], 1 }

// kernel: bottleneck_csp_forward.10
= control target key start
LH: loop header
LB: loop body
LE: loop exit
PB: predicated region body
PF: predicated region fallthrough
CT: control target
= control target key end

     0   :  { %s2174_s24 = smov 0   ;;  %s2885_s0 = inlined_call_operand.vmem [shape: bf16[512,16], index: 0, kind: input, shape index: {}]   ;;  %s2886_s1 = inlined_call_operand.vmem [shape: bf16[512,16], index: 1, kind: input, shape index: {}]   ;;  %s2887_s2 = inlined_call_operand.vmem [shape: f32[1,32], index: 2, kind: input, shape index: {}]   ;;  %s2888_s3 = inlined_call_operand.vmem [shape: f32[1,32], index: 3, kind: input, shape index: {}]   ;;  %s2889_s4 = inlined_call_operand.vmem [shape: bf16[32,32], index: 4, kind: input, shape index: {}]   ;;  %s2890_s5 = inlined_call_operand.vmem [shape: bf16[512,32], index: 5, kind: output, shape index: {0}]   ;;  %s2891_s6 = inlined_call_operand.vmem [shape: f32[1,32], index: 6, kind: output, shape index: {1}]   ;;  %s2892_s7 = inlined_call_operand.vmem [shape: f32[1,32], index: 7, kind: output, shape index: {2}]  }
   0x1 LB: > { %s1558_s25 = sadd.s32 4294967295, %s2130_s24   ;;  %p1562_p0 = scmp.ge.s32.totalorder %s2130_s24, 1  ;;  %s2130_s24 = sphi %s2174_s24, %s18_s24  }
   0x2   : > { %p244_p1 = scmp.lt.s32.totalorder %s2130_s24, 3 }
   0x4   : > { %p245_p2 = pnand %p1562_p0, %p244_p1 }
   0x6   : > { %248 = sbr.rel (%p245_p2) target bundleno = 519 (0x207), region = 40 }
   0xd   : > { %s1563_s26 = sshll.u32 %s1558_s25, 5  ;;  %p1569_p4 = scmp.ne.s32.totalorder %s1558_s25, 0 }
   0xe   : > { %p282_p3 = scmp.lt.s32.totalorder %s1563_s26, 63  ;;  %vm304_vm0 = vcmask (!%p1569_p4), 253952   ;;  %v2132_v0 = vmov (!%p1569_p4), 0.0  }
   0xf   : > { %303 = sbr.rel (%p1569_p4) target bundleno = 22 (0x16), region = 44  ;;  %305 = vst.msk [vmem:[%s2891_s6] sm:$0x1] (!%p1569_p4), %vm304_vm0, %v2132_v0  ;;  %306 = vst.msk [vmem:[%s2892_s7] sm:$0x1] (!%p1569_p4), %vm304_vm0, %v2132_v0 }
  0x10   : > { %s2903_s26 = smov (!%p282_p3, %s1563_s26), 63 }
  0x11   : > { %s1564_s27 = sshll.u32 %s2903_s26, 2 }
  0x12   : > { %s2185_s30 = scalar_lea.vmem %s2885_s0, %s1564_s27  ;;  %s2190_s10 = scalar_lea.vmem %s2886_s1, %s1564_s27 }
  0x13   : > { %s2195_s13 = scalar_lea.vmem %s2890_s5, %s1564_s27 }
  0x16 PF: > { %v1832_v1 = vld [vmem:[%s2190_s10 + $0x10] sm:$0xff]   ;;  %v1753_v2 = vld [vmem:[%s2190_s10] sm:$0xff]   ;;  %v1833_v3 = vld [vmem:[%s2190_s10 + $0x18] sm:$0xff]   ;;  %s2133_s18 = smov 16   ;;  %vm563_vm1 = vcmask 130048   ;;  %vm930_vm2 = vcmask 261120  }
  0x17   : > { %v1762_v4 = vunpack.c.l.bf16 %v1832_v1  ;;  %v1763_v5 = vunpack.c.h.bf16 %v1832_v1  ;;  %v1754_v6 = vunpack.c.l.bf16 %v1753_v2  ;;  %v1755_v7 = vunpack.c.h.bf16 %v1753_v2  ;;  %v1831_v8 = vld [vmem:[%s2190_s10 + $0x8] sm:$0xff]   ;;  %v1834_v14 = vld [vmem:[%s2190_s10 + $0x20] sm:$0xff]   ;;  %v1837_v23 = vld [vmem:[%s2190_s10 + $0x38] sm:$0xff]  }
  0x18   : > { %v1835_v9 = vld [vmem:[%s2190_s10 + $0x28] sm:$0xff]   ;;  %v1766_v10 = vunpack.c.l.bf16 %v1833_v3  ;;  %v1767_v11 = vunpack.c.h.bf16 %v1833_v3  ;;  %v1758_v12 = vunpack.c.l.bf16 %v1831_v8  ;;  %v1759_v13 = vunpack.c.h.bf16 %v1831_v8  ;;  %v1836_v24 = vld [vmem:[%s2190_s10 + $0x30] sm:$0xff]   ;;  %v1838_v32 = vld [vmem:[%s2190_s10 + $0x40] sm:$0xff]  }
  0x19   : > { %v1924_v15 = vpack.i.bf16 %v1763_v5, %v1762_v4  ;;  %v1914_v16 = vpack.i.bf16 %v1755_v7, %v1754_v6  ;;  %v1774_v17 = vunpack.c.l.bf16 %v1835_v9  ;;  %v1775_v18 = vunpack.c.h.bf16 %v1835_v9  ;;  %v1839_v27 = vld [vmem:[%s2190_s10 + $0x48] sm:$0xff]   ;;  %v1841_v39 = vld [vmem:[%s2190_s10 + $0x58] sm:$0xff]   ;;  %v1840_v40 = vld [vmem:[%s2190_s10 + $0x50] sm:$0xff]  }
  0x1a   : > { %v1929_v19 = vpack.i.bf16 %v1767_v11, %v1766_v10  ;;  %v1919_v20 = vpack.i.bf16 %v1759_v13, %v1758_v12  ;;  %v1770_v21 = vunpack.c.l.bf16 %v1834_v14  ;;  %v1771_v22 = vunpack.c.h.bf16 %v1834_v14  ;;  %v1842_v47 = vld [vmem:[%s2190_s10 + $0x60] sm:$0xff]   ;;  %v1843_v48 = vld [vmem:[%s2190_s10 + $0x68] sm:$0xff]   ;;  %v1844_v55 = vld [vmem:[%s2190_s10 + $0x70] sm:$0xff]  }
  0x1b   : > { %1925 = vrot.lane.b32.xlu1 %v1924_v15, %s2133_s18  ;;  %1915 = vrot.lane.b32.xlu0 %v1914_v16, %s2133_s18  ;;  %v1939_v25 = vpack.i.bf16 %v1775_v18, %v1774_v17  ;;  %v1782_v26 = vunpack.c.l.bf16 %v1837_v23  ;;  %v1783_v29 = vunpack.c.h.bf16 %v1837_v23  ;;  %v1778_v30 = vunpack.c.l.bf16 %v1836_v24  ;;  %v1845_v56 = vld [vmem:[%s2190_s10 + $0x78] sm:$0xff]   ;;  %v1994_v1 = vld [vmem:[%s2889_s4] sm:$0xff]  }
  0x1c   : > { %v1934_v28 = vpack.i.bf16 %v1771_v22, %v1770_v21  ;;  %v1779_v31 = vunpack.c.h.bf16 %v1836_v24  ;;  %v1790_v33 = vunpack.c.l.bf16 %v1839_v27  ;;  %v1791_v34 = vunpack.c.h.bf16 %v1839_v27  ;;  %1864 = vmatprep.subr.bf16.mxu0 %v1994_v1  ;;  %1900 = vmatprep.subr.bf16.mxu1 %v1994_v1  ;;  %v1995_v2 = vld [vmem:[%s2889_s4 + $0x8] sm:$0xff]   ;;  %v1817_v4 = vld [vmem:[%s2185_s30 + $0x10] sm:$0xff]   ;;  %v1818_v11 = vld [vmem:[%s2185_s30 + $0x18] sm:$0xff]  }
  0x1d   : > { %v1949_v35 = vpack.i.bf16 %v1783_v29, %v1782_v26  ;;  %v1786_v37 = vunpack.c.l.bf16 %v1838_v32  ;;  %v1787_v38 = vunpack.c.h.bf16 %v1838_v32  ;;  %v1798_v42 = vunpack.c.l.bf16 %v1841_v39  ;;  %1865 = vmatpush3.bf16.msra.mxu0 %v1994_v1  ;;  %1902 = vmatpush3.bf16.msra.mxu1 %v1994_v1  ;;  %v2248_v12 = vld [vmem:[%s2887_s2] ss:$0 sm:$0xff]  ;;  %v1816_v16 = vld [vmem:[%s2185_s30 + $0x8] sm:$0xff]  }
  0x1e   : > { %v1944_v36 = vpack.i.bf16 %v1779_v31, %v1778_v30  ;;  %v1959_v41 = vpack.i.bf16 %v1791_v34, %v1790_v33  ;;  %v1799_v44 = vunpack.c.h.bf16 %v1841_v39  ;;  %v1794_v45 = vunpack.c.l.bf16 %v1840_v40  ;;  %1866 = vmatprep.subr.bf16.mxu0 %v1995_v2  ;;  %1901 = vmatprep.subr.bf16.mxu1 %v1995_v2  ;;  %v2257_v22 = vld [vmem:[%s2888_s3] ss:$0 sm:$0xff]  ;;  %v1820_v31 = vld [vmem:[%s2185_s30 + $0x28] sm:$0xff]   ;;  %v1822_v39 = vld [vmem:[%s2185_s30 + $0x38] sm:$0xff]  }
  0x1f   : > { %1930 = vrot.lane.b32.xlu1 %v1929_v19, %s2133_s18  ;;  %1920 = vrot.lane.b32.xlu0 %v1919_v20, %s2133_s18  ;;  %v1954_v43 = vpack.i.bf16 %v1787_v38, %v1786_v37  ;;  %v1795_v46 = vunpack.c.h.bf16 %v1840_v40  ;;  %v1802_v49 = vunpack.c.l.bf16 %v1842_v47  ;;  %v1803_v50 = vunpack.c.h.bf16 %v1842_v47  ;;  %v2261_v26 = vld [vmem:[%s2185_s30] sm:$0xff]  }
  0x20   : > { %v1969_v51 = vpack.i.bf16 %v1799_v44, %v1798_v42  ;;  %v1806_v53 = vunpack.c.l.bf16 %v1843_v48  ;;  %v1807_v54 = vunpack.c.h.bf16 %v1843_v48  ;;  %v1810_v58 = vunpack.c.l.bf16 %v1844_v55  ;;  %v1819_v34 = vld [vmem:[%s2185_s30 + $0x20] sm:$0xff]  }
  0x21   : > { %v1964_v52 = vpack.i.bf16 %v1795_v46, %v1794_v45  ;;  %v1974_v57 = vpack.i.bf16 %v1803_v50, %v1802_v49  ;;  %v1811_v60 = vunpack.c.h.bf16 %v1844_v55  ;;  %v1814_v61 = vunpack.c.l.bf16 %v1845_v56  ;;  %1867 = vmatpush3.bf16.msra.mxu0 %v1995_v2  ;;  %1903 = vmatpush3.bf16.msra.mxu1 %v1995_v2  ;;  %v2279_v45 = vld [vmem:[%s2185_s30 + $0x30] sm:$0xff]  }
  0x22   : > { %v1979_v59 = vpack.i.bf16 %v1807_v54, %v1806_v53  ;;  %v1815_v62 = vunpack.c.h.bf16 %v1845_v56  ;;  %v1698_v7 = vunpack.c.l.bf16 %v1817_v4  ;;  %v1699_v9 = vunpack.c.h.bf16 %v1817_v4  ;;  %v2286_v54 = vld [vmem:[%s2185_s30 + $0x48] sm:$0xff]  }
  0x23   : > { %1940 = vrot.lane.b32.xlu1 %v1939_v25, %s2133_s18  ;;  %1935 = vrot.lane.b32.xlu0 %v1934_v28, %s2133_s18  ;;  %v1984_v63 = vpack.i.bf16 %v1811_v60, %v1810_v58  ;;  %v1702_v18 = vunpack.c.l.bf16 %v1818_v11  ;;  %v1703_v21 = vunpack.c.h.bf16 %v1818_v11  ;;  %v1694_v25 = vunpack.c.l.bf16 %v1816_v16 }
  0x24   : > { %v1989_v0 = vpack.i.bf16 %v1815_v62, %v1814_v61  ;;  %v1695_v29 = vunpack.c.h.bf16 %v1816_v16  ;;  %v1691_v37 = vunpack.c.h.bf16 %v2261_v26  ;;  %v1710_v42 = vunpack.c.l.bf16 %v1820_v31 }
  0x25   : > { %v1706_v48 = vunpack.c.l.bf16 %v1819_v34  ;;  %v1707_v49 = vunpack.c.h.bf16 %v1819_v34  ;;  %v1718_v53 = vunpack.c.l.bf16 %v1822_v39  ;;  %v1714_v58 = vunpack.c.l.bf16 %v2279_v45 }
  0x26   : > { %v1715_v2 = vunpack.c.h.bf16 %v2279_v45  ;;  %v1727_v4 = vunpack.c.h.bf16 %v2286_v54  ;;  %vm1268_vm3 = vcmask 257024   ;;  %vm1372_vm4 = vcmask 253952  }
  0x27   : > { %1950 = vrot.lane.b32.xlu1 %v1949_v35, %s2133_s18  ;;  %1945 = vrot.lane.b32.xlu0 %v1944_v36, %s2133_s18  ;;  %v1690_v36 = vunpack.c.l.bf16 %v2261_v26 }
  0x2b   : > { %1960 = vrot.lane.b32.xlu1 %v1959_v41, %s2133_s18  ;;  %1955 = vrot.lane.b32.xlu0 %v1954_v43, %s2133_s18  ;;  %v1711_v43 = vunpack.c.h.bf16 %v1820_v31 }
  0x2f   : > { %1970 = vrot.lane.b32.xlu1 %v1969_v51, %s2133_s18  ;;  %1965 = vrot.lane.b32.xlu0 %v1964_v52, %s2133_s18 }
  0x33   : > { %1975 = vrot.lane.b32.xlu0 %v1974_v57, %s2133_s18  ;;  %1980 = vrot.lane.b32.xlu1 %v1979_v59, %s2133_s18  ;;  %v1719_v57 = vunpack.c.h.bf16 %v1822_v39  ;;  %v2291_v59 = vld [vmem:[%s2185_s30 + $0x40] sm:$0xff]  }
  0x37   : > { %1985 = vrot.lane.b32.xlu0 %v1984_v63, %s2133_s18  ;;  %1990 = vrot.lane.b32.xlu1 %v1989_v0, %s2133_s18 }
  0x8d   : > { %v1926_v3 = vpop.permute.xlu1 %1925  ;;  %v2242_v5 = vpop.permute.xlu0 %1915 }
  0x8e   : > { %v1927_v6 = vunpack.i.l.bf16 %v1926_v3  ;;  %v1928_v8 = vunpack.i.h.bf16 %v1926_v3  ;;  %v1726_v3 = vunpack.c.l.bf16 %v2286_v54 }
  0x90   : > { %v568_v13 = vsel %vm563_vm1, %v1698_v7, %v1927_v6  ;;  %v569_v14 = vsel %vm563_vm1, %v1699_v9, %v1928_v8  ;;  %v1722_v9 = vunpack.c.l.bf16 %v2291_v59 }
  0x91   : > { %v1931_v10 = vpop.permute.xlu1 %1930  ;;  %v1921_v15 = vpop.permute.xlu0 %1920  ;;  %v607_v19 = vmul.f32 %v2248_v12, %v568_v13  ;;  %v608_v23 = vmul.f32 %v2248_v12, %v569_v14  ;;  %v2314_v14 = vld [vmem:[%s2185_s30 + $0x58] sm:$0xff]  }
  0x92   : > { %v1932_v17 = vunpack.i.l.bf16 %v1931_v10  ;;  %v1933_v20 = vunpack.i.h.bf16 %v1931_v10  ;;  %v1922_v24 = vunpack.i.l.bf16 %v1921_v15  ;;  %v1923_v28 = vunpack.i.h.bf16 %v1921_v15 }
  0x93   : > { %v2266_v32 = vadd.f32 %v2257_v22, %v607_v19  ;;  %v2271_v35 = vadd.f32 %v2257_v22, %v608_v23  ;;  %v1917_v19 = vunpack.i.l.bf16 %v2242_v5  ;;  %v1723_v23 = vunpack.c.h.bf16 %v2291_v59 }
  0x94   : > { %v570_v27 = vsel %vm563_vm1, %v1702_v18, %v1932_v17  ;;  %v571_v33 = vsel %vm563_vm1, %v1703_v21, %v1933_v20  ;;  %v566_v38 = vsel %vm563_vm1, %v1694_v25, %v1922_v24  ;;  %v567_v47 = vsel %vm563_vm1, %v1695_v29, %v1923_v28  ;;  %v2326_v24 = vld [vmem:[%s2185_s30 + $0x50] sm:$0xff]  }
  0x95   : > { %v1941_v30 = vpop.permute.xlu1 %1940  ;;  %v609_v40 = vmul.f32 %v2248_v12, %v570_v27  ;;  %v1936_v44 = vpop.permute.xlu0 %1935  ;;  %v610_v46 = vmul.f32 %v2248_v12, %v571_v33  ;;  %v1576_v50 = vmul.f32 -1.442695, %v2266_v32  ;;  %v605_v51 = vmul.f32 %v2248_v12, %v566_v38 }
  0x96   : > { %v1942_v41 = vunpack.i.l.bf16 %v1941_v30  ;;  %v1943_v52 = vunpack.i.h.bf16 %v1941_v30  ;;  %v1577_v55 = vmul.f32 -1.442695, %v2271_v35  ;;  %v1938_v56 = vunpack.i.h.bf16 %v1936_v44 }
  0x97   : > { %v2294_v60 = vadd.f32 %v2257_v22, %v609_v40  ;;  %v606_v61 = vmul.f32 %v2248_v12, %v567_v47  ;;  %v1937_v63 = vunpack.i.l.bf16 %v1936_v44  ;;  %v2299_v1 = vadd.f32 %v2257_v22, %v610_v46  ;;  %v2351_v44 = vld [vmem:[%s2185_s30 + $0x60] sm:$0xff]   ;;  %v2354_v46 = vld [vmem:[%s2185_s30 + $0x68] sm:$0xff]  }
  0x98   : > { %v574_v62 = vsel %vm563_vm1, %v1710_v42, %v1942_v41  ;;  %1996 = vpow2.f32 %v1576_v50  ;;  %v2305_v6 = vadd.f32 %v2257_v22, %v605_v51  ;;  %v575_v7 = vsel %vm563_vm1, %v1711_v43, %v1943_v52 }
  0x99   : > { %v1951_v0 = vpop.permute.xlu1 %1950  ;;  %v2308_v8 = vpop.permute.xlu0 %1945  ;;  %1998 = vpow2.f32 %v1577_v55  ;;  %v613_v10 = vmul.f32 %v2248_v12, %v574_v62  ;;  %v573_v11 = vsel %vm563_vm1, %v1707_v49, %v1938_v56  ;;  %v1578_v15 = vmul.f32 -1.442695, %v2294_v60 }
  0x9a   : > { %v1952_v13 = vunpack.i.l.bf16 %v1951_v0  ;;  %v2318_v16 = vadd.f32 %v2257_v22, %v606_v61  ;;  %v572_v17 = vsel %vm563_vm1, %v1706_v48, %v1937_v63  ;;  %v1953_v18 = vunpack.i.h.bf16 %v1951_v0 }
  0x9b   : > { %v1579_v20 = vmul.f32 -1.442695, %v2299_v1  ;;  %v614_v21 = vmul.f32 %v2248_v12, %v575_v7  ;;  %v1918_v25 = vunpack.i.h.bf16 %v2242_v5  ;;  %v1574_v27 = vmul.f32 -1.442695, %v2305_v6  ;;  %v2377_v7 = vld [vmem:[%s2185_s30 + $0x70] sm:$0xff]  }
  0x9c   : > { %v612_v28 = vmul.f32 %v2248_v12, %v573_v11  ;;  %v1734_v29 = vunpack.c.l.bf16 %v2314_v14  ;;  %v2333_v30 = vadd.f32 %v2257_v22, %v613_v10  ;;  %v611_v31 = vmul.f32 %v2248_v12, %v572_v17 }
  0x9d   : > { %v578_v33 = vsel %vm563_vm1, %v1718_v53, %v1952_v13  ;;  %v1735_v34 = vunpack.c.h.bf16 %v2314_v14  ;;  %2000 = vpow2.f32 %v1578_v15  ;;  %v1575_v5 = vmul.f32 -1.442695, %v2318_v16  ;;  %v2340_v39 = vpop.permute.xlu0 %1955  ;;  %v1961_v53 = vpop.permute.xlu1 %1960 }
  0x9e   : > { %v579_v38 = vsel %vm563_vm1, %v1719_v57, %v1953_v18  ;;  %v1730_v40 = vunpack.c.l.bf16 %v2326_v24  ;;  %v564_v41 = vsel %vm563_vm1, %v1690_v36, %v1917_v19  ;;  %2002 = vpow2.f32 %v1579_v20 }
  0x9f   : > { %v2347_v42 = vadd.f32 %v2257_v22, %v614_v21  ;;  %v1731_v43 = vunpack.c.h.bf16 %v2326_v24  ;;  %v565_v47 = vsel %vm563_vm1, %v1691_v37, %v1918_v25  ;;  %2004 = vpow2.f32 %v1574_v27 }
  0xa0   : > { %v2360_v48 = vadd.f32 %v2257_v22, %v612_v28  ;;  %v617_v36 = vmul.f32 %v2248_v12, %v578_v33  ;;  %v1582_v49 = vmul.f32 -1.442695, %v2333_v30  ;;  %v2365_v50 = vadd.f32 %v2257_v22, %v611_v31 }
  0xa1   : > { %v618_v51 = vmul.f32 %v2248_v12, %v579_v38  ;;  %v1947_v52 = vunpack.i.l.bf16 %v2308_v8  ;;  %2006 = vpow2.f32 %v1575_v5  ;;  %v1738_v37 = vunpack.c.l.bf16 %v2351_v44  ;;  %v1966_v17 = vpop.permute.xlu0 %1965  ;;  %v1971_v45 = vpop.permute.xlu1 %1970 }
  0xa2   : > { %v1997_v26 = vpop.eup %1996  ;;  %v1739_v55 = vunpack.c.h.bf16 %v2351_v44  ;;  %v1742_v56 = vunpack.c.l.bf16 %v2354_v46  ;;  %v603_v61 = vmul.f32 %v2248_v12, %v564_v41  ;;  %v1583_v62 = vmul.f32 -1.442695, %v2347_v42 }
  0xa3   : > { %v1999_v57 = vpop.eup %1998  ;;  %v1948_v63 = vunpack.i.h.bf16 %v2308_v8  ;;  %v1743_v0 = vunpack.c.h.bf16 %v2354_v46  ;;  %v604_v10 = vmul.f32 %v2248_v12, %v565_v47  ;;  %v1581_v11 = vmul.f32 -1.442695, %v2360_v48 }
  0xa4   : > { %v2382_v13 = vadd.f32 %v2257_v22, %v617_v36  ;;  %v1962_v15 = vunpack.i.l.bf16 %v1961_v53  ;;  %2008 = vpow2.f32 %v1582_v49  ;;  %v1580_v18 = vmul.f32 -1.442695, %v2365_v50 }
  0xa5   : > { %v2386_v19 = vadd.f32 %v2257_v22, %v618_v51  ;;  %v576_v8 = vsel %vm563_vm1, %v1714_v58, %v1947_v52  ;;  %v774_v20 = vadd.f32 1.0, %v1997_v26  ;;  %v1963_v21 = vunpack.i.h.bf16 %v1961_v53 }
  0xa6   : > { %2896 = vst [vmem:[#allocation2_spill] sm:$0xff] %v2382_v13  ;;  %v1746_v25 = vunpack.c.l.bf16 %v2377_v7  ;;  %v1747_v27 = vunpack.c.h.bf16 %v2377_v7  ;;  %v775_v28 = vadd.f32 1.0, %v1999_v57  ;;  %2010 = vpow2.f32 %v1583_v62  ;;  %v1976_v57 = vpop.permute.xlu0 %1975 }
  0xa7   : > { %2897 = vst [vmem:[#allocation3_spill] sm:$0xff] %v2386_v19  ;;  %v577_v31 = vsel %vm563_vm1, %v1715_v2, %v1948_v63  ;;  %v2397_v33 = vadd.f32 %v2257_v22, %v603_v61  ;;  %v2001_v5 = vpop.eup %2000  ;;  %2012 = vpow2.f32 %v1581_v11  ;;  %v1586_v38 = vmul.f32 -1.442695, %v2382_v13 }
  0xa8   : > { %v615_v58 = vmul.f32 %v2248_v12, %v576_v8  ;;  %v582_v41 = vsel %vm563_vm1, %v1726_v3, %v1962_v15  ;;  %v2003_v47 = vpop.eup %2002  ;;  %2014 = vpow2.f32 %v1580_v18  ;;  %v1587_v36 = vmul.f32 -1.442695, %v2386_v19 }
  0xa9   : > { %v1967_v49 = vunpack.i.l.bf16 %v1966_v17  ;;  %v2406_v2 = vadd.f32 %v2257_v22, %v604_v10  ;;  %v2005_v51 = vpop.eup %2004  ;;  %2016 = vrcp.f32 %v774_v20  ;;  %v616_v52 = vmul.f32 %v2248_v12, %v577_v31 }
  0xaa   : > { %v583_v53 = vsel %vm563_vm1, %v1727_v4, %v1963_v21  ;;  %v1968_v26 = vunpack.i.h.bf16 %v1966_v17  ;;  %2018 = vrcp.f32 %v775_v28  ;;  %v776_v3 = vadd.f32 1.0, %v2001_v5 }
  0xab   : > { %v621_v61 = vmul.f32 %v2248_v12, %v582_v41  ;;  %v1958_v62 = vunpack.i.h.bf16 %v2340_v39  ;;  %v2007_v63 = vpop.eup %2006  ;;  %v777_v11 = vadd.f32 1.0, %v2003_v47  ;;  %2020 = vpow2.f32 %v1586_v38 }
  0xac   : > { %v2415_v10 = vadd.f32 %v2257_v22, %v615_v58  ;;  %v1973_v15 = vunpack.i.h.bf16 %v1971_v45  ;;  %v622_v18 = vmul.f32 %v2248_v12, %v583_v53  ;;  %v1972_v54 = vunpack.i.l.bf16 %v1971_v45 }
  0xad   : > { %v584_v4 = vsel %vm563_vm1, %v1730_v40, %v1967_v49  ;;  %v1977_v17 = vunpack.i.l.bf16 %v1976_v57  ;;  %v772_v8 = vadd.f32 1.0, %v2005_v51  ;;  %2022 = vpow2.f32 %v1587_v36 }
  0xae   : > { %v2422_v20 = vadd.f32 %v2257_v22, %v616_v52  ;;  %v585_v21 = vsel %vm563_vm1, %v1731_v43, %v1968_v26  ;;  %v2009_v28 = vpop.eup %2008  ;;  %2024 = vrcp.f32 %v776_v3  ;;  %v773_v31 = vadd.f32 1.0, %v2007_v63 }
  0xaf   : > { %v2428_v5 = vadd.f32 %v2257_v22, %v621_v61  ;;  %v1978_v38 = vunpack.i.h.bf16 %v1976_v57  ;;  %2026 = vrcp.f32 %v777_v11  ;;  %v1584_v40 = vmul.f32 -1.442695, %v2415_v10 }
  0xb0   : > { %v587_v58 = vsel %vm563_vm1, %v1735_v34, %v1973_v15  ;;  %v623_v41 = vmul.f32 %v2248_v12, %v584_v4  ;;  %v2011_v47 = vpop.eup %2010  ;;  %v2436_v24 = vadd.f32 %v2257_v22, %v622_v18  ;;  %v586_v43 = vsel %vm563_vm1, %v1734_v29, %v1972_v54  ;;  %v1986_v4 = vpop.permute.xlu0 %1985 }
  0xb1   : > { %v624_v36 = vmul.f32 %v2248_v12, %v585_v21  ;;  %v588_v45 = vsel %vm563_vm1, %v1738_v37, %v1977_v17  ;;  %v2013_v49 = vpop.eup %2012  ;;  %2028 = vrcp.f32 %v772_v8  ;;  %v780_v51 = vadd.f32 1.0, %v2009_v28  ;;  %v1981_v37 = vpop.permute.xlu1 %1980 }
  0xb2   : > { %v1957_v34 = vunpack.i.l.bf16 %v2340_v39  ;;  %v581_v52 = vsel %vm563_vm1, %v1723_v23, %v1958_v62  ;;  %v2015_v53 = vpop.eup %2014  ;;  %2030 = vrcp.f32 %v773_v31  ;;  %v1590_v14 = vmul.f32 -1.442695, %v2428_v5 }
  0xb3   : > { %v626_v29 = vmul.f32 %v2248_v12, %v587_v58  ;;  %v589_v26 = vsel %vm563_vm1, %v1739_v55, %v1978_v38  ;;  %v2454_v57 = vpop.eup %2016  ;;  %v781_v3 = vadd.f32 1.0, %v2011_v47  ;;  %v625_v39 = vmul.f32 %v2248_v12, %v586_v43 }
  0xb4   : > { %v2458_v61 = vadd.f32 %v2257_v22, %v623_v41  ;;  %v627_v23 = vmul.f32 %v2248_v12, %v588_v45  ;;  %v2461_v62 = vpop.eup %2018  ;;  %v779_v63 = vadd.f32 1.0, %v2013_v49  ;;  %2032 = vpow2.f32 %v1584_v40 }
  0xb5   : > { %v1591_v11 = vmul.f32 -1.442695, %v2436_v24  ;;  %v2465_v44 = vadd.f32 %v2257_v22, %v624_v36  ;;  %v2467_v55 = vpop.eup %2020  ;;  %2034 = vrcp.f32 %v780_v51  ;;  %v580_v15 = vsel %vm563_vm1, %v1722_v9, %v1957_v34 }
  0xb6   : > { %v628_v18 = vmul.f32 %v2248_v12, %v589_v26  ;;  %v1982_v54 = vunpack.i.l.bf16 %v1981_v37  ;;  %v778_v17 = vadd.f32 1.0, %v2015_v53  ;;  %2036 = vpow2.f32 %v1590_v14 }
  0xb7   : > { %v2474_v8 = vadd.f32 %v2257_v22, %v626_v29  ;;  %v1983_v21 = vunpack.i.h.bf16 %v1981_v37  ;;  %v2476_v28 = vpop.eup %2022  ;;  %2038 = vrcp.f32 %v781_v3  ;;  %v2479_v31 = vadd.f32 %v2257_v22, %v625_v39 }
  0xb8   : > { %v1592_v59 = vmul.f32 -1.442695, %v2458_v61  ;;  %v2483_v9 = vadd.f32 %v2257_v22, %v627_v23  ;;  %v2485_v38 = vpop.eup %2024  ;;  %2040 = vrcp.f32 %v779_v63  ;;  %v619_v40 = vmul.f32 %v2248_v12, %v580_v15 }
  0xb9   : > { %v1593_v58 = vmul.f32 -1.442695, %v2465_v44  ;;  %v1987_v41 = vunpack.i.l.bf16 %v1986_v4  ;;  %v2489_v47 = vpop.eup %2026  ;;  %v1585_v43 = vmul.f32 -1.442695, %v2422_v20  ;;  %2042 = vpow2.f32 %v1591_v11 }
  0xba   : > { %v2493_v36 = vadd.f32 %v2257_v22, %v628_v18  ;;  %v590_v45 = vsel %vm563_vm1, %v1742_v56, %v1982_v54  ;;  %2044 = vrcp.f32 %v778_v17  ;;  %v620_v49 = vmul.f32 %v2248_v12, %v581_v52  ;;  %v1830_v18 = vld [vmem:[%s2185_s30 + $0x78] sm:$0xff]  }
  0xbb   : > { %v1595_v51 = vmul.f32 -1.442695, %v2474_v8  ;;  %v591_v34 = vsel %vm563_vm1, %v1743_v0, %v1983_v21  ;;  %v2503_v53 = vpop.eup %2028  ;;  %v1594_v14 = vmul.f32 -1.442695, %v2479_v31  ;;  %2046 = vpow2.f32 %v1592_v59  ;;  %v1991_v21 = vpop.permute.xlu1 %1990 }
  0xbc   : > { %v1596_v29 = vmul.f32 -1.442695, %v2483_v9  ;;  %v1988_v26 = vunpack.i.h.bf16 %v1986_v4  ;;  %v2507_v37 = vpop.eup %2030  ;;  %2048 = vpow2.f32 %v1593_v58  ;;  %v629_v56 = vmul.f32 %v2248_v12, %v590_v45 }
  0xbd   : > { %v592_v46 = vsel %vm563_vm1, %v1746_v25, %v1987_v41  ;;  %v2514_v0 = vadd.f32 %v2257_v22, %v619_v40  ;;  %2050 = vpow2.f32 %v1585_v43  ;;  %v1597_v52 = vmul.f32 -1.442695, %v2493_v36 }
  0xbe   : > { %v630_v3 = vmul.f32 %v2248_v12, %v591_v34  ;;  %v2033_v39 = vpop.eup %2032  ;;  %2052 = vpow2.f32 %v1595_v51  ;;  %v1572_v23 = vmul.f32 -1.442695, %v2397_v33  ;;  %v2520_v63 = vadd.f32 %v2257_v22, %v620_v49 }
  0xbf   : > { %v2522_v11 = vpop.eup %2034  ;;  %2054 = vpow2.f32 %v1594_v14  ;;  %v593_v25 = vsel %vm563_vm1, %v1747_v27, %v1988_v26  ;;  %v631_v15 = vmul.f32 %v2248_v12, %v592_v46  ;;  %v1573_v54 = vmul.f32 -1.442695, %v2406_v2 }
  0xc0   : > { %v2037_v4 = vpop.eup %2036  ;;  %2056 = vpow2.f32 %v1596_v29  ;;  %v2531_v17 = vadd.f32 %v2257_v22, %v629_v56  ;;  %v1588_v59 = vmul.f32 -1.442695, %v2514_v0  ;;  %v782_v58 = vadd.f32 1.0, %v2033_v39 }
  0xc1   : > { %v2534_v40 = vpop.eup %2038  ;;  %2058 = vpow2.f32 %v1597_v52  ;;  %v2537_v7 = vadd.f32 %v2257_v22, %v630_v3  ;;  %v632_v41 = vmul.f32 %v2248_v12, %v593_v25  ;;  %v1750_v43 = vunpack.c.l.bf16 %v1830_v18 }
  0xc2   : > { %v2539_v27 = vpop.eup %2040  ;;  %2060 = vpow2.f32 %v1572_v23  ;;  %v1589_v45 = vmul.f32 -1.442695, %v2520_v63  ;;  %v788_v51 = vadd.f32 1.0, %v2037_v4  ;;  %v2544_v34 = vadd.f32 %v2257_v22, %v631_v15 }
  0xc3   : > { %2898 = vst [vmem:[#allocation4_spill] sm:$0xff] %v2537_v7  ;;  %v2043_v49 = vpop.eup %2042  ;;  %v1992_v14 = vunpack.i.l.bf16 %v1991_v21  ;;  %2062 = vpow2.f32 %v1573_v54  ;;  %v1598_v26 = vmul.f32 -1.442695, %v2531_v17  ;;  %v1993_v56 = vunpack.i.h.bf16 %v1991_v21 }
  0xc4   : > { %v2546_v29 = vpop.eup %2044  ;;  %v1751_v46 = vunpack.c.h.bf16 %v1830_v18  ;;  %2064 = vpow2.f32 %v1588_v59  ;;  %v1599_v3 = vmul.f32 -1.442695, %v2537_v7  ;;  %v789_v23 = vadd.f32 1.0, %v2043_v49 }
  0xc5   : > { %v2047_v52 = vpop.eup %2046  ;;  %2066 = vrcp.f32 %v782_v58  ;;  %v2551_v25 = vadd.f32 %v2257_v22, %v632_v41  ;;  %v1600_v54 = vmul.f32 -1.442695, %v2544_v34  ;;  %v594_v4 = vsel %vm563_vm1, %v1750_v43, %v1992_v14 }
  0xc6   : > { %v2049_v39 = vpop.eup %2048  ;;  %2068 = vpow2.f32 %v1589_v45  ;;  %v790_v21 = vadd.f32 1.0, %v2047_v52  ;;  %v595_v18 = vsel %vm563_vm1, %v1751_v46, %v1993_v56  ;;  %v633_v45 = vmul.f32 %v2248_v12, %v594_v4 }
  0xc7   : > { %v2051_v15 = vpop.eup %2050  ;;  %2070 = vrcp.f32 %v788_v51  ;;  %v791_v58 = vadd.f32 1.0, %v2049_v39  ;;  %v1601_v41 = vmul.f32 -1.442695, %v2551_v25  ;;  %v634_v51 = vmul.f32 %v2248_v12, %v595_v18 }
  0xc8   : > { %v2053_v19 = vpop.eup %2052  ;;  %2072 = vpow2.f32 %v1598_v26  ;;  %v2560_v46 = vadd.f32 %v2257_v22, %v633_v45 }
  0xc9   : > { %v2055_v59 = vpop.eup %2054  ;;  %2074 = vpow2.f32 %v1599_v3  ;;  %v793_v56 = vadd.f32 1.0, %v2053_v19  ;;  %v2565_v39 = vadd.f32 %v2257_v22, %v634_v51 }
  0xca   : > { %v2057_v13 = vpop.eup %2056  ;;  %2076 = vrcp.f32 %v789_v23  ;;  %v1602_v18 = vmul.f32 -1.442695, %v2560_v46  ;;  %v792_v22 = vadd.f32 1.0, %v2055_v59 }
  0xcb   : > { %v2059_v49 = vpop.eup %2058  ;;  %2078 = vpow2.f32 %v1600_v54  ;;  %v794_v54 = vadd.f32 1.0, %v2057_v13 }
  0xcc   : > { %v2061_v7 = vpop.eup %2060  ;;  %2080 = vrcp.f32 %v790_v21  ;;  %v795_v21 = vadd.f32 1.0, %v2059_v49  ;;  %v868_v49 = vmul.f32 %v2503_v53, %v2305_v6  ;;  %v871_v6 = vmul.f32 %v2461_v62, %v2271_v35 }
  0xcd   : > { %v2063_v43 = vpop.eup %2062  ;;  %2082 = vrcp.f32 %v791_v58  ;;  %v770_v14 = vadd.f32 1.0, %v2061_v7 }
  0xce   : > { %v2065_v26 = vpop.eup %2064  ;;  %2084 = vpow2.f32 %v1601_v41  ;;  %v771_v52 = vadd.f32 1.0, %v2063_v43  ;;  %v1603_v41 = vmul.f32 -1.442695, %v2565_v39  ;;  %v783_v43 = vadd.f32 1.0, %v2051_v15 }
  0xcf   : > { %v2562_v3 = vpop.eup %2066  ;;  %2086 = vrcp.f32 %v770_v14  ;;  %v786_v23 = vadd.f32 1.0, %v2065_v26  ;;  %v869_v14 = vmul.f32 %v2507_v37, %v2318_v16  ;;  %v870_v15 = vmul.f32 %v2454_v57, %v2266_v32 }
  0xd0   : > { %v2069_v12 = vpop.eup %2068  ;;  %2088 = vrcp.f32 %v771_v52 }
  0xd1   : > { %v2071_v4 = vpop.eup %2070  ;;  %v787_v7 = vadd.f32 1.0, %v2069_v12  ;;  %2090 = vrcp.f32 %v786_v23 }
  0xd2   : > { %v2073_v19 = vpop.eup %2072  ;;  %2092 = vrcp.f32 %v793_v56 }
  0xd3   : > { %v2075_v58 = vpop.eup %2074  ;;  %2094 = vrcp.f32 %v787_v7  ;;  %v796_v23 = vadd.f32 1.0, %v2073_v19  ;;  %v884_v7 = vmul.f32 %v2071_v4, %v2428_v5  ;;  %v900_v5 = vpack.c.bf16 %v871_v6, %v870_v15 }
  0xd4   : > { %v2077_v45 = vpop.eup %2076  ;;  %2096 = vrcp.f32 %v794_v54 }
  0xd5   : > { %v2079_v51 = vpop.eup %2078  ;;  %2098 = vrcp.f32 %v795_v21  ;;  %v899_v21 = vpack.c.bf16 %v869_v14, %v868_v49  ;;  %v885_v19 = vmul.f32 %v2077_v45, %v2436_v24  ;;  %v785_v45 = vadd.f32 1.0, %v2476_v28 }
  0xd6   : > { %v2081_v13 = vpop.eup %2080  ;;  %2100 = vpow2.f32 %v1602_v18  ;;  %v798_v12 = vadd.f32 1.0, %v2079_v51  ;;  %v874_v14 = vmul.f32 %v2546_v29, %v2365_v50 }
  0xd7   : > { %v2083_v26 = vpop.eup %2082  ;;  %2102 = vpow2.f32 %v1603_v41  ;;  %v797_v41 = vadd.f32 1.0, %v2075_v58  ;;  %v886_v57 = vmul.f32 %v2081_v13, %v2458_v61  ;;  %v907_v24 = vpack.c.bf16 %v885_v19, %v884_v7 }
  0xd8   : > { %v2085_v56 = vpop.eup %2084  ;;  %2104 = vrcp.f32 %v792_v22  ;;  %v873_v13 = vmul.f32 %v2489_v47, %v2299_v1 }
  0xd9   : > { %v2087_v52 = vpop.eup %2086  ;;  %2106 = vrcp.f32 %v783_v43  ;;  %v799_v53 = vadd.f32 1.0, %v2085_v56  ;;  %v872_v43 = vmul.f32 %v2485_v38, %v2294_v60 }
  0xda   : > { %v2089_v59 = vpop.eup %2088  ;;  %v866_v54 = vmul.f32 %v2087_v52, %v2397_v33  ;;  %v887_v33 = vmul.f32 %v2083_v26, %v2465_v44  ;;  %2108 = vrcp.f32 %v796_v23  ;;  %v875_v26 = vmul.f32 %v2539_v27, %v2360_v48 }
  0xdb   : > { %v2091_v16 = vpop.eup %2090  ;;  %v867_v37 = vmul.f32 %v2089_v59, %v2406_v2  ;;  %2110 = vrcp.f32 %v798_v12  ;;  %v901_v56 = vpack.c.bf16 %v873_v13, %v872_v43 }
  0xdc   : > { %v2093_v18 = vpop.eup %2092  ;;  %v882_v32 = vmul.f32 %v2091_v16, %v2514_v0  ;;  %2112 = vrcp.f32 %v799_v53  ;;  %v784_v0 = vadd.f32 1.0, %v2467_v55  ;;  %v908_v44 = vpack.c.bf16 %v887_v33, %v886_v57  ;;  %v2900_v53 = vld [vmem:[#allocation2_spill] sm:$0xff] }
  0xdd   : > { %v2095_v22 = vpop.eup %2094  ;;  %v898_v51 = vpack.c.bf16 %v867_v37, %v866_v54  ;;  %2114 = vrcp.f32 %v797_v41  ;;  %v889_v47 = vmul.f32 %v2093_v18, %v2474_v8  ;;  %v902_v29 = vpack.c.bf16 %v875_v26, %v874_v14  ;;  %v2901_v37 = vld [vmem:[#allocation3_spill] sm:$0xff] }
  0xde   : > { %v2097_v35 = vpop.eup %2096  ;;  %v883_v62 = vmul.f32 %v2095_v22, %v2520_v63  ;;  %2116 = vrcp.f32 %v784_v0  ;;  %v877_v8 = vmul.f32 %v2534_v40, %v2347_v42 }
  0xdf   : > { %v2099_v2 = vpop.eup %2098  ;;  %1868 = vmatprep.mubr.msk.bf16.mxu0 %vm930_vm2, %v898_v51  ;;  %v890_v60 = vmul.f32 %v2097_v35, %v2483_v9  ;;  %2118 = vrcp.f32 %v785_v45 }
  0xe0   : > { %v2101_v4 = vpop.eup %2100  ;;  %1869 = vmatmul.mubr.msk.bf16.vlgmr.msra.gmra.mrb[0].mxu0 %vm930_vm2, %v899_v21  ;;  %v906_v61 = vpack.c.bf16 %v883_v62, %v882_v32  ;;  %v891_v1 = vmul.f32 %v2099_v2, %v2493_v36  ;;  %v876_v36 = vmul.f32 %v2522_v11, %v2333_v30  ;;  %v2899_v21 = vld [vmem:[#allocation4_spill] sm:$0xff] }
  0xe1   : > { %v2103_v58 = vpop.eup %2102  ;;  %1872 = vmatprep.mubr.msk.bf16.mxu0 %vm930_vm2, %v900_v5  ;;  %v800_v49 = vadd.f32 1.0, %v2101_v4 }
  0xe2   : > { %v2105_v63 = vpop.eup %2104  ;;  %1884 = vmatprep.mubr.msk.bf16.mxu1 %vm930_vm2, %v906_v61  ;;  %v801_v28 = vadd.f32 1.0, %v2103_v58  ;;  %v910_v27 = vpack.c.bf16 %v891_v1, %v890_v60  ;;  %v903_v6 = vpack.c.bf16 %v877_v8, %v876_v36 }
  0xe3   : > { %v2107_v55 = vpop.eup %2106  ;;  %1885 = vmatmul.mubr.msk.bf16.vlgmr.msra.gmra.mrb[0].mxu1 %vm930_vm2, %v907_v24  ;;  %v888_v38 = vmul.f32 %v2105_v63, %v2479_v31  ;;  %2120 = vrcp.f32 %v800_v49  ;;  %v878_v31 = vmul.f32 %v2562_v3, %v2415_v10 }
  0xe4   : > { %1888 = vmatprep.mubr.msk.bf16.mxu1 %vm930_vm2, %v908_v44  ;;  %v2109_v50 = vpop.eup %2108  ;;  %2122 = vrcp.f32 %v801_v28  ;;  %v879_v15 = vmul.f32 %v2107_v55, %v2422_v20 }
  0xe5   : > { %v2111_v48 = vpop.eup %2110  ;;  %v909_v9 = vpack.c.bf16 %v889_v47, %v888_v38  ;;  %v892_v54 = vmul.f32 %v2109_v50, %v2531_v17 }
  0xe6   : > { %v2113_v52 = vpop.eup %2112  ;;  %v894_v59 = vmul.f32 %v2111_v48, %v2544_v34  ;;  %v904_v40 = vpack.c.bf16 %v879_v15, %v878_v31 }
  0xe7   : > { %v2115_v23 = vpop.eup %2114  ;;  %v895_v12 = vmul.f32 %v2113_v52, %v2551_v25 }
  0xe8   : > { %1873 = vmatmul.mubr.msk.bf16.gmra.mrb[4].mxu0 %vm930_vm2, %v901_v56  ;;  %v893_v30 = vmul.f32 %v2115_v23, %v2899_v21  ;;  %v2117_v11 = vpop.eup %2116 }
  0xe9   : > { %1876 = vmatprep.mubr.msk.bf16.mxu0 %vm930_vm2, %v902_v29  ;;  %v2119_v42 = vpop.eup %2118  ;;  %v912_v10 = vpack.c.bf16 %v895_v12, %v894_v59  ;;  %v880_v34 = vmul.f32 %v2117_v11, %v2900_v53 }
  0xea   : > { %v911_v3 = vpack.c.bf16 %v893_v30, %v892_v54  ;;  %v881_v25 = vmul.f32 %v2119_v42, %v2901_v37 }
  0xeb   : > { %1889 = vmatmul.mubr.msk.bf16.gmra.mrb[4].mxu1 %vm930_vm2, %v909_v9 }
  0xec   : > { %1892 = vmatprep.mubr.msk.bf16.mxu1 %vm930_vm2, %v910_v27  ;;  %v905_v19 = vpack.c.bf16 %v881_v25, %v880_v34 }
  0xed   : > { %v2121_v20 = vpop.eup %2120 }
  0xee   : > { %v2123_v16 = vpop.eup %2122  ;;  %v896_v17 = vmul.f32 %v2121_v20, %v2560_v46 }
  0xef   : > { %v897_v7 = vmul.f32 %v2123_v16, %v2565_v39 }
  0xf0   : > { %1877 = vmatmul.mubr.msk.bf16.gmra.mrb[8].mxu0 %vm930_vm2, %v903_v6 }
  0xf1   : > { %1880 = vmatprep.mubr.msk.bf16.mxu0 %vm930_vm2, %v904_v40  ;;  %v913_v18 = vpack.c.bf16 %v897_v7, %v896_v17 }
  0xf3   : > { %1893 = vmatmul.mubr.msk.bf16.gmra.mrb[8].mxu1 %vm930_vm2, %v911_v3 }
  0xf4   : > { %1896 = vmatprep.mubr.msk.bf16.mxu1 %vm930_vm2, %v912_v10 }
  0xf8   : > { %1881 = vmatmul.mubr.msk.bf16.gmra.mrb[12].mxu0 %vm930_vm2, %v905_v19 }
  0xfb   : > { %1897 = vmatmul.mubr.msk.bf16.gmra.mrb[12].mxu1 %vm930_vm2, %v913_v18 }
 0x1b3   : > { %v1870_v41 = vpop.f32.mrb[0].mxu0 }
 0x1b4   : > { %v1658_v32 = vpack.c.bf16 %v1870_v41, %v1870_v41  ;;  %v1013_v57 = vpop.f32.mrb[1].mxu0  ;;  %v1377_v46 = vmul.f32 %v1870_v41, %v1870_v41  ;;  %v1305_v63 = vsel %vm930_vm2, %v1870_v41, 0.0 }
 0x1b5   : > { %v1656_v33 = vpack.c.bf16 %v1013_v57, %v1013_v57  ;;  %v1375_v22 = vmul.f32 %v1013_v57, %v1013_v57  ;;  %v1871_v51 = vpop.f32.mrb[2].mxu0  ;;  %v1302_v2 = vsel %vm930_vm2, %v1013_v57, 0.0 }
 0x1b6   : > { %1271 = vst.msk [vmem:[%s2195_s13 + $0x8] sm:$0xf] %vm1268_vm3, %v1658_v32  ;;  %v1659_v35 = vpack.c.bf16 %v1871_v51, %v1871_v51  ;;  %v1016_v39 = vpop.f32.mrb[3].mxu0  ;;  %v2632_v62 = vpop.f32.mrb[0].mxu1  ;;  %v1378_v61 = vmul.f32 %v1871_v51, %v1871_v51  ;;  %v1410_v60 = vsel %vm930_vm2, %v1377_v46, 0.0  ;;  %v1307_v47 = vsel %vm930_vm2, %v1871_v51, 0.0 }
 0x1b7   : > { %1269 = vst.msk [vmem:[%s2195_s13] sm:$0xf] %vm1268_vm3, %v1656_v33  ;;  %v1657_v5 = vpack.c.bf16 %v1016_v39, %v1016_v39  ;;  %v1303_v24 = vsel %vm930_vm2, %v1016_v39, 0.0  ;;  %v1376_v4 = vmul.f32 %v1016_v39, %v1016_v39  ;;  %v2638_v0 = vpop.f32.mrb[1].mxu1  ;;  %v1674_v58 = vpack.c.bf16 %v2632_v62, %v2632_v62 }
 0x1b8   : > { %1272 = vst.msk [vmem:[%s2195_s13 + $0xc] sm:$0xf] %vm1268_vm3, %v1659_v35  ;;  %v1304_v44 = vadd.f32 %v1303_v24, %v1302_v2  ;;  %v2644_v45 = vpop.f32.mrb[2].mxu1  ;;  %v1407_v43 = vsel %vm930_vm2, %v1375_v22, 0.0  ;;  %v1672_v55 = vpack.c.bf16 %v2638_v0, %v2638_v0  ;;  %v1412_v56 = vsel %vm930_vm2, %v1378_v61, 0.0 }
 0x1b9   : > { %1270 = vst.msk [vmem:[%s2195_s13 + $0x4] sm:$0xf] %vm1268_vm3, %v1657_v5  ;;  %v1408_v13 = vsel %vm930_vm2, %v1376_v4, 0.0  ;;  %v2653_v49 = vpop.f32.mrb[3].mxu1  ;;  %1287 = vst.msk [vmem:[%s2195_s13 + $0x48] sm:$0xf] %vm1268_vm3, %v1674_v58  ;;  %v1675_v28 = vpack.c.bf16 %v2644_v45, %v2644_v45 }
 0x1ba   : > { %v1306_v14 = vadd.f32 %v1305_v63, %v1304_v44  ;;  %v1409_v26 = vadd.f32 %v1408_v13, %v1407_v43  ;;  %1285 = vst.msk [vmem:[%s2195_s13 + $0x40] sm:$0xf] %vm1268_vm3, %v1672_v55  ;;  %v1673_v38 = vpack.c.bf16 %v2653_v49, %v2653_v49 }
 0x1bb   : > { %v1874_v1 = vpop.f32.mrb[4].mxu0  ;;  %1288 = vst.msk [vmem:[%s2195_s13 + $0x4c] sm:$0xf] %vm1268_vm3, %v1675_v28 }
 0x1bc   : > { %v1411_v50 = vadd.f32 %v1410_v60, %v1409_v26  ;;  %v1662_v29 = vpack.c.bf16 %v1874_v1, %v1874_v1  ;;  %v1029_v48 = vpop.f32.mrb[5].mxu0  ;;  %v1308_v52 = vadd.f32 %v1307_v47, %v1306_v14  ;;  %1286 = vst.msk [vmem:[%s2195_s13 + $0x44] sm:$0xf] %vm1268_vm3, %v1673_v38  ;;  %v1381_v11 = vmul.f32 %v1874_v1, %v1874_v1 }
 0x1bd   : > { %v1660_v27 = vpack.c.bf16 %v1029_v48, %v1029_v48  ;;  %v1309_v9 = vsel %vm930_vm2, %v1029_v48, 0.0  ;;  %v1379_v23 = vmul.f32 %v1029_v48, %v1029_v48  ;;  %v1875_v36 = vpop.f32.mrb[6].mxu0  ;;  %v1313_v16 = vsel %vm930_vm2, %v1874_v1, 0.0 }
 0x1be   : > { %1275 = vst.msk [vmem:[%s2195_s13 + $0x18] sm:$0xf] %vm1268_vm3, %v1662_v29  ;;  %v1413_v8 = vadd.f32 %v1412_v56, %v1411_v50  ;;  %v1663_v31 = vpack.c.bf16 %v1875_v36, %v1875_v36  ;;  %v1032_v15 = vpop.f32.mrb[7].mxu0  ;;  %v2673_v59 = vpop.f32.mrb[4].mxu1  ;;  %v1310_v12 = vadd.f32 %v1309_v9, %v1308_v52  ;;  %v1382_v53 = vmul.f32 %v1875_v36, %v1875_v36 }
 0x1bf   : > { %1273 = vst.msk [vmem:[%s2195_s13 + $0x10] sm:$0xf] %vm1268_vm3, %v1660_v27  ;;  %v1414_v54 = vsel %vm930_vm2, %v1379_v23, 0.0  ;;  %v1661_v21 = vpack.c.bf16 %v1032_v15, %v1032_v15  ;;  %v2678_v30 = vpop.f32.mrb[5].mxu1  ;;  %v1311_v42 = vsel %vm930_vm2, %v1032_v15, 0.0  ;;  %v1380_v40 = vmul.f32 %v1032_v15, %v1032_v15 }
 0x1c0   : > { %v1415_v6 = vadd.f32 %v1414_v54, %v1413_v8  ;;  %1276 = vst.msk [vmem:[%s2195_s13 + $0x1c] sm:$0xf] %vm1268_vm3, %v1663_v31  ;;  %v2683_v10 = vpop.f32.mrb[6].mxu1  ;;  %v1312_v20 = vadd.f32 %v1311_v42, %v1310_v12  ;;  %v1678_v37 = vpack.c.bf16 %v2673_v59, %v2673_v59  ;;  %v1676_v19 = vpack.c.bf16 %v2678_v30, %v2678_v30 }
 0x1c1   : > { %1274 = vst.msk [vmem:[%s2195_s13 + $0x14] sm:$0xf] %vm1268_vm3, %v1661_v21  ;;  %v2687_v3 = vpop.f32.mrb[7].mxu1  ;;  %v1416_v34 = vsel %vm930_vm2, %v1380_v40, 0.0  ;;  %v1418_v18 = vsel %vm930_vm2, %v1381_v11, 0.0  ;;  %v1315_v41 = vsel %vm930_vm2, %v1875_v36, 0.0  ;;  %v1679_v50 = vpack.c.bf16 %v2683_v10, %v2683_v10 }
 0x1c2   : > { %v1314_v25 = vadd.f32 %v1313_v16, %v1312_v20  ;;  %v1417_v17 = vadd.f32 %v1416_v34, %v1415_v6  ;;  %1291 = vst.msk [vmem:[%s2195_s13 + $0x58] sm:$0xf] %vm1268_vm3, %v1678_v37  ;;  %1289 = vst.msk [vmem:[%s2195_s13 + $0x50] sm:$0xf] %vm1268_vm3, %v1676_v19  ;;  %v1420_v39 = vsel %vm930_vm2, %v1382_v53, 0.0  ;;  %v1677_v52 = vpack.c.bf16 %v2687_v3, %v2687_v3 }
 0x1c3   : > { %v1878_v7 = vpop.f32.mrb[8].mxu0  ;;  %1292 = vst.msk [vmem:[%s2195_s13 + $0x5c] sm:$0xf] %vm1268_vm3, %v1679_v50  ;;  %v1393_v50 = vmul.f32 %v2632_v62, %v2632_v62 }
 0x1c4   : > { %v1666_v32 = vpack.c.bf16 %v1878_v7, %v1878_v7  ;;  %v1045_v57 = vpop.f32.mrb[9].mxu0  ;;  %v1419_v33 = vadd.f32 %v1418_v18, %v1417_v17  ;;  %v1316_v51 = vadd.f32 %v1315_v41, %v1314_v25  ;;  %v1385_v43 = vmul.f32 %v1878_v7, %v1878_v7  ;;  %1290 = vst.msk [vmem:[%s2195_s13 + $0x54] sm:$0xf] %vm1268_vm3, %v1677_v52 }
 0x1c5   : > { %v1664_v22 = vpack.c.bf16 %v1045_v57, %v1045_v57  ;;  %v1317_v46 = vsel %vm930_vm2, %v1045_v57, 0.0  ;;  %v1879_v35 = vpop.f32.mrb[10].mxu0  ;;  %v1383_v2 = vmul.f32 %v1045_v57, %v1045_v57  ;;  %v1321_v38 = vsel %vm930_vm2, %v1878_v7, 0.0 }
 0x1c6   : > { %1279 = vst.msk [vmem:[%s2195_s13 + $0x28] sm:$0xf] %vm1268_vm3, %v1666_v32  ;;  %v1667_v5 = vpack.c.bf16 %v1879_v35, %v1879_v35  ;;  %v1048_v24 = vpop.f32.mrb[11].mxu0  ;;  %v2705_v4 = vpop.f32.mrb[8].mxu1  ;;  %v1318_v61 = vadd.f32 %v1317_v46, %v1316_v51  ;;  %v1421_v44 = vadd.f32 %v1420_v39, %v1419_v33  ;;  %v1386_v47 = vmul.f32 %v1879_v35, %v1879_v35 }
 0x1c7   : > { %1277 = vst.msk [vmem:[%s2195_s13 + $0x20] sm:$0xf] %vm1268_vm3, %v1664_v22  ;;  %v1665_v58 = vpack.c.bf16 %v1048_v24, %v1048_v24  ;;  %v2709_v63 = vpop.f32.mrb[9].mxu1  ;;  %v1422_v13 = vsel %vm930_vm2, %v1383_v2, 0.0  ;;  %v1319_v55 = vsel %vm930_vm2, %v1048_v24, 0.0  ;;  %v1384_v14 = vmul.f32 %v1048_v24, %v1048_v24 }
 0x1c8   : > { %1280 = vst.msk [vmem:[%s2195_s13 + $0x2c] sm:$0xf] %vm1268_vm3, %v1667_v5  ;;  %v2715_v26 = vpop.f32.mrb[10].mxu1  ;;  %v1423_v28 = vadd.f32 %v1422_v13, %v1421_v44  ;;  %v1320_v60 = vadd.f32 %v1319_v55, %v1318_v61  ;;  %v1426_v9 = vsel %vm930_vm2, %v1385_v43, 0.0  ;;  %v1323_v8 = vsel %vm930_vm2, %v1879_v35, 0.0 }
 0x1c9   : > { %1278 = vst.msk [vmem:[%s2195_s13 + $0x24] sm:$0xf] %vm1268_vm3, %v1665_v58  ;;  %v2719_v1 = vpop.f32.mrb[11].mxu1  ;;  %v1424_v56 = vsel %vm930_vm2, %v1384_v14, 0.0  ;;  %v1428_v12 = vsel %vm930_vm2, %v1386_v47, 0.0  ;;  %v1682_v41 = vpack.c.bf16 %v2705_v4, %v2705_v4  ;;  %v1680_v35 = vpack.c.bf16 %v2709_v63, %v2709_v63 }
 0x1ca   : > { %v1322_v29 = vadd.f32 %v1321_v38, %v1320_v60  ;;  %v1425_v48 = vadd.f32 %v1424_v56, %v1423_v28  ;;  %v1683_v5 = vpack.c.bf16 %v2715_v26, %v2715_v26  ;;  %v1391_v24 = vmul.f32 %v2638_v0, %v2638_v0 }
 0x1cb   : > { %v1882_v27 = vpop.f32.mrb[12].mxu0  ;;  %1295 = vst.msk [vmem:[%s2195_s13 + $0x68] sm:$0xf] %vm1268_vm3, %v1682_v41  ;;  %1293 = vst.msk [vmem:[%s2195_s13 + $0x60] sm:$0xf] %vm1268_vm3, %v1680_v35  ;;  %v1681_v58 = vpack.c.bf16 %v2719_v1, %v2719_v1  ;;  %v1333_v55 = vsel %vm930_vm2, %v2638_v0, 0.0  ;;  %v1392_v14 = vmul.f32 %v2653_v49, %v2653_v49 }
 0x1cc   : > { %v1670_v23 = vpack.c.bf16 %v1882_v27, %v1882_v27  ;;  %v1061_v36 = vpop.f32.mrb[13].mxu0  ;;  %v1427_v31 = vadd.f32 %v1426_v9, %v1425_v48  ;;  %v1324_v21 = vadd.f32 %v1323_v8, %v1322_v29  ;;  %v1389_v34 = vmul.f32 %v1882_v27, %v1882_v27  ;;  %1296 = vst.msk [vmem:[%s2195_s13 + $0x6c] sm:$0xf] %vm1268_vm3, %v1683_v5 }
 0x1cd   : > { %v1883_v15 = vpop.f32.mrb[14].mxu0  ;;  %v1668_v54 = vpack.c.bf16 %v1061_v36, %v1061_v36  ;;  %v1325_v11 = vsel %vm930_vm2, %v1061_v36, 0.0  ;;  %v1387_v40 = vmul.f32 %v1061_v36, %v1061_v36  ;;  %v1329_v22 = vsel %vm930_vm2, %v1882_v27, 0.0  ;;  %1294 = vst.msk [vmem:[%s2195_s13 + $0x64] sm:$0xf] %vm1268_vm3, %v1681_v58 }
 0x1ce   : > { %1283 = vst.msk [vmem:[%s2195_s13 + $0x38] sm:$0xf] %vm1268_vm3, %v1670_v23  ;;  %v1064_v6 = vpop.f32.mrb[15].mxu0  ;;  %v2737_v42 = vpop.f32.mrb[12].mxu1  ;;  %v1429_v20 = vadd.f32 %v1428_v12, %v1427_v31  ;;  %v1671_v16 = vpack.c.bf16 %v1883_v15, %v1883_v15  ;;  %v1326_v37 = vadd.f32 %v1325_v11, %v1324_v21  ;;  %v1390_v51 = vmul.f32 %v1883_v15, %v1883_v15 }
 0x1cf   : > { %v2739_v53 = vpop.f32.mrb[13].mxu1  ;;  %1281 = vst.msk [vmem:[%s2195_s13 + $0x30] sm:$0xf] %vm1268_vm3, %v1668_v54  ;;  %v1669_v25 = vpack.c.bf16 %v1064_v6, %v1064_v6  ;;  %v1430_v7 = vsel %vm930_vm2, %v1387_v40, 0.0  ;;  %v1327_v19 = vsel %vm930_vm2, %v1064_v6, 0.0  ;;  %v1388_v18 = vmul.f32 %v1064_v6, %v1064_v6 }
 0x1d0   : > { %v2743_v17 = vpop.f32.mrb[14].mxu1  ;;  %1284 = vst.msk [vmem:[%s2195_s13 + $0x3c] sm:$0xf] %vm1268_vm3, %v1671_v16  ;;  %v1431_v57 = vadd.f32 %v1430_v7, %v1429_v20  ;;  %v1328_v33 = vadd.f32 %v1327_v19, %v1326_v37  ;;  %v1434_v61 = vsel %vm930_vm2, %v1389_v34, 0.0  ;;  %v1331_v44 = vsel %vm930_vm2, %v1883_v15, 0.0 }
 0x1d1   : > { %v2751_v32 = vpop.f32.mrb[15].mxu1  ;;  %1282 = vst.msk [vmem:[%s2195_s13 + $0x34] sm:$0xf] %vm1268_vm3, %v1669_v25  ;;  %v1432_v46 = vsel %vm930_vm2, %v1388_v18, 0.0  ;;  %v1436_v28 = vsel %vm930_vm2, %v1390_v51, 0.0  ;;  %v1686_v60 = vpack.c.bf16 %v2737_v42, %v2737_v42  ;;  %v1684_v56 = vpack.c.bf16 %v2739_v53, %v2739_v53 }
 0x1d2   : > { %v1330_v39 = vadd.f32 %v1329_v22, %v1328_v33  ;;  %v1433_v2 = vadd.f32 %v1432_v46, %v1431_v57  ;;  %v1438_v0 = vsel %vm930_vm2, %v1391_v24, 0.0  ;;  %v1335_v29 = vsel %vm930_vm2, %v2653_v49, 0.0 }
 0x1d3   : > { %1299 = vst.msk [vmem:[%s2195_s13 + $0x78] sm:$0xf] %vm1268_vm3, %v1686_v60  ;;  %v1687_v48 = vpack.c.bf16 %v2743_v17, %v2743_v17  ;;  %1297 = vst.msk [vmem:[%s2195_s13 + $0x70] sm:$0xf] %vm1268_vm3, %v1684_v56  ;;  %v1337_v9 = vsel %vm930_vm2, %v2632_v62, 0.0  ;;  %v1394_v23 = vmul.f32 %v2644_v45, %v2644_v45  ;;  %v1440_v36 = vsel %vm930_vm2, %v1392_v14, 0.0 }
 0x1d4   : > { %v1332_v43 = vadd.f32 %v1331_v44, %v1330_v39  ;;  %v1435_v13 = vadd.f32 %v1434_v61, %v1433_v2  ;;  %v1685_v49 = vpack.c.bf16 %v2751_v32, %v2751_v32  ;;  %v1442_v15 = vsel %vm930_vm2, %v1393_v50, 0.0 }
 0x1d5   : > { %1300 = vst.msk [vmem:[%s2195_s13 + $0x7c] sm:$0xf] %vm1268_vm3, %v1687_v48  ;;  %v1339_v12 = vsel %vm930_vm2, %v2644_v45, 0.0  ;;  %v1395_v62 = vmul.f32 %v2678_v30, %v2678_v30  ;;  %v1444_v11 = vsel %vm930_vm2, %v1394_v23, 0.0  ;;  %v1341_v6 = vsel %vm930_vm2, %v2678_v30, 0.0 }
 0x1d6   : > { %v1334_v38 = vadd.f32 %v1333_v55, %v1332_v43  ;;  %v1437_v47 = vadd.f32 %v1436_v28, %v1435_v13  ;;  %1298 = vst.msk [vmem:[%s2195_s13 + $0x74] sm:$0xf] %vm1268_vm3, %v1685_v49  ;;  %v1396_v40 = vmul.f32 %v2687_v3, %v2687_v3  ;;  %v1397_v45 = vmul.f32 %v2673_v59, %v2673_v59 }
 0x1d7   : > { %v1446_v34 = vsel %vm930_vm2, %v1395_v62, 0.0  ;;  %v1343_v37 = vsel %vm930_vm2, %v2687_v3, 0.0  ;;  %v1345_v19 = vsel %vm930_vm2, %v2673_v59, 0.0  ;;  %v1398_v30 = vmul.f32 %v2683_v10, %v2683_v10 }
 0x1d8   : > { %v1336_v27 = vadd.f32 %v1335_v29, %v1334_v38  ;;  %v1439_v52 = vadd.f32 %v1438_v0, %v1437_v47  ;;  %v1448_v18 = vsel %vm930_vm2, %v1396_v40, 0.0  ;;  %v1450_v33 = vsel %vm930_vm2, %v1397_v45, 0.0 }
 0x1d9   : > { %v1347_v22 = vsel %vm930_vm2, %v2683_v10, 0.0  ;;  %v1399_v3 = vmul.f32 %v2709_v63, %v2709_v63  ;;  %v1452_v35 = vsel %vm930_vm2, %v1398_v30, 0.0  ;;  %v1349_v59 = vsel %vm930_vm2, %v2709_v63, 0.0 }
 0x1da   : > { %v1338_v8 = vadd.f32 %v1337_v9, %v1336_v27  ;;  %v1441_v31 = vadd.f32 %v1440_v36, %v1439_v52  ;;  %v1400_v39 = vmul.f32 %v2719_v1, %v2719_v1  ;;  %v1401_v24 = vmul.f32 %v2705_v4, %v2705_v4 }
 0x1db   : > { %v1454_v10 = vsel %vm930_vm2, %v1399_v3, 0.0  ;;  %v1351_v61 = vsel %vm930_vm2, %v2719_v1, 0.0  ;;  %v1353_v43 = vsel %vm930_vm2, %v2705_v4, 0.0  ;;  %v1402_v63 = vmul.f32 %v2715_v26, %v2715_v26 }
 0x1dc   : > { %v1443_v54 = vadd.f32 %v1442_v15, %v1441_v31  ;;  %v1340_v21 = vadd.f32 %v1339_v12, %v1338_v8  ;;  %v1456_v13 = vsel %vm930_vm2, %v1400_v39, 0.0  ;;  %v1458_v28 = vsel %vm930_vm2, %v1401_v24, 0.0 }
 0x1dd   : > { %v1355_v60 = vsel %vm930_vm2, %v2715_v26, 0.0  ;;  %v1403_v1 = vmul.f32 %v2739_v53, %v2739_v53  ;;  %v1460_v56 = vsel %vm930_vm2, %v1402_v63, 0.0  ;;  %v1357_v4 = vsel %vm930_vm2, %v2739_v53, 0.0 }
 0x1de   : > { %v1342_v20 = vadd.f32 %v1341_v6, %v1340_v21  ;;  %v1445_v16 = vadd.f32 %v1444_v11, %v1443_v54  ;;  %v1404_v50 = vmul.f32 %v2751_v32, %v2751_v32  ;;  %v1405_v48 = vmul.f32 %v2737_v42, %v2737_v42 }
 0x1df   : > { %v1462_v26 = vsel %vm930_vm2, %v1403_v1, 0.0  ;;  %v1359_v27 = vsel %vm930_vm2, %v2751_v32, 0.0  ;;  %v1361_v23 = vsel %vm930_vm2, %v2737_v42, 0.0  ;;  %v1406_v53 = vmul.f32 %v2743_v17, %v2743_v17 }
 0x1e0   : > { %v1344_v25 = vadd.f32 %v1343_v37, %v1342_v20  ;;  %v1447_v7 = vadd.f32 %v1446_v34, %v1445_v16  ;;  %v1464_v36 = vsel %vm930_vm2, %v1404_v50, 0.0  ;;  %v1466_v31 = vsel %vm930_vm2, %v1405_v48, 0.0  ;;  %v1301_v37 = vld [vmem:[%s2891_s6] sm:$0x1] }
 0x1e1   : > { %v1363_v15 = vsel %vm930_vm2, %v2743_v17, 0.0  ;;  %v1468_v32 = vsel %vm930_vm2, %v1406_v53, 0.0 }
 0x1e2   : > { %v1346_v41 = vadd.f32 %v1345_v19, %v1344_v25  ;;  %v1449_v57 = vadd.f32 %v1448_v18, %v1447_v7  ;;  %v1374_v7 = vld [vmem:[%s2892_s7] sm:$0x1] }
 0x1e4   : > { %v1348_v51 = vadd.f32 %v1347_v22, %v1346_v41  ;;  %v1451_v46 = vadd.f32 %v1450_v33, %v1449_v57 }
 0x1e6   : > { %v1350_v2 = vadd.f32 %v1349_v59, %v1348_v51  ;;  %v1453_v5 = vadd.f32 %v1452_v35, %v1451_v46 }
 0x1e8   : > { %v1455_v44 = vadd.f32 %v1454_v10, %v1453_v5  ;;  %v1352_v58 = vadd.f32 %v1351_v61, %v1350_v2 }
 0x1ea   : > { %v1354_v55 = vadd.f32 %v1353_v43, %v1352_v58  ;;  %v1457_v14 = vadd.f32 %v1456_v13, %v1455_v44 }
 0x1ec   : > { %v1459_v38 = vadd.f32 %v1458_v28, %v1457_v14  ;;  %v1356_v47 = vadd.f32 %v1355_v60, %v1354_v55 }
 0x1ee   : > { %v1358_v0 = vadd.f32 %v1357_v4, %v1356_v47  ;;  %v1461_v29 = vadd.f32 %v1460_v56, %v1459_v38 }
 0x1f0   : > { %v1463_v52 = vadd.f32 %v1462_v26, %v1461_v29  ;;  %v1360_v9 = vadd.f32 %v1359_v27, %v1358_v0 }
 0x1f2   : > { %v1362_v49 = vadd.f32 %v1361_v23, %v1360_v9  ;;  %v1465_v8 = vadd.f32 %v1464_v36, %v1463_v52 }
 0x1f4   : > { %v1364_v12 = vadd.f32 %v1363_v15, %v1362_v49  ;;  %v1467_v62 = vadd.f32 %v1466_v31, %v1465_v8 }
 0x1f6   : > { %v1365_v54 = vrot.slane %v1364_v12, 4  ;;  %v1469_v21 = vadd.f32 %v1468_v32, %v1467_v62 }
 0x1f8   : > { %v1366_v11 = vadd.f32 %v1365_v54, %v1364_v12  ;;  %v1470_v42 = vrot.slane %v1469_v21, 4 }
 0x1fa   : > { %v1367_v6 = vrot.slane %v1366_v11, 2  ;;  %v1471_v40 = vadd.f32 %v1470_v42, %v1469_v21 }
 0x1fc   : > { %v1368_v20 = vadd.f32 %v1367_v6, %v1366_v11  ;;  %v1472_v16 = vrot.slane %v1471_v40, 2 }
 0x1fe   : > { %v1369_v45 = vrot.slane %v1368_v20, 1  ;;  %v1473_v34 = vadd.f32 %v1472_v16, %v1471_v40 }
 0x200   : > { %v1370_v25 = vadd.f32 %v1369_v45, %v1368_v20  ;;  %v1474_v17 = vrot.slane %v1473_v34, 1 }
 0x202   : > { %v1371_v19 = vadd.f32 %v1370_v25, %v1301_v37  ;;  %v1475_v30 = vadd.f32 %v1474_v17, %v1473_v34 }
 0x204   : > { %1373 = vst.msk [vmem:[%s2891_s6] sm:$0x1] %vm1372_vm4, %v1371_v19  ;;  %v1476_v18 = vadd.f32 %v1475_v30, %v1374_v7 }
 0x206   : > { %1477 = vst.msk [vmem:[%s2892_s7] sm:$0x1] %vm1372_vm4, %v1476_v18 }
 0x207 PF: > { %s18_s24 = sadd.s32 1, %s2130_s24  }
 0x208   : > { %p15_p5 = scmp.ge.s32.totalorder %s18_s24, 4  }
 0x20a   :  { %17 = sbr.rel (!%p15_p5) target bundleno = 1 (0x1), region = 93 }

// kernel: bottleneck_csp_forward.8
= control target key start
LH: loop header
LB: loop body
LE: loop exit
PB: predicated region body
PF: predicated region fallthrough
CT: control target
= control target key end

     0   :  { %s5451_s21 = smov 0   ;;  %s6670_s0 = inlined_call_operand.vmem [shape: bf16[2,16,16,16], index: 0, kind: input, shape index: {}]   ;;  %s6671_s1 = inlined_call_operand.vmem [shape: f32[1,1,16], index: 1, kind: input, shape index: {}]   ;;  %s6672_s2 = inlined_call_operand.vmem [shape: f32[1,1,16], index: 2, kind: input, shape index: {}]   ;;  %s6673_s3 = inlined_call_operand.vmem [shape: bf16[9,16,16], index: 3, kind: input, shape index: {}]   ;;  %s6674_s4 = inlined_call_operand.vmem [shape: bf16[2,16,16,16], index: 4, kind: output, shape index: {0}]   ;;  %s6675_s5 = inlined_call_operand.vmem [shape: f32[1,16], index: 5, kind: output, shape index: {1}]   ;;  %s6676_s6 = inlined_call_operand.vmem [shape: f32[1,16], index: 6, kind: output, shape index: {2}]  }
   0x1 LB: > { %s4438_s22 = sadd.s32 4294967295, %s5412_s21   ;;  %p4442_p0 = scmp.ge.s32.totalorder %s5412_s21, 1  ;;  %s5412_s21 = sphi %s5451_s21, %s17_s21  }
   0x2   : > { %p207_p1 = scmp.lt.s32.totalorder %s5412_s21, 3 }
   0x4   : > { %p208_p2 = pnand %p4442_p0, %p207_p1 }
   0x5   : > { %p237_p3 = scmp.lt.s32.totalorder (!%p208_p2), %s4438_s22, 1  ;;  %p4447_p4 = scmp.ne.s32.totalorder (!%p208_p2), %s4438_s22, 0 }
   0x6   : > { %211 = sbr.rel (%p208_p2) target bundleno = 661 (0x295), region = 36 }
   0xd   : > { %s238_s23 = scalar_select %p237_p3, %s4438_s22, 1 }
   0xe   : > { %251 = sbr.rel (%p4447_p4) target bundleno = 43 (0x2b), region = 40  ;;  %vm252_vm0 = vcmask (!%p4447_p4), 122880   ;;  %vm255_vm1 = vcmask (!%p4447_p4), 130048   ;;  %vm258_vm2 = vcmask (!%p4447_p4), 123904   ;;  %v5414_v0 = vmov (!%p4447_p4), 0.0  }
   0xf   : > { %s4685_s24 = sshll.u32 %s238_s23, 7  ;;  %253 = vst.msk [vmem:[%s6675_s5] sm:$0x1] (!%p4447_p4), %vm252_vm0, %v5414_v0  ;;  %254 = vst.msk [vmem:[%s6676_s6] sm:$0x1] (!%p4447_p4), %vm252_vm0, %v5414_v0 }
  0x10   : > { %s5462_s27 = scalar_lea.vmem %s6670_s0, %s4685_s24  ;;  %s5467_s30 = scalar_lea.vmem %s6674_s4, %s4685_s24  ;;  %256 = vst.msk [vmem:[#allocation2] sm:$0xff] (!%p4447_p4), %vm255_vm1, %v5414_v0  ;;  %257 = vst.msk [vmem:[#allocation2 + $0x8] sm:$0xff] (!%p4447_p4), %vm255_vm1, %v5414_v0 }
  0x11   : > { %260 = vst.msk [vmem:[#allocation2 + $0x18] sm:$0xff] (!%p4447_p4), %vm255_vm1, %v5414_v0  ;;  %261 = vst.msk [vmem:[#allocation2 + $0x20] sm:$0xff] (!%p4447_p4), %vm255_vm1, %v5414_v0 }
  0x12   : > { %263 = vst.msk [vmem:[#allocation2 + $0x30] sm:$0xff] (!%p4447_p4), %vm255_vm1, %v5414_v0  ;;  %264 = vst.msk [vmem:[#allocation2 + $0x38] sm:$0xff] (!%p4447_p4), %vm255_vm1, %v5414_v0 }
  0x13   : > { %266 = vst.msk [vmem:[#allocation2 + $0x48] sm:$0xff] (!%p4447_p4), %vm255_vm1, %v5414_v0  ;;  %267 = vst.msk [vmem:[#allocation2 + $0x50] sm:$0xff] (!%p4447_p4), %vm255_vm1, %v5414_v0 }
  0x14   : > { %269 = vst.msk [vmem:[#allocation2 + $0x60] sm:$0xff] (!%p4447_p4), %vm255_vm1, %v5414_v0  ;;  %270 = vst.msk [vmem:[#allocation2 + $0x68] sm:$0xff] (!%p4447_p4), %vm255_vm1, %v5414_v0 }
  0x15   : > { %272 = vst.msk [vmem:[#allocation2 + $0x78] sm:$0xff] %vm255_vm1, %v5414_v0  ;;  %273 = vst.msk [vmem:[#allocation2 + $0x80] sm:$0xff] %vm255_vm1, %v5414_v0 }
  0x16   : > { %275 = vst.msk [vmem:[#allocation2 + $0x90] sm:$0xff] %vm255_vm1, %v5414_v0  ;;  %276 = vst.msk [vmem:[#allocation2 + $0x98] sm:$0xff] %vm255_vm1, %v5414_v0 }
  0x17   : > { %278 = vst.msk [vmem:[#allocation2 + $0xa8] sm:$0xff] %vm255_vm1, %v5414_v0  ;;  %279 = vst.msk [vmem:[#allocation2 + $0xb0] sm:$0xff] %vm255_vm1, %v5414_v0 }
  0x18   : > { %281 = vst.msk [vmem:[#allocation2 + $0xc0] sm:$0xff] %vm255_vm1, %v5414_v0  ;;  %282 = vst.msk [vmem:[#allocation2 + $0xc8] sm:$0xff] %vm255_vm1, %v5414_v0 }
  0x19   : > { %284 = vst.msk [vmem:[#allocation2 + $0xd8] sm:$0xff] %vm255_vm1, %v5414_v0  ;;  %285 = vst.msk [vmem:[#allocation2 + $0xe0] sm:$0xff] %vm255_vm1, %v5414_v0 }
  0x1a   : > { %287 = vst.msk [vmem:[#allocation2 + $0xf0] sm:$0xff] %vm255_vm1, %v5414_v0  ;;  %288 = vst.msk [vmem:[#allocation2 + $0xf8] sm:$0xff] %vm255_vm1, %v5414_v0 }
  0x1b   : > { %290 = vst.msk [vmem:[#allocation2 + $0x108] sm:$0xff] %vm255_vm1, %v5414_v0  ;;  %291 = vst.msk [vmem:[#allocation2 + $0x110] sm:$0xff] %vm255_vm1, %v5414_v0 }
  0x1c   : > { %293 = vst.msk [vmem:[#allocation2 + $0x120] sm:$0xff] %vm255_vm1, %v5414_v0  ;;  %294 = vst.msk [vmem:[#allocation2 + $0x128] sm:$0xff] %vm255_vm1, %v5414_v0 }
  0x1d   : > { %296 = vst.msk [vmem:[#allocation2 + $0x138] sm:$0xff] %vm255_vm1, %v5414_v0  ;;  %297 = vst.msk [vmem:[#allocation2 + $0x140] sm:$0xff] %vm255_vm1, %v5414_v0 }
  0x1e   : > { %299 = vst.msk [vmem:[#allocation2 + $0x150] sm:$0xff] %vm255_vm1, %v5414_v0  ;;  %300 = vst.msk [vmem:[#allocation2 + $0x158] sm:$0xff] %vm255_vm1, %v5414_v0 }
  0x1f   : > { %302 = vst.msk [vmem:[#allocation2 + $0x168] sm:$0xff] %vm255_vm1, %v5414_v0  ;;  %303 = vst.msk [vmem:[#allocation2 + $0x170] sm:$0xff] %vm255_vm1, %v5414_v0 }
  0x20   : > { %305 = vst.msk [vmem:[#allocation2 + $0x180] sm:$0xff] %vm255_vm1, %v5414_v0  ;;  %306 = vst.msk [vmem:[#allocation2 + $0x188] sm:$0xff] %vm255_vm1, %v5414_v0 }
  0x21   : > { %308 = vst.msk [vmem:[#allocation2 + $0x198] sm:$0xff] %vm255_vm1, %v5414_v0  ;;  %309 = vst.msk [vmem:[#allocation2 + $0x1a0] sm:$0xff] %vm255_vm1, %v5414_v0 }
  0x22   : > { %259 = vst.msk [vmem:[#allocation2 + $0x10] sm:$0x3] %vm258_vm2, %v5414_v0  ;;  %262 = vst.msk [vmem:[#allocation2 + $0x28] sm:$0x3] %vm258_vm2, %v5414_v0 }
  0x23   : > { %265 = vst.msk [vmem:[#allocation2 + $0x40] sm:$0x3] %vm258_vm2, %v5414_v0  ;;  %268 = vst.msk [vmem:[#allocation2 + $0x58] sm:$0x3] %vm258_vm2, %v5414_v0 }
  0x24   : > { %271 = vst.msk [vmem:[#allocation2 + $0x70] sm:$0x3] %vm258_vm2, %v5414_v0  ;;  %274 = vst.msk [vmem:[#allocation2 + $0x88] sm:$0x3] %vm258_vm2, %v5414_v0 }
  0x25   : > { %277 = vst.msk [vmem:[#allocation2 + $0xa0] sm:$0x3] %vm258_vm2, %v5414_v0  ;;  %280 = vst.msk [vmem:[#allocation2 + $0xb8] sm:$0x3] %vm258_vm2, %v5414_v0 }
  0x26   : > { %283 = vst.msk [vmem:[#allocation2 + $0xd0] sm:$0x3] %vm258_vm2, %v5414_v0  ;;  %286 = vst.msk [vmem:[#allocation2 + $0xe8] sm:$0x3] %vm258_vm2, %v5414_v0 }
  0x27   : > { %289 = vst.msk [vmem:[#allocation2 + $0x100] sm:$0x3] %vm258_vm2, %v5414_v0  ;;  %292 = vst.msk [vmem:[#allocation2 + $0x118] sm:$0x3] %vm258_vm2, %v5414_v0 }
  0x28   : > { %295 = vst.msk [vmem:[#allocation2 + $0x130] sm:$0x3] %vm258_vm2, %v5414_v0  ;;  %298 = vst.msk [vmem:[#allocation2 + $0x148] sm:$0x3] %vm258_vm2, %v5414_v0 }
  0x29   : > { %301 = vst.msk [vmem:[#allocation2 + $0x160] sm:$0x3] %vm258_vm2, %v5414_v0  ;;  %304 = vst.msk [vmem:[#allocation2 + $0x178] sm:$0x3] %vm258_vm2, %v5414_v0 }
  0x2a   : > { %307 = vst.msk [vmem:[#allocation2 + $0x190] sm:$0x3] %vm258_vm2, %v5414_v0  ;;  %310 = vst.msk [vmem:[#allocation2 + $0x1a8] sm:$0x3] %vm258_vm2, %v5414_v0 }
  0x2b PF: > { %v5269_v1 = vld [vmem:[%s6673_s3] sm:$0xff]   ;;  %v4789_v2 = vld [vmem:[%s5462_s27 + $0x38] sm:$0xff]   ;;  %v5546_v7 = vld [vmem:[%s6673_s3 + $0x8] sm:$0xff]   ;;  %vm678_vm3 = vcmask 130048   ;;  %vm4161_vm4 = vcmask 125952   ;;  %vm4265_vm5 = vcmask 122880  }
  0x2c   : > { %v5536_v3 = vld [vmem:[%s6671_s1] ss:$0 sm:$0xff]  ;;  %5257 = vmatprep.subr.bf16.mxu1 %v5269_v1  ;;  %v4749_v5 = vunpack.c.l.bf16 %v4789_v2  ;;  %v4750_v6 = vunpack.c.h.bf16 %v4789_v2  ;;  %4951 = vmatprep.subr.bf16.mxu0 %v5269_v1  ;;  %v4791_v16 = vld [vmem:[%s5462_s27 + $0x48] sm:$0xff]   ;;  %v5557_v21 = vld [vmem:[%s6673_s3 + $0x10] sm:$0xff]  }
  0x2d   : > { %v5541_v4 = vld [vmem:[%s6672_s2] ss:$0 sm:$0xff]  ;;  %5258 = vmatpush3.bf16.msra.mxu1 %v5269_v1  ;;  %4952 = vmatpush3.bf16.msra.mxu0 %v5269_v1  ;;  %v744_v10 = vld [vmem:[#allocation2 + $0x8] sm:$0xff]  ;;  %v4757_v20 = vunpack.c.l.bf16 %v4791_v16  ;;  %v4758_v28 = vunpack.c.h.bf16 %v4791_v16  ;;  %v4792_v30 = vld [vmem:[%s5462_s27 + $0x50] sm:$0xff]  }
  0x2e   : > { %v4790_v8 = vld [vmem:[%s5462_s27 + $0x40] sm:$0xff]   ;;  %v396_v11 = vmul.f32 %v4749_v5, %v5536_v3  ;;  %v397_v12 = vmul.f32 %v4750_v6, %v5536_v3  ;;  %4985 = vmatprep.subr.bf16.mxu1 %v5546_v7  ;;  %5019 = vmatprep.subr.bf16.mxu0 %v5557_v21  ;;  %v4761_v41 = vunpack.c.l.bf16 %v4792_v30  ;;  %v4783_v42 = vld [vmem:[%s5462_s27 + $0x8] sm:$0xff]   ;;  %v4784_v43 = vld [vmem:[%s5462_s27 + $0x10] sm:$0xff]   ;;  %v4762_v48 = vunpack.c.h.bf16 %v4792_v30 }
  0x2f   : > { %v743_v9 = vld [vmem:[#allocation2] sm:$0xff]  ;;  %v4753_v13 = vunpack.c.l.bf16 %v4790_v8  ;;  %v4754_v14 = vunpack.c.h.bf16 %v4790_v8  ;;  %v400_v29 = vmul.f32 %v4757_v20, %v5536_v3  ;;  %v401_v37 = vmul.f32 %v4758_v28, %v5536_v3  ;;  %v4793_v56 = vld [vmem:[%s5462_s27 + $0x58] sm:$0xff]  }
  0x30   : > { %v4720_v15 = vld [vmem:[%s5462_s27] sm:$0xff]   ;;  %v775_v17 = vpack.c.bf16 %v744_v10, %v743_v9  ;;  %v5560_v22 = vadd.f32 %v5541_v4, %v396_v11  ;;  %v5563_v23 = vadd.f32 %v5541_v4, %v397_v12  ;;  %v402_v49 = vmul.f32 %v4761_v41, %v5536_v3 }
  0x31   : > { %v4721_v18 = vunpack.c.l.bf16 %v4720_v15  ;;  %v4722_v19 = vunpack.c.h.bf16 %v4720_v15  ;;  %v398_v24 = vmul.f32 %v4753_v13, %v5536_v3  ;;  %v399_v25 = vmul.f32 %v4754_v14, %v5536_v3  ;;  %v4794_v2 = vld [vmem:[%s5462_s27 + $0x60] sm:$0xff]  }
  0x32   : > { %4953 = vmatprep.mubr.msk.bf16.mxu0 %vm678_vm3, %v775_v17  ;;  %v4464_v31 = vmul.f32 -1.442695, %v5560_v22  ;;  %v4465_v32 = vmul.f32 -1.442695, %v5563_v23  ;;  %v5589_v38 = vadd.f32 %v5541_v4, %v400_v29  ;;  %v5598_v46 = vadd.f32 %v5541_v4, %v401_v37  ;;  %v4785_v29 = vld [vmem:[%s5462_s27 + $0x18] sm:$0xff]  }
  0x33   : > { %v382_v26 = vmul.f32 %v4721_v18, %v5536_v3  ;;  %v383_v27 = vmul.f32 %v4722_v19, %v5536_v3  ;;  %v5576_v33 = vadd.f32 %v5541_v4, %v398_v24  ;;  %v5579_v34 = vadd.f32 %v5541_v4, %v399_v25 }
  0x34   : > { %5278 = vpow2.f32 %v4464_v31  ;;  %v4468_v47 = vmul.f32 -1.442695, %v5589_v38  ;;  %v4469_v50 = vmul.f32 -1.442695, %v5598_v46  ;;  %v4725_v51 = vunpack.c.l.bf16 %v4783_v42 }
  0x35   : > { %v5582_v35 = vadd.f32 %v5541_v4, %v382_v26  ;;  %v5585_v36 = vadd.f32 %v5541_v4, %v383_v27  ;;  %v4466_v39 = vmul.f32 -1.442695, %v5576_v33  ;;  %v4467_v40 = vmul.f32 -1.442695, %v5579_v34 }
  0x36   : > { %5280 = vpow2.f32 %v4465_v32  ;;  %v4726_v52 = vunpack.c.h.bf16 %v4783_v42  ;;  %v403_v53 = vmul.f32 %v4762_v48, %v5536_v3  ;;  %v5605_v54 = vadd.f32 %v5541_v4, %v402_v49  ;;  %v4786_v48 = vld [vmem:[%s5462_s27 + $0x20] sm:$0xff]  }
  0x37   : > { %v4450_v44 = vmul.f32 -1.442695, %v5582_v35  ;;  %v4451_v45 = vmul.f32 -1.442695, %v5585_v36  ;;  %5282 = vpow2.f32 %v4466_v39  ;;  %v4729_v55 = vunpack.c.l.bf16 %v4784_v43 }
  0x38   : > { %5284 = vpow2.f32 %v4467_v40  ;;  %v384_v57 = vmul.f32 %v4725_v51, %v5536_v3  ;;  %v385_v58 = vmul.f32 %v4726_v52, %v5536_v3  ;;  %v4730_v59 = vunpack.c.h.bf16 %v4784_v43 }
  0x39   : > { %5286 = vpow2.f32 %v4450_v44  ;;  %v5611_v60 = vadd.f32 %v5541_v4, %v403_v53  ;;  %v4470_v61 = vmul.f32 -1.442695, %v5605_v54  ;;  %v386_v62 = vmul.f32 %v4729_v55, %v5536_v3 }
  0x3a   : > { %5288 = vpow2.f32 %v4451_v45  ;;  %v5616_v63 = vadd.f32 %v5541_v4, %v384_v57  ;;  %v5619_v0 = vadd.f32 %v5541_v4, %v385_v58  ;;  %v387_v1 = vmul.f32 %v4730_v59, %v5536_v3  ;;  %v4795_v58 = vld [vmem:[%s5462_s27 + $0x68] sm:$0xff]  }
  0x3b   : > { %5290 = vpow2.f32 %v4468_v47  ;;  %v4471_v5 = vmul.f32 -1.442695, %v5611_v60  ;;  %v4765_v6 = vunpack.c.l.bf16 %v4793_v56  ;;  %v4766_v10 = vunpack.c.h.bf16 %v4793_v56 }
  0x3c   : > { %5292 = vpow2.f32 %v4469_v50  ;;  %v4452_v8 = vmul.f32 -1.442695, %v5616_v63  ;;  %v4453_v9 = vmul.f32 -1.442695, %v5619_v0  ;;  %v5627_v12 = vadd.f32 %v5541_v4, %v386_v62 }
  0x3d   : > { %5294 = vpow2.f32 %v4470_v61  ;;  %v404_v13 = vmul.f32 %v4765_v6, %v5536_v3  ;;  %v4769_v14 = vunpack.c.l.bf16 %v4794_v2  ;;  %v5631_v17 = vadd.f32 %v5541_v4, %v387_v1 }
  0x3e   : > { %v5279_v11 = vpop.eup %5278  ;;  %5296 = vpow2.f32 %v4471_v5  ;;  %v405_v18 = vmul.f32 %v4766_v10, %v5536_v3  ;;  %v4770_v25 = vunpack.c.h.bf16 %v4794_v2  ;;  %v4454_v32 = vmul.f32 -1.442695, %v5627_v12 }
  0x3f   : > { %v563_v16 = vadd.f32 1.0, %v5279_v11  ;;  %5298 = vpow2.f32 %v4452_v8  ;;  %v5635_v24 = vadd.f32 %v5541_v4, %v404_v13  ;;  %v406_v28 = vmul.f32 %v4769_v14, %v5536_v3 }
  0x40   : > { %v5281_v15 = vpop.eup %5280  ;;  %5300 = vpow2.f32 %v4453_v9  ;;  %v407_v37 = vmul.f32 %v4770_v25, %v5536_v3  ;;  %v4455_v41 = vmul.f32 -1.442695, %v5631_v17  ;;  %v5643_v42 = vadd.f32 %v5541_v4, %v405_v18 }
  0x41   : > { %v5283_v19 = vpop.eup %5282  ;;  %v564_v20 = vadd.f32 1.0, %v5281_v15  ;;  %5302 = vrcp.f32 %v563_v16  ;;  %v4472_v45 = vmul.f32 -1.442695, %v5635_v24  ;;  %v4733_v47 = vunpack.c.l.bf16 %v4785_v29 }
  0x42   : > { %v5285_v26 = vpop.eup %5284  ;;  %v565_v27 = vadd.f32 1.0, %v5283_v19  ;;  %v5648_v51 = vadd.f32 %v5541_v4, %v406_v28  ;;  %v4734_v52 = vunpack.c.h.bf16 %v4785_v29  ;;  %v5651_v56 = vadd.f32 %v5541_v4, %v407_v37 }
  0x43   : > { %v5287_v30 = vpop.eup %5286  ;;  %5304 = vrcp.f32 %v564_v20  ;;  %v566_v31 = vadd.f32 1.0, %v5285_v26  ;;  %v388_v57 = vmul.f32 %v4733_v47, %v5536_v3  ;;  %v4737_v62 = vunpack.c.l.bf16 %v4786_v48 }
  0x44   : > { %v5289_v39 = vpop.eup %5288  ;;  %5306 = vrcp.f32 %v565_v27  ;;  %v549_v40 = vadd.f32 1.0, %v5287_v30  ;;  %v389_v61 = vmul.f32 %v4734_v52, %v5536_v3  ;;  %v4473_v2 = vmul.f32 -1.442695, %v5643_v42  ;;  %v4796_v30 = vld [vmem:[%s5462_s27 + $0x70] sm:$0xff]  }
  0x45   : > { %v5291_v43 = vpop.eup %5290  ;;  %5308 = vrcp.f32 %v566_v31  ;;  %v550_v44 = vadd.f32 1.0, %v5289_v39  ;;  %v5658_v5 = vadd.f32 %v5541_v4, %v388_v57  ;;  %v4738_v6 = vunpack.c.h.bf16 %v4786_v48 }
  0x46   : > { %v5293_v49 = vpop.eup %5292  ;;  %5310 = vrcp.f32 %v549_v40  ;;  %v567_v50 = vadd.f32 1.0, %v5291_v43  ;;  %v390_v10 = vmul.f32 %v4737_v62, %v5536_v3  ;;  %v4773_v11 = vunpack.c.l.bf16 %v4795_v58 }
  0x47   : > { %v5295_v53 = vpop.eup %5294  ;;  %5312 = vrcp.f32 %v550_v44  ;;  %v568_v55 = vadd.f32 1.0, %v5293_v49  ;;  %v4474_v15 = vmul.f32 -1.442695, %v5648_v51  ;;  %v391_v16 = vmul.f32 %v4738_v6, %v5536_v3 }
  0x48   : > { %5314 = vrcp.f32 %v567_v50  ;;  %v569_v59 = vadd.f32 1.0, %v5295_v53  ;;  %v5297_v1 = vpop.eup %5296  ;;  %v4475_v20 = vmul.f32 -1.442695, %v5651_v56  ;;  %v5665_v25 = vadd.f32 %v5541_v4, %v389_v61 }
  0x49   : > { %5316 = vrcp.f32 %v568_v55  ;;  %v5299_v8 = vpop.eup %5298  ;;  %v570_v9 = vadd.f32 1.0, %v5297_v1  ;;  %v5669_v28 = vadd.f32 %v5541_v4, %v390_v10  ;;  %v4774_v29 = vunpack.c.h.bf16 %v4795_v58  ;;  %v4787_v10 = vld [vmem:[%s5462_s27 + $0x28] sm:$0xff]  }
  0x4a   : > { %5318 = vrcp.f32 %v569_v59  ;;  %v5301_v13 = vpop.eup %5300  ;;  %v551_v14 = vadd.f32 1.0, %v5299_v8  ;;  %v4456_v37 = vmul.f32 -1.442695, %v5658_v5  ;;  %v408_v39 = vmul.f32 %v4773_v11, %v5536_v3 }
  0x4b   : > { %5320 = vpow2.f32 %v4454_v32  ;;  %v5303_v18 = vpop.eup %5302  ;;  %v552_v19 = vadd.f32 1.0, %v5301_v13  ;;  %v409_v44 = vmul.f32 %v4774_v29, %v5536_v3  ;;  %v4457_v48 = vmul.f32 -1.442695, %v5665_v25 }
  0x4c   : > { %5322 = vrcp.f32 %v570_v9  ;;  %v659_v27 = vmul.f32 %v5303_v18, %v5560_v22  ;;  %v5678_v22 = vadd.f32 %v5541_v4, %v391_v16  ;;  %v4777_v49 = vunpack.c.l.bf16 %v4796_v30 }
  0x4d   : > { %v5305_v26 = vpop.eup %5304  ;;  %5324 = vrcp.f32 %v551_v14  ;;  %v5688_v52 = vadd.f32 %v5541_v4, %v408_v39  ;;  %v4778_v59 = vunpack.c.h.bf16 %v4796_v30  ;;  %v4741_v30 = vunpack.c.l.bf16 %v4787_v10 }
  0x4e   : > { %v5307_v31 = vpop.eup %5306  ;;  %v660_v32 = vmul.f32 %v5305_v26, %v5563_v23  ;;  %5326 = vrcp.f32 %v552_v19  ;;  %693 = vst.msk [vmem:[#allocation2 + $0xc1] sm:$0xff] %vm678_vm3, %v659_v27  ;;  %v410_v55 = vmul.f32 %v4777_v49, %v5536_v3  ;;  %v4459_v58 = vmul.f32 -1.442695, %v5678_v22  ;;  %v4788_v26 = vld [vmem:[%s5462_s27 + $0x30] sm:$0xff]  }
  0x4f   : > { %v5309_v40 = vpop.eup %5308  ;;  %v661_v43 = vmul.f32 %v5307_v31, %v5576_v33  ;;  %5328 = vpow2.f32 %v4455_v41  ;;  %v4458_v41 = vmul.f32 -1.442695, %v5669_v28 }
  0x50   : > { %v5311_v47 = vpop.eup %5310  ;;  %694 = vst.msk [vmem:[#allocation2 + $0xc9] sm:$0xff] %vm678_vm3, %v660_v32  ;;  %v662_v23 = vmul.f32 %v5309_v40, %v5579_v34  ;;  %5330 = vpow2.f32 %v4472_v45  ;;  %v5693_v45 = vadd.f32 %v5541_v4, %v409_v44  ;;  %v5702_v62 = vadd.f32 %v5541_v4, %v410_v55  ;;  %v5723_v40 = vld [vmem:[%s6673_s3 + $0x18] sm:$0xff]  }
  0x51   : > { %v5313_v50 = vpop.eup %5312  ;;  %695 = vst.msk [vmem:[#allocation2 + $0xd9] sm:$0xff] %vm678_vm3, %v661_v43  ;;  %v645_v33 = vmul.f32 %v5311_v47, %v5582_v35  ;;  %5332 = vpow2.f32 %v4473_v2 }
  0x52   : > { %v5315_v53 = vpop.eup %5314  ;;  %696 = vst.msk [vmem:[#allocation2 + $0xe1] sm:$0xff] %vm678_vm3, %v662_v23  ;;  %v646_v34 = vmul.f32 %v5313_v50, %v5585_v36  ;;  %5334 = vpow2.f32 %v4474_v15  ;;  %v4478_v15 = vmul.f32 -1.442695, %v5702_v62  ;;  %v4745_v23 = vunpack.c.l.bf16 %v4788_v26 }
  0x53   : > { %v5317_v57 = vpop.eup %5316  ;;  %679 = vst.msk [vmem:[#allocation2 + $0x19] sm:$0xff] %vm678_vm3, %v645_v33  ;;  %v663_v35 = vmul.f32 %v5315_v53, %v5589_v38  ;;  %5336 = vpow2.f32 %v4475_v20  ;;  %v4476_v38 = vmul.f32 -1.442695, %v5688_v52  ;;  %v5735_v53 = vld [vmem:[%s6673_s3 + $0x20] sm:$0xff]  }
  0x54   : > { %v5319_v61 = vpop.eup %5318  ;;  %680 = vst.msk [vmem:[#allocation2 + $0x21] sm:$0xff] %vm678_vm3, %v646_v34  ;;  %v664_v36 = vmul.f32 %v5317_v57, %v5598_v46  ;;  %5338 = vpow2.f32 %v4456_v37  ;;  %v4477_v46 = vmul.f32 -1.442695, %v5693_v45 }
  0x55   : > { %v5321_v1 = vpop.eup %5320  ;;  %697 = vst.msk [vmem:[#allocation2 + $0xf1] sm:$0xff] %vm678_vm3, %v663_v35  ;;  %v665_v2 = vmul.f32 %v5319_v61, %v5605_v54  ;;  %5340 = vpow2.f32 %v4457_v48  ;;  %v759_v8 = vld [vmem:[#allocation2 + $0xc0] sm:$0xff]  ;;  %v411_v54 = vmul.f32 %v4778_v59, %v5536_v3  ;;  %v392_v35 = vmul.f32 %v4741_v30, %v5536_v3 }
  0x56   : > { %v5323_v6 = vpop.eup %5322  ;;  %698 = vst.msk [vmem:[#allocation2 + $0xf9] sm:$0xff] %vm678_vm3, %v664_v36  ;;  %v553_v9 = vadd.f32 1.0, %v5321_v1  ;;  %5342 = vpow2.f32 %v4458_v41  ;;  %v4746_v41 = vunpack.c.h.bf16 %v4788_v26 }
  0x57   : > { %v5325_v11 = vpop.eup %5324  ;;  %v760_v13 = vld [vmem:[#allocation2 + $0xc8] sm:$0xff]  ;;  %v666_v14 = vmul.f32 %v5323_v6, %v5611_v60  ;;  %699 = vst.msk [vmem:[#allocation2 + $0x109] sm:$0xff] %vm678_vm3, %v665_v2  ;;  %5344 = vpow2.f32 %v4459_v58  ;;  %v5727_v47 = vadd.f32 %v5541_v4, %v411_v54  ;;  %v5755_v54 = vadd.f32 %v5541_v4, %v392_v35 }
  0x58   : > { %v5327_v16 = vpop.eup %5326  ;;  %v783_v18 = vpack.c.bf16 %v760_v13, %v759_v8  ;;  %v761_v19 = vld [vmem:[#allocation2 + $0xd8] sm:$0xff]  ;;  %v647_v20 = vmul.f32 %v5325_v11, %v5616_v63  ;;  %5346 = vrcp.f32 %v553_v9  ;;  %v4742_v63 = vunpack.c.h.bf16 %v4787_v10 }
  0x59   : > { %v5329_v27 = vpop.eup %5328  ;;  %v762_v29 = vld [vmem:[#allocation2 + $0xe0] sm:$0xff]  ;;  %700 = vst.msk [vmem:[#allocation2 + $0x111] sm:$0xff] %vm678_vm3, %v666_v14  ;;  %v648_v60 = vmul.f32 %v5327_v16, %v5619_v0  ;;  %5348 = vpow2.f32 %v4476_v38  ;;  %v394_v38 = vmul.f32 %v4745_v23, %v5536_v3  ;;  %v395_v10 = vmul.f32 %v4746_v41, %v5536_v3 }
  0x5a   : > { %v5331_v31 = vpop.eup %5330  ;;  %4969 = vmatprep.mubr.msk.bf16.mxu1 %vm678_vm3, %v783_v18  ;;  %v784_v32 = vpack.c.bf16 %v762_v29, %v761_v19  ;;  %v745_v37 = vld [vmem:[#allocation2 + $0x18] sm:$0xff]  ;;  %681 = vst.msk [vmem:[#allocation2 + $0x31] sm:$0xff] %vm678_vm3, %v647_v20  ;;  %v554_v39 = vadd.f32 1.0, %v5329_v27  ;;  %5350 = vpow2.f32 %v4477_v46  ;;  %v393_v1 = vmul.f32 %v4742_v63, %v5536_v3 }
  0x5b   : > { %v5333_v43 = vpop.eup %5332  ;;  %v746_v44 = vld [vmem:[#allocation2 + $0x20] sm:$0xff]  ;;  %682 = vst.msk [vmem:[#allocation2 + $0x39] sm:$0xff] %vm678_vm3, %v648_v60  ;;  %v571_v0 = vadd.f32 1.0, %v5331_v31  ;;  %5352 = vpow2.f32 %v4478_v15  ;;  %v4479_v46 = vmul.f32 -1.442695, %v5727_v47  ;;  %v5764_v29 = vadd.f32 %v5541_v4, %v394_v38 }
  0x5c   : > { %v5335_v48 = vpop.eup %5334  ;;  %4970 = vmatmul.mubr.msk.bf16.vlgmr.msra.gmra.mrb[0].mxu1 %vm678_vm3, %v784_v32  ;;  %v5730_v49 = vpack.c.bf16 %v746_v44, %v745_v37  ;;  %v763_v50 = vld [vmem:[#allocation2 + $0xf0] sm:$0xff]  ;;  %5354 = vrcp.f32 %v554_v39  ;;  %v572_v33 = vadd.f32 1.0, %v5333_v43  ;;  %v5758_v19 = vadd.f32 %v5541_v4, %v393_v1  ;;  %v4797_v39 = vld [vmem:[%s5462_s27 + $0x78] sm:$0xff]  }
  0x5d   : > { %v5337_v34 = vpop.eup %5336  ;;  %4986 = vmatpush3.bf16.msra.mxu1 %v5546_v7  ;;  %v764_v55 = vld [vmem:[#allocation2 + $0xf8] sm:$0xff]  ;;  %5356 = vrcp.f32 %v571_v0  ;;  %v573_v57 = vadd.f32 1.0, %v5335_v48  ;;  %v5769_v31 = vadd.f32 %v5541_v4, %v395_v10  ;;  %v4460_v37 = vmul.f32 -1.442695, %v5755_v54 }
  0x5e   : > { %v5339_v58 = vpop.eup %5338  ;;  %4954 = vmatmul.mubr.msk.bf16.vlgmr.msra.gmra.mrb[0].mxu0 %vm678_vm3, %v5730_v49  ;;  %v5741_v59 = vpack.c.bf16 %v764_v55, %v763_v50  ;;  %v765_v61 = vld [vmem:[#allocation2 + $0x108] sm:$0xff]  ;;  %5358 = vrcp.f32 %v572_v33  ;;  %v574_v36 = vadd.f32 1.0, %v5337_v34  ;;  %5053 = vmatprep.subr.bf16.mxu1 %v5723_v40  ;;  %v4461_v44 = vmul.f32 -1.442695, %v5758_v19 }
  0x5f   : > { %v5341_v2 = vpop.eup %5340  ;;  %5020 = vmatpush3.bf16.msra.mxu0 %v5557_v21  ;;  %5360 = vrcp.f32 %v573_v57  ;;  %v555_v7 = vadd.f32 1.0, %v5339_v58  ;;  %v4462_v48 = vmul.f32 -1.442695, %v5764_v29  ;;  %v4463_v41 = vmul.f32 -1.442695, %v5769_v31 }
  0x60   : > { %v5343_v6 = vpop.eup %5342  ;;  %4973 = vmatprep.mubr.msk.bf16.mxu1 %vm678_vm3, %v5741_v59  ;;  %v766_v8 = vld [vmem:[#allocation2 + $0x110] sm:$0xff]  ;;  %5362 = vrcp.f32 %v574_v36  ;;  %v556_v9 = vadd.f32 1.0, %v5341_v2  ;;  %5087 = vmatprep.subr.bf16.mxu0 %v5735_v53  ;;  %v4781_v34 = vunpack.c.l.bf16 %v4797_v39  ;;  %v4782_v35 = vunpack.c.h.bf16 %v4797_v39 }
  0x61   : > { %v5345_v11 = vpop.eup %5344  ;;  %v5752_v13 = vpack.c.bf16 %v766_v8, %v765_v61  ;;  %v747_v21 = vld [vmem:[#allocation2 + $0x30] sm:$0xff]  ;;  %5364 = vrcp.f32 %v555_v7  ;;  %v557_v14 = vadd.f32 1.0, %v5343_v6 }
  0x62   : > { %v5347_v15 = vpop.eup %5346  ;;  %v748_v16 = vld [vmem:[#allocation2 + $0x38] sm:$0xff]  ;;  %5366 = vrcp.f32 %v556_v9  ;;  %v558_v18 = vadd.f32 1.0, %v5345_v11  ;;  %v412_v61 = vmul.f32 %v4781_v34, %v5536_v3  ;;  %v413_v1 = vmul.f32 %v4782_v35, %v5536_v3 }
  0x63   : > { %v5349_v20 = vpop.eup %5348  ;;  %v5760_v26 = vpack.c.bf16 %v748_v16, %v747_v21  ;;  %v649_v27 = vmul.f32 %v5347_v15, %v5627_v12  ;;  %5368 = vrcp.f32 %v557_v14 }
  0x64   : > { %v5351_v60 = vpop.eup %5350  ;;  %4974 = vmatmul.mubr.msk.bf16.gmra.mrb[4].mxu1 %vm678_vm3, %v5752_v13  ;;  %5370 = vrcp.f32 %v558_v18  ;;  %v575_v30 = vadd.f32 1.0, %v5349_v20  ;;  %v5792_v7 = vadd.f32 %v5541_v4, %v412_v61  ;;  %v5797_v6 = vadd.f32 %v5541_v4, %v413_v1 }
  0x65   : > { %v5353_v32 = vpop.eup %5352  ;;  %4957 = vmatprep.mubr.msk.bf16.mxu0 %vm678_vm3, %v5760_v26  ;;  %683 = vst.msk [vmem:[#allocation2 + $0x49] sm:$0xff] %vm678_vm3, %v649_v27  ;;  %v576_v12 = vadd.f32 1.0, %v5351_v60  ;;  %5372 = vpow2.f32 %v4479_v46 }
  0x66   : > { %v5355_v63 = vpop.eup %5354  ;;  %5374 = vrcp.f32 %v575_v30  ;;  %v577_v43 = vadd.f32 1.0, %v5353_v32  ;;  %v4481_v10 = vmul.f32 -1.442695, %v5797_v6 }
  0x67   : > { %v5357_v0 = vpop.eup %5356  ;;  %v650_v23 = vmul.f32 %v5355_v63, %v5631_v17  ;;  %5376 = vrcp.f32 %v576_v12 }
  0x68   : > { %v5359_v50 = vpop.eup %5358  ;;  %v667_v33 = vmul.f32 %v5357_v0, %v5635_v24  ;;  %5378 = vrcp.f32 %v577_v43 }
  0x69   : > { %v5361_v55 = vpop.eup %5360  ;;  %684 = vst.msk [vmem:[#allocation2 + $0x51] sm:$0xff] %vm678_vm3, %v650_v23  ;;  %v668_v57 = vmul.f32 %v5359_v50, %v5643_v42  ;;  %5380 = vpow2.f32 %v4460_v37 }
  0x6a   : > { %v5363_v58 = vpop.eup %5362  ;;  %701 = vst.msk [vmem:[#allocation2 + $0x121] sm:$0xff] %vm678_vm3, %v667_v33  ;;  %v669_v17 = vmul.f32 %v5361_v55, %v5648_v51  ;;  %5382 = vpow2.f32 %v4461_v44 }
  0x6b   : > { %v5365_v24 = vpop.eup %5364  ;;  %702 = vst.msk [vmem:[#allocation2 + $0x129] sm:$0xff] %vm678_vm3, %v668_v57  ;;  %v670_v36 = vmul.f32 %v5363_v58, %v5651_v56  ;;  %5384 = vpow2.f32 %v4462_v48 }
  0x6c   : > { %v5367_v2 = vpop.eup %5366  ;;  %703 = vst.msk [vmem:[#allocation2 + $0x139] sm:$0xff] %vm678_vm3, %v669_v17  ;;  %v651_v42 = vmul.f32 %v5365_v24, %v5658_v5  ;;  %5386 = vpow2.f32 %v4463_v41  ;;  %v749_v8 = vld [vmem:[#allocation2 + $0x48] sm:$0xff]  ;;  %v4480_v5 = vmul.f32 -1.442695, %v5792_v7 }
  0x6d   : > { %v5369_v51 = vpop.eup %5368  ;;  %704 = vst.msk [vmem:[#allocation2 + $0x141] sm:$0xff] %vm678_vm3, %v670_v36  ;;  %v652_v38 = vmul.f32 %v5367_v2, %v5665_v25 }
  0x6e   : > { %v5371_v56 = vpop.eup %5370  ;;  %685 = vst.msk [vmem:[#allocation2 + $0x61] sm:$0xff] %vm678_vm3, %v651_v42  ;;  %v653_v3 = vmul.f32 %v5369_v51, %v5669_v28  ;;  %5388 = vpow2.f32 %v4480_v5 }
  0x6f   : > { %v5373_v9 = vpop.eup %5372  ;;  %686 = vst.msk [vmem:[#allocation2 + $0x69] sm:$0xff] %vm678_vm3, %v652_v38  ;;  %v654_v46 = vmul.f32 %v5371_v56, %v5678_v22  ;;  %5390 = vpow2.f32 %v4481_v10 }
  0x70   : > { %v5375_v11 = vpop.eup %5374  ;;  %v750_v25 = vld [vmem:[#allocation2 + $0x50] sm:$0xff]  ;;  %687 = vst.msk [vmem:[#allocation2 + $0x79] sm:$0xff] %vm678_vm3, %v653_v3  ;;  %v578_v4 = vadd.f32 1.0, %v5373_v9 }
  0x71   : > { %v5377_v21 = vpop.eup %5376  ;;  %v5806_v14 = vpack.c.bf16 %v750_v25, %v749_v8  ;;  %v767_v15 = vld [vmem:[#allocation2 + $0x120] sm:$0xff]  ;;  %688 = vst.msk [vmem:[#allocation2 + $0x81] sm:$0xff] %vm678_vm3, %v654_v46  ;;  %v671_v28 = vmul.f32 %v5375_v11, %v5688_v52  ;;  %v1105_v8 = vld [vmem:[#allocation2 + $0x9] sm:$0xff] }
  0x72   : > { %v5379_v16 = vpop.eup %5378  ;;  %v768_v18 = vld [vmem:[#allocation2 + $0x128] sm:$0xff]  ;;  %v672_v22 = vmul.f32 %v5377_v21, %v5693_v45  ;;  %5392 = vrcp.f32 %v578_v4  ;;  %v1106_v21 = vld [vmem:[#allocation2 + $0x19] sm:$0xff] }
  0x73   : > { %v5381_v20 = vpop.eup %5380  ;;  %4958 = vmatmul.mubr.msk.bf16.gmra.mrb[4].mxu0 %vm678_vm3, %v5806_v14  ;;  %v5813_v27 = vpack.c.bf16 %v768_v18, %v767_v15  ;;  %v769_v60 = vld [vmem:[#allocation2 + $0x138] sm:$0xff]  ;;  %705 = vst.msk [vmem:[#allocation2 + $0x151] sm:$0xff] %vm678_vm3, %v671_v28  ;;  %v673_v30 = vmul.f32 %v5379_v16, %v5702_v62  ;;  %v1467_v25 = vld [vmem:[#allocation2 + $0xa] sm:$0xff]  ;;  %v1107_v15 = vld [vmem:[#allocation2 + $0x21] sm:$0xff] }
  0x74   : > { %v5383_v32 = vpop.eup %5382  ;;  %v770_v12 = vld [vmem:[#allocation2 + $0x140] sm:$0xff]  ;;  %706 = vst.msk [vmem:[#allocation2 + $0x159] sm:$0xff] %vm678_vm3, %v672_v22  ;;  %v559_v52 = vadd.f32 1.0, %v5381_v20  ;;  %v1108_v16 = vld [vmem:[#allocation2 + $0x31] sm:$0xff] }
  0x75   : > { %v5385_v37 = vpop.eup %5384  ;;  %4977 = vmatprep.mubr.msk.bf16.mxu1 %vm678_vm3, %v5813_v27  ;;  %v5820_v45 = vpack.c.bf16 %v770_v12, %v769_v60  ;;  %v751_v39 = vld [vmem:[#allocation2 + $0x60] sm:$0xff]  ;;  %707 = vst.msk [vmem:[#allocation2 + $0x169] sm:$0xff] %vm678_vm3, %v673_v30  ;;  %v560_v63 = vadd.f32 1.0, %v5383_v32  ;;  %v5858_v60 = vpack.c.bf16 %v1107_v15, %v1106_v21  ;;  %v5869_v12 = vld [vmem:[%s6673_s3 + $0x28] sm:$0xff]  }
  0x76   : > { %v5387_v43 = vpop.eup %5386  ;;  %v752_v44 = vld [vmem:[#allocation2 + $0x68] sm:$0xff]  ;;  %5394 = vrcp.f32 %v559_v52  ;;  %v561_v0 = vadd.f32 1.0, %v5385_v37  ;;  %v1109_v18 = vld [vmem:[#allocation2 + $0x39] sm:$0xff] }
  0x77   : > { %4978 = vmatmul.mubr.msk.bf16.gmra.mrb[8].mxu1 %vm678_vm3, %v5820_v45  ;;  %v5825_v62 = vpack.c.bf16 %v752_v44, %v751_v39  ;;  %v753_v23 = vld [vmem:[#allocation2 + $0x78] sm:$0xff]  ;;  %5396 = vrcp.f32 %v560_v63  ;;  %v562_v48 = vadd.f32 1.0, %v5387_v43  ;;  %v5864_v32 = vpack.c.bf16 %v1109_v18, %v1108_v16  ;;  %v1469_v37 = vld [vmem:[#allocation2 + $0x22] sm:$0xff] }
  0x78   : > { %v754_v50 = vld [vmem:[#allocation2 + $0x80] sm:$0xff]  ;;  %5398 = vrcp.f32 %v561_v0  ;;  %v5389_v41 = vpop.eup %5388  ;;  %v1110_v39 = vld [vmem:[#allocation2 + $0x49] sm:$0xff]  ;;  %v1111_v63 = vld [vmem:[#allocation2 + $0x51] sm:$0xff] }
  0x79   : > { %4961 = vmatprep.mubr.msk.bf16.mxu0 %vm678_vm3, %v5825_v62  ;;  %v5829_v33 = vpack.c.bf16 %v754_v50, %v753_v23  ;;  %5400 = vrcp.f32 %v562_v48  ;;  %v5391_v55 = vpop.eup %5390  ;;  %v579_v35 = vadd.f32 1.0, %v5389_v41  ;;  %v1468_v52 = vld [vmem:[#allocation2 + $0x1a] sm:$0xff]  ;;  %v1470_v43 = vld [vmem:[#allocation2 + $0x32] sm:$0xff]  ;;  %v1113_v23 = vld [vmem:[#allocation2 + $0x69] sm:$0xff]  ;;  %v5882_v50 = vpack.c.bf16 %v1111_v63, %v1110_v39 }
  0x7a   : > { %v771_v34 = vld [vmem:[#allocation2 + $0x150] sm:$0xff]  ;;  %v580_v61 = vadd.f32 1.0, %v5391_v55  ;;  %v1471_v44 = vld [vmem:[#allocation2 + $0x3a] sm:$0xff]  ;;  %v5880_v48 = vpack.c.bf16 %v1469_v37, %v1468_v52  ;;  %v1485_v39 = vld [vmem:[#allocation2 + $0xe2] sm:$0xff] }
  0x7b   : > { %4962 = vmatmul.mubr.msk.bf16.gmra.mrb[8].mxu0 %vm678_vm3, %v5829_v33  ;;  %v772_v57 = vld [vmem:[#allocation2 + $0x158] sm:$0xff]  ;;  %5402 = vrcp.f32 %v579_v35  ;;  %v1112_v0 = vld [vmem:[#allocation2 + $0x61] sm:$0xff]  ;;  %v5884_v41 = vpack.c.bf16 %v1471_v44, %v1470_v43  ;;  %v1472_v55 = vld [vmem:[#allocation2 + $0x4a] sm:$0xff] }
  0x7c   : > { %v5393_v58 = vpop.eup %5392  ;;  %v5833_v17 = vpack.c.bf16 %v772_v57, %v771_v34  ;;  %5404 = vrcp.f32 %v580_v61  ;;  %v773_v3 = vld [vmem:[#allocation2 + $0x168] sm:$0xff]  ;;  %v5886_v34 = vpack.c.bf16 %v1113_v23, %v1112_v0  ;;  %v1473_v57 = vld [vmem:[#allocation2 + $0x52] sm:$0xff]  ;;  %v1484_v37 = vld [vmem:[#allocation2 + $0xda] sm:$0xff] }
  0x7d   : > { %v674_v24 = vmul.f32 %v5393_v58, %v5727_v47  ;;  %v1104_v47 = vld [vmem:[#allocation2 + $0x1] sm:$0xff]  ;;  %v1114_v58 = vld [vmem:[#allocation2 + $0x79] sm:$0xff]  ;;  %v1124_v16 = vld [vmem:[#allocation2 + $0xf1] sm:$0xff] }
  0x7e   : > { %4981 = vmatprep.mubr.msk.bf16.mxu1 %vm678_vm3, %v5833_v17  ;;  %v1474_v35 = vld [vmem:[#allocation2 + $0x62] sm:$0xff]  ;;  %v1122_v21 = vld [vmem:[#allocation2 + $0xd9] sm:$0xff]  ;;  %v1127_v44 = vld [vmem:[#allocation2 + $0x111] sm:$0xff] }
  0x7f   : > { %708 = vst.msk [vmem:[#allocation2 + $0x171] sm:$0xff] %vm678_vm3, %v674_v24  ;;  %v1115_v61 = vld [vmem:[#allocation2 + $0x81] sm:$0xff]  ;;  %v1475_v24 = vld [vmem:[#allocation2 + $0x6a] sm:$0xff]  ;;  %v1125_v18 = vld [vmem:[#allocation2 + $0xf9] sm:$0xff] }
  0x80   : > { %v5395_v36 = vpop.eup %5394  ;;  %v1123_v15 = vld [vmem:[#allocation2 + $0xe1] sm:$0xff]  ;;  %v5941_v52 = vpack.c.bf16 %v1125_v18, %v1124_v16  ;;  %v1486_v63 = vld [vmem:[#allocation2 + $0xf2] sm:$0xff]  ;;  %v1126_v43 = vld [vmem:[#allocation2 + $0x109] sm:$0xff] }
  0x81   : > { %v5397_v1 = vpop.eup %5396  ;;  %v655_v2 = vmul.f32 %v5395_v36, %v5755_v54  ;;  %v1136_v54 = vpack.c.bf16 %v1105_v8, %v1104_v47  ;;  %v1487_v0 = vld [vmem:[#allocation2 + $0xfa] sm:$0xff] }
  0x82   : > { %v5399_v42 = vpop.eup %5398  ;;  %v656_v51 = vmul.f32 %v5397_v1, %v5758_v19  ;;  %v1128_v23 = vld [vmem:[#allocation2 + $0x121] sm:$0xff] }
  0x83   : > { %v5401_v38 = vpop.eup %5400  ;;  %689 = vst.msk [vmem:[#allocation2 + $0x91] sm:$0xff] %vm678_vm3, %v655_v2  ;;  %v657_v56 = vmul.f32 %v5399_v42, %v5764_v29  ;;  %v1466_v29 = vld [vmem:[#allocation2 + $0x2] sm:$0xff]  ;;  %v5903_v2 = vpack.c.bf16 %v1473_v57, %v1472_v55  ;;  %v5905_v42 = vpack.c.bf16 %v1115_v61, %v1114_v58  ;;  %v5951_v57 = vpack.c.bf16 %v1485_v39, %v1484_v37  ;;  %v1495_v18 = vld [vmem:[#allocation2 + $0x15a] sm:$0xff] }
  0x84   : > { %690 = vst.msk [vmem:[#allocation2 + $0x99] sm:$0xff] %vm678_vm3, %v656_v51  ;;  %v658_v5 = vmul.f32 %v5401_v38, %v5769_v31  ;;  %v1498_v30 = vpack.c.bf16 %v1467_v25, %v1466_v29  ;;  %v1476_v38 = vld [vmem:[#allocation2 + $0x7a] sm:$0xff]  ;;  %v1129_v55 = vld [vmem:[#allocation2 + $0x129] sm:$0xff]  ;;  %v5955_v58 = vpack.c.bf16 %v1487_v0, %v1486_v63 }
  0x85   : > { %691 = vst.msk [vmem:[#allocation2 + $0xa9] sm:$0xff] %vm678_vm3, %v657_v56  ;;  %v5403_v46 = vpop.eup %5402  ;;  %v1477_v56 = vld [vmem:[#allocation2 + $0x82] sm:$0xff]  ;;  %v5957_v61 = vpack.c.bf16 %v1129_v55, %v1128_v23  ;;  %v5276_v23 = vld [vmem:[%s6673_s3 + $0x38] sm:$0xff]  }
  0x86   : > { %v774_v9 = vld [vmem:[#allocation2 + $0x170] sm:$0xff]  ;;  %692 = vst.msk [vmem:[#allocation2 + $0xb1] sm:$0xff] %vm678_vm3, %v658_v5  ;;  %v5405_v10 = vpop.eup %5404  ;;  %v675_v11 = vmul.f32 %v5403_v46, %v5792_v7  ;;  %v5919_v46 = vpack.c.bf16 %v1477_v56, %v1476_v38  ;;  %v1130_v38 = vld [vmem:[#allocation2 + $0x139] sm:$0xff]  ;;  %v1131_v56 = vld [vmem:[#allocation2 + $0x141] sm:$0xff] }
  0x87   : > { %v5847_v19 = vpack.c.bf16 %v774_v9, %v773_v3  ;;  %v676_v4 = vmul.f32 %v5405_v10, %v5797_v6  ;;  %v1120_v9 = vld [vmem:[#allocation2 + $0xc1] sm:$0xff]  ;;  %v1135_v16 = vld [vmem:[#allocation2 + $0x171] sm:$0xff] }
  0x88   : > { %709 = vst.msk [vmem:[#allocation2 + $0x181] sm:$0xff] %vm678_vm3, %v675_v11 }
  0x89   : > { %4982 = vmatmul.mubr.msk.bf16.gmra.mrb[12].mxu1 %vm678_vm3, %v5847_v19  ;;  %710 = vst.msk [vmem:[#allocation2 + $0x189] sm:$0xff] %vm678_vm3, %v676_v4 }
  0x8a   : > { %v755_v31 = vld [vmem:[#allocation2 + $0x90] sm:$0xff]  ;;  %4987 = vmatprep.mubr.msk.bf16.mxu1 %vm678_vm3, %v1136_v54 }
  0x8b   : > { %v756_v28 = vld [vmem:[#allocation2 + $0x98] sm:$0xff]  ;;  %v1121_v54 = vld [vmem:[#allocation2 + $0xc9] sm:$0xff] }
  0x8c   : > { %v5856_v7 = vpack.c.bf16 %v756_v28, %v755_v31  ;;  %v757_v22 = vld [vmem:[#allocation2 + $0xa8] sm:$0xff]  ;;  %v1116_v36 = vld [vmem:[#allocation2 + $0x91] sm:$0xff]  ;;  %v1117_v1 = vld [vmem:[#allocation2 + $0x99] sm:$0xff]  ;;  %v5925_v29 = vpack.c.bf16 %v1121_v54, %v1120_v9  ;;  %v5969_v9 = vpack.c.bf16 %v1131_v56, %v1130_v38 }
  0x8d   : > { %v758_v20 = vld [vmem:[#allocation2 + $0xb0] sm:$0xff]  ;;  %v5909_v51 = vpack.c.bf16 %v1117_v1, %v1116_v36  ;;  %v1479_v5 = vld [vmem:[#allocation2 + $0x9a] sm:$0xff]  ;;  %v1482_v31 = vld [vmem:[#allocation2 + $0xc2] sm:$0xff] }
  0x8e   : > { %4965 = vmatprep.mubr.msk.bf16.mxu0 %vm678_vm3, %v5856_v7  ;;  %v5862_v6 = vpack.c.bf16 %v758_v20, %v757_v22  ;;  %v1478_v47 = vld [vmem:[#allocation2 + $0x92] sm:$0xff]  ;;  %v1118_v8 = vld [vmem:[#allocation2 + $0xa9] sm:$0xff]  ;;  %v5937_v20 = vpack.c.bf16 %v1123_v15, %v1122_v21 }
  0x8f   : > { %v1119_v3 = vld [vmem:[#allocation2 + $0xb1] sm:$0xff]  ;;  %v5923_v11 = vpack.c.bf16 %v1479_v5, %v1478_v47  ;;  %v1490_v1 = vld [vmem:[#allocation2 + $0x122] sm:$0xff] }
  0x90   : > { %4966 = vmatmul.mubr.msk.bf16.gmra.mrb[12].mxu0 %vm678_vm3, %v5862_v6  ;;  %v5921_v10 = vpack.c.bf16 %v1119_v3, %v1118_v8  ;;  %v1480_v25 = vld [vmem:[#allocation2 + $0xaa] sm:$0xff]  ;;  %v1481_v4 = vld [vmem:[#allocation2 + $0xb2] sm:$0xff]  ;;  %v1493_v21 = vld [vmem:[#allocation2 + $0x142] sm:$0xff] }
  0x91   : > { %4988 = vmatmul.mubr.msk.bf16.vlgmr.msra.gmra.mrb[16].mxu1 %vm678_vm3, %v5858_v60  ;;  %5021 = vmatprep.mubr.msk.bf16.mxu0 %vm678_vm3, %v1498_v30  ;;  %v1483_v28 = vld [vmem:[#allocation2 + $0xca] sm:$0xff]  ;;  %v5935_v22 = vpack.c.bf16 %v1481_v4, %v1480_v25  ;;  %v1489_v36 = vld [vmem:[#allocation2 + $0x112] sm:$0xff]  ;;  %v5415_v25 = vmov 0.0  }
  0x92   : > { %5054 = vmatpush3.bf16.msra.mxu1 %v5723_v40  ;;  %4991 = vmatprep.mubr.msk.bf16.mxu1 %vm678_vm3, %v5864_v32  ;;  %v5891_v40 = vld [vmem:[%s6673_s3 + $0x30] sm:$0xff]   ;;  %v5939_v30 = vpack.c.bf16 %v1483_v28, %v1482_v31  ;;  %v1133_v3 = vld [vmem:[#allocation2 + $0x159] sm:$0xff]  ;;  %729 = vst.msk [vmem:[#allocation3 + $0x90] sm:$0xff] %vm678_vm3, %v5415_v25  ;;  %711 = vst.msk [vmem:[#allocation3] sm:$0xff] %vm678_vm3, %v5415_v25 }
  0x93   : > { %5121 = vmatprep.subr.bf16.mxu1 %v5869_v12  ;;  %v1491_v47 = vld [vmem:[#allocation2 + $0x12a] sm:$0xff]  ;;  %712 = vst.msk [vmem:[#allocation3 + $0x8] sm:$0xff] %vm678_vm3, %v5415_v25  ;;  %713 = vst.msk [vmem:[#allocation3 + $0x10] sm:$0xff] %vm678_vm3, %v5415_v25  ;;  %v1492_v31 = vld [vmem:[#allocation2 + $0x13a] sm:$0xff] }
  0x94   : > { %v1132_v8 = vld [vmem:[#allocation2 + $0x151] sm:$0xff]  ;;  %v5971_v54 = vpack.c.bf16 %v1491_v47, %v1490_v1  ;;  %714 = vst.msk [vmem:[#allocation3 + $0x18] sm:$0xff] %vm678_vm3, %v5415_v25  ;;  %715 = vst.msk [vmem:[#allocation3 + $0x20] sm:$0xff] %vm678_vm3, %v5415_v25  ;;  %v1134_v28 = vld [vmem:[#allocation2 + $0x169] sm:$0xff]  ;;  %v6015_v37 = vpack.c.bf16 %v1493_v21, %v1492_v31 }
  0x95   : > { %716 = vst.msk [vmem:[#allocation3 + $0x28] sm:$0xff] %vm678_vm3, %v5415_v25  ;;  %717 = vst.msk [vmem:[#allocation3 + $0x30] sm:$0xff] %vm678_vm3, %v5415_v25  ;;  %v6005_v4 = vpack.c.bf16 %v1133_v3, %v1132_v8  ;;  %v1494_v15 = vld [vmem:[#allocation2 + $0x152] sm:$0xff]  ;;  %v1151_v39 = vpack.c.bf16 %v1135_v16, %v1134_v28 }
  0x96   : > { %718 = vst.msk [vmem:[#allocation3 + $0x38] sm:$0xff] %vm678_vm3, %v5415_v25  ;;  %719 = vst.msk [vmem:[#allocation3 + $0x40] sm:$0xff] %vm678_vm3, %v5415_v25  ;;  %v6017_v63 = vpack.c.bf16 %v1495_v18, %v1494_v15 }
  0x97   : > { %720 = vst.msk [vmem:[#allocation3 + $0x48] sm:$0xff] %vm678_vm3, %v5415_v25  ;;  %721 = vst.msk [vmem:[#allocation3 + $0x50] sm:$0xff] %vm678_vm3, %v5415_v25 }
  0x98   : > { %5022 = vmatmul.mubr.msk.bf16.vlgmr.msra.gmra.mrb[16].mxu0 %vm678_vm3, %v5880_v48  ;;  %722 = vst.msk [vmem:[#allocation3 + $0x58] sm:$0xff] %vm678_vm3, %v5415_v25  ;;  %723 = vst.msk [vmem:[#allocation3 + $0x60] sm:$0xff] %vm678_vm3, %v5415_v25 }
  0x99   : > { %4992 = vmatmul.mubr.msk.bf16.gmra.mrb[20].mxu1 %vm678_vm3, %v5882_v50  ;;  %5088 = vmatpush3.bf16.msra.mxu0 %v5735_v53  ;;  %v5907_v53 = vpack.c.bf16 %v1475_v24, %v1474_v35  ;;  %v5953_v35 = vpack.c.bf16 %v1127_v44, %v1126_v43  ;;  %v1488_v24 = vld [vmem:[#allocation2 + $0x10a] sm:$0xff]  ;;  %724 = vst.msk [vmem:[#allocation3 + $0x68] sm:$0xff] %vm678_vm3, %v5415_v25  ;;  %725 = vst.msk [vmem:[#allocation3 + $0x70] sm:$0xff] %vm678_vm3, %v5415_v25  ;;  %v1497_v44 = vld [vmem:[#allocation2 + $0x172] sm:$0xff] }
  0x9a   : > { %5025 = vmatprep.mubr.msk.bf16.mxu0 %vm678_vm3, %v5884_v41  ;;  %4995 = vmatprep.mubr.msk.bf16.mxu1 %vm678_vm3, %v5886_v34  ;;  %v5967_v5 = vpack.c.bf16 %v1489_v36, %v1488_v24  ;;  %726 = vst.msk [vmem:[#allocation3 + $0x78] sm:$0xff] %vm678_vm3, %v5415_v25  ;;  %727 = vst.msk [vmem:[#allocation3 + $0x80] sm:$0xff] %vm678_vm3, %v5415_v25  ;;  %v1496_v43 = vld [vmem:[#allocation2 + $0x16a] sm:$0xff] }
  0x9b   : > { %5155 = vmatprep.subr.bf16.mxu0 %v5891_v40  ;;  %728 = vst.msk [vmem:[#allocation3 + $0x88] sm:$0xff] %vm678_vm3, %v5415_v25  ;;  %730 = vst.msk [vmem:[#allocation3 + $0x98] sm:$0xff] %vm678_vm3, %v5415_v25  ;;  %v6026_v0 = vpack.c.bf16 %v1497_v44, %v1496_v43  ;;  %v2937_v44 = vld [vmem:[#allocation2 + $0x138] sm:$0xff] }
  0x9c   : > { %731 = vst.msk [vmem:[#allocation3 + $0xa0] sm:$0xff] %vm678_vm3, %v5415_v25  ;;  %732 = vst.msk [vmem:[#allocation3 + $0xa8] sm:$0xff] %vm678_vm3, %v5415_v25 }
  0x9d   : > { %733 = vst.msk [vmem:[#allocation3 + $0xb0] sm:$0xff] %vm678_vm3, %v5415_v25  ;;  %734 = vst.msk [vmem:[#allocation3 + $0xb8] sm:$0xff] %vm678_vm3, %v5415_v25 }
  0x9e   : > { %735 = vst.msk [vmem:[#allocation3 + $0xc0] sm:$0xff] %vm678_vm3, %v5415_v25  ;;  %736 = vst.msk [vmem:[#allocation3 + $0xc8] sm:$0xff] %vm678_vm3, %v5415_v25 }
  0x9f   : > { %737 = vst.msk [vmem:[#allocation3 + $0xd0] sm:$0xff] %vm678_vm3, %v5415_v25  ;;  %738 = vst.msk [vmem:[#allocation3 + $0xd8] sm:$0xff] %vm678_vm3, %v5415_v25 }
  0xa0   : > { %5026 = vmatmul.mubr.msk.bf16.gmra.mrb[20].mxu0 %vm678_vm3, %v5903_v2  ;;  %739 = vst.msk [vmem:[#allocation3 + $0xe0] sm:$0xff] %vm678_vm3, %v5415_v25  ;;  %740 = vst.msk [vmem:[#allocation3 + $0xe8] sm:$0xff] %vm678_vm3, %v5415_v25 }
  0xa1   : > { %4996 = vmatmul.mubr.msk.bf16.gmra.mrb[24].mxu1 %vm678_vm3, %v5905_v42  ;;  %5029 = vmatprep.mubr.msk.bf16.mxu0 %vm678_vm3, %v5907_v53  ;;  %741 = vst.msk [vmem:[#allocation3 + $0xf0] sm:$0xff] %vm678_vm3, %v5415_v25  ;;  %742 = vst.msk [vmem:[#allocation3 + $0xf8] sm:$0xff] %vm678_vm3, %v5415_v25 }
  0xa2   : > { %4999 = vmatprep.mubr.msk.bf16.mxu1 %vm678_vm3, %v5909_v51 }
  0xa3   : > { %v811_v15 = vld [vmem:[#allocation3 + $0xa0] sm:$0xff]  ;;  %v812_v43 = vld [vmem:[#allocation3 + $0xa8] sm:$0xff] }
  0xa4   : > { %v813_v31 = vld [vmem:[#allocation3 + $0xb0] sm:$0xff]  ;;  %v814_v16 = vld [vmem:[#allocation3 + $0xb8] sm:$0xff] }
  0xa8   : > { %5030 = vmatmul.mubr.msk.bf16.gmra.mrb[24].mxu0 %vm678_vm3, %v5919_v46 }
  0xa9   : > { %5000 = vmatmul.mubr.msk.bf16.gmra.mrb[28].mxu1 %vm678_vm3, %v5921_v10  ;;  %5033 = vmatprep.mubr.msk.bf16.mxu0 %vm678_vm3, %v5923_v11 }
  0xaa   : > { %5003 = vmatprep.mubr.msk.bf16.mxu1 %vm678_vm3, %v5925_v29 }
  0xb0   : > { %5034 = vmatmul.mubr.msk.bf16.gmra.mrb[28].mxu0 %vm678_vm3, %v5935_v22 }
  0xb1   : > { %5004 = vmatmul.mubr.msk.bf16.gmra.mrb[32].mxu1 %vm678_vm3, %v5937_v20  ;;  %5037 = vmatprep.mubr.msk.bf16.mxu0 %vm678_vm3, %v5939_v30 }
  0xb2   : > { %5007 = vmatprep.mubr.msk.bf16.mxu1 %vm678_vm3, %v5941_v52 }
  0xb8   : > { %5038 = vmatmul.mubr.msk.bf16.gmra.mrb[32].mxu0 %vm678_vm3, %v5951_v57 }
  0xb9   : > { %5008 = vmatmul.mubr.msk.bf16.gmra.mrb[36].mxu1 %vm678_vm3, %v5953_v35  ;;  %5041 = vmatprep.mubr.msk.bf16.mxu0 %vm678_vm3, %v5955_v58 }
  0xba   : > { %5011 = vmatprep.mubr.msk.bf16.mxu1 %vm678_vm3, %v5957_v61 }
  0xc0   : > { %5042 = vmatmul.mubr.msk.bf16.gmra.mrb[36].mxu0 %vm678_vm3, %v5967_v5 }
  0xc1   : > { %5012 = vmatmul.mubr.msk.bf16.gmra.mrb[40].mxu1 %vm678_vm3, %v5969_v9  ;;  %5045 = vmatprep.mubr.msk.bf16.mxu0 %vm678_vm3, %v5971_v54 }
  0xc2   : > { %5015 = vmatprep.mubr.msk.bf16.mxu1 %vm678_vm3, %v6005_v4 }
  0xc8   : > { %5046 = vmatmul.mubr.msk.bf16.gmra.mrb[40].mxu0 %vm678_vm3, %v6015_v37 }
  0xc9   : > { %5016 = vmatmul.mubr.msk.bf16.gmra.mrb[44].mxu1 %vm678_vm3, %v1151_v39  ;;  %5049 = vmatprep.mubr.msk.bf16.mxu0 %vm678_vm3, %v6017_v63 }
  0xca   : > { %5055 = vmatprep.mubr.msk.bf16.mxu1 %vm678_vm3, %v5730_v49  ;;  %v5277_v49 = vld [vmem:[%s6673_s3 + $0x40] sm:$0xff]  }
  0xd0   : > { %5050 = vmatmul.mubr.msk.bf16.gmra.mrb[44].mxu0 %vm678_vm3, %v6026_v0 }
  0xd1   : > { %5056 = vmatmul.mubr.msk.bf16.vlgmr.msra.gmra.mrb[48].mxu1 %vm678_vm3, %v5760_v26  ;;  %5089 = vmatprep.mubr.msk.bf16.mxu0 %vm678_vm3, %v5858_v60  ;;  %v1842_v26 = vld [vmem:[#allocation2 + $0xc0] sm:$0xff]  ;;  %v1843_v60 = vld [vmem:[#allocation2 + $0xc8] sm:$0xff] }
  0xd2   : > { %5122 = vmatpush3.bf16.msra.mxu1 %v5869_v12  ;;  %5059 = vmatprep.mubr.msk.bf16.mxu1 %vm678_vm3, %v5806_v14  ;;  %v1844_v12 = vld [vmem:[#allocation2 + $0xd8] sm:$0xff]  ;;  %v1867_v55 = vpack.c.bf16 %v1843_v60, %v1842_v26  ;;  %v2939_v60 = vld [vmem:[#allocation2 + $0x150] sm:$0xff] }
  0xd3   : > { %5189 = vmatprep.subr.bf16.mxu1 %v5276_v23 }
  0xd8   : > { %5090 = vmatmul.mubr.msk.bf16.vlgmr.msra.gmra.mrb[48].mxu0 %vm678_vm3, %v5864_v32 }
  0xd9   : > { %5060 = vmatmul.mubr.msk.bf16.gmra.mrb[52].mxu1 %vm678_vm3, %v5825_v62  ;;  %5156 = vmatpush3.bf16.msra.mxu0 %v5891_v40  ;;  %v1845_v40 = vld [vmem:[#allocation2 + $0xe0] sm:$0xff] }
  0xda   : > { %5093 = vmatprep.mubr.msk.bf16.mxu0 %vm678_vm3, %v5882_v50  ;;  %5063 = vmatprep.mubr.msk.bf16.mxu1 %vm678_vm3, %v5829_v33  ;;  %v1868_v24 = vpack.c.bf16 %v1845_v40, %v1844_v12  ;;  %v2940_v12 = vld [vmem:[#allocation2 + $0x158] sm:$0xff] }
  0xdb   : > { %5223 = vmatprep.subr.bf16.mxu0 %v5277_v49 }
  0xe0   : > { %5094 = vmatmul.mubr.msk.bf16.gmra.mrb[52].mxu0 %vm678_vm3, %v5886_v34  ;;  %v2915_v34 = vld [vmem:[#allocation2 + $0x30] sm:$0xff] }
  0xe1   : > { %5064 = vmatmul.mubr.msk.bf16.gmra.mrb[56].mxu1 %vm678_vm3, %v5856_v7  ;;  %5097 = vmatprep.mubr.msk.bf16.mxu0 %vm678_vm3, %v5905_v42  ;;  %v2916_v42 = vld [vmem:[#allocation2 + $0x38] sm:$0xff] }
  0xe2   : > { %5067 = vmatprep.mubr.msk.bf16.mxu1 %vm678_vm3, %v5862_v6 }
  0xe8   : > { %5098 = vmatmul.mubr.msk.bf16.gmra.mrb[56].mxu0 %vm678_vm3, %v5909_v51  ;;  %v2947_v51 = vpack.c.bf16 %v2916_v42, %v2915_v34  ;;  %v797_v42 = vld [vmem:[#allocation3 + $0x30] sm:$0xff] }
  0xe9   : > { %5068 = vmatmul.mubr.msk.bf16.gmra.mrb[60].mxu1 %vm678_vm3, %v1867_v55  ;;  %5101 = vmatprep.mubr.msk.bf16.mxu0 %vm678_vm3, %v5921_v10  ;;  %v808_v10 = vld [vmem:[#allocation3 + $0x88] sm:$0xff] }
  0xea   : > { %5071 = vmatprep.mubr.msk.bf16.mxu1 %vm678_vm3, %v1868_v24 }
  0xf0   : > { %5102 = vmatmul.mubr.msk.bf16.gmra.mrb[60].mxu0 %vm678_vm3, %v5925_v29  ;;  %v2933_v29 = vld [vmem:[#allocation2 + $0x108] sm:$0xff] }
  0xf1   : > { %5072 = vmatmul.mubr.msk.bf16.gmra.mrb[64].mxu1 %vm678_vm3, %v5741_v59  ;;  %5105 = vmatprep.mubr.msk.bf16.mxu0 %vm678_vm3, %v5937_v20  ;;  %v1858_v59 = vld [vmem:[#allocation2 + $0x180] sm:$0xff] }
  0xf2   : > { %5075 = vmatprep.mubr.msk.bf16.mxu1 %vm678_vm3, %v5752_v13  ;;  %v1859_v13 = vld [vmem:[#allocation2 + $0x188] sm:$0xff] }
  0xf8   : > { %5106 = vmatmul.mubr.msk.bf16.gmra.mrb[64].mxu0 %vm678_vm3, %v5941_v52 }
  0xf9   : > { %5076 = vmatmul.mubr.msk.bf16.gmra.mrb[68].mxu1 %vm678_vm3, %v5813_v27  ;;  %5109 = vmatprep.mubr.msk.bf16.mxu0 %vm678_vm3, %v5953_v35  ;;  %v6090_v27 = vpack.c.bf16 %v1859_v13, %v1858_v59  ;;  %v2935_v35 = vld [vmem:[#allocation2 + $0x120] sm:$0xff]  ;;  %v2942_v13 = vld [vmem:[#allocation2 + $0x170] sm:$0xff] }
  0xfa   : > { %5079 = vmatprep.mubr.msk.bf16.mxu1 %vm678_vm3, %v5820_v45  ;;  %v2220_v45 = vld [vmem:[#allocation2 + $0x181] sm:$0xff] }
 0x100   : > { %5110 = vmatmul.mubr.msk.bf16.gmra.mrb[68].mxu0 %vm678_vm3, %v5957_v61  ;;  %v2936_v61 = vld [vmem:[#allocation2 + $0x128] sm:$0xff] }
 0x101   : > { %5080 = vmatmul.mubr.msk.bf16.gmra.mrb[72].mxu1 %vm678_vm3, %v5833_v17  ;;  %5113 = vmatprep.mubr.msk.bf16.mxu0 %vm678_vm3, %v5969_v9  ;;  %v2221_v17 = vld [vmem:[#allocation2 + $0x189] sm:$0xff] }
 0x102   : > { %5083 = vmatprep.mubr.msk.bf16.mxu1 %vm678_vm3, %v5847_v19  ;;  %v2237_v19 = vpack.c.bf16 %v2221_v17, %v2220_v45  ;;  %v2582_v45 = vld [vmem:[#allocation2 + $0x182] sm:$0xff]  ;;  %v2583_v17 = vld [vmem:[#allocation2 + $0x18a] sm:$0xff] }
 0x108   : > { %5114 = vmatmul.mubr.msk.bf16.gmra.mrb[72].mxu0 %vm678_vm3, %v6005_v4  ;;  %v2957_v4 = vpack.c.bf16 %v2936_v61, %v2935_v35  ;;  %v3281_v35 = vld [vmem:[#allocation2 + $0x61] sm:$0xff]  ;;  %v3282_v61 = vld [vmem:[#allocation2 + $0x69] sm:$0xff] }
 0x109   : > { %5084 = vmatmul.mubr.msk.bf16.gmra.mrb[76].mxu1 %vm678_vm3, %v6090_v27  ;;  %5117 = vmatprep.mubr.msk.bf16.mxu0 %vm678_vm3, %v1151_v39 }
 0x10a   : > { %5123 = vmatprep.mubr.msk.bf16.mxu1 %vm678_vm3, %v5880_v48  ;;  %v809_v48 = vld [vmem:[#allocation3 + $0x90] sm:$0xff] }
 0x110   : > { %5118 = vmatmul.mubr.msk.bf16.gmra.mrb[76].mxu0 %vm678_vm3, %v2237_v19  ;;  %v6158_v19 = vpack.c.bf16 %v2583_v17, %v2582_v45  ;;  %v3287_v45 = vld [vmem:[#allocation2 + $0xa9] sm:$0xff]  ;;  %v3288_v17 = vld [vmem:[#allocation2 + $0xb1] sm:$0xff] }
 0x111   : > { %5124 = vmatmul.mubr.msk.bf16.vlgmr.msra.gmra.mrb[80].mxu1 %vm678_vm3, %v5884_v41  ;;  %5157 = vmatprep.mubr.msk.bf16.mxu0 %vm678_vm3, %v2947_v51  ;;  %v807_v41 = vld [vmem:[#allocation3 + $0x80] sm:$0xff] }
 0x112   : > { %5190 = vmatpush3.bf16.msra.mxu1 %v5276_v23  ;;  %5127 = vmatprep.mubr.msk.bf16.mxu1 %vm678_vm3, %v5903_v2  ;;  %v810_v2 = vld [vmem:[#allocation3 + $0x98] sm:$0xff]  ;;  %v2938_v23 = vld [vmem:[#allocation2 + $0x140] sm:$0xff]  ;;  %v795_v51 = vld [vmem:[#allocation3 + $0x20] sm:$0xff] }
 0x113   : > { %v2958_v59 = vpack.c.bf16 %v2938_v23, %v2937_v44  ;;  %v3284_v23 = vld [vmem:[#allocation2 + $0x81] sm:$0xff] }
 0x118   : > { %5158 = vmatmul.mubr.msk.bf16.vlgmr.msra.gmra.mrb[80].mxu0 %vm678_vm3, %v5806_v14  ;;  %v2931_v14 = vld [vmem:[#allocation2 + $0xf0] sm:$0xff] }
 0x119   : > { %5128 = vmatmul.mubr.msk.bf16.gmra.mrb[84].mxu1 %vm678_vm3, %v5907_v53  ;;  %5224 = vmatpush3.bf16.msra.mxu0 %v5277_v49  ;;  %v793_v53 = vld [vmem:[#allocation3 + $0x10] sm:$0xff] }
 0x11a   : > { %5161 = vmatprep.mubr.msk.bf16.mxu0 %vm678_vm3, %v5825_v62  ;;  %5131 = vmatprep.mubr.msk.bf16.mxu1 %vm678_vm3, %v5919_v46  ;;  %v2932_v62 = vld [vmem:[#allocation2 + $0xf8] sm:$0xff] }
 0x120   : > { %5162 = vmatmul.mubr.msk.bf16.gmra.mrb[84].mxu0 %vm678_vm3, %v5829_v33  ;;  %v2955_v33 = vpack.c.bf16 %v2932_v62, %v2931_v14  ;;  %v798_v62 = vld [vmem:[#allocation3 + $0x38] sm:$0xff] }
 0x121   : > { %5132 = vmatmul.mubr.msk.bf16.gmra.mrb[88].mxu1 %vm678_vm3, %v5923_v11  ;;  %5165 = vmatprep.mubr.msk.bf16.mxu0 %vm678_vm3, %v5856_v7  ;;  %v791_v11 = vld [vmem:[#allocation3] sm:$0xff] }
 0x122   : > { %5135 = vmatprep.mubr.msk.bf16.mxu1 %vm678_vm3, %v5935_v22  ;;  %v2934_v22 = vld [vmem:[#allocation2 + $0x110] sm:$0xff] }
 0x123   : > { %v2956_v9 = vpack.c.bf16 %v2934_v22, %v2933_v29  ;;  %v818_v22 = vld [vmem:[#allocation3 + $0xd8] sm:$0xff] }
 0x128   : > { %5166 = vmatmul.mubr.msk.bf16.gmra.mrb[88].mxu0 %vm678_vm3, %v5862_v6 }
 0x129   : > { %5136 = vmatmul.mubr.msk.bf16.gmra.mrb[92].mxu1 %vm678_vm3, %v5939_v30  ;;  %5169 = vmatprep.mubr.msk.bf16.mxu0 %vm678_vm3, %v1867_v55 }
 0x12a   : > { %5139 = vmatprep.mubr.msk.bf16.mxu1 %vm678_vm3, %v5951_v57  ;;  %v794_v57 = vld [vmem:[#allocation3 + $0x18] sm:$0xff] }
 0x12f   : > { %v4971_v7 = vpop.f32.mrb[0].mxu1 }
 0x130   : > { %5170 = vmatmul.mubr.msk.bf16.gmra.mrb[92].mxu0 %vm678_vm3, %v1868_v24  ;;  %v1058_v46 = vadd.f32 %v4971_v7, %v809_v48  ;;  %v977_v6 = vpop.f32.mrb[1].mxu1  ;;  %v817_v7 = vld [vmem:[#allocation3 + $0xd0] sm:$0xff] }
 0x131   : > { %5140 = vmatmul.mubr.msk.bf16.gmra.mrb[96].mxu1 %vm678_vm3, %v5955_v58  ;;  %5173 = vmatprep.mubr.msk.bf16.mxu0 %vm678_vm3, %v2955_v33  ;;  %v1056_v20 = vadd.f32 %v977_v6, %v807_v41  ;;  %v4972_v30 = vpop.f32.mrb[2].mxu1  ;;  %v4955_v52 = vpop.f32.mrb[0].mxu0  ;;  %v792_v58 = vld [vmem:[#allocation3 + $0x8] sm:$0xff]  ;;  %v815_v6 = vld [vmem:[#allocation3 + $0xc0] sm:$0xff] }
 0x132   : > { %5143 = vmatprep.mubr.msk.bf16.mxu1 %vm678_vm3, %v5967_v5  ;;  %1090 = vst.msk [vmem:[#allocation3 + $0x90] sm:$0xff] %vm678_vm3, %v1058_v46  ;;  %v1059_v36 = vadd.f32 %v4972_v30, %v810_v2  ;;  %v980_v1 = vpop.f32.mrb[3].mxu1  ;;  %v1042_v38 = vadd.f32 %v4955_v52, %v793_v53  ;;  %v913_v56 = vpop.f32.mrb[1].mxu0  ;;  %v796_v41 = vld [vmem:[#allocation3 + $0x28] sm:$0xff]  ;;  %v2946_v53 = vld [vmem:[#allocation2 + $0x1a0] sm:$0xff] }
 0x133   : > { %1088 = vst.msk [vmem:[#allocation3 + $0x80] sm:$0xff] %vm678_vm3, %v1056_v20  ;;  %v1057_v47 = vadd.f32 %v980_v1, %v808_v10  ;;  %v1040_v8 = vadd.f32 %v913_v56, %v791_v11  ;;  %v4956_v3 = vpop.f32.mrb[2].mxu0  ;;  %v3639_v20 = vld [vmem:[#allocation2 + $0x32] sm:$0xff]  ;;  %v3640_v30 = vld [vmem:[#allocation2 + $0x3a] sm:$0xff] }
 0x134   : > { %1091 = vst.msk [vmem:[#allocation3 + $0x98] sm:$0xff] %vm678_vm3, %v1059_v36  ;;  %1074 = vst.msk [vmem:[#allocation3 + $0x10] sm:$0xff] %vm678_vm3, %v1042_v38  ;;  %v1043_v5 = vadd.f32 %v4956_v3, %v794_v57  ;;  %v916_v25 = vpop.f32.mrb[3].mxu0  ;;  %v816_v57 = vld [vmem:[#allocation3 + $0xc8] sm:$0xff] }
 0x135   : > { %1089 = vst.msk [vmem:[#allocation3 + $0x88] sm:$0xff] %vm678_vm3, %v1057_v47  ;;  %1072 = vst.msk [vmem:[#allocation3] sm:$0xff] %vm678_vm3, %v1040_v8  ;;  %v1041_v21 = vadd.f32 %v916_v25, %v792_v58  ;;  %v3671_v47 = vpack.c.bf16 %v3640_v30, %v3639_v20  ;;  %v799_v8 = vld [vmem:[#allocation3 + $0x40] sm:$0xff]  ;;  %v802_v25 = vld [vmem:[#allocation3 + $0x58] sm:$0xff] }
 0x136   : > { %1075 = vst.msk [vmem:[#allocation3 + $0x18] sm:$0xff] %vm678_vm3, %v1043_v5  ;;  %v805_v20 = vld [vmem:[#allocation3 + $0x70] sm:$0xff]  ;;  %v3649_v30 = vld [vmem:[#allocation2 + $0xaa] sm:$0xff] }
 0x137   : > { %v4975_v28 = vpop.f32.mrb[4].mxu1  ;;  %1073 = vst.msk [vmem:[#allocation3 + $0x8] sm:$0xff] %vm678_vm3, %v1041_v21  ;;  %v800_v21 = vld [vmem:[#allocation3 + $0x48] sm:$0xff] }
 0x138   : > { %5174 = vmatmul.mubr.msk.bf16.gmra.mrb[96].mxu0 %vm678_vm3, %v2956_v9  ;;  %v1062_v18 = vadd.f32 %v4975_v28, %v813_v31  ;;  %v993_v39 = vpop.f32.mrb[5].mxu1  ;;  %v3311_v9 = vpack.c.bf16 %v3282_v61, %v3281_v35  ;;  %v3292_v35 = vld [vmem:[#allocation2 + $0xe1] sm:$0xff] }
 0x139   : > { %5144 = vmatmul.mubr.msk.bf16.gmra.mrb[100].mxu1 %vm678_vm3, %v5971_v54  ;;  %5177 = vmatprep.mubr.msk.bf16.mxu0 %vm678_vm3, %v2957_v4  ;;  %v1060_v49 = vadd.f32 %v993_v39, %v811_v15  ;;  %v4976_v26 = vpop.f32.mrb[6].mxu1  ;;  %v2959_v54 = vpack.c.bf16 %v2940_v12, %v2939_v60  ;;  %v3283_v39 = vld [vmem:[#allocation2 + $0x79] sm:$0xff]  ;;  %v3644_v60 = vld [vmem:[#allocation2 + $0x6a] sm:$0xff]  ;;  %v3651_v61 = vld [vmem:[#allocation2 + $0xc2] sm:$0xff] }
 0x13a   : > { %5147 = vmatprep.mubr.msk.bf16.mxu1 %vm678_vm3, %v6015_v37  ;;  %1094 = vst.msk [vmem:[#allocation3 + $0xb0] sm:$0xff] %vm678_vm3, %v1062_v18  ;;  %v1063_v40 = vadd.f32 %v4976_v26, %v814_v16  ;;  %v996_v55 = vpop.f32.mrb[7].mxu1  ;;  %v2941_v37 = vld [vmem:[#allocation2 + $0x168] sm:$0xff]  ;;  %v3642_v18 = vld [vmem:[#allocation2 + $0x52] sm:$0xff] }
 0x13b   : > { %1092 = vst.msk [vmem:[#allocation3 + $0xa0] sm:$0xff] %vm678_vm3, %v1060_v49  ;;  %v1061_v24 = vadd.f32 %v996_v55, %v812_v43  ;;  %v2960_v34 = vpack.c.bf16 %v2942_v13, %v2941_v37  ;;  %v3641_v16 = vld [vmem:[#allocation2 + $0x4a] sm:$0xff]  ;;  %v3643_v26 = vld [vmem:[#allocation2 + $0x62] sm:$0xff]  ;;  %v3286_v12 = vld [vmem:[#allocation2 + $0x99] sm:$0xff]  ;;  %v3312_v55 = vpack.c.bf16 %v3284_v23, %v3283_v39 }
 0x13c   : > { %1095 = vst.msk [vmem:[#allocation3 + $0xb8] sm:$0xff] %vm678_vm3, %v1063_v40  ;;  %v3672_v40 = vpack.c.bf16 %v3642_v18, %v3641_v16  ;;  %v3645_v37 = vld [vmem:[#allocation2 + $0x7a] sm:$0xff]  ;;  %v3646_v13 = vld [vmem:[#allocation2 + $0x82] sm:$0xff] }
 0x13d   : > { %1093 = vst.msk [vmem:[#allocation3 + $0xa8] sm:$0xff] %vm678_vm3, %v1061_v24  ;;  %v3673_v24 = vpack.c.bf16 %v3644_v60, %v3643_v26 }
 0x140   : > { %5178 = vmatmul.mubr.msk.bf16.gmra.mrb[100].mxu0 %vm678_vm3, %v2958_v59 }
 0x141   : > { %5148 = vmatmul.mubr.msk.bf16.gmra.mrb[104].mxu1 %vm678_vm3, %v6017_v63  ;;  %5181 = vmatprep.mubr.msk.bf16.mxu0 %vm678_vm3, %v2959_v54  ;;  %v821_v54 = vld [vmem:[#allocation3 + $0xf0] sm:$0xff] }
 0x142   : > { %5151 = vmatprep.mubr.msk.bf16.mxu1 %vm678_vm3, %v6026_v0  ;;  %v2945_v0 = vld [vmem:[#allocation2 + $0x198] sm:$0xff] }
 0x143   : > { %v2962_v36 = vpack.c.bf16 %v2946_v53, %v2945_v0  ;;  %v3314_v0 = vpack.c.bf16 %v3288_v17, %v3287_v45  ;;  %v3297_v17 = vld [vmem:[#allocation2 + $0x121] sm:$0xff] }
 0x146   : > { %v4959_v14 = vpop.f32.mrb[4].mxu0 }
 0x147   : > { %v1046_v33 = vadd.f32 %v4959_v14, %v797_v42  ;;  %v929_v48 = vpop.f32.mrb[5].mxu0  ;;  %v3648_v42 = vld [vmem:[#allocation2 + $0x9a] sm:$0xff] }
 0x148   : > { %5182 = vmatmul.mubr.msk.bf16.gmra.mrb[104].mxu0 %vm678_vm3, %v2960_v34  ;;  %v1044_v63 = vadd.f32 %v929_v48, %v795_v51  ;;  %v4960_v2 = vpop.f32.mrb[6].mxu0  ;;  %v3647_v34 = vld [vmem:[#allocation2 + $0x92] sm:$0xff]  ;;  %v3289_v14 = vld [vmem:[#allocation2 + $0xc1] sm:$0xff] }
 0x149   : > { %5152 = vmatmul.mubr.msk.bf16.gmra.mrb[108].mxu1 %vm678_vm3, %v6158_v19  ;;  %5185 = vmatprep.mubr.msk.bf16.mxu0 %vm678_vm3, %v6090_v27  ;;  %1078 = vst.msk [vmem:[#allocation3 + $0x30] sm:$0xff] %vm678_vm3, %v1046_v33  ;;  %v1047_v46 = vadd.f32 %v4960_v2, %v798_v62  ;;  %v932_v10 = vpop.f32.mrb[7].mxu0  ;;  %v819_v51 = vld [vmem:[#allocation3 + $0xe0] sm:$0xff]  ;;  %v822_v48 = vld [vmem:[#allocation3 + $0xf8] sm:$0xff]  ;;  %v820_v2 = vld [vmem:[#allocation3 + $0xe8] sm:$0xff]  ;;  %v3675_v53 = vpack.c.bf16 %v3648_v42, %v3647_v34 }
 0x14a   : > { %5191 = vmatprep.mubr.msk.bf16.mxu1 %vm678_vm3, %v5864_v32  ;;  %1076 = vst.msk [vmem:[#allocation3 + $0x20] sm:$0xff] %vm678_vm3, %v1044_v63  ;;  %v4979_v11 = vpop.f32.mrb[8].mxu1  ;;  %v1045_v29 = vadd.f32 %v932_v10, %v796_v41  ;;  %v801_v32 = vld [vmem:[#allocation3 + $0x50] sm:$0xff]  ;;  %v3290_v62 = vld [vmem:[#allocation2 + $0xc9] sm:$0xff]  ;;  %v3674_v41 = vpack.c.bf16 %v3646_v13, %v3645_v37  ;;  %v3655_v37 = vld [vmem:[#allocation2 + $0xf2] sm:$0xff] }
 0x14b   : > { %v1066_v52 = vadd.f32 %v4979_v11, %v817_v7  ;;  %1079 = vst.msk [vmem:[#allocation3 + $0x38] sm:$0xff] %vm678_vm3, %v1047_v46  ;;  %v1009_v27 = vpop.f32.mrb[9].mxu1  ;;  %v3315_v10 = vpack.c.bf16 %v3290_v62, %v3289_v14  ;;  %v3656_v13 = vld [vmem:[#allocation2 + $0xfa] sm:$0xff]  ;;  %v3298_v34 = vld [vmem:[#allocation2 + $0x129] sm:$0xff] }
 0x14c   : > { %v1064_v1 = vadd.f32 %v1009_v27, %v815_v6  ;;  %1077 = vst.msk [vmem:[#allocation3 + $0x28] sm:$0xff] %vm678_vm3, %v1045_v29  ;;  %v4980_v38 = vpop.f32.mrb[10].mxu1  ;;  %v3650_v27 = vld [vmem:[#allocation2 + $0xb2] sm:$0xff] }
 0x14d   : > { %1098 = vst.msk [vmem:[#allocation3 + $0xd0] sm:$0xff] %vm678_vm3, %v1066_v52  ;;  %v1067_v56 = vadd.f32 %v4980_v38, %v818_v22  ;;  %v1012_v58 = vpop.f32.mrb[11].mxu1  ;;  %v803_v52 = vld [vmem:[#allocation3 + $0x60] sm:$0xff]  ;;  %v806_v38 = vld [vmem:[#allocation3 + $0x78] sm:$0xff] }
 0x14e   : > { %1096 = vst.msk [vmem:[#allocation3 + $0xc0] sm:$0xff] %vm678_vm3, %v1064_v1  ;;  %v1065_v3 = vadd.f32 %v1012_v58, %v816_v57  ;;  %v4963_v5 = vpop.f32.mrb[8].mxu0  ;;  %v3291_v57 = vld [vmem:[#allocation2 + $0xd9] sm:$0xff] }
 0x14f   : > { %1099 = vst.msk [vmem:[#allocation3 + $0xd8] sm:$0xff] %vm678_vm3, %v1067_v56  ;;  %v1050_v4 = vadd.f32 %v4963_v5, %v801_v32  ;;  %v945_v31 = vpop.f32.mrb[9].mxu0  ;;  %v3293_v32 = vld [vmem:[#allocation2 + $0xf1] sm:$0xff]  ;;  %v3294_v56 = vld [vmem:[#allocation2 + $0xf9] sm:$0xff]  ;;  %v3676_v5 = vpack.c.bf16 %v3650_v27, %v3649_v30 }
 0x150   : > { %5186 = vmatmul.mubr.msk.bf16.gmra.mrb[108].mxu0 %vm678_vm3, %v2962_v36  ;;  %1097 = vst.msk [vmem:[#allocation3 + $0xc8] sm:$0xff] %vm678_vm3, %v1065_v3  ;;  %v1048_v15 = vadd.f32 %v945_v31, %v799_v8  ;;  %v4964_v28 = vpop.f32.mrb[10].mxu0  ;;  %v3652_v36 = vld [vmem:[#allocation2 + $0xca] sm:$0xff]  ;;  %v1154_v8 = vld [vmem:[#allocation3 + $0x10] sm:$0xff] }
 0x151   : > { %5192 = vmatmul.mubr.msk.bf16.vlgmr.msra.gmra.mrb[112].mxu1 %vm678_vm3, %v5882_v50  ;;  %5225 = vmatprep.mubr.msk.bf16.mxu0 %vm678_vm3, %v3671_v47  ;;  %1082 = vst.msk [vmem:[#allocation3 + $0x50] sm:$0xff] %vm678_vm3, %v1050_v4  ;;  %v1051_v43 = vadd.f32 %v4964_v28, %v802_v25  ;;  %v948_v44 = vpop.f32.mrb[11].mxu0  ;;  %v3285_v50 = vld [vmem:[#allocation2 + $0x91] sm:$0xff]  ;;  %v3316_v28 = vpack.c.bf16 %v3292_v35, %v3291_v57  ;;  %v1158_v42 = vld [vmem:[#allocation3 + $0x30] sm:$0xff] }
 0x152   : > { %5195 = vmatprep.mubr.msk.bf16.mxu1 %vm678_vm3, %v3311_v9  ;;  %1080 = vst.msk [vmem:[#allocation3 + $0x40] sm:$0xff] %vm678_vm3, %v1048_v15  ;;  %v1049_v49 = vadd.f32 %v948_v44, %v800_v21  ;;  %v3313_v59 = vpack.c.bf16 %v3286_v12, %v3285_v50  ;;  %v804_v9 = vld [vmem:[#allocation3 + $0x68] sm:$0xff]  ;;  %v1152_v21 = vld [vmem:[#allocation3] sm:$0xff]  ;;  %v3677_v16 = vpack.c.bf16 %v3652_v36, %v3651_v61  ;;  %v1155_v44 = vld [vmem:[#allocation3 + $0x18] sm:$0xff] }
 0x153   : > { %1083 = vst.msk [vmem:[#allocation3 + $0x58] sm:$0xff] %vm678_vm3, %v1051_v43  ;;  %v1153_v50 = vld [vmem:[#allocation3 + $0x8] sm:$0xff]  ;;  %v3657_v61 = vld [vmem:[#allocation2 + $0x10a] sm:$0xff] }
 0x154   : > { %1081 = vst.msk [vmem:[#allocation3 + $0x48] sm:$0xff] %vm678_vm3, %v1049_v49  ;;  %v3317_v49 = vpack.c.bf16 %v3294_v56, %v3293_v32  ;;  %v1157_v30 = vld [vmem:[#allocation3 + $0x28] sm:$0xff] }
 0x155   : > { %v3299_v32 = vld [vmem:[#allocation2 + $0x139] sm:$0xff] }
 0x158   : > { %5226 = vmatmul.mubr.msk.bf16.vlgmr.msra.gmra.mrb[112].mxu0 %vm678_vm3, %v3672_v40 }
 0x159   : > { %5196 = vmatmul.mubr.msk.bf16.gmra.mrb[116].mxu1 %vm678_vm3, %v3312_v55  ;;  %5229 = vmatprep.mubr.msk.bf16.mxu0 %vm678_vm3, %v3673_v24  ;;  %v3653_v55 = vld [vmem:[#allocation2 + $0xda] sm:$0xff]  ;;  %v3654_v24 = vld [vmem:[#allocation2 + $0xe2] sm:$0xff] }
 0x15a   : > { %5199 = vmatprep.mubr.msk.bf16.mxu1 %vm678_vm3, %v3313_v59  ;;  %v3295_v59 = vld [vmem:[#allocation2 + $0x109] sm:$0xff]  ;;  %v3678_v62 = vpack.c.bf16 %v3654_v24, %v3653_v55 }
 0x15b   : > { %v1161_v24 = vld [vmem:[#allocation3 + $0x48] sm:$0xff] }
 0x15c   : > { %v4983_v33 = vpop.f32.mrb[12].mxu1 }
 0x15d   : > { %v1070_v63 = vadd.f32 %v4983_v33, %v821_v54  ;;  %v1025_v7 = vpop.f32.mrb[13].mxu1  ;;  %v3296_v54 = vld [vmem:[#allocation2 + $0x111] sm:$0xff] }
 0x15e   : > { %v1068_v46 = vadd.f32 %v1025_v7, %v819_v51  ;;  %v4984_v6 = vpop.f32.mrb[14].mxu1  ;;  %v3318_v7 = vpack.c.bf16 %v3296_v54, %v3295_v59 }
 0x15f   : > { %1102 = vst.msk [vmem:[#allocation3 + $0xf0] sm:$0xff] %vm678_vm3, %v1070_v63  ;;  %v1071_v11 = vadd.f32 %v4984_v6, %v822_v48  ;;  %v1028_v29 = vpop.f32.mrb[15].mxu1  ;;  %v1156_v48 = vld [vmem:[#allocation3 + $0x20] sm:$0xff] }
 0x160   : > { %1100 = vst.msk [vmem:[#allocation3 + $0xe0] sm:$0xff] %vm678_vm3, %v1068_v46  ;;  %v1069_v22 = vadd.f32 %v1028_v29, %v820_v2  ;;  %5230 = vmatmul.mubr.msk.bf16.gmra.mrb[116].mxu0 %vm678_vm3, %v3674_v41  ;;  %v3679_v2 = vpack.c.bf16 %v3656_v13, %v3655_v37  ;;  %v1159_v46 = vld [vmem:[#allocation3 + $0x38] sm:$0xff] }
 0x161   : > { %1103 = vst.msk [vmem:[#allocation3 + $0xf8] sm:$0xff] %vm678_vm3, %v1071_v11  ;;  %5200 = vmatmul.mubr.msk.bf16.gmra.mrb[120].mxu1 %vm678_vm3, %v3314_v0  ;;  %5233 = vmatprep.mubr.msk.bf16.mxu0 %vm678_vm3, %v3675_v53  ;;  %v3319_v11 = vpack.c.bf16 %v3298_v34, %v3297_v17 }
 0x162   : > { %1101 = vst.msk [vmem:[#allocation3 + $0xe8] sm:$0xff] %vm678_vm3, %v1069_v22  ;;  %5203 = vmatprep.mubr.msk.bf16.mxu1 %vm678_vm3, %v3315_v10 }
 0x163   : > { %v4967_v1 = vpop.f32.mrb[12].mxu0 }
 0x164   : > { %v1054_v58 = vadd.f32 %v4967_v1, %v805_v20  ;;  %v961_v47 = vpop.f32.mrb[13].mxu0  ;;  %v4989_v3 = vpop.f32.mrb[16].mxu1 }
 0x165   : > { %v1052_v25 = vadd.f32 %v961_v47, %v803_v52  ;;  %v1404_v4 = vadd.f32 %v4989_v3, %v1154_v8  ;;  %v4968_v31 = vpop.f32.mrb[14].mxu0  ;;  %v1275_v15 = vpop.f32.mrb[17].mxu1  ;;  %v3659_v47 = vld [vmem:[#allocation2 + $0x122] sm:$0xff]  ;;  %v3660_v8 = vld [vmem:[#allocation2 + $0x12a] sm:$0xff] }
 0x166   : > { %1086 = vst.msk [vmem:[#allocation3 + $0x70] sm:$0xff] %vm678_vm3, %v1054_v58  ;;  %v1055_v18 = vadd.f32 %v4968_v31, %v806_v38  ;;  %v1402_v39 = vadd.f32 %v1275_v15, %v1152_v21  ;;  %v964_v43 = vpop.f32.mrb[15].mxu0  ;;  %v4990_v23 = vpop.f32.mrb[18].mxu1  ;;  %v3658_v38 = vld [vmem:[#allocation2 + $0x112] sm:$0xff]  ;;  %v3300_v58 = vld [vmem:[#allocation2 + $0x141] sm:$0xff] }
 0x167   : > { %1084 = vst.msk [vmem:[#allocation3 + $0x60] sm:$0xff] %vm678_vm3, %v1052_v25  ;;  %1436 = vst.msk [vmem:[#allocation3 + $0x10] sm:$0xff] %vm678_vm3, %v1404_v4  ;;  %v1053_v26 = vadd.f32 %v964_v43, %v804_v9  ;;  %v1405_v60 = vadd.f32 %v4990_v23, %v1155_v44  ;;  %v1278_v12 = vpop.f32.mrb[19].mxu1  ;;  %v3301_v9 = vld [vmem:[#allocation2 + $0x151] sm:$0xff]  ;;  %v1162_v25 = vld [vmem:[#allocation3 + $0x50] sm:$0xff]  ;;  %v3680_v21 = vpack.c.bf16 %v3658_v38, %v3657_v61 }
 0x168   : > { %1087 = vst.msk [vmem:[#allocation3 + $0x78] sm:$0xff] %vm678_vm3, %v1055_v18  ;;  %1434 = vst.msk [vmem:[#allocation3] sm:$0xff] %vm678_vm3, %v1402_v39  ;;  %v1403_v40 = vadd.f32 %v1278_v12, %v1153_v50  ;;  %5234 = vmatmul.mubr.msk.bf16.gmra.mrb[120].mxu0 %vm678_vm3, %v3676_v5  ;;  %v3302_v5 = vld [vmem:[#allocation2 + $0x159] sm:$0xff]  ;;  %v3320_v39 = vpack.c.bf16 %v3300_v58, %v3299_v32  ;;  %v3681_v43 = vpack.c.bf16 %v3660_v8, %v3659_v47 }
 0x169   : > { %1085 = vst.msk [vmem:[#allocation3 + $0x68] sm:$0xff] %vm678_vm3, %v1053_v26  ;;  %1437 = vst.msk [vmem:[#allocation3 + $0x18] sm:$0xff] %vm678_vm3, %v1405_v60  ;;  %5204 = vmatmul.mubr.msk.bf16.gmra.mrb[124].mxu1 %vm678_vm3, %v3316_v28  ;;  %5237 = vmatprep.mubr.msk.bf16.mxu0 %vm678_vm3, %v3677_v16  ;;  %v1160_v28 = vld [vmem:[#allocation3 + $0x40] sm:$0xff]  ;;  %v3321_v50 = vpack.c.bf16 %v3302_v5, %v3301_v9 }
 0x16a   : > { %1435 = vst.msk [vmem:[#allocation3 + $0x8] sm:$0xff] %vm678_vm3, %v1403_v40  ;;  %5207 = vmatprep.mubr.msk.bf16.mxu1 %vm678_vm3, %v3317_v49  ;;  %v1163_v49 = vld [vmem:[#allocation3 + $0x58] sm:$0xff] }
 0x16b   : > { %v5023_v45 = vpop.f32.mrb[16].mxu0  ;;  %v3665_v5 = vld [vmem:[#allocation2 + $0x16a] sm:$0xff] }
 0x16c   : > { %v4993_v51 = vpop.f32.mrb[20].mxu1  ;;  %v1637_v14 = vpop.f32.mrb[17].mxu0 }
 0x16d   : > { %v1408_v33 = vadd.f32 %v4993_v51, %v1158_v42  ;;  %v1291_v41 = vpop.f32.mrb[21].mxu1  ;;  %v5024_v63 = vpop.f32.mrb[18].mxu0  ;;  %v3662_v42 = vld [vmem:[#allocation2 + $0x142] sm:$0xff] }
 0x16e   : > { %v1516_v0 = vld [vmem:[#allocation3 + $0x10] sm:$0xff]  ;;  %v1406_v53 = vadd.f32 %v1291_v41, %v1156_v48  ;;  %v4994_v6 = vpop.f32.mrb[22].mxu1  ;;  %v1640_v10 = vpop.f32.mrb[19].mxu0  ;;  %v3303_v51 = vld [vmem:[#allocation2 + $0x169] sm:$0xff] }
 0x16f   : > { %v1766_v29 = vadd.f32 %v5023_v45, %v1516_v0  ;;  %1440 = vst.msk [vmem:[#allocation3 + $0x30] sm:$0xff] %vm678_vm3, %v1408_v33  ;;  %v1514_v22 = vld [vmem:[#allocation3] sm:$0xff]  ;;  %v1409_v20 = vadd.f32 %v4994_v6, %v1159_v46  ;;  %v1294_v52 = vpop.f32.mrb[23].mxu1  ;;  %v3661_v45 = vld [vmem:[#allocation2 + $0x13a] sm:$0xff] }
 0x170   : > { %v1764_v27 = vadd.f32 %v1637_v14, %v1514_v22  ;;  %1438 = vst.msk [vmem:[#allocation3 + $0x20] sm:$0xff] %vm678_vm3, %v1406_v53  ;;  %v1517_v57 = vld [vmem:[#allocation3 + $0x18] sm:$0xff]  ;;  %v1407_v35 = vadd.f32 %v1294_v52, %v1157_v30  ;;  %5238 = vmatmul.mubr.msk.bf16.gmra.mrb[124].mxu0 %vm678_vm3, %v3678_v62  ;;  %v3304_v62 = vld [vmem:[#allocation2 + $0x171] sm:$0xff]  ;;  %v3664_v48 = vld [vmem:[#allocation2 + $0x15a] sm:$0xff]  ;;  %v3682_v46 = vpack.c.bf16 %v3662_v42, %v3661_v45 }
 0x171   : > { %1798 = vst.msk [vmem:[#allocation3 + $0x10] sm:$0xff] %vm678_vm3, %v1766_v29  ;;  %v1767_v36 = vadd.f32 %v5024_v63, %v1517_v57  ;;  %1441 = vst.msk [vmem:[#allocation3 + $0x38] sm:$0xff] %vm678_vm3, %v1409_v20  ;;  %v1515_v1 = vld [vmem:[#allocation3 + $0x8] sm:$0xff]  ;;  %5208 = vmatmul.mubr.msk.bf16.gmra.mrb[128].mxu1 %vm678_vm3, %v3318_v7  ;;  %5241 = vmatprep.mubr.msk.bf16.mxu0 %vm678_vm3, %v3679_v2  ;;  %v3305_v63 = vld [vmem:[#allocation2 + $0x181] sm:$0xff]  ;;  %v3322_v22 = vpack.c.bf16 %v3304_v62, %v3303_v51 }
 0x172   : > { %1796 = vst.msk [vmem:[#allocation3] sm:$0xff] %vm678_vm3, %v1764_v27  ;;  %v1765_v56 = vadd.f32 %v1640_v10, %v1515_v1  ;;  %1439 = vst.msk [vmem:[#allocation3 + $0x28] sm:$0xff] %vm678_vm3, %v1407_v35  ;;  %5211 = vmatprep.mubr.msk.bf16.mxu1 %vm678_vm3, %v3319_v11  ;;  %v3663_v33 = vld [vmem:[#allocation2 + $0x152] sm:$0xff]  ;;  %v3306_v7 = vld [vmem:[#allocation2 + $0x189] sm:$0xff] }
 0x173   : > { %1799 = vst.msk [vmem:[#allocation3 + $0x18] sm:$0xff] %vm678_vm3, %v1767_v36  ;;  %v5027_v3 = vpop.f32.mrb[20].mxu0  ;;  %v1166_v2 = vld [vmem:[#allocation3 + $0x70] sm:$0xff]  ;;  %v1164_v10 = vld [vmem:[#allocation3 + $0x60] sm:$0xff]  ;;  %v3683_v20 = vpack.c.bf16 %v3664_v48, %v3663_v33  ;;  %v1167_v27 = vld [vmem:[#allocation3 + $0x78] sm:$0xff]  ;;  %v3323_v61 = vpack.c.bf16 %v3306_v7, %v3305_v63 }
 0x174   : > { %1797 = vst.msk [vmem:[#allocation3 + $0x8] sm:$0xff] %vm678_vm3, %v1765_v56  ;;  %v4997_v4 = vpop.f32.mrb[24].mxu1  ;;  %v1653_v31 = vpop.f32.mrb[21].mxu0  ;;  %v1165_v32 = vld [vmem:[#allocation3 + $0x68] sm:$0xff]  ;;  %v3670_v62 = vld [vmem:[#allocation2 + $0x1a2] sm:$0xff] }
 0x175   : > { %v1412_v15 = vadd.f32 %v4997_v4, %v1162_v25  ;;  %v1307_v16 = vpop.f32.mrb[25].mxu1  ;;  %v5028_v18 = vpop.f32.mrb[22].mxu0  ;;  %v3666_v25 = vld [vmem:[#allocation2 + $0x172] sm:$0xff] }
 0x176   : > { %v1520_v44 = vld [vmem:[#allocation3 + $0x30] sm:$0xff]  ;;  %v1410_v23 = vadd.f32 %v1307_v16, %v1160_v28  ;;  %v4998_v26 = vpop.f32.mrb[26].mxu1  ;;  %v1656_v60 = vpop.f32.mrb[23].mxu0 }
 0x177   : > { %v1770_v12 = vadd.f32 %v5027_v3, %v1520_v44  ;;  %1444 = vst.msk [vmem:[#allocation3 + $0x50] sm:$0xff] %vm678_vm3, %v1412_v15  ;;  %v1518_v40 = vld [vmem:[#allocation3 + $0x20] sm:$0xff]  ;;  %v1413_v55 = vadd.f32 %v4998_v26, %v1163_v49  ;;  %v1310_v59 = vpop.f32.mrb[27].mxu1  ;;  %v1170_v28 = vld [vmem:[#allocation3 + $0x90] sm:$0xff] }
 0x178   : > { %v1768_v54 = vadd.f32 %v1653_v31, %v1518_v40  ;;  %1442 = vst.msk [vmem:[#allocation3 + $0x40] sm:$0xff] %vm678_vm3, %v1410_v23  ;;  %v1521_v37 = vld [vmem:[#allocation3 + $0x38] sm:$0xff]  ;;  %v1411_v13 = vadd.f32 %v1310_v59, %v1161_v24  ;;  %5242 = vmatmul.mubr.msk.bf16.gmra.mrb[128].mxu0 %vm678_vm3, %v3680_v21  ;;  %v3307_v31 = vld [vmem:[#allocation2 + $0x199] sm:$0xff]  ;;  %v1168_v44 = vld [vmem:[#allocation3 + $0x80] sm:$0xff] }
 0x179   : > { %1802 = vst.msk [vmem:[#allocation3 + $0x30] sm:$0xff] %vm678_vm3, %v1770_v12  ;;  %v1771_v17 = vadd.f32 %v5028_v18, %v1521_v37  ;;  %1445 = vst.msk [vmem:[#allocation3 + $0x58] sm:$0xff] %vm678_vm3, %v1413_v55  ;;  %v1519_v34 = vld [vmem:[#allocation3 + $0x28] sm:$0xff]  ;;  %5212 = vmatmul.mubr.msk.bf16.gmra.mrb[132].mxu1 %vm678_vm3, %v3320_v39  ;;  %5245 = vmatprep.mubr.msk.bf16.mxu0 %vm678_vm3, %v3681_v43  ;;  %v3308_v21 = vld [vmem:[#allocation2 + $0x1a1] sm:$0xff]  ;;  %v3684_v39 = vpack.c.bf16 %v3666_v25, %v3665_v5 }
 0x17a   : > { %1800 = vst.msk [vmem:[#allocation3 + $0x20] sm:$0xff] %vm678_vm3, %v1768_v54  ;;  %v1769_v14 = vadd.f32 %v1656_v60, %v1519_v34  ;;  %1443 = vst.msk [vmem:[#allocation3 + $0x48] sm:$0xff] %vm678_vm3, %v1411_v13  ;;  %5215 = vmatprep.mubr.msk.bf16.mxu1 %vm678_vm3, %v3321_v50  ;;  %v3324_v26 = vpack.c.bf16 %v3308_v21, %v3307_v31  ;;  %v1171_v12 = vld [vmem:[#allocation3 + $0x98] sm:$0xff]  ;;  %v1169_v37 = vld [vmem:[#allocation3 + $0x88] sm:$0xff] }
 0x17b   : > { %1803 = vst.msk [vmem:[#allocation3 + $0x38] sm:$0xff] %vm678_vm3, %v1771_v17  ;;  %v5031_v41 = vpop.f32.mrb[24].mxu0  ;;  %v1179_v21 = vld [vmem:[#allocation3 + $0xd8] sm:$0xff] }
 0x17c   : > { %1801 = vst.msk [vmem:[#allocation3 + $0x28] sm:$0xff] %vm678_vm3, %v1769_v14  ;;  %v5001_v0 = vpop.f32.mrb[28].mxu1  ;;  %v1669_v53 = vpop.f32.mrb[25].mxu0  ;;  %v3669_v14 = vld [vmem:[#allocation2 + $0x19a] sm:$0xff] }
 0x17d   : > { %v1416_v6 = vadd.f32 %v5001_v0, %v1166_v2  ;;  %v1323_v11 = vpop.f32.mrb[29].mxu1  ;;  %v5032_v29 = vpop.f32.mrb[26].mxu0  ;;  %v3686_v2 = vpack.c.bf16 %v3670_v62, %v3669_v14 }
 0x17e   : > { %v1524_v30 = vld [vmem:[#allocation3 + $0x50] sm:$0xff]  ;;  %v1414_v52 = vadd.f32 %v1323_v11, %v1164_v10  ;;  %v5002_v57 = vpop.f32.mrb[30].mxu1  ;;  %v1672_v35 = vpop.f32.mrb[27].mxu0  ;;  %v1175_v11 = vld [vmem:[#allocation3 + $0xb8] sm:$0xff] }
 0x17f   : > { %v1774_v36 = vadd.f32 %v5031_v41, %v1524_v30  ;;  %1448 = vst.msk [vmem:[#allocation3 + $0x70] sm:$0xff] %vm678_vm3, %v1416_v6  ;;  %v1522_v1 = vld [vmem:[#allocation3 + $0x40] sm:$0xff]  ;;  %v1417_v38 = vadd.f32 %v5002_v57, %v1167_v27  ;;  %v1326_v56 = vpop.f32.mrb[31].mxu1  ;;  %v1174_v41 = vld [vmem:[#allocation3 + $0xb0] sm:$0xff]  ;;  %v1173_v27 = vld [vmem:[#allocation3 + $0xa8] sm:$0xff] }
 0x180   : > { %v1772_v58 = vadd.f32 %v1669_v53, %v1522_v1  ;;  %1446 = vst.msk [vmem:[#allocation3 + $0x60] sm:$0xff] %vm678_vm3, %v1414_v52  ;;  %v1525_v47 = vld [vmem:[#allocation3 + $0x58] sm:$0xff]  ;;  %v1415_v8 = vadd.f32 %v1326_v56, %v1165_v32  ;;  %5246 = vmatmul.mubr.msk.bf16.gmra.mrb[132].mxu0 %vm678_vm3, %v3682_v46  ;;  %v1172_v53 = vld [vmem:[#allocation3 + $0xa0] sm:$0xff] }
 0x181   : > { %1806 = vst.msk [vmem:[#allocation3 + $0x50] sm:$0xff] %vm678_vm3, %v1774_v36  ;;  %v1775_v3 = vadd.f32 %v5032_v29, %v1525_v47  ;;  %1449 = vst.msk [vmem:[#allocation3 + $0x78] sm:$0xff] %vm678_vm3, %v1417_v38  ;;  %v1523_v9 = vld [vmem:[#allocation3 + $0x48] sm:$0xff]  ;;  %5216 = vmatmul.mubr.msk.bf16.gmra.mrb[136].mxu1 %vm678_vm3, %v3322_v22  ;;  %5249 = vmatprep.mubr.msk.bf16.mxu0 %vm678_vm3, %v3683_v20 }
 0x182   : > { %1804 = vst.msk [vmem:[#allocation3 + $0x40] sm:$0xff] %vm678_vm3, %v1772_v58  ;;  %v1773_v4 = vadd.f32 %v1672_v35, %v1523_v9  ;;  %1447 = vst.msk [vmem:[#allocation3 + $0x68] sm:$0xff] %vm678_vm3, %v1415_v8  ;;  %5219 = vmatprep.mubr.msk.bf16.mxu1 %vm678_vm3, %v3323_v61  ;;  %v1178_v58 = vld [vmem:[#allocation3 + $0xd0] sm:$0xff]  ;;  %v1176_v9 = vld [vmem:[#allocation3 + $0xc0] sm:$0xff] }
 0x183   : > { %1807 = vst.msk [vmem:[#allocation3 + $0x58] sm:$0xff] %vm678_vm3, %v1775_v3  ;;  %v5035_v15 = vpop.f32.mrb[28].mxu0 }
 0x184   : > { %1805 = vst.msk [vmem:[#allocation3 + $0x48] sm:$0xff] %vm678_vm3, %v1773_v4  ;;  %v5005_v16 = vpop.f32.mrb[32].mxu1  ;;  %v1685_v18 = vpop.f32.mrb[29].mxu0 }
 0x185   : > { %v1420_v43 = vadd.f32 %v5005_v16, %v1170_v28  ;;  %v1339_v23 = vpop.f32.mrb[33].mxu1  ;;  %v5036_v49 = vpop.f32.mrb[30].mxu0 }
 0x186   : > { %v1528_v60 = vld [vmem:[#allocation3 + $0x70] sm:$0xff]  ;;  %v1418_v50 = vadd.f32 %v1339_v23, %v1168_v44  ;;  %v5006_v40 = vpop.f32.mrb[34].mxu1  ;;  %v1688_v55 = vpop.f32.mrb[31].mxu0 }
 0x187   : > { %v1778_v24 = vadd.f32 %v5035_v15, %v1528_v60  ;;  %1452 = vst.msk [vmem:[#allocation3 + $0x90] sm:$0xff] %vm678_vm3, %v1420_v43  ;;  %v1526_v59 = vld [vmem:[#allocation3 + $0x60] sm:$0xff]  ;;  %v1421_v54 = vadd.f32 %v5006_v40, %v1171_v12  ;;  %v1342_v13 = vpop.f32.mrb[35].mxu1  ;;  %v1177_v43 = vld [vmem:[#allocation3 + $0xc8] sm:$0xff] }
 0x188   : > { %v1776_v45 = vadd.f32 %v1685_v18, %v1526_v59  ;;  %1450 = vst.msk [vmem:[#allocation3 + $0x80] sm:$0xff] %vm678_vm3, %v1418_v50  ;;  %v1529_v17 = vld [vmem:[#allocation3 + $0x78] sm:$0xff]  ;;  %v1419_v34 = vadd.f32 %v1342_v13, %v1169_v37  ;;  %5250 = vmatmul.mubr.msk.bf16.gmra.mrb[136].mxu0 %vm678_vm3, %v3684_v39  ;;  %v1180_v37 = vld [vmem:[#allocation3 + $0xe0] sm:$0xff] }
 0x189   : > { %1810 = vst.msk [vmem:[#allocation3 + $0x70] sm:$0xff] %vm678_vm3, %v1778_v24  ;;  %v1779_v42 = vadd.f32 %v5036_v49, %v1529_v17  ;;  %1453 = vst.msk [vmem:[#allocation3 + $0x98] sm:$0xff] %vm678_vm3, %v1421_v54  ;;  %v1527_v51 = vld [vmem:[#allocation3 + $0x68] sm:$0xff]  ;;  %5220 = vmatmul.mubr.msk.bf16.gmra.mrb[140].mxu1 %vm678_vm3, %v3324_v26  ;;  %5253 = vmatprep.mubr.msk.bf16.mxu0 %vm678_vm3, %v6158_v19 }
 0x18a   : > { %1808 = vst.msk [vmem:[#allocation3 + $0x60] sm:$0xff] %vm678_vm3, %v1776_v45  ;;  %v1777_v33 = vadd.f32 %v1688_v55, %v1527_v51  ;;  %1451 = vst.msk [vmem:[#allocation3 + $0x88] sm:$0xff] %vm678_vm3, %v1419_v34  ;;  %v1182_v55 = vld [vmem:[#allocation3 + $0xf0] sm:$0xff] }
 0x18b   : > { %1811 = vst.msk [vmem:[#allocation3 + $0x78] sm:$0xff] %vm678_vm3, %v1779_v42  ;;  %v5039_v48 = vpop.f32.mrb[32].mxu0  ;;  %v1183_v42 = vld [vmem:[#allocation3 + $0xf8] sm:$0xff] }
 0x18c   : > { %1809 = vst.msk [vmem:[#allocation3 + $0x68] sm:$0xff] %vm678_vm3, %v1777_v33  ;;  %v5009_v63 = vpop.f32.mrb[36].mxu1  ;;  %v1701_v7 = vpop.f32.mrb[33].mxu0 }
 0x18d   : > { %v1424_v0 = vadd.f32 %v5009_v63, %v1174_v41  ;;  %v1355_v46 = vpop.f32.mrb[37].mxu1  ;;  %v5040_v19 = vpop.f32.mrb[34].mxu0  ;;  %v1181_v41 = vld [vmem:[#allocation3 + $0xe8] sm:$0xff] }
 0x18e   : > { %v1532_v6 = vld [vmem:[#allocation3 + $0x90] sm:$0xff]  ;;  %v1422_v10 = vadd.f32 %v1355_v46, %v1172_v53  ;;  %v5010_v29 = vpop.f32.mrb[38].mxu1  ;;  %v1704_v22 = vpop.f32.mrb[35].mxu0 }
 0x18f   : > { %v1782_v20 = vadd.f32 %v5039_v48, %v1532_v6  ;;  %1456 = vst.msk [vmem:[#allocation3 + $0xb0] sm:$0xff] %vm678_vm3, %v1424_v0  ;;  %v1530_v30 = vld [vmem:[#allocation3 + $0x80] sm:$0xff]  ;;  %v1425_v52 = vadd.f32 %v5010_v29, %v1175_v11  ;;  %v1358_v57 = vpop.f32.mrb[39].mxu1  ;;  %v1878_v11 = vld [vmem:[#allocation3 + $0x10] sm:$0xff] }
 0x190   : > { %v1780_v35 = vadd.f32 %v1701_v7, %v1530_v30  ;;  %1454 = vst.msk [vmem:[#allocation3 + $0xa0] sm:$0xff] %vm678_vm3, %v1422_v10  ;;  %v1533_v61 = vld [vmem:[#allocation3 + $0x98] sm:$0xff]  ;;  %v1423_v36 = vadd.f32 %v1358_v57, %v1173_v27  ;;  %5254 = vmatmul.mubr.msk.bf16.gmra.mrb[140].mxu0 %vm678_vm3, %v3686_v2  ;;  %v1876_v30 = vld [vmem:[#allocation3] sm:$0xff] }
 0x191   : > { %1814 = vst.msk [vmem:[#allocation3 + $0x90] sm:$0xff] %vm678_vm3, %v1782_v20  ;;  %v1783_v1 = vadd.f32 %v5040_v19, %v1533_v61  ;;  %1457 = vst.msk [vmem:[#allocation3 + $0xb8] sm:$0xff] %vm678_vm3, %v1425_v52  ;;  %v1531_v38 = vld [vmem:[#allocation3 + $0x88] sm:$0xff]  ;;  %v1879_v61 = vld [vmem:[#allocation3 + $0x18] sm:$0xff] }
 0x192   : > { %1812 = vst.msk [vmem:[#allocation3 + $0x80] sm:$0xff] %vm678_vm3, %v1780_v35  ;;  %v1781_v32 = vadd.f32 %v1704_v22, %v1531_v38  ;;  %1455 = vst.msk [vmem:[#allocation3 + $0xa8] sm:$0xff] %vm678_vm3, %v1423_v36 }
 0x193   : > { %1815 = vst.msk [vmem:[#allocation3 + $0x98] sm:$0xff] %vm678_vm3, %v1783_v1  ;;  %v5043_v56 = vpop.f32.mrb[36].mxu0 }
 0x194   : > { %1813 = vst.msk [vmem:[#allocation3 + $0x88] sm:$0xff] %vm678_vm3, %v1781_v32  ;;  %v5013_v47 = vpop.f32.mrb[40].mxu1  ;;  %v1717_v8 = vpop.f32.mrb[37].mxu0 }
 0x195   : > { %v1428_v3 = vadd.f32 %v5013_v47, %v1178_v58  ;;  %v1371_v5 = vpop.f32.mrb[41].mxu1  ;;  %v5044_v25 = vpop.f32.mrb[38].mxu0 }
 0x196   : > { %v1536_v4 = vld [vmem:[#allocation3 + $0xb0] sm:$0xff]  ;;  %v1426_v31 = vadd.f32 %v1371_v5, %v1176_v9  ;;  %v5014_v15 = vpop.f32.mrb[42].mxu1  ;;  %v1720_v28 = vpop.f32.mrb[39].mxu0 }
 0x197   : > { %v1786_v16 = vadd.f32 %v5043_v56, %v1536_v4  ;;  %1460 = vst.msk [vmem:[#allocation3 + $0xd0] sm:$0xff] %vm678_vm3, %v1428_v3  ;;  %v1534_v18 = vld [vmem:[#allocation3 + $0xa0] sm:$0xff]  ;;  %v1429_v39 = vadd.f32 %v5014_v15, %v1179_v21  ;;  %v1374_v44 = vpop.f32.mrb[43].mxu1  ;;  %v1877_v56 = vld [vmem:[#allocation3 + $0x8] sm:$0xff] }
 0x198   : > { %v1784_v23 = vadd.f32 %v1717_v8, %v1534_v18  ;;  %1458 = vst.msk [vmem:[#allocation3 + $0xc0] sm:$0xff] %vm678_vm3, %v1426_v31  ;;  %v1537_v49 = vld [vmem:[#allocation3 + $0xb8] sm:$0xff]  ;;  %v1427_v26 = vadd.f32 %v1374_v44, %v1177_v43  ;;  %v1882_v31 = vld [vmem:[#allocation3 + $0x30] sm:$0xff] }
 0x199   : > { %1818 = vst.msk [vmem:[#allocation3 + $0xb0] sm:$0xff] %vm678_vm3, %v1786_v16  ;;  %v1787_v60 = vadd.f32 %v5044_v25, %v1537_v49  ;;  %1461 = vst.msk [vmem:[#allocation3 + $0xd8] sm:$0xff] %vm678_vm3, %v1429_v39  ;;  %v1535_v50 = vld [vmem:[#allocation3 + $0xa8] sm:$0xff]  ;;  %v1880_v16 = vld [vmem:[#allocation3 + $0x20] sm:$0xff] }
 0x19a   : > { %1816 = vst.msk [vmem:[#allocation3 + $0xa0] sm:$0xff] %vm678_vm3, %v1784_v23  ;;  %v1785_v12 = vadd.f32 %v1720_v28, %v1535_v50  ;;  %1459 = vst.msk [vmem:[#allocation3 + $0xc8] sm:$0xff] %vm678_vm3, %v1427_v26  ;;  %v1883_v23 = vld [vmem:[#allocation3 + $0x38] sm:$0xff] }
 0x19b   : > { %1819 = vst.msk [vmem:[#allocation3 + $0xb8] sm:$0xff] %vm678_vm3, %v1787_v60  ;;  %v5047_v40 = vpop.f32.mrb[40].mxu0 }
 0x19c   : > { %1817 = vst.msk [vmem:[#allocation3 + $0xa8] sm:$0xff] %vm678_vm3, %v1785_v12  ;;  %v5017_v24 = vpop.f32.mrb[44].mxu1  ;;  %v1733_v59 = vpop.f32.mrb[41].mxu0 }
 0x19d   : > { %v1432_v54 = vadd.f32 %v5017_v24, %v1182_v55  ;;  %v1387_v13 = vpop.f32.mrb[45].mxu1  ;;  %v5048_v45 = vpop.f32.mrb[42].mxu0 }
 0x19e   : > { %v1540_v17 = vld [vmem:[#allocation3 + $0xd0] sm:$0xff]  ;;  %v1430_v34 = vadd.f32 %v1387_v13, %v1180_v37  ;;  %v5018_v51 = vpop.f32.mrb[46].mxu1  ;;  %v1736_v14 = vpop.f32.mrb[43].mxu0 }
 0x19f   : > { %v1790_v62 = vadd.f32 %v5047_v40, %v1540_v17  ;;  %1464 = vst.msk [vmem:[#allocation3 + $0xf0] sm:$0xff] %vm678_vm3, %v1432_v54  ;;  %v1538_v33 = vld [vmem:[#allocation3 + $0xc0] sm:$0xff]  ;;  %v1433_v48 = vadd.f32 %v5018_v51, %v1183_v42  ;;  %v1390_v63 = vpop.f32.mrb[47].mxu1  ;;  %v1881_v40 = vld [vmem:[#allocation3 + $0x28] sm:$0xff] }
 0x1a0   : > { %v1788_v7 = vadd.f32 %v1733_v59, %v1538_v33  ;;  %1462 = vst.msk [vmem:[#allocation3 + $0xe0] sm:$0xff] %vm678_vm3, %v1430_v34  ;;  %v1541_v2 = vld [vmem:[#allocation3 + $0xd8] sm:$0xff]  ;;  %v1431_v0 = vadd.f32 %v1390_v63, %v1181_v41  ;;  %v1886_v34 = vld [vmem:[#allocation3 + $0x50] sm:$0xff] }
 0x1a1   : > { %1822 = vst.msk [vmem:[#allocation3 + $0xd0] sm:$0xff] %vm678_vm3, %v1790_v62  ;;  %v1791_v53 = vadd.f32 %v5048_v45, %v1541_v2  ;;  %1465 = vst.msk [vmem:[#allocation3 + $0xf8] sm:$0xff] %vm678_vm3, %v1433_v48  ;;  %v1539_v46 = vld [vmem:[#allocation3 + $0xc8] sm:$0xff]  ;;  %v1884_v62 = vld [vmem:[#allocation3 + $0x40] sm:$0xff] }
 0x1a2   : > { %1820 = vst.msk [vmem:[#allocation3 + $0xc0] sm:$0xff] %vm678_vm3, %v1788_v7  ;;  %v1789_v19 = vadd.f32 %v1736_v14, %v1539_v46  ;;  %1463 = vst.msk [vmem:[#allocation3 + $0xe8] sm:$0xff] %vm678_vm3, %v1431_v0  ;;  %v1887_v7 = vld [vmem:[#allocation3 + $0x58] sm:$0xff] }
 0x1a3   : > { %1823 = vst.msk [vmem:[#allocation3 + $0xd8] sm:$0xff] %vm678_vm3, %v1791_v53  ;;  %v5051_v6 = vpop.f32.mrb[44].mxu0 }
 0x1a4   : > { %1821 = vst.msk [vmem:[#allocation3 + $0xc8] sm:$0xff] %vm678_vm3, %v1789_v19  ;;  %v1749_v10 = vpop.f32.mrb[45].mxu0  ;;  %v5057_v29 = vpop.f32.mrb[48].mxu1 }
 0x1a5   : > { %v2128_v22 = vadd.f32 %v5057_v29, %v1878_v11  ;;  %v5052_v20 = vpop.f32.mrb[46].mxu0  ;;  %v1999_v52 = vpop.f32.mrb[49].mxu1 }
 0x1a6   : > { %v1544_v27 = vld [vmem:[#allocation3 + $0xf0] sm:$0xff]  ;;  %v2126_v57 = vadd.f32 %v1999_v52, %v1876_v30  ;;  %v1752_v35 = vpop.f32.mrb[47].mxu0  ;;  %v5058_v36 = vpop.f32.mrb[50].mxu1 }
 0x1a7   : > { %v1794_v1 = vadd.f32 %v5051_v6, %v1544_v27  ;;  %v1542_v38 = vld [vmem:[#allocation3 + $0xe0] sm:$0xff]  ;;  %2160 = vst.msk [vmem:[#allocation3 + $0x10] sm:$0xff] %vm678_vm3, %v2128_v22  ;;  %v2129_v32 = vadd.f32 %v5058_v36, %v1879_v61  ;;  %v2002_v58 = vpop.f32.mrb[51].mxu1  ;;  %v1885_v6 = vld [vmem:[#allocation3 + $0x48] sm:$0xff] }
 0x1a8   : > { %v1792_v47 = vadd.f32 %v1749_v10, %v1542_v38  ;;  %v1545_v8 = vld [vmem:[#allocation3 + $0xf8] sm:$0xff]  ;;  %2158 = vst.msk [vmem:[#allocation3] sm:$0xff] %vm678_vm3, %v2126_v57  ;;  %v2127_v3 = vadd.f32 %v2002_v58, %v1877_v56  ;;  %v1890_v57 = vld [vmem:[#allocation3 + $0x70] sm:$0xff] }
 0x1a9   : > { %1826 = vst.msk [vmem:[#allocation3 + $0xf0] sm:$0xff] %vm678_vm3, %v1794_v1  ;;  %v1795_v9 = vadd.f32 %v5052_v20, %v1545_v8  ;;  %v1543_v5 = vld [vmem:[#allocation3 + $0xe8] sm:$0xff]  ;;  %2161 = vst.msk [vmem:[#allocation3 + $0x18] sm:$0xff] %vm678_vm3, %v2129_v32  ;;  %v1888_v1 = vld [vmem:[#allocation3 + $0x60] sm:$0xff] }
 0x1aa   : > { %1824 = vst.msk [vmem:[#allocation3 + $0xe0] sm:$0xff] %vm678_vm3, %v1792_v47  ;;  %v1793_v25 = vadd.f32 %v1752_v35, %v1543_v5  ;;  %2159 = vst.msk [vmem:[#allocation3 + $0x8] sm:$0xff] %vm678_vm3, %v2127_v3  ;;  %v1891_v47 = vld [vmem:[#allocation3 + $0x78] sm:$0xff] }
 0x1ab   : > { %1827 = vst.msk [vmem:[#allocation3 + $0xf8] sm:$0xff] %vm678_vm3, %v1795_v9  ;;  %v5091_v4 = vpop.f32.mrb[48].mxu0 }
 0x1ac   : > { %1825 = vst.msk [vmem:[#allocation3 + $0xe8] sm:$0xff] %vm678_vm3, %v1793_v25  ;;  %v5061_v21 = vpop.f32.mrb[52].mxu1  ;;  %v2361_v15 = vpop.f32.mrb[49].mxu0 }
 0x1ad   : > { %v2132_v28 = vadd.f32 %v5061_v21, %v1882_v31  ;;  %v2015_v18 = vpop.f32.mrb[53].mxu1  ;;  %v5092_v39 = vpop.f32.mrb[50].mxu0 }
 0x1ae   : > { %v2240_v43 = vld [vmem:[#allocation3 + $0x10] sm:$0xff]  ;;  %v2130_v44 = vadd.f32 %v2015_v18, %v1880_v16  ;;  %v5062_v49 = vpop.f32.mrb[54].mxu1  ;;  %v2364_v26 = vpop.f32.mrb[51].mxu0 }
 0x1af   : > { %v2490_v60 = vadd.f32 %v5091_v4, %v2240_v43  ;;  %2164 = vst.msk [vmem:[#allocation3 + $0x30] sm:$0xff] %vm678_vm3, %v2132_v28  ;;  %v2238_v50 = vld [vmem:[#allocation3] sm:$0xff]  ;;  %v2133_v12 = vadd.f32 %v5062_v49, %v1883_v23  ;;  %v2018_v55 = vpop.f32.mrb[55].mxu1  ;;  %v1889_v4 = vld [vmem:[#allocation3 + $0x68] sm:$0xff] }
 0x1b0   : > { %v2488_v24 = vadd.f32 %v2361_v15, %v2238_v50  ;;  %2162 = vst.msk [vmem:[#allocation3 + $0x20] sm:$0xff] %vm678_vm3, %v2130_v44  ;;  %v2241_v59 = vld [vmem:[#allocation3 + $0x18] sm:$0xff]  ;;  %v2131_v54 = vadd.f32 %v2018_v55, %v1881_v40  ;;  %v1894_v44 = vld [vmem:[#allocation3 + $0x90] sm:$0xff] }
 0x1b1   : > { %2522 = vst.msk [vmem:[#allocation3 + $0x10] sm:$0xff] %vm678_vm3, %v2490_v60  ;;  %v2491_v37 = vadd.f32 %v5092_v39, %v2241_v59  ;;  %2165 = vst.msk [vmem:[#allocation3 + $0x38] sm:$0xff] %vm678_vm3, %v2133_v12  ;;  %v2239_v13 = vld [vmem:[#allocation3 + $0x8] sm:$0xff]  ;;  %v1892_v60 = vld [vmem:[#allocation3 + $0x80] sm:$0xff] }
 0x1b2   : > { %2520 = vst.msk [vmem:[#allocation3] sm:$0xff] %vm678_vm3, %v2488_v24  ;;  %v2489_v45 = vadd.f32 %v2364_v26, %v2239_v13  ;;  %2163 = vst.msk [vmem:[#allocation3 + $0x28] sm:$0xff] %vm678_vm3, %v2131_v54  ;;  %v1895_v24 = vld [vmem:[#allocation3 + $0x98] sm:$0xff] }
 0x1b3   : > { %2523 = vst.msk [vmem:[#allocation3 + $0x18] sm:$0xff] %vm678_vm3, %v2491_v37  ;;  %v5095_v17 = vpop.f32.mrb[52].mxu0 }
 0x1b4   : > { %2521 = vst.msk [vmem:[#allocation3 + $0x8] sm:$0xff] %vm678_vm3, %v2489_v45  ;;  %v5065_v42 = vpop.f32.mrb[56].mxu1  ;;  %v2377_v51 = vpop.f32.mrb[53].mxu0 }
 0x1b5   : > { %v2136_v14 = vadd.f32 %v5065_v42, %v1886_v34  ;;  %v2031_v33 = vpop.f32.mrb[57].mxu1  ;;  %v5096_v48 = vpop.f32.mrb[54].mxu0 }
 0x1b6   : > { %v2244_v41 = vld [vmem:[#allocation3 + $0x30] sm:$0xff]  ;;  %v2134_v63 = vadd.f32 %v2031_v33, %v1884_v62  ;;  %v5066_v2 = vpop.f32.mrb[58].mxu1  ;;  %v2380_v0 = vpop.f32.mrb[55].mxu0 }
 0x1b7   : > { %v2494_v53 = vadd.f32 %v5095_v17, %v2244_v41  ;;  %2168 = vst.msk [vmem:[#allocation3 + $0x50] sm:$0xff] %vm678_vm3, %v2136_v14  ;;  %v2242_v46 = vld [vmem:[#allocation3 + $0x20] sm:$0xff]  ;;  %v2137_v19 = vadd.f32 %v5066_v2, %v1887_v7  ;;  %v2034_v10 = vpop.f32.mrb[59].mxu1  ;;  %v1893_v17 = vld [vmem:[#allocation3 + $0x88] sm:$0xff] }
 0x1b8   : > { %v2492_v11 = vadd.f32 %v2377_v51, %v2242_v46  ;;  %2166 = vst.msk [vmem:[#allocation3 + $0x40] sm:$0xff] %vm678_vm3, %v2134_v63  ;;  %v2245_v29 = vld [vmem:[#allocation3 + $0x38] sm:$0xff]  ;;  %v2135_v22 = vadd.f32 %v2034_v10, %v1885_v6  ;;  %v1898_v63 = vld [vmem:[#allocation3 + $0xb0] sm:$0xff] }
 0x1b9   : > { %2526 = vst.msk [vmem:[#allocation3 + $0x30] sm:$0xff] %vm678_vm3, %v2494_v53  ;;  %v2495_v20 = vadd.f32 %v5096_v48, %v2245_v29  ;;  %2169 = vst.msk [vmem:[#allocation3 + $0x58] sm:$0xff] %vm678_vm3, %v2137_v19  ;;  %v2243_v30 = vld [vmem:[#allocation3 + $0x28] sm:$0xff]  ;;  %v1896_v53 = vld [vmem:[#allocation3 + $0xa0] sm:$0xff] }
 0x1ba   : > { %2524 = vst.msk [vmem:[#allocation3 + $0x20] sm:$0xff] %vm678_vm3, %v2492_v11  ;;  %v2493_v52 = vadd.f32 %v2380_v0, %v2243_v30  ;;  %2167 = vst.msk [vmem:[#allocation3 + $0x48] sm:$0xff] %vm678_vm3, %v2135_v22  ;;  %v1899_v11 = vld [vmem:[#allocation3 + $0xb8] sm:$0xff] }
 0x1bb   : > { %2527 = vst.msk [vmem:[#allocation3 + $0x38] sm:$0xff] %vm678_vm3, %v2495_v20  ;;  %v5099_v27 = vpop.f32.mrb[56].mxu0 }
 0x1bc   : > { %2525 = vst.msk [vmem:[#allocation3 + $0x28] sm:$0xff] %vm678_vm3, %v2493_v52  ;;  %v5069_v35 = vpop.f32.mrb[60].mxu1  ;;  %v2393_v61 = vpop.f32.mrb[57].mxu0 }
 0x1bd   : > { %v2140_v36 = vadd.f32 %v5069_v35, %v1890_v57  ;;  %v2047_v38 = vpop.f32.mrb[61].mxu1  ;;  %v5100_v32 = vpop.f32.mrb[58].mxu0 }
 0x1be   : > { %v2248_v56 = vld [vmem:[#allocation3 + $0x50] sm:$0xff]  ;;  %v2138_v58 = vadd.f32 %v2047_v38, %v1888_v1  ;;  %v5070_v8 = vpop.f32.mrb[62].mxu1  ;;  %v2396_v3 = vpop.f32.mrb[59].mxu0 }
 0x1bf   : > { %v2498_v9 = vadd.f32 %v5099_v27, %v2248_v56  ;;  %2172 = vst.msk [vmem:[#allocation3 + $0x70] sm:$0xff] %vm678_vm3, %v2140_v36  ;;  %v2246_v5 = vld [vmem:[#allocation3 + $0x40] sm:$0xff]  ;;  %v2141_v25 = vadd.f32 %v5070_v8, %v1891_v47  ;;  %v2050_v31 = vpop.f32.mrb[63].mxu1  ;;  %v1897_v27 = vld [vmem:[#allocation3 + $0xa8] sm:$0xff] }
 0x1c0   : > { %v2496_v21 = vadd.f32 %v2393_v61, %v2246_v5  ;;  %2170 = vst.msk [vmem:[#allocation3 + $0x60] sm:$0xff] %vm678_vm3, %v2138_v58  ;;  %v2249_v15 = vld [vmem:[#allocation3 + $0x58] sm:$0xff]  ;;  %v2139_v28 = vadd.f32 %v2050_v31, %v1889_v4  ;;  %v1902_v58 = vld [vmem:[#allocation3 + $0xd0] sm:$0xff] }
 0x1c1   : > { %2530 = vst.msk [vmem:[#allocation3 + $0x50] sm:$0xff] %vm678_vm3, %v2498_v9  ;;  %v2499_v16 = vadd.f32 %v5100_v32, %v2249_v15  ;;  %2173 = vst.msk [vmem:[#allocation3 + $0x78] sm:$0xff] %vm678_vm3, %v2141_v25  ;;  %v2247_v18 = vld [vmem:[#allocation3 + $0x48] sm:$0xff]  ;;  %v1900_v9 = vld [vmem:[#allocation3 + $0xc0] sm:$0xff] }
 0x1c2   : > { %2528 = vst.msk [vmem:[#allocation3 + $0x40] sm:$0xff] %vm678_vm3, %v2496_v21  ;;  %v2497_v39 = vadd.f32 %v2396_v3, %v2247_v18  ;;  %2171 = vst.msk [vmem:[#allocation3 + $0x68] sm:$0xff] %vm678_vm3, %v2139_v28  ;;  %v1903_v21 = vld [vmem:[#allocation3 + $0xd8] sm:$0xff] }
 0x1c3   : > { %2531 = vst.msk [vmem:[#allocation3 + $0x58] sm:$0xff] %vm678_vm3, %v2499_v16  ;;  %v5103_v43 = vpop.f32.mrb[60].mxu0 }
 0x1c4   : > { %2529 = vst.msk [vmem:[#allocation3 + $0x48] sm:$0xff] %vm678_vm3, %v2497_v39  ;;  %v5073_v23 = vpop.f32.mrb[64].mxu1  ;;  %v2409_v49 = vpop.f32.mrb[61].mxu0 }
 0x1c5   : > { %v2144_v26 = vadd.f32 %v5073_v23, %v1894_v44  ;;  %v2063_v50 = vpop.f32.mrb[65].mxu1  ;;  %v5104_v12 = vpop.f32.mrb[62].mxu0 }
 0x1c6   : > { %v2252_v40 = vld [vmem:[#allocation3 + $0x70] sm:$0xff]  ;;  %v2142_v55 = vadd.f32 %v2063_v50, %v1892_v60  ;;  %v5074_v59 = vpop.f32.mrb[66].mxu1  ;;  %v2412_v54 = vpop.f32.mrb[63].mxu0 }
 0x1c7   : > { %v2502_v37 = vadd.f32 %v5103_v43, %v2252_v40  ;;  %2176 = vst.msk [vmem:[#allocation3 + $0x90] sm:$0xff] %vm678_vm3, %v2144_v26  ;;  %v2250_v13 = vld [vmem:[#allocation3 + $0x60] sm:$0xff]  ;;  %v2145_v45 = vadd.f32 %v5074_v59, %v1895_v24  ;;  %v2066_v34 = vpop.f32.mrb[67].mxu1  ;;  %v1901_v43 = vld [vmem:[#allocation3 + $0xc8] sm:$0xff] }
 0x1c8   : > { %v2500_v42 = vadd.f32 %v2409_v49, %v2250_v13  ;;  %2174 = vst.msk [vmem:[#allocation3 + $0x80] sm:$0xff] %vm678_vm3, %v2142_v55  ;;  %v2253_v51 = vld [vmem:[#allocation3 + $0x78] sm:$0xff]  ;;  %v2143_v14 = vadd.f32 %v2066_v34, %v1893_v17  ;;  %v1906_v55 = vld [vmem:[#allocation3 + $0xf0] sm:$0xff] }
 0x1c9   : > { %2534 = vst.msk [vmem:[#allocation3 + $0x70] sm:$0xff] %vm678_vm3, %v2502_v37  ;;  %v2503_v62 = vadd.f32 %v5104_v12, %v2253_v51  ;;  %2177 = vst.msk [vmem:[#allocation3 + $0x98] sm:$0xff] %vm678_vm3, %v2145_v45  ;;  %v2251_v33 = vld [vmem:[#allocation3 + $0x68] sm:$0xff]  ;;  %v1904_v37 = vld [vmem:[#allocation3 + $0xe0] sm:$0xff] }
 0x1ca   : > { %2532 = vst.msk [vmem:[#allocation3 + $0x60] sm:$0xff] %vm678_vm3, %v2500_v42  ;;  %v2501_v48 = vadd.f32 %v2412_v54, %v2251_v33  ;;  %2175 = vst.msk [vmem:[#allocation3 + $0x88] sm:$0xff] %vm678_vm3, %v2143_v14  ;;  %v1907_v42 = vld [vmem:[#allocation3 + $0xf8] sm:$0xff] }
 0x1cb   : > { %2535 = vst.msk [vmem:[#allocation3 + $0x78] sm:$0xff] %vm678_vm3, %v2503_v62  ;;  %v5107_v41 = vpop.f32.mrb[64].mxu0 }
 0x1cc   : > { %2533 = vst.msk [vmem:[#allocation3 + $0x68] sm:$0xff] %vm678_vm3, %v2501_v48  ;;  %v5077_v7 = vpop.f32.mrb[68].mxu1  ;;  %v2425_v2 = vpop.f32.mrb[65].mxu0 }
 0x1cd   : > { %v2148_v0 = vadd.f32 %v5077_v7, %v1898_v63  ;;  %v2079_v46 = vpop.f32.mrb[69].mxu1  ;;  %v5108_v19 = vpop.f32.mrb[66].mxu0 }
 0x1ce   : > { %v2256_v6 = vld [vmem:[#allocation3 + $0x90] sm:$0xff]  ;;  %v2146_v10 = vadd.f32 %v2079_v46, %v1896_v53  ;;  %v5078_v29 = vpop.f32.mrb[70].mxu1  ;;  %v2428_v22 = vpop.f32.mrb[67].mxu0 }
 0x1cf   : > { %v2506_v20 = vadd.f32 %v5107_v41, %v2256_v6  ;;  %2180 = vst.msk [vmem:[#allocation3 + $0xb0] sm:$0xff] %vm678_vm3, %v2148_v0  ;;  %v2254_v30 = vld [vmem:[#allocation3 + $0x80] sm:$0xff]  ;;  %v2149_v52 = vadd.f32 %v5078_v29, %v1899_v11  ;;  %v2082_v57 = vpop.f32.mrb[71].mxu1  ;;  %v1905_v41 = vld [vmem:[#allocation3 + $0xe8] sm:$0xff]  ;;  %v2602_v11 = vld [vmem:[#allocation3 + $0x10] sm:$0xff] }
 0x1d0   : > { %v2504_v35 = vadd.f32 %v2425_v2, %v2254_v30  ;;  %2178 = vst.msk [vmem:[#allocation3 + $0xa0] sm:$0xff] %vm678_vm3, %v2146_v10  ;;  %v2257_v61 = vld [vmem:[#allocation3 + $0x98] sm:$0xff]  ;;  %v2147_v36 = vadd.f32 %v2082_v57, %v1897_v27  ;;  %v2600_v30 = vld [vmem:[#allocation3] sm:$0xff] }
 0x1d1   : > { %2538 = vst.msk [vmem:[#allocation3 + $0x90] sm:$0xff] %vm678_vm3, %v2506_v20  ;;  %v2507_v1 = vadd.f32 %v5108_v19, %v2257_v61  ;;  %2181 = vst.msk [vmem:[#allocation3 + $0xb8] sm:$0xff] %vm678_vm3, %v2149_v52  ;;  %v2255_v38 = vld [vmem:[#allocation3 + $0x88] sm:$0xff]  ;;  %v2603_v61 = vld [vmem:[#allocation3 + $0x18] sm:$0xff] }
 0x1d2   : > { %2536 = vst.msk [vmem:[#allocation3 + $0x80] sm:$0xff] %vm678_vm3, %v2504_v35  ;;  %v2505_v32 = vadd.f32 %v2428_v22, %v2255_v38  ;;  %2179 = vst.msk [vmem:[#allocation3 + $0xa8] sm:$0xff] %vm678_vm3, %v2147_v36 }
 0x1d3   : > { %2539 = vst.msk [vmem:[#allocation3 + $0x98] sm:$0xff] %vm678_vm3, %v2507_v1  ;;  %v5111_v56 = vpop.f32.mrb[68].mxu0 }
 0x1d4   : > { %2537 = vst.msk [vmem:[#allocation3 + $0x88] sm:$0xff] %vm678_vm3, %v2505_v32  ;;  %v5081_v47 = vpop.f32.mrb[72].mxu1  ;;  %v2441_v8 = vpop.f32.mrb[69].mxu0 }
 0x1d5   : > { %v2152_v3 = vadd.f32 %v5081_v47, %v1902_v58  ;;  %v2095_v5 = vpop.f32.mrb[73].mxu1  ;;  %v5112_v25 = vpop.f32.mrb[70].mxu0 }
 0x1d6   : > { %v2260_v4 = vld [vmem:[#allocation3 + $0xb0] sm:$0xff]  ;;  %v2150_v31 = vadd.f32 %v2095_v5, %v1900_v9  ;;  %v5082_v15 = vpop.f32.mrb[74].mxu1  ;;  %v2444_v28 = vpop.f32.mrb[71].mxu0 }
 0x1d7   : > { %v2510_v16 = vadd.f32 %v5111_v56, %v2260_v4  ;;  %2184 = vst.msk [vmem:[#allocation3 + $0xd0] sm:$0xff] %vm678_vm3, %v2152_v3  ;;  %v2258_v18 = vld [vmem:[#allocation3 + $0xa0] sm:$0xff]  ;;  %v2153_v39 = vadd.f32 %v5082_v15, %v1903_v21  ;;  %v2098_v44 = vpop.f32.mrb[75].mxu1  ;;  %v2601_v56 = vld [vmem:[#allocation3 + $0x8] sm:$0xff] }
 0x1d8   : > { %v2508_v23 = vadd.f32 %v2441_v8, %v2258_v18  ;;  %2182 = vst.msk [vmem:[#allocation3 + $0xc0] sm:$0xff] %vm678_vm3, %v2150_v31  ;;  %v2261_v49 = vld [vmem:[#allocation3 + $0xb8] sm:$0xff]  ;;  %v2151_v26 = vadd.f32 %v2098_v44, %v1901_v43  ;;  %v2606_v31 = vld [vmem:[#allocation3 + $0x30] sm:$0xff] }
 0x1d9   : > { %2542 = vst.msk [vmem:[#allocation3 + $0xb0] sm:$0xff] %vm678_vm3, %v2510_v16  ;;  %v2511_v60 = vadd.f32 %v5112_v25, %v2261_v49  ;;  %2185 = vst.msk [vmem:[#allocation3 + $0xd8] sm:$0xff] %vm678_vm3, %v2153_v39  ;;  %v2259_v50 = vld [vmem:[#allocation3 + $0xa8] sm:$0xff]  ;;  %v2604_v16 = vld [vmem:[#allocation3 + $0x20] sm:$0xff] }
 0x1da   : > { %2540 = vst.msk [vmem:[#allocation3 + $0xa0] sm:$0xff] %vm678_vm3, %v2508_v23  ;;  %v2509_v12 = vadd.f32 %v2444_v28, %v2259_v50  ;;  %2183 = vst.msk [vmem:[#allocation3 + $0xc8] sm:$0xff] %vm678_vm3, %v2151_v26  ;;  %v2607_v23 = vld [vmem:[#allocation3 + $0x38] sm:$0xff] }
 0x1db   : > { %2543 = vst.msk [vmem:[#allocation3 + $0xb8] sm:$0xff] %vm678_vm3, %v2511_v60  ;;  %v5115_v40 = vpop.f32.mrb[72].mxu0 }
 0x1dc   : > { %2541 = vst.msk [vmem:[#allocation3 + $0xa8] sm:$0xff] %vm678_vm3, %v2509_v12  ;;  %v5085_v24 = vpop.f32.mrb[76].mxu1  ;;  %v2457_v59 = vpop.f32.mrb[73].mxu0 }
 0x1dd   : > { %v2156_v54 = vadd.f32 %v5085_v24, %v1906_v55  ;;  %v2111_v13 = vpop.f32.mrb[77].mxu1  ;;  %v5116_v45 = vpop.f32.mrb[74].mxu0 }
 0x1de   : > { %v2264_v17 = vld [vmem:[#allocation3 + $0xd0] sm:$0xff]  ;;  %v2154_v34 = vadd.f32 %v2111_v13, %v1904_v37  ;;  %v5086_v51 = vpop.f32.mrb[78].mxu1  ;;  %v2460_v14 = vpop.f32.mrb[75].mxu0 }
 0x1df   : > { %v2514_v62 = vadd.f32 %v5115_v40, %v2264_v17  ;;  %2188 = vst.msk [vmem:[#allocation3 + $0xf0] sm:$0xff] %vm678_vm3, %v2156_v54  ;;  %v2262_v33 = vld [vmem:[#allocation3 + $0xc0] sm:$0xff]  ;;  %v2157_v48 = vadd.f32 %v5086_v51, %v1907_v42  ;;  %v2114_v63 = vpop.f32.mrb[79].mxu1  ;;  %v2605_v40 = vld [vmem:[#allocation3 + $0x28] sm:$0xff] }
 0x1e0   : > { %v2512_v7 = vadd.f32 %v2457_v59, %v2262_v33  ;;  %2186 = vst.msk [vmem:[#allocation3 + $0xe0] sm:$0xff] %vm678_vm3, %v2154_v34  ;;  %v2265_v2 = vld [vmem:[#allocation3 + $0xd8] sm:$0xff]  ;;  %v2155_v0 = vadd.f32 %v2114_v63, %v1905_v41  ;;  %v2610_v34 = vld [vmem:[#allocation3 + $0x50] sm:$0xff] }
 0x1e1   : > { %2546 = vst.msk [vmem:[#allocation3 + $0xd0] sm:$0xff] %vm678_vm3, %v2514_v62  ;;  %v2515_v53 = vadd.f32 %v5116_v45, %v2265_v2  ;;  %2189 = vst.msk [vmem:[#allocation3 + $0xf8] sm:$0xff] %vm678_vm3, %v2157_v48  ;;  %v2263_v46 = vld [vmem:[#allocation3 + $0xc8] sm:$0xff]  ;;  %v2608_v62 = vld [vmem:[#allocation3 + $0x40] sm:$0xff] }
 0x1e2   : > { %2544 = vst.msk [vmem:[#allocation3 + $0xc0] sm:$0xff] %vm678_vm3, %v2512_v7  ;;  %v2513_v19 = vadd.f32 %v2460_v14, %v2263_v46  ;;  %2187 = vst.msk [vmem:[#allocation3 + $0xe8] sm:$0xff] %vm678_vm3, %v2155_v0  ;;  %v2611_v7 = vld [vmem:[#allocation3 + $0x58] sm:$0xff] }
 0x1e3   : > { %2547 = vst.msk [vmem:[#allocation3 + $0xd8] sm:$0xff] %vm678_vm3, %v2515_v53  ;;  %v5119_v6 = vpop.f32.mrb[76].mxu0 }
 0x1e4   : > { %2545 = vst.msk [vmem:[#allocation3 + $0xc8] sm:$0xff] %vm678_vm3, %v2513_v19  ;;  %v2473_v10 = vpop.f32.mrb[77].mxu0  ;;  %v5125_v29 = vpop.f32.mrb[80].mxu1 }
 0x1e5   : > { %v2852_v22 = vadd.f32 %v5125_v29, %v2602_v11  ;;  %v5120_v20 = vpop.f32.mrb[78].mxu0  ;;  %v2723_v52 = vpop.f32.mrb[81].mxu1 }
 0x1e6   : > { %v2268_v27 = vld [vmem:[#allocation3 + $0xf0] sm:$0xff]  ;;  %v2850_v57 = vadd.f32 %v2723_v52, %v2600_v30  ;;  %v2476_v35 = vpop.f32.mrb[79].mxu0  ;;  %v5126_v36 = vpop.f32.mrb[82].mxu1 }
 0x1e7   : > { %v2518_v1 = vadd.f32 %v5119_v6, %v2268_v27  ;;  %v2266_v38 = vld [vmem:[#allocation3 + $0xe0] sm:$0xff]  ;;  %2884 = vst.msk [vmem:[#allocation3 + $0x10] sm:$0xff] %vm678_vm3, %v2852_v22  ;;  %v2853_v32 = vadd.f32 %v5126_v36, %v2603_v61  ;;  %v2726_v58 = vpop.f32.mrb[83].mxu1  ;;  %v2609_v6 = vld [vmem:[#allocation3 + $0x48] sm:$0xff] }
 0x1e8   : > { %v2516_v47 = vadd.f32 %v2473_v10, %v2266_v38  ;;  %v2269_v8 = vld [vmem:[#allocation3 + $0xf8] sm:$0xff]  ;;  %2882 = vst.msk [vmem:[#allocation3] sm:$0xff] %vm678_vm3, %v2850_v57  ;;  %v2851_v3 = vadd.f32 %v2726_v58, %v2601_v56  ;;  %v2614_v57 = vld [vmem:[#allocation3 + $0x70] sm:$0xff] }
 0x1e9   : > { %2550 = vst.msk [vmem:[#allocation3 + $0xf0] sm:$0xff] %vm678_vm3, %v2518_v1  ;;  %v2519_v9 = vadd.f32 %v5120_v20, %v2269_v8  ;;  %v2267_v5 = vld [vmem:[#allocation3 + $0xe8] sm:$0xff]  ;;  %2885 = vst.msk [vmem:[#allocation3 + $0x18] sm:$0xff] %vm678_vm3, %v2853_v32  ;;  %v2612_v1 = vld [vmem:[#allocation3 + $0x60] sm:$0xff] }
 0x1ea   : > { %2548 = vst.msk [vmem:[#allocation3 + $0xe0] sm:$0xff] %vm678_vm3, %v2516_v47  ;;  %v2517_v25 = vadd.f32 %v2476_v35, %v2267_v5  ;;  %2883 = vst.msk [vmem:[#allocation3 + $0x8] sm:$0xff] %vm678_vm3, %v2851_v3  ;;  %v2615_v47 = vld [vmem:[#allocation3 + $0x78] sm:$0xff] }
 0x1eb   : > { %2551 = vst.msk [vmem:[#allocation3 + $0xf8] sm:$0xff] %vm678_vm3, %v2519_v9  ;;  %v5159_v4 = vpop.f32.mrb[80].mxu0 }
 0x1ec   : > { %2549 = vst.msk [vmem:[#allocation3 + $0xe8] sm:$0xff] %vm678_vm3, %v2517_v25  ;;  %v5129_v21 = vpop.f32.mrb[84].mxu1  ;;  %v3086_v15 = vpop.f32.mrb[81].mxu0 }
 0x1ed   : > { %v2856_v28 = vadd.f32 %v5129_v21, %v2606_v31  ;;  %v2739_v18 = vpop.f32.mrb[85].mxu1  ;;  %v5160_v39 = vpop.f32.mrb[82].mxu0 }
 0x1ee   : > { %v2965_v43 = vld [vmem:[#allocation3 + $0x10] sm:$0xff]  ;;  %v2854_v44 = vadd.f32 %v2739_v18, %v2604_v16  ;;  %v5130_v49 = vpop.f32.mrb[86].mxu1  ;;  %v3089_v26 = vpop.f32.mrb[83].mxu0 }
 0x1ef   : > { %v3215_v60 = vadd.f32 %v5159_v4, %v2965_v43  ;;  %2888 = vst.msk [vmem:[#allocation3 + $0x30] sm:$0xff] %vm678_vm3, %v2856_v28  ;;  %v2963_v50 = vld [vmem:[#allocation3] sm:$0xff]  ;;  %v2857_v12 = vadd.f32 %v5130_v49, %v2607_v23  ;;  %v2742_v55 = vpop.f32.mrb[87].mxu1  ;;  %v2613_v4 = vld [vmem:[#allocation3 + $0x68] sm:$0xff] }
 0x1f0   : > { %v3213_v24 = vadd.f32 %v3086_v15, %v2963_v50  ;;  %2886 = vst.msk [vmem:[#allocation3 + $0x20] sm:$0xff] %vm678_vm3, %v2854_v44  ;;  %v2966_v59 = vld [vmem:[#allocation3 + $0x18] sm:$0xff]  ;;  %v2855_v54 = vadd.f32 %v2742_v55, %v2605_v40  ;;  %v2618_v44 = vld [vmem:[#allocation3 + $0x90] sm:$0xff] }
 0x1f1   : > { %3247 = vst.msk [vmem:[#allocation3 + $0x10] sm:$0xff] %vm678_vm3, %v3215_v60  ;;  %v3216_v37 = vadd.f32 %v5160_v39, %v2966_v59  ;;  %2889 = vst.msk [vmem:[#allocation3 + $0x38] sm:$0xff] %vm678_vm3, %v2857_v12  ;;  %v2964_v13 = vld [vmem:[#allocation3 + $0x8] sm:$0xff]  ;;  %v2616_v60 = vld [vmem:[#allocation3 + $0x80] sm:$0xff] }
 0x1f2   : > { %3245 = vst.msk [vmem:[#allocation3] sm:$0xff] %vm678_vm3, %v3213_v24  ;;  %v3214_v45 = vadd.f32 %v3089_v26, %v2964_v13  ;;  %2887 = vst.msk [vmem:[#allocation3 + $0x28] sm:$0xff] %vm678_vm3, %v2855_v54  ;;  %v2619_v24 = vld [vmem:[#allocation3 + $0x98] sm:$0xff] }
 0x1f3   : > { %3248 = vst.msk [vmem:[#allocation3 + $0x18] sm:$0xff] %vm678_vm3, %v3216_v37  ;;  %v5163_v17 = vpop.f32.mrb[84].mxu0 }
 0x1f4   : > { %3246 = vst.msk [vmem:[#allocation3 + $0x8] sm:$0xff] %vm678_vm3, %v3214_v45  ;;  %v5133_v42 = vpop.f32.mrb[88].mxu1  ;;  %v3102_v51 = vpop.f32.mrb[85].mxu0 }
 0x1f5   : > { %v2860_v14 = vadd.f32 %v5133_v42, %v2610_v34  ;;  %v2755_v33 = vpop.f32.mrb[89].mxu1  ;;  %v5164_v48 = vpop.f32.mrb[86].mxu0 }
 0x1f6   : > { %v2969_v41 = vld [vmem:[#allocation3 + $0x30] sm:$0xff]  ;;  %v2858_v63 = vadd.f32 %v2755_v33, %v2608_v62  ;;  %v5134_v2 = vpop.f32.mrb[90].mxu1  ;;  %v3105_v0 = vpop.f32.mrb[87].mxu0 }
 0x1f7   : > { %v3219_v53 = vadd.f32 %v5163_v17, %v2969_v41  ;;  %2892 = vst.msk [vmem:[#allocation3 + $0x50] sm:$0xff] %vm678_vm3, %v2860_v14  ;;  %v2967_v46 = vld [vmem:[#allocation3 + $0x20] sm:$0xff]  ;;  %v2861_v19 = vadd.f32 %v5134_v2, %v2611_v7  ;;  %v2758_v10 = vpop.f32.mrb[91].mxu1  ;;  %v2617_v17 = vld [vmem:[#allocation3 + $0x88] sm:$0xff] }
 0x1f8   : > { %v3217_v11 = vadd.f32 %v3102_v51, %v2967_v46  ;;  %2890 = vst.msk [vmem:[#allocation3 + $0x40] sm:$0xff] %vm678_vm3, %v2858_v63  ;;  %v2970_v29 = vld [vmem:[#allocation3 + $0x38] sm:$0xff]  ;;  %v2859_v22 = vadd.f32 %v2758_v10, %v2609_v6  ;;  %v2622_v63 = vld [vmem:[#allocation3 + $0xb0] sm:$0xff] }
 0x1f9   : > { %3251 = vst.msk [vmem:[#allocation3 + $0x30] sm:$0xff] %vm678_vm3, %v3219_v53  ;;  %v3220_v20 = vadd.f32 %v5164_v48, %v2970_v29  ;;  %2893 = vst.msk [vmem:[#allocation3 + $0x58] sm:$0xff] %vm678_vm3, %v2861_v19  ;;  %v2968_v30 = vld [vmem:[#allocation3 + $0x28] sm:$0xff]  ;;  %v2620_v53 = vld [vmem:[#allocation3 + $0xa0] sm:$0xff] }
 0x1fa   : > { %3249 = vst.msk [vmem:[#allocation3 + $0x20] sm:$0xff] %vm678_vm3, %v3217_v11  ;;  %v3218_v52 = vadd.f32 %v3105_v0, %v2968_v30  ;;  %2891 = vst.msk [vmem:[#allocation3 + $0x48] sm:$0xff] %vm678_vm3, %v2859_v22  ;;  %v2623_v11 = vld [vmem:[#allocation3 + $0xb8] sm:$0xff] }
 0x1fb   : > { %3252 = vst.msk [vmem:[#allocation3 + $0x38] sm:$0xff] %vm678_vm3, %v3220_v20  ;;  %v5167_v27 = vpop.f32.mrb[88].mxu0 }
 0x1fc   : > { %3250 = vst.msk [vmem:[#allocation3 + $0x28] sm:$0xff] %vm678_vm3, %v3218_v52  ;;  %v5137_v35 = vpop.f32.mrb[92].mxu1  ;;  %v3118_v61 = vpop.f32.mrb[89].mxu0 }
 0x1fd   : > { %v2864_v36 = vadd.f32 %v5137_v35, %v2614_v57  ;;  %v2771_v38 = vpop.f32.mrb[93].mxu1  ;;  %v5168_v32 = vpop.f32.mrb[90].mxu0 }
 0x1fe   : > { %v2973_v56 = vld [vmem:[#allocation3 + $0x50] sm:$0xff]  ;;  %v2862_v58 = vadd.f32 %v2771_v38, %v2612_v1  ;;  %v5138_v8 = vpop.f32.mrb[94].mxu1  ;;  %v3121_v3 = vpop.f32.mrb[91].mxu0 }
 0x1ff   : > { %v3223_v9 = vadd.f32 %v5167_v27, %v2973_v56  ;;  %2896 = vst.msk [vmem:[#allocation3 + $0x70] sm:$0xff] %vm678_vm3, %v2864_v36  ;;  %v2971_v5 = vld [vmem:[#allocation3 + $0x40] sm:$0xff]  ;;  %v2865_v25 = vadd.f32 %v5138_v8, %v2615_v47  ;;  %v2774_v31 = vpop.f32.mrb[95].mxu1  ;;  %v2621_v27 = vld [vmem:[#allocation3 + $0xa8] sm:$0xff] }
 0x200   : > { %v3221_v21 = vadd.f32 %v3118_v61, %v2971_v5  ;;  %2894 = vst.msk [vmem:[#allocation3 + $0x60] sm:$0xff] %vm678_vm3, %v2862_v58  ;;  %v2974_v15 = vld [vmem:[#allocation3 + $0x58] sm:$0xff]  ;;  %v2863_v28 = vadd.f32 %v2774_v31, %v2613_v4  ;;  %v2626_v58 = vld [vmem:[#allocation3 + $0xd0] sm:$0xff] }
 0x201   : > { %3255 = vst.msk [vmem:[#allocation3 + $0x50] sm:$0xff] %vm678_vm3, %v3223_v9  ;;  %v3224_v16 = vadd.f32 %v5168_v32, %v2974_v15  ;;  %2897 = vst.msk [vmem:[#allocation3 + $0x78] sm:$0xff] %vm678_vm3, %v2865_v25  ;;  %v2972_v18 = vld [vmem:[#allocation3 + $0x48] sm:$0xff]  ;;  %v2624_v9 = vld [vmem:[#allocation3 + $0xc0] sm:$0xff] }
 0x202   : > { %3253 = vst.msk [vmem:[#allocation3 + $0x40] sm:$0xff] %vm678_vm3, %v3221_v21  ;;  %v3222_v39 = vadd.f32 %v3121_v3, %v2972_v18  ;;  %2895 = vst.msk [vmem:[#allocation3 + $0x68] sm:$0xff] %vm678_vm3, %v2863_v28  ;;  %v2627_v21 = vld [vmem:[#allocation3 + $0xd8] sm:$0xff] }
 0x203   : > { %3256 = vst.msk [vmem:[#allocation3 + $0x58] sm:$0xff] %vm678_vm3, %v3224_v16  ;;  %v5171_v43 = vpop.f32.mrb[92].mxu0 }
 0x204   : > { %3254 = vst.msk [vmem:[#allocation3 + $0x48] sm:$0xff] %vm678_vm3, %v3222_v39  ;;  %v5141_v23 = vpop.f32.mrb[96].mxu1  ;;  %v3134_v49 = vpop.f32.mrb[93].mxu0 }
 0x205   : > { %v2868_v26 = vadd.f32 %v5141_v23, %v2618_v44  ;;  %v2787_v50 = vpop.f32.mrb[97].mxu1  ;;  %v5172_v12 = vpop.f32.mrb[94].mxu0 }
 0x206   : > { %v2977_v40 = vld [vmem:[#allocation3 + $0x70] sm:$0xff]  ;;  %v2866_v55 = vadd.f32 %v2787_v50, %v2616_v60  ;;  %v5142_v59 = vpop.f32.mrb[98].mxu1  ;;  %v3137_v54 = vpop.f32.mrb[95].mxu0 }
 0x207   : > { %v3227_v37 = vadd.f32 %v5171_v43, %v2977_v40  ;;  %2900 = vst.msk [vmem:[#allocation3 + $0x90] sm:$0xff] %vm678_vm3, %v2868_v26  ;;  %v2975_v13 = vld [vmem:[#allocation3 + $0x60] sm:$0xff]  ;;  %v2869_v45 = vadd.f32 %v5142_v59, %v2619_v24  ;;  %v2790_v34 = vpop.f32.mrb[99].mxu1  ;;  %v2625_v43 = vld [vmem:[#allocation3 + $0xc8] sm:$0xff] }
 0x208   : > { %v3225_v42 = vadd.f32 %v3134_v49, %v2975_v13  ;;  %2898 = vst.msk [vmem:[#allocation3 + $0x80] sm:$0xff] %vm678_vm3, %v2866_v55  ;;  %v2978_v51 = vld [vmem:[#allocation3 + $0x78] sm:$0xff]  ;;  %v2867_v14 = vadd.f32 %v2790_v34, %v2617_v17  ;;  %v2630_v55 = vld [vmem:[#allocation3 + $0xf0] sm:$0xff] }
 0x209   : > { %3259 = vst.msk [vmem:[#allocation3 + $0x70] sm:$0xff] %vm678_vm3, %v3227_v37  ;;  %v3228_v62 = vadd.f32 %v5172_v12, %v2978_v51  ;;  %2901 = vst.msk [vmem:[#allocation3 + $0x98] sm:$0xff] %vm678_vm3, %v2869_v45  ;;  %v2976_v33 = vld [vmem:[#allocation3 + $0x68] sm:$0xff]  ;;  %v2628_v37 = vld [vmem:[#allocation3 + $0xe0] sm:$0xff] }
 0x20a   : > { %3257 = vst.msk [vmem:[#allocation3 + $0x60] sm:$0xff] %vm678_vm3, %v3225_v42  ;;  %v3226_v48 = vadd.f32 %v3137_v54, %v2976_v33  ;;  %2899 = vst.msk [vmem:[#allocation3 + $0x88] sm:$0xff] %vm678_vm3, %v2867_v14  ;;  %v2631_v42 = vld [vmem:[#allocation3 + $0xf8] sm:$0xff] }
 0x20b   : > { %3260 = vst.msk [vmem:[#allocation3 + $0x78] sm:$0xff] %vm678_vm3, %v3228_v62  ;;  %v5175_v41 = vpop.f32.mrb[96].mxu0 }
 0x20c   : > { %3258 = vst.msk [vmem:[#allocation3 + $0x68] sm:$0xff] %vm678_vm3, %v3226_v48  ;;  %v5145_v7 = vpop.f32.mrb[100].mxu1  ;;  %v3150_v2 = vpop.f32.mrb[97].mxu0 }
 0x20d   : > { %v2872_v0 = vadd.f32 %v5145_v7, %v2622_v63  ;;  %v2803_v46 = vpop.f32.mrb[101].mxu1  ;;  %v5176_v19 = vpop.f32.mrb[98].mxu0 }
 0x20e   : > { %v2981_v6 = vld [vmem:[#allocation3 + $0x90] sm:$0xff]  ;;  %v2870_v10 = vadd.f32 %v2803_v46, %v2620_v53  ;;  %v5146_v29 = vpop.f32.mrb[102].mxu1  ;;  %v3153_v22 = vpop.f32.mrb[99].mxu0 }
 0x20f   : > { %v3231_v20 = vadd.f32 %v5175_v41, %v2981_v6  ;;  %2904 = vst.msk [vmem:[#allocation3 + $0xb0] sm:$0xff] %vm678_vm3, %v2872_v0  ;;  %v2979_v30 = vld [vmem:[#allocation3 + $0x80] sm:$0xff]  ;;  %v2873_v52 = vadd.f32 %v5146_v29, %v2623_v11  ;;  %v2806_v57 = vpop.f32.mrb[103].mxu1  ;;  %v2629_v41 = vld [vmem:[#allocation3 + $0xe8] sm:$0xff]  ;;  %v3327_v11 = vld [vmem:[#allocation3 + $0x10] sm:$0xff] }
 0x210   : > { %v3229_v35 = vadd.f32 %v3150_v2, %v2979_v30  ;;  %2902 = vst.msk [vmem:[#allocation3 + $0xa0] sm:$0xff] %vm678_vm3, %v2870_v10  ;;  %v2982_v61 = vld [vmem:[#allocation3 + $0x98] sm:$0xff]  ;;  %v2871_v36 = vadd.f32 %v2806_v57, %v2621_v27  ;;  %v3325_v30 = vld [vmem:[#allocation3] sm:$0xff] }
 0x211   : > { %3263 = vst.msk [vmem:[#allocation3 + $0x90] sm:$0xff] %vm678_vm3, %v3231_v20  ;;  %v3232_v1 = vadd.f32 %v5176_v19, %v2982_v61  ;;  %2905 = vst.msk [vmem:[#allocation3 + $0xb8] sm:$0xff] %vm678_vm3, %v2873_v52  ;;  %v2980_v38 = vld [vmem:[#allocation3 + $0x88] sm:$0xff]  ;;  %v3328_v61 = vld [vmem:[#allocation3 + $0x18] sm:$0xff] }
 0x212   : > { %3261 = vst.msk [vmem:[#allocation3 + $0x80] sm:$0xff] %vm678_vm3, %v3229_v35  ;;  %v3230_v32 = vadd.f32 %v3153_v22, %v2980_v38  ;;  %2903 = vst.msk [vmem:[#allocation3 + $0xa8] sm:$0xff] %vm678_vm3, %v2871_v36 }
 0x213   : > { %3264 = vst.msk [vmem:[#allocation3 + $0x98] sm:$0xff] %vm678_vm3, %v3232_v1  ;;  %v5179_v56 = vpop.f32.mrb[100].mxu0 }
 0x214   : > { %3262 = vst.msk [vmem:[#allocation3 + $0x88] sm:$0xff] %vm678_vm3, %v3230_v32  ;;  %v5149_v47 = vpop.f32.mrb[104].mxu1  ;;  %v3166_v8 = vpop.f32.mrb[101].mxu0 }
 0x215   : > { %v2876_v3 = vadd.f32 %v5149_v47, %v2626_v58  ;;  %v2819_v5 = vpop.f32.mrb[105].mxu1  ;;  %v5180_v25 = vpop.f32.mrb[102].mxu0 }
 0x216   : > { %v2985_v4 = vld [vmem:[#allocation3 + $0xb0] sm:$0xff]  ;;  %v2874_v31 = vadd.f32 %v2819_v5, %v2624_v9  ;;  %v5150_v15 = vpop.f32.mrb[106].mxu1  ;;  %v3169_v28 = vpop.f32.mrb[103].mxu0 }
 0x217   : > { %v3235_v16 = vadd.f32 %v5179_v56, %v2985_v4  ;;  %2908 = vst.msk [vmem:[#allocation3 + $0xd0] sm:$0xff] %vm678_vm3, %v2876_v3  ;;  %v2983_v18 = vld [vmem:[#allocation3 + $0xa0] sm:$0xff]  ;;  %v2877_v39 = vadd.f32 %v5150_v15, %v2627_v21  ;;  %v2822_v44 = vpop.f32.mrb[107].mxu1  ;;  %v3326_v56 = vld [vmem:[#allocation3 + $0x8] sm:$0xff] }
 0x218   : > { %v3233_v23 = vadd.f32 %v3166_v8, %v2983_v18  ;;  %2906 = vst.msk [vmem:[#allocation3 + $0xc0] sm:$0xff] %vm678_vm3, %v2874_v31  ;;  %v2986_v49 = vld [vmem:[#allocation3 + $0xb8] sm:$0xff]  ;;  %v2875_v26 = vadd.f32 %v2822_v44, %v2625_v43  ;;  %v3331_v31 = vld [vmem:[#allocation3 + $0x30] sm:$0xff] }
 0x219   : > { %3267 = vst.msk [vmem:[#allocation3 + $0xb0] sm:$0xff] %vm678_vm3, %v3235_v16  ;;  %v3236_v60 = vadd.f32 %v5180_v25, %v2986_v49  ;;  %2909 = vst.msk [vmem:[#allocation3 + $0xd8] sm:$0xff] %vm678_vm3, %v2877_v39  ;;  %v2984_v50 = vld [vmem:[#allocation3 + $0xa8] sm:$0xff]  ;;  %v3329_v16 = vld [vmem:[#allocation3 + $0x20] sm:$0xff] }
 0x21a   : > { %3265 = vst.msk [vmem:[#allocation3 + $0xa0] sm:$0xff] %vm678_vm3, %v3233_v23  ;;  %v3234_v12 = vadd.f32 %v3169_v28, %v2984_v50  ;;  %2907 = vst.msk [vmem:[#allocation3 + $0xc8] sm:$0xff] %vm678_vm3, %v2875_v26  ;;  %v3332_v23 = vld [vmem:[#allocation3 + $0x38] sm:$0xff] }
 0x21b   : > { %3268 = vst.msk [vmem:[#allocation3 + $0xb8] sm:$0xff] %vm678_vm3, %v3236_v60  ;;  %v5183_v40 = vpop.f32.mrb[104].mxu0 }
 0x21c   : > { %3266 = vst.msk [vmem:[#allocation3 + $0xa8] sm:$0xff] %vm678_vm3, %v3234_v12  ;;  %v5153_v24 = vpop.f32.mrb[108].mxu1  ;;  %v3182_v59 = vpop.f32.mrb[105].mxu0 }
 0x21d   : > { %v2880_v54 = vadd.f32 %v5153_v24, %v2630_v55  ;;  %v2835_v13 = vpop.f32.mrb[109].mxu1  ;;  %v5184_v45 = vpop.f32.mrb[106].mxu0 }
 0x21e   : > { %v2989_v17 = vld [vmem:[#allocation3 + $0xd0] sm:$0xff]  ;;  %v2878_v34 = vadd.f32 %v2835_v13, %v2628_v37  ;;  %v5154_v51 = vpop.f32.mrb[110].mxu1  ;;  %v3185_v14 = vpop.f32.mrb[107].mxu0 }
 0x21f   : > { %v3239_v62 = vadd.f32 %v5183_v40, %v2989_v17  ;;  %2912 = vst.msk [vmem:[#allocation3 + $0xf0] sm:$0xff] %vm678_vm3, %v2880_v54  ;;  %v2987_v33 = vld [vmem:[#allocation3 + $0xc0] sm:$0xff]  ;;  %v2881_v48 = vadd.f32 %v5154_v51, %v2631_v42  ;;  %v2838_v63 = vpop.f32.mrb[111].mxu1  ;;  %v3330_v40 = vld [vmem:[#allocation3 + $0x28] sm:$0xff] }
 0x220   : > { %v3237_v7 = vadd.f32 %v3182_v59, %v2987_v33  ;;  %2910 = vst.msk [vmem:[#allocation3 + $0xe0] sm:$0xff] %vm678_vm3, %v2878_v34  ;;  %v2990_v2 = vld [vmem:[#allocation3 + $0xd8] sm:$0xff]  ;;  %v2879_v0 = vadd.f32 %v2838_v63, %v2629_v41  ;;  %v3335_v34 = vld [vmem:[#allocation3 + $0x50] sm:$0xff] }
 0x221   : > { %3271 = vst.msk [vmem:[#allocation3 + $0xd0] sm:$0xff] %vm678_vm3, %v3239_v62  ;;  %v3240_v53 = vadd.f32 %v5184_v45, %v2990_v2  ;;  %2913 = vst.msk [vmem:[#allocation3 + $0xf8] sm:$0xff] %vm678_vm3, %v2881_v48  ;;  %v2988_v46 = vld [vmem:[#allocation3 + $0xc8] sm:$0xff]  ;;  %v3333_v62 = vld [vmem:[#allocation3 + $0x40] sm:$0xff] }
 0x222   : > { %3269 = vst.msk [vmem:[#allocation3 + $0xc0] sm:$0xff] %vm678_vm3, %v3237_v7  ;;  %v3238_v19 = vadd.f32 %v3185_v14, %v2988_v46  ;;  %2911 = vst.msk [vmem:[#allocation3 + $0xe8] sm:$0xff] %vm678_vm3, %v2879_v0  ;;  %v3336_v7 = vld [vmem:[#allocation3 + $0x58] sm:$0xff] }
 0x223   : > { %3272 = vst.msk [vmem:[#allocation3 + $0xd8] sm:$0xff] %vm678_vm3, %v3240_v53  ;;  %v5187_v6 = vpop.f32.mrb[108].mxu0 }
 0x224   : > { %3270 = vst.msk [vmem:[#allocation3 + $0xc8] sm:$0xff] %vm678_vm3, %v3238_v19  ;;  %v3198_v10 = vpop.f32.mrb[109].mxu0  ;;  %v5193_v29 = vpop.f32.mrb[112].mxu1 }
 0x225   : > { %v3577_v22 = vadd.f32 %v5193_v29, %v3327_v11  ;;  %v5188_v20 = vpop.f32.mrb[110].mxu0  ;;  %v3448_v52 = vpop.f32.mrb[113].mxu1 }
 0x226   : > { %v2993_v27 = vld [vmem:[#allocation3 + $0xf0] sm:$0xff]  ;;  %v3575_v57 = vadd.f32 %v3448_v52, %v3325_v30  ;;  %v3201_v35 = vpop.f32.mrb[111].mxu0  ;;  %v5194_v36 = vpop.f32.mrb[114].mxu1 }
 0x227   : > { %v3243_v1 = vadd.f32 %v5187_v6, %v2993_v27  ;;  %v2991_v38 = vld [vmem:[#allocation3 + $0xe0] sm:$0xff]  ;;  %3609 = vst.msk [vmem:[#allocation3 + $0x10] sm:$0xff] %vm678_vm3, %v3577_v22  ;;  %v3578_v32 = vadd.f32 %v5194_v36, %v3328_v61  ;;  %v3451_v58 = vpop.f32.mrb[115].mxu1  ;;  %v3334_v6 = vld [vmem:[#allocation3 + $0x48] sm:$0xff] }
 0x228   : > { %v3241_v47 = vadd.f32 %v3198_v10, %v2991_v38  ;;  %v2994_v8 = vld [vmem:[#allocation3 + $0xf8] sm:$0xff]  ;;  %3607 = vst.msk [vmem:[#allocation3] sm:$0xff] %vm678_vm3, %v3575_v57  ;;  %v3576_v3 = vadd.f32 %v3451_v58, %v3326_v56 }
 0x229   : > { %3275 = vst.msk [vmem:[#allocation3 + $0xf0] sm:$0xff] %vm678_vm3, %v3243_v1  ;;  %v3244_v9 = vadd.f32 %v5188_v20, %v2994_v8  ;;  %v2992_v5 = vld [vmem:[#allocation3 + $0xe8] sm:$0xff]  ;;  %3610 = vst.msk [vmem:[#allocation3 + $0x18] sm:$0xff] %vm678_vm3, %v3578_v32 }
 0x22a   : > { %3273 = vst.msk [vmem:[#allocation3 + $0xe0] sm:$0xff] %vm678_vm3, %v3241_v47  ;;  %v3242_v25 = vadd.f32 %v3201_v35, %v2992_v5  ;;  %3608 = vst.msk [vmem:[#allocation3 + $0x8] sm:$0xff] %vm678_vm3, %v3576_v3  ;;  %v3339_v5 = vld [vmem:[#allocation3 + $0x70] sm:$0xff] }
 0x22b   : > { %3276 = vst.msk [vmem:[#allocation3 + $0xf8] sm:$0xff] %vm678_vm3, %v3244_v9  ;;  %v5227_v4 = vpop.f32.mrb[112].mxu0 }
 0x22c   : > { %3274 = vst.msk [vmem:[#allocation3 + $0xe8] sm:$0xff] %vm678_vm3, %v3242_v25  ;;  %v5197_v21 = vpop.f32.mrb[116].mxu1  ;;  %v3810_v15 = vpop.f32.mrb[113].mxu0 }
 0x22d   : > { %v3581_v28 = vadd.f32 %v5197_v21, %v3331_v31  ;;  %v3464_v18 = vpop.f32.mrb[117].mxu1  ;;  %v5228_v39 = vpop.f32.mrb[114].mxu0 }
 0x22e   : > { %v3689_v43 = vld [vmem:[#allocation3 + $0x10] sm:$0xff]  ;;  %v3579_v44 = vadd.f32 %v3464_v18, %v3329_v16  ;;  %v5198_v49 = vpop.f32.mrb[118].mxu1  ;;  %v3813_v26 = vpop.f32.mrb[115].mxu0 }
 0x22f   : > { %v3939_v60 = vadd.f32 %v5227_v4, %v3689_v43  ;;  %3613 = vst.msk [vmem:[#allocation3 + $0x30] sm:$0xff] %vm678_vm3, %v3581_v28  ;;  %v3687_v50 = vld [vmem:[#allocation3] sm:$0xff]  ;;  %v3582_v12 = vadd.f32 %v5198_v49, %v3332_v23  ;;  %v3467_v55 = vpop.f32.mrb[119].mxu1 }
 0x230   : > { %v3937_v24 = vadd.f32 %v3810_v15, %v3687_v50  ;;  %3611 = vst.msk [vmem:[#allocation3 + $0x20] sm:$0xff] %vm678_vm3, %v3579_v44  ;;  %v3690_v59 = vld [vmem:[#allocation3 + $0x18] sm:$0xff]  ;;  %v3580_v54 = vadd.f32 %v3467_v55, %v3330_v40  ;;  %v3337_v28 = vld [vmem:[#allocation3 + $0x60] sm:$0xff] }
 0x231   : > { %3971 = vst.msk [vmem:[#allocation3 + $0x10] sm:$0xff] %vm678_vm3, %v3939_v60  ;;  %v3940_v37 = vadd.f32 %v5228_v39, %v3690_v59  ;;  %3614 = vst.msk [vmem:[#allocation3 + $0x38] sm:$0xff] %vm678_vm3, %v3582_v12  ;;  %v3688_v13 = vld [vmem:[#allocation3 + $0x8] sm:$0xff]  ;;  %v3340_v39 = vld [vmem:[#allocation3 + $0x78] sm:$0xff] }
 0x232   : > { %3969 = vst.msk [vmem:[#allocation3] sm:$0xff] %vm678_vm3, %v3937_v24  ;;  %v3938_v45 = vadd.f32 %v3813_v26, %v3688_v13  ;;  %3612 = vst.msk [vmem:[#allocation3 + $0x28] sm:$0xff] %vm678_vm3, %v3580_v54  ;;  %v3338_v54 = vld [vmem:[#allocation3 + $0x68] sm:$0xff] }
 0x233   : > { %3972 = vst.msk [vmem:[#allocation3 + $0x18] sm:$0xff] %vm678_vm3, %v3940_v37  ;;  %v5231_v17 = vpop.f32.mrb[116].mxu0 }
 0x234   : > { %3970 = vst.msk [vmem:[#allocation3 + $0x8] sm:$0xff] %vm678_vm3, %v3938_v45  ;;  %v5201_v42 = vpop.f32.mrb[120].mxu1  ;;  %v3826_v51 = vpop.f32.mrb[117].mxu0 }
 0x235   : > { %v3585_v14 = vadd.f32 %v5201_v42, %v3335_v34  ;;  %v3480_v33 = vpop.f32.mrb[121].mxu1  ;;  %v5232_v48 = vpop.f32.mrb[118].mxu0 }
 0x236   : > { %v3693_v41 = vld [vmem:[#allocation3 + $0x30] sm:$0xff]  ;;  %v3583_v63 = vadd.f32 %v3480_v33, %v3333_v62  ;;  %v5202_v2 = vpop.f32.mrb[122].mxu1  ;;  %v3829_v0 = vpop.f32.mrb[119].mxu0 }
 0x237   : > { %v3943_v53 = vadd.f32 %v5231_v17, %v3693_v41  ;;  %3617 = vst.msk [vmem:[#allocation3 + $0x50] sm:$0xff] %vm678_vm3, %v3585_v14  ;;  %v3691_v46 = vld [vmem:[#allocation3 + $0x20] sm:$0xff]  ;;  %v3586_v19 = vadd.f32 %v5202_v2, %v3336_v7  ;;  %v3483_v10 = vpop.f32.mrb[123].mxu1 }
 0x238   : > { %v4003_v11 = vld [vmem:[#allocation3 + $0x10] sm:$0xff]  ;;  %v3941_v29 = vadd.f32 %v3826_v51, %v3691_v46  ;;  %3615 = vst.msk [vmem:[#allocation3 + $0x40] sm:$0xff] %vm678_vm3, %v3583_v63  ;;  %v3694_v22 = vld [vmem:[#allocation3 + $0x38] sm:$0xff]  ;;  %v3584_v20 = vadd.f32 %v3483_v10, %v3334_v6 }
 0x239   : > { %v4689_v30 = vpack.c.bf16 %v4003_v11, %v4003_v11  ;;  %v4001_v52 = vld [vmem:[#allocation3] sm:$0xff]  ;;  %3975 = vst.msk [vmem:[#allocation3 + $0x30] sm:$0xff] %vm678_vm3, %v3943_v53  ;;  %v3944_v27 = vadd.f32 %v5232_v48, %v3694_v22  ;;  %3618 = vst.msk [vmem:[#allocation3 + $0x58] sm:$0xff] %vm678_vm3, %v3586_v19  ;;  %v3692_v57 = vld [vmem:[#allocation3 + $0x28] sm:$0xff]  ;;  %v4270_v38 = vmul.f32 %v4003_v11, %v4003_v11  ;;  %v4198_v43 = vsel %vm678_vm3, %v4003_v11, 0.0 }
 0x23a   : > { %v4687_v35 = vpack.c.bf16 %v4001_v52, %v4001_v52  ;;  %v4268_v61 = vmul.f32 %v4001_v52, %v4001_v52  ;;  %v4004_v36 = vld [vmem:[#allocation3 + $0x18] sm:$0xff]  ;;  %3973 = vst.msk [vmem:[#allocation3 + $0x20] sm:$0xff] %vm678_vm3, %v3941_v29  ;;  %v3942_v1 = vadd.f32 %v3829_v0, %v3692_v57  ;;  %3616 = vst.msk [vmem:[#allocation3 + $0x48] sm:$0xff] %vm678_vm3, %v3584_v20  ;;  %v4195_v47 = vsel %vm678_vm3, %v4001_v52, 0.0 }
 0x23b   : > { %4164 = vst.msk [vmem:[%s5467_s30 + $0x8] sm:$0xf] %vm4161_vm4, %v4689_v30  ;;  %v4690_v32 = vpack.c.bf16 %v4004_v36, %v4004_v36  ;;  %v4002_v56 = vld [vmem:[#allocation3 + $0x8] sm:$0xff]  ;;  %v5235_v58 = vpop.f32.mrb[120].mxu0  ;;  %v4271_v31 = vmul.f32 %v4004_v36, %v4004_v36  ;;  %v4303_v13 = vsel %vm678_vm3, %v4270_v38, 0.0  ;;  %v4200_v42 = vsel %vm678_vm3, %v4004_v36, 0.0 }
 0x23c   : > { %3976 = vst.msk [vmem:[#allocation3 + $0x38] sm:$0xff] %vm678_vm3, %v3944_v27  ;;  %v4688_v8 = vpack.c.bf16 %v4002_v56, %v4002_v56  ;;  %v4196_v3 = vsel %vm678_vm3, %v4002_v56, 0.0  ;;  %v4269_v9 = vmul.f32 %v4002_v56, %v4002_v56  ;;  %3974 = vst.msk [vmem:[#allocation3 + $0x28] sm:$0xff] %vm678_vm3, %v3942_v1  ;;  %v5205_v25 = vpop.f32.mrb[124].mxu1  ;;  %v3842_v4 = vpop.f32.mrb[121].mxu0  ;;  %v4300_v44 = vsel %vm678_vm3, %v4268_v61, 0.0 }
 0x23d   : > { %4162 = vst.msk [vmem:[%s5467_s30] sm:$0xf] %vm4161_vm4, %v4687_v35  ;;  %4165 = vst.msk [vmem:[%s5467_s30 + $0xc] sm:$0xf] %vm4161_vm4, %v4690_v32  ;;  %v4197_v21 = vadd.f32 %v4196_v3, %v4195_v47  ;;  %v3589_v15 = vadd.f32 %v5205_v25, %v3339_v5  ;;  %v3496_v16 = vpop.f32.mrb[125].mxu1  ;;  %v5236_v18 = vpop.f32.mrb[122].mxu0 }
 0x23e   : > { %4163 = vst.msk [vmem:[%s5467_s30 + $0x4] sm:$0xf] %vm4161_vm4, %v4688_v8  ;;  %v4301_v23 = vsel %vm678_vm3, %v4269_v9, 0.0  ;;  %v3697_v49 = vld [vmem:[#allocation3 + $0x50] sm:$0xff]  ;;  %v3587_v26 = vadd.f32 %v3496_v16, %v3337_v28  ;;  %v5206_v60 = vpop.f32.mrb[126].mxu1  ;;  %v3845_v50 = vpop.f32.mrb[123].mxu0 }
 0x23f   : > { %v4199_v12 = vadd.f32 %v4198_v43, %v4197_v21  ;;  %v4302_v40 = vadd.f32 %v4301_v23, %v4300_v44  ;;  %v3947_v55 = vadd.f32 %v5235_v58, %v3697_v49  ;;  %3621 = vst.msk [vmem:[#allocation3 + $0x70] sm:$0xff] %vm678_vm3, %v3589_v15  ;;  %v3695_v24 = vld [vmem:[#allocation3 + $0x40] sm:$0xff]  ;;  %v3590_v59 = vadd.f32 %v5206_v60, %v3340_v39  ;;  %v3499_v37 = vpop.f32.mrb[127].mxu1  ;;  %v3343_v1 = vld [vmem:[#allocation3 + $0x90] sm:$0xff]  ;;  %v3344_v5 = vld [vmem:[#allocation3 + $0x98] sm:$0xff] }
 0x240   : > { %v4007_v45 = vld [vmem:[#allocation3 + $0x30] sm:$0xff]  ;;  %v3945_v17 = vadd.f32 %v3842_v4, %v3695_v24  ;;  %3619 = vst.msk [vmem:[#allocation3 + $0x60] sm:$0xff] %vm678_vm3, %v3587_v26  ;;  %v3588_v34 = vadd.f32 %v3499_v37, %v3338_v54  ;;  %v4305_v51 = vsel %vm678_vm3, %v4271_v31, 0.0  ;;  %v3698_v0 = vld [vmem:[#allocation3 + $0x58] sm:$0xff]  ;;  %v3341_v9 = vld [vmem:[#allocation3 + $0x80] sm:$0xff] }
 0x241   : > { %v4304_v14 = vadd.f32 %v4303_v13, %v4302_v40  ;;  %v4693_v62 = vpack.c.bf16 %v4007_v45, %v4007_v45  ;;  %v4005_v33 = vld [vmem:[#allocation3 + $0x20] sm:$0xff]  ;;  %3979 = vst.msk [vmem:[#allocation3 + $0x50] sm:$0xff] %vm678_vm3, %v3947_v55  ;;  %3622 = vst.msk [vmem:[#allocation3 + $0x78] sm:$0xff] %vm678_vm3, %v3590_v59  ;;  %v4201_v41 = vadd.f32 %v4200_v42, %v4199_v12  ;;  %v4206_v53 = vsel %vm678_vm3, %v4007_v45, 0.0  ;;  %v3696_v10 = vld [vmem:[#allocation3 + $0x48] sm:$0xff] }
 0x242   : > { %v4691_v48 = vpack.c.bf16 %v4005_v33, %v4005_v33  ;;  %v4202_v63 = vsel %vm678_vm3, %v4005_v33, 0.0  ;;  %v4272_v7 = vmul.f32 %v4005_v33, %v4005_v33  ;;  %3977 = vst.msk [vmem:[#allocation3 + $0x40] sm:$0xff] %vm678_vm3, %v3945_v17  ;;  %3620 = vst.msk [vmem:[#allocation3 + $0x68] sm:$0xff] %vm678_vm3, %v3588_v34  ;;  %v4274_v29 = vmul.f32 %v4007_v45, %v4007_v45 }
 0x243   : > { %v4008_v2 = vld [vmem:[#allocation3 + $0x38] sm:$0xff]  ;;  %4168 = vst.msk [vmem:[%s5467_s30 + $0x18] sm:$0xf] %vm4161_vm4, %v4693_v62  ;;  %v4306_v46 = vadd.f32 %v4305_v51, %v4304_v14  ;;  %v4006_v6 = vld [vmem:[#allocation3 + $0x28] sm:$0xff]  ;;  %v5239_v11 = vpop.f32.mrb[124].mxu0  ;;  %v4203_v22 = vadd.f32 %v4202_v63, %v4201_v41  ;;  %v3948_v36 = vadd.f32 %v5236_v18, %v3698_v0  ;;  %v3946_v47 = vadd.f32 %v3845_v50, %v3696_v10  ;;  %v3347_v62 = vld [vmem:[#allocation3 + $0xb0] sm:$0xff] }
 0x244   : > { %v4694_v19 = vpack.c.bf16 %v4008_v2, %v4008_v2  ;;  %4166 = vst.msk [vmem:[%s5467_s30 + $0x10] sm:$0xf] %vm4161_vm4, %v4691_v48  ;;  %v4307_v20 = vsel %vm678_vm3, %v4272_v7, 0.0  ;;  %v4692_v30 = vpack.c.bf16 %v4006_v6, %v4006_v6  ;;  %v5209_v52 = vpop.f32.mrb[128].mxu1  ;;  %v3858_v27 = vpop.f32.mrb[125].mxu0  ;;  %v4204_v35 = vsel %vm678_vm3, %v4006_v6, 0.0 }
 0x245   : > { %v4308_v57 = vadd.f32 %v4307_v20, %v4306_v46  ;;  %v4273_v61 = vmul.f32 %v4006_v6, %v4006_v6  ;;  %v3512_v38 = vpop.f32.mrb[129].mxu1  ;;  %v5240_v32 = vpop.f32.mrb[126].mxu0  ;;  %v4275_v56 = vmul.f32 %v4008_v2, %v4008_v2  ;;  %v4205_v58 = vadd.f32 %v4204_v35, %v4203_v22  ;;  %3980 = vst.msk [vmem:[#allocation3 + $0x58] sm:$0xff] %vm678_vm3, %v3948_v36  ;;  %v3342_v18 = vld [vmem:[#allocation3 + $0x88] sm:$0xff]  ;;  %v3348_v10 = vld [vmem:[#allocation3 + $0xb8] sm:$0xff] }
 0x246   : > { %4169 = vst.msk [vmem:[%s5467_s30 + $0x1c] sm:$0xf] %vm4161_vm4, %v4694_v19  ;;  %4167 = vst.msk [vmem:[%s5467_s30 + $0x14] sm:$0xf] %vm4161_vm4, %v4692_v30  ;;  %v3701_v8 = vld [vmem:[#allocation3 + $0x70] sm:$0xff]  ;;  %v3593_v3 = vadd.f32 %v5209_v52, %v3343_v1  ;;  %v5210_v25 = vpop.f32.mrb[130].mxu1  ;;  %v3591_v28 = vadd.f32 %v3512_v38, %v3341_v9 }
 0x247   : > { %v3861_v4 = vpop.f32.mrb[127].mxu0  ;;  %v4309_v31 = vsel %vm678_vm3, %v4273_v61, 0.0  ;;  %v3951_v21 = vadd.f32 %v5239_v11, %v3701_v8  ;;  %v3699_v15 = vld [vmem:[#allocation3 + $0x60] sm:$0xff]  ;;  %v3594_v16 = vadd.f32 %v5210_v25, %v3344_v5  ;;  %v3515_v39 = vpop.f32.mrb[131].mxu1  ;;  %v4207_v43 = vadd.f32 %v4206_v53, %v4205_v58  ;;  %3978 = vst.msk [vmem:[#allocation3 + $0x48] sm:$0xff] %vm678_vm3, %v3946_v47 }
 0x248   : > { %v4310_v44 = vadd.f32 %v4309_v31, %v4308_v57  ;;  %v4011_v23 = vld [vmem:[#allocation3 + $0x50] sm:$0xff]  ;;  %3625 = vst.msk [vmem:[#allocation3 + $0x90] sm:$0xff] %vm678_vm3, %v3593_v3  ;;  %v3949_v49 = vadd.f32 %v3858_v27, %v3699_v15  ;;  %v3702_v26 = vld [vmem:[#allocation3 + $0x78] sm:$0xff]  ;;  %v3592_v60 = vadd.f32 %v3515_v39, %v3342_v18  ;;  %v4311_v50 = vsel %vm678_vm3, %v4274_v29, 0.0  ;;  %3623 = vst.msk [vmem:[#allocation3 + $0x80] sm:$0xff] %vm678_vm3, %v3591_v28 }
 0x249   : > { %v4208_v12 = vsel %vm678_vm3, %v4008_v2, 0.0  ;;  %v4697_v40 = vpack.c.bf16 %v4011_v23, %v4011_v23  ;;  %v4009_v55 = vld [vmem:[#allocation3 + $0x40] sm:$0xff]  ;;  %3983 = vst.msk [vmem:[#allocation3 + $0x70] sm:$0xff] %vm678_vm3, %v3951_v21  ;;  %v3952_v24 = vadd.f32 %v5240_v32, %v3702_v26  ;;  %3626 = vst.msk [vmem:[#allocation3 + $0x98] sm:$0xff] %vm678_vm3, %v3594_v16  ;;  %v3700_v59 = vld [vmem:[#allocation3 + $0x68] sm:$0xff]  ;;  %v4313_v17 = vsel %vm678_vm3, %v4275_v56, 0.0 }
 0x24a   : > { %v4312_v54 = vadd.f32 %v4311_v50, %v4310_v44  ;;  %v4695_v37 = vpack.c.bf16 %v4009_v55, %v4009_v55  ;;  %v4209_v13 = vadd.f32 %v4208_v12, %v4207_v43  ;;  %v4210_v45 = vsel %vm678_vm3, %v4009_v55, 0.0  ;;  %3981 = vst.msk [vmem:[#allocation3 + $0x60] sm:$0xff] %vm678_vm3, %v3949_v49  ;;  %3624 = vst.msk [vmem:[#allocation3 + $0x88] sm:$0xff] %vm678_vm3, %v3592_v60  ;;  %v3345_v2 = vld [vmem:[#allocation3 + $0xa0] sm:$0xff] }
 0x24b   : > { %4172 = vst.msk [vmem:[%s5467_s30 + $0x28] sm:$0xf] %vm4161_vm4, %v4697_v40  ;;  %v4276_v34 = vmul.f32 %v4009_v55, %v4009_v55  ;;  %v3950_v42 = vadd.f32 %v3861_v4, %v3700_v59  ;;  %v5243_v51 = vpop.f32.mrb[128].mxu0  ;;  %v4278_v46 = vmul.f32 %v4011_v23, %v4011_v23  ;;  %v4214_v56 = vsel %vm678_vm3, %v4011_v23, 0.0 }
 0x24c   : > { %3984 = vst.msk [vmem:[#allocation3 + $0x78] sm:$0xff] %vm678_vm3, %v3952_v24  ;;  %v4314_v14 = vadd.f32 %v4313_v17, %v4312_v54  ;;  %v5213_v33 = vpop.f32.mrb[132].mxu1  ;;  %v3874_v48 = vpop.f32.mrb[129].mxu0  ;;  %v4211_v41 = vadd.f32 %v4210_v45, %v4209_v13  ;;  %v4012_v19 = vld [vmem:[#allocation3 + $0x58] sm:$0xff] }
 0x24d   : > { %4170 = vst.msk [vmem:[%s5467_s30 + $0x20] sm:$0xf] %vm4161_vm4, %v4695_v37  ;;  %v4315_v63 = vsel %vm678_vm3, %v4276_v34, 0.0  ;;  %v3597_v7 = vadd.f32 %v5213_v33, %v3347_v62  ;;  %v3528_v0 = vpop.f32.mrb[133].mxu1  ;;  %v5244_v53 = vpop.f32.mrb[130].mxu0  ;;  %v4698_v20 = vpack.c.bf16 %v4012_v19, %v4012_v19  ;;  %v4279_v30 = vmul.f32 %v4012_v19, %v4012_v19 }
 0x24e   : > { %3982 = vst.msk [vmem:[#allocation3 + $0x68] sm:$0xff] %vm678_vm3, %v3950_v42  ;;  %v3595_v6 = vadd.f32 %v3528_v0, %v3345_v2  ;;  %v5214_v11 = vpop.f32.mrb[134].mxu1  ;;  %v6487_v29 = vpop.f32.mrb[131].mxu0  ;;  %v4316_v22 = vadd.f32 %v4315_v63, %v4314_v14  ;;  %v4010_v52 = vld [vmem:[#allocation3 + $0x48] sm:$0xff]  ;;  %v4319_v9 = vsel %vm678_vm3, %v4278_v46, 0.0  ;;  %v4216_v5 = vsel %vm678_vm3, %v4012_v19, 0.0 }
 0x24f   : > { %v3705_v27 = vld [vmem:[#allocation3 + $0x90] sm:$0xff]  ;;  %3629 = vst.msk [vmem:[#allocation3 + $0xb0] sm:$0xff] %vm678_vm3, %v3597_v7  ;;  %v3598_v57 = vadd.f32 %v5214_v11, %v3348_v10  ;;  %v3531_v35 = vpop.f32.mrb[135].mxu1  ;;  %v4696_v61 = vpack.c.bf16 %v4010_v52, %v4010_v52  ;;  %v4212_v36 = vsel %vm678_vm3, %v4010_v52, 0.0  ;;  %v4277_v1 = vmul.f32 %v4010_v52, %v4010_v52  ;;  %v3703_v3 = vld [vmem:[#allocation3 + $0x80] sm:$0xff]  ;;  %v3346_v42 = vld [vmem:[#allocation3 + $0xa8] sm:$0xff] }
 0x250   : > { %v6491_v38 = vld [vmem:[#allocation3 + $0x70] sm:$0xff]  ;;  %v3955_v32 = vadd.f32 %v5243_v51, %v3705_v27  ;;  %3627 = vst.msk [vmem:[#allocation3 + $0xa0] sm:$0xff] %vm678_vm3, %v3595_v6  ;;  %v4213_v58 = vadd.f32 %v4212_v36, %v4211_v41  ;;  %v3706_v18 = vld [vmem:[#allocation3 + $0x98] sm:$0xff]  ;;  %v4321_v43 = vsel %vm678_vm3, %v4279_v30, 0.0  ;;  %v3953_v26 = vadd.f32 %v3874_v48, %v3703_v3  ;;  %v3349_v10 = vld [vmem:[#allocation3 + $0xc0] sm:$0xff] }
 0x251   : > { %4173 = vst.msk [vmem:[%s5467_s30 + $0x2c] sm:$0xf] %vm4161_vm4, %v4698_v20  ;;  %v4701_v47 = vpack.c.bf16 %v6491_v38, %v6491_v38  ;;  %v4013_v8 = vld [vmem:[#allocation3 + $0x60] sm:$0xff]  ;;  %4171 = vst.msk [vmem:[%s5467_s30 + $0x24] sm:$0xf] %vm4161_vm4, %v4696_v61  ;;  %v4317_v25 = vsel %vm678_vm3, %v4277_v1, 0.0  ;;  %v4282_v44 = vmul.f32 %v6491_v38, %v6491_v38  ;;  %v3956_v34 = vadd.f32 %v5244_v53, %v3706_v18 }
 0x252   : > { %3630 = vst.msk [vmem:[#allocation3 + $0xb8] sm:$0xff] %vm678_vm3, %v3598_v57  ;;  %v4699_v4 = vpack.c.bf16 %v4013_v8, %v4013_v8  ;;  %3987 = vst.msk [vmem:[#allocation3 + $0x90] sm:$0xff] %vm678_vm3, %v3955_v32  ;;  %v4215_v21 = vadd.f32 %v4214_v56, %v4213_v58  ;;  %v4318_v15 = vadd.f32 %v4317_v25, %v4316_v22  ;;  %v4218_v23 = vsel %vm678_vm3, %v4013_v8, 0.0  ;;  %v3704_v60 = vld [vmem:[#allocation3 + $0x88] sm:$0xff]  ;;  %v3351_v7 = vld [vmem:[#allocation3 + $0xd0] sm:$0xff] }
 0x253   : > { %v6505_v31 = vld [vmem:[#allocation3 + $0x78] sm:$0xff]  ;;  %4176 = vst.msk [vmem:[%s5467_s30 + $0x38] sm:$0xf] %vm4161_vm4, %v4701_v47  ;;  %v4280_v28 = vmul.f32 %v4013_v8, %v4013_v8  ;;  %v5247_v39 = vpop.f32.mrb[132].mxu0  ;;  %v3954_v41 = vadd.f32 %v6487_v29, %v3704_v60  ;;  %v3596_v63 = vadd.f32 %v3531_v35, %v3346_v42  ;;  %v4222_v57 = vsel %vm678_vm3, %v6491_v38, 0.0  ;;  %v3350_v36 = vld [vmem:[#allocation3 + $0xc8] sm:$0xff] }
 0x254   : > { %v4702_v16 = vpack.c.bf16 %v6505_v31, %v6505_v31  ;;  %4174 = vst.msk [vmem:[%s5467_s30 + $0x30] sm:$0xf] %vm4161_vm4, %v4699_v4  ;;  %v5217_v50 = vpop.f32.mrb[136].mxu1  ;;  %v3890_v12 = vpop.f32.mrb[133].mxu0  ;;  %v4320_v40 = vadd.f32 %v4319_v9, %v4318_v15  ;;  %v4217_v55 = vadd.f32 %v4216_v5, %v4215_v21  ;;  %v4283_v24 = vmul.f32 %v6505_v31, %v6505_v31  ;;  %v3352_v27 = vld [vmem:[#allocation3 + $0xd8] sm:$0xff]  ;;  %v3355_v8 = vld [vmem:[#allocation3 + $0xf0] sm:$0xff] }
 0x255   : > { %v4014_v49 = vld [vmem:[#allocation3 + $0x68] sm:$0xff]  ;;  %v3544_v54 = vpop.f32.mrb[137].mxu1  ;;  %v5248_v37 = vpop.f32.mrb[134].mxu0  ;;  %v4323_v13 = vsel %vm678_vm3, %v4280_v28, 0.0  ;;  %3985 = vst.msk [vmem:[#allocation3 + $0x80] sm:$0xff] %vm678_vm3, %v3953_v26  ;;  %3988 = vst.msk [vmem:[#allocation3 + $0x98] sm:$0xff] %vm678_vm3, %v3956_v34  ;;  %v3601_v19 = vadd.f32 %v5217_v50, %v3351_v7 }
 0x256   : > { %4177 = vst.msk [vmem:[%s5467_s30 + $0x3c] sm:$0xf] %vm4161_vm4, %v4702_v16  ;;  %v4700_v59 = vpack.c.bf16 %v4014_v49, %v4014_v49  ;;  %v4220_v45 = vsel %vm678_vm3, %v4014_v49, 0.0  ;;  %v4281_v17 = vmul.f32 %v4014_v49, %v4014_v49  ;;  %v3709_v51 = vld [vmem:[#allocation3 + $0xb0] sm:$0xff]  ;;  %v5218_v14 = vpop.f32.mrb[138].mxu1  ;;  %v6525_v62 = vpop.f32.mrb[135].mxu0  ;;  %v4219_v33 = vadd.f32 %v4218_v23, %v4217_v55 }
 0x257   : > { %v4322_v48 = vadd.f32 %v4321_v43, %v4320_v40  ;;  %v3707_v2 = vld [vmem:[#allocation3 + $0xa0] sm:$0xff]  ;;  %v3547_v0 = vpop.f32.mrb[139].mxu1  ;;  %v3959_v53 = vadd.f32 %v5247_v39, %v3709_v51  ;;  %3986 = vst.msk [vmem:[#allocation3 + $0x88] sm:$0xff] %vm678_vm3, %v3954_v41  ;;  %3628 = vst.msk [vmem:[#allocation3 + $0xa8] sm:$0xff] %vm678_vm3, %v3596_v63  ;;  %v3599_v29 = vadd.f32 %v3544_v54, %v3349_v10  ;;  %v4327_v38 = vsel %vm678_vm3, %v4282_v44, 0.0  ;;  %v3356_v23 = vld [vmem:[#allocation3 + $0xf8] sm:$0xff] }
 0x258   : > { %4175 = vst.msk [vmem:[%s5467_s30 + $0x34] sm:$0xf] %vm4161_vm4, %v4700_v59  ;;  %v4325_v46 = vsel %vm678_vm3, %v4281_v17, 0.0  ;;  %v3957_v6 = vadd.f32 %v3890_v12, %v3707_v2  ;;  %v4221_v20 = vadd.f32 %v4220_v45, %v4219_v33  ;;  %v3602_v61 = vadd.f32 %v5218_v14, %v3352_v27  ;;  %v3353_v28 = vld [vmem:[#allocation3 + $0xe0] sm:$0xff] }
 0x259   : > { %v3710_v11 = vld [vmem:[#allocation3 + $0xb8] sm:$0xff]  ;;  %v4324_v22 = vadd.f32 %v4323_v13, %v4322_v48  ;;  %v6532_v30 = vld [vmem:[#allocation3 + $0x90] sm:$0xff]  ;;  %3991 = vst.msk [vmem:[#allocation3 + $0xb0] sm:$0xff] %vm678_vm3, %v3959_v53  ;;  %3633 = vst.msk [vmem:[#allocation3 + $0xd0] sm:$0xff] %vm678_vm3, %v3601_v19  ;;  %v3600_v56 = vadd.f32 %v3547_v0, %v3350_v36  ;;  %v4224_v47 = vsel %vm678_vm3, %v6505_v31, 0.0  ;;  %v4329_v5 = vsel %vm678_vm3, %v4283_v24, 0.0 }
 0x25a   : > { %v3960_v52 = vadd.f32 %v5248_v37, %v3710_v11  ;;  %v4705_v35 = vpack.c.bf16 %v6532_v30, %v6532_v30  ;;  %3989 = vst.msk [vmem:[#allocation3 + $0xa0] sm:$0xff] %vm678_vm3, %v3957_v6  ;;  %v4223_v1 = vadd.f32 %v4222_v57, %v4221_v20  ;;  %3631 = vst.msk [vmem:[#allocation3 + $0xc0] sm:$0xff] %vm678_vm3, %v3599_v29  ;;  %v4230_v63 = vsel %vm678_vm3, %v6532_v30, 0.0 }
 0x25b   : > { %v4326_v32 = vadd.f32 %v4325_v46, %v4324_v22  ;;  %v6545_v58 = vpop.f32.mrb[136].mxu0  ;;  %3634 = vst.msk [vmem:[#allocation3 + $0xd8] sm:$0xff] %vm678_vm3, %v3602_v61  ;;  %3632 = vst.msk [vmem:[#allocation3 + $0xc8] sm:$0xff] %vm678_vm3, %v3600_v56  ;;  %v4286_v24 = vmul.f32 %v6532_v30, %v6532_v30 }
 0x25c   : > { %3992 = vst.msk [vmem:[#allocation3 + $0xb8] sm:$0xff] %vm678_vm3, %v3960_v52  ;;  %v5221_v3 = vpop.f32.mrb[140].mxu1  ;;  %v6553_v9 = vpop.f32.mrb[137].mxu0  ;;  %v4017_v4 = vld [vmem:[#allocation3 + $0x80] sm:$0xff]  ;;  %v4225_v21 = vadd.f32 %v4224_v47, %v4223_v1  ;;  %v4020_v12 = vld [vmem:[#allocation3 + $0x98] sm:$0xff] }
 0x25d   : > { %4180 = vst.msk [vmem:[%s5467_s30 + $0x48] sm:$0xf] %vm4161_vm4, %v4705_v35  ;;  %v4328_v25 = vadd.f32 %v4327_v38, %v4326_v32  ;;  %v3605_v15 = vadd.f32 %v5221_v3, %v3355_v8  ;;  %v3560_v16 = vpop.f32.mrb[141].mxu1  ;;  %v5252_v31 = vpop.f32.mrb[138].mxu0  ;;  %v4703_v18 = vpack.c.bf16 %v4017_v4, %v4017_v4  ;;  %v4226_v39 = vsel %vm678_vm3, %v4017_v4, 0.0  ;;  %v3354_v8 = vld [vmem:[#allocation3 + $0xe8] sm:$0xff] }
 0x25e   : > { %v4284_v43 = vmul.f32 %v4017_v4, %v4017_v4  ;;  %v3603_v44 = vadd.f32 %v3560_v16, %v3353_v28  ;;  %v5222_v49 = vpop.f32.mrb[142].mxu1  ;;  %v3909_v26 = vpop.f32.mrb[139].mxu0  ;;  %v4227_v60 = vadd.f32 %v4226_v39, %v4225_v21  ;;  %v4706_v54 = vpack.c.bf16 %v4020_v12, %v4020_v12  ;;  %v4018_v37 = vld [vmem:[#allocation3 + $0x88] sm:$0xff] }
 0x25f   : > { %v4330_v50 = vadd.f32 %v4329_v5, %v4328_v25  ;;  %3637 = vst.msk [vmem:[#allocation3 + $0xf0] sm:$0xff] %vm678_vm3, %v3605_v15  ;;  %v3606_v40 = vadd.f32 %v5222_v49, %v3356_v23  ;;  %v3563_v55 = vpop.f32.mrb[143].mxu1  ;;  %v4704_v45 = vpack.c.bf16 %v4018_v37, %v4018_v37  ;;  %v4228_v17 = vsel %vm678_vm3, %v4018_v37, 0.0  ;;  %v3708_v41 = vld [vmem:[#allocation3 + $0xa8] sm:$0xff] }
 0x260   : > { %4178 = vst.msk [vmem:[%s5467_s30 + $0x40] sm:$0xf] %vm4161_vm4, %v4703_v18  ;;  %v4331_v59 = vsel %vm678_vm3, %v4284_v43, 0.0  ;;  %v4285_v34 = vmul.f32 %v4018_v37, %v4018_v37  ;;  %v6566_v42 = vld [vmem:[#allocation3 + $0xb0] sm:$0xff]  ;;  %4181 = vst.msk [vmem:[%s5467_s30 + $0x4c] sm:$0xf] %vm4161_vm4, %v4706_v54  ;;  %v4229_v14 = vadd.f32 %v4228_v17, %v4227_v60  ;;  %v4287_v29 = vmul.f32 %v4020_v12, %v4020_v12 }
 0x261   : > { %3635 = vst.msk [vmem:[#allocation3 + $0xe0] sm:$0xff] %vm678_vm3, %v3603_v44  ;;  %v4332_v13 = vadd.f32 %v4331_v59, %v4330_v50  ;;  %v4021_v51 = vld [vmem:[#allocation3 + $0xa0] sm:$0xff]  ;;  %3638 = vst.msk [vmem:[#allocation3 + $0xf8] sm:$0xff] %vm678_vm3, %v3606_v40  ;;  %v4709_v33 = vpack.c.bf16 %v6566_v42, %v6566_v42  ;;  %v3713_v0 = vld [vmem:[#allocation3 + $0xd0] sm:$0xff]  ;;  %v4335_v30 = vsel %vm678_vm3, %v4286_v24, 0.0  ;;  %v3958_v52 = vadd.f32 %v6525_v62, %v3708_v41 }
 0x262   : > { %4179 = vst.msk [vmem:[%s5467_s30 + $0x44] sm:$0xf] %vm4161_vm4, %v4704_v45  ;;  %v4333_v7 = vsel %vm678_vm3, %v4285_v34, 0.0  ;;  %v4707_v2 = vpack.c.bf16 %v4021_v51, %v4021_v51  ;;  %v4231_v53 = vadd.f32 %v4230_v63, %v4229_v14  ;;  %v3711_v10 = vld [vmem:[#allocation3 + $0xc0] sm:$0xff]  ;;  %v3714_v11 = vld [vmem:[#allocation3 + $0xd8] sm:$0xff]  ;;  %v3712_v22 = vld [vmem:[#allocation3 + $0xc8] sm:$0xff]  ;;  %v3963_v61 = vadd.f32 %v6545_v58, %v3713_v0 }
 0x263   : > { %v6573_v48 = vld [vmem:[#allocation3 + $0xb8] sm:$0xff]  ;;  %v5255_v46 = vpop.f32.mrb[140].mxu0  ;;  %v4334_v19 = vadd.f32 %v4333_v7, %v4332_v13  ;;  %4184 = vst.msk [vmem:[%s5467_s30 + $0x58] sm:$0xf] %vm4161_vm4, %v4709_v33  ;;  %v4232_v57 = vsel %vm678_vm3, %v4020_v12, 0.0  ;;  %v4288_v32 = vmul.f32 %v4021_v51, %v4021_v51  ;;  %v3961_v56 = vadd.f32 %v6553_v9, %v3711_v10 }
 0x264   : > { %v4710_v6 = vpack.c.bf16 %v6573_v48, %v6573_v48  ;;  %v3922_v20 = vpop.f32.mrb[141].mxu0  ;;  %4182 = vst.msk [vmem:[%s5467_s30 + $0x50] sm:$0xf] %vm4161_vm4, %v4707_v2  ;;  %v3964_v38 = vadd.f32 %v5252_v31, %v3714_v11  ;;  %v3962_v47 = vadd.f32 %v3909_v26, %v3712_v22  ;;  %v4233_v3 = vadd.f32 %v4232_v57, %v4231_v53 }
 0x265   : > { %v5256_v27 = vpop.f32.mrb[142].mxu0  ;;  %v4336_v35 = vadd.f32 %v4335_v30, %v4334_v19  ;;  %3990 = vst.msk [vmem:[#allocation3 + $0xa8] sm:$0xff] %vm678_vm3, %v3958_v52  ;;  %3995 = vst.msk [vmem:[#allocation3 + $0xd0] sm:$0xff] %vm678_vm3, %v3963_v61  ;;  %v3604_v5 = vadd.f32 %v3563_v55, %v3354_v8  ;;  %v4337_v58 = vsel %vm678_vm3, %v4287_v29, 0.0  ;;  %v4234_v21 = vsel %vm678_vm3, %v4021_v51, 0.0 }
 0x266   : > { %4185 = vst.msk [vmem:[%s5467_s30 + $0x5c] sm:$0xf] %vm4161_vm4, %v4710_v6  ;;  %v3717_v36 = vld [vmem:[#allocation3 + $0xf0] sm:$0xff]  ;;  %v6592_v1 = vpop.f32.mrb[143].mxu0  ;;  %v4339_v16 = vsel %vm678_vm3, %v4288_v32, 0.0  ;;  %v4235_v31 = vadd.f32 %v4234_v21, %v4233_v3  ;;  %v4290_v43 = vmul.f32 %v6566_v42, %v6566_v42  ;;  %v4238_v60 = vsel %vm678_vm3, %v6566_v42, 0.0 }
 0x267   : > { %v3967_v25 = vadd.f32 %v5255_v46, %v3717_v36  ;;  %3993 = vst.msk [vmem:[#allocation3 + $0xc0] sm:$0xff] %vm678_vm3, %v3961_v56  ;;  %3996 = vst.msk [vmem:[#allocation3 + $0xd8] sm:$0xff] %vm678_vm3, %v3964_v38  ;;  %v4338_v28 = vadd.f32 %v4337_v58, %v4336_v35  ;;  %v4291_v59 = vmul.f32 %v6573_v48, %v6573_v48  ;;  %v4240_v14 = vsel %vm678_vm3, %v6573_v48, 0.0 }
 0x268   : > { %v3715_v62 = vld [vmem:[#allocation3 + $0xe0] sm:$0xff]  ;;  %v3718_v4 = vld [vmem:[#allocation3 + $0xf8] sm:$0xff]  ;;  %3994 = vst.msk [vmem:[#allocation3 + $0xc8] sm:$0xff] %vm678_vm3, %v3962_v47  ;;  %3636 = vst.msk [vmem:[#allocation3 + $0xe8] sm:$0xff] %vm678_vm3, %v3604_v5  ;;  %v4343_v51 = vsel %vm678_vm3, %v4290_v43, 0.0 }
 0x269   : > { %v3965_v9 = vadd.f32 %v3922_v20, %v3715_v62  ;;  %v3968_v15 = vadd.f32 %v5256_v27, %v3718_v4  ;;  %3999 = vst.msk [vmem:[#allocation3 + $0xf0] sm:$0xff] %vm678_vm3, %v3967_v25  ;;  %v4340_v18 = vadd.f32 %v4339_v16, %v4338_v28  ;;  %v4345_v53 = vsel %vm678_vm3, %v4291_v59, 0.0 }
 0x26b   : > { %3997 = vst.msk [vmem:[#allocation3 + $0xe0] sm:$0xff] %vm678_vm3, %v3965_v9  ;;  %4000 = vst.msk [vmem:[#allocation3 + $0xf8] sm:$0xff] %vm678_vm3, %v3968_v15 }
 0x26c   : > { %v4022_v39 = vld [vmem:[#allocation3 + $0xa8] sm:$0xff]  ;;  %v4027_v26 = vld [vmem:[#allocation3 + $0xd0] sm:$0xff] }
 0x26d   : > { %v4708_v44 = vpack.c.bf16 %v4022_v39, %v4022_v39  ;;  %v4236_v23 = vsel %vm678_vm3, %v4022_v39, 0.0  ;;  %v4289_v49 = vmul.f32 %v4022_v39, %v4022_v39  ;;  %v4713_v12 = vpack.c.bf16 %v4027_v26, %v4027_v26 }
 0x26e   : > { %v4237_v50 = vadd.f32 %v4236_v23, %v4235_v31  ;;  %v4025_v40 = vld [vmem:[#allocation3 + $0xc0] sm:$0xff]  ;;  %v4028_v55 = vld [vmem:[#allocation3 + $0xd8] sm:$0xff]  ;;  %v4294_v30 = vmul.f32 %v4027_v26, %v4027_v26  ;;  %v4246_v35 = vsel %vm678_vm3, %v4027_v26, 0.0 }
 0x26f   : > { %v4026_v24 = vld [vmem:[#allocation3 + $0xc8] sm:$0xff]  ;;  %4183 = vst.msk [vmem:[%s5467_s30 + $0x54] sm:$0xf] %vm4161_vm4, %v4708_v44  ;;  %v4341_v54 = vsel %vm678_vm3, %v4289_v49, 0.0  ;;  %v4711_v37 = vpack.c.bf16 %v4025_v40, %v4025_v40  ;;  %v4292_v13 = vmul.f32 %v4025_v40, %v4025_v40  ;;  %4188 = vst.msk [vmem:[%s5467_s30 + $0x68] sm:$0xf] %vm4161_vm4, %v4713_v12  ;;  %v4714_v34 = vpack.c.bf16 %v4028_v55, %v4028_v55 }
 0x270   : > { %v4239_v45 = vadd.f32 %v4238_v60, %v4237_v50  ;;  %v4342_v17 = vadd.f32 %v4341_v54, %v4340_v18  ;;  %v4031_v42 = vld [vmem:[#allocation3 + $0xf0] sm:$0xff]  ;;  %v4242_v33 = vsel %vm678_vm3, %v4025_v40, 0.0  ;;  %v4712_v41 = vpack.c.bf16 %v4026_v24, %v4026_v24  ;;  %v3716_v20 = vld [vmem:[#allocation3 + $0xe8] sm:$0xff] }
 0x271   : > { %4186 = vst.msk [vmem:[%s5467_s30 + $0x60] sm:$0xf] %vm4161_vm4, %v4711_v37  ;;  %4189 = vst.msk [vmem:[%s5467_s30 + $0x6c] sm:$0xf] %vm4161_vm4, %v4714_v34  ;;  %v4293_v0 = vmul.f32 %v4026_v24, %v4026_v24  ;;  %v4347_v19 = vsel %vm678_vm3, %v4292_v13, 0.0  ;;  %v4244_v48 = vsel %vm678_vm3, %v4026_v24, 0.0  ;;  %v4717_v6 = vpack.c.bf16 %v4031_v42, %v4031_v42 }
 0x272   : > { %v4029_v63 = vld [vmem:[#allocation3 + $0xe0] sm:$0xff]  ;;  %v4344_v7 = vadd.f32 %v4343_v51, %v4342_v17  ;;  %v4241_v2 = vadd.f32 %v4240_v14, %v4239_v45  ;;  %v4032_v46 = vld [vmem:[#allocation3 + $0xf8] sm:$0xff]  ;;  %4187 = vst.msk [vmem:[%s5467_s30 + $0x64] sm:$0xf] %vm4161_vm4, %v4712_v41  ;;  %v4295_v61 = vmul.f32 %v4028_v55, %v4028_v55  ;;  %v3966_v36 = vadd.f32 %v6592_v1, %v3716_v20  ;;  %v4194_v51 = vld [vmem:[%s6675_s5] sm:$0x1] }
 0x273   : > { %v4715_v22 = vpack.c.bf16 %v4029_v63, %v4029_v63  ;;  %v4349_v29 = vsel %vm678_vm3, %v4293_v0, 0.0  ;;  %4192 = vst.msk [vmem:[%s5467_s30 + $0x78] sm:$0xf] %vm4161_vm4, %v4717_v6  ;;  %v4718_v52 = vpack.c.bf16 %v4032_v46, %v4032_v46  ;;  %v4351_v38 = vsel %vm678_vm3, %v4294_v30, 0.0  ;;  %v4267_v41 = vld [vmem:[%s6676_s6] sm:$0x1] }
 0x274   : > { %v4243_v10 = vadd.f32 %v4242_v33, %v4241_v2  ;;  %v4346_v11 = vadd.f32 %v4345_v53, %v4344_v7  ;;  %v4248_v47 = vsel %vm678_vm3, %v4028_v55, 0.0  ;;  %v4296_v8 = vmul.f32 %v4029_v63, %v4029_v63  ;;  %3998 = vst.msk [vmem:[#allocation3 + $0xe8] sm:$0xff] %vm678_vm3, %v3966_v36 }
 0x275   : > { %4190 = vst.msk [vmem:[%s5467_s30 + $0x70] sm:$0xf] %vm4161_vm4, %v4715_v22  ;;  %4193 = vst.msk [vmem:[%s5467_s30 + $0x7c] sm:$0xf] %vm4161_vm4, %v4718_v52  ;;  %v4353_v5 = vsel %vm678_vm3, %v4295_v61, 0.0  ;;  %v4250_v25 = vsel %vm678_vm3, %v4029_v63, 0.0  ;;  %v4298_v15 = vmul.f32 %v4031_v42, %v4031_v42  ;;  %v4299_v43 = vmul.f32 %v4032_v46, %v4032_v46 }
 0x276   : > { %v4348_v27 = vadd.f32 %v4347_v19, %v4346_v11  ;;  %v4245_v57 = vadd.f32 %v4244_v48, %v4243_v10  ;;  %v4355_v58 = vsel %vm678_vm3, %v4296_v8, 0.0  ;;  %v4254_v39 = vsel %vm678_vm3, %v4031_v42, 0.0 }
 0x277   : > { %v4359_v26 = vsel %vm678_vm3, %v4298_v15, 0.0  ;;  %v4256_v60 = vsel %vm678_vm3, %v4032_v46, 0.0  ;;  %v4361_v40 = vsel %vm678_vm3, %v4299_v43, 0.0 }
 0x278   : > { %v4247_v32 = vadd.f32 %v4246_v35, %v4245_v57  ;;  %v4350_v56 = vadd.f32 %v4349_v29, %v4348_v27 }
 0x27a   : > { %v4352_v62 = vadd.f32 %v4351_v38, %v4350_v56  ;;  %v4249_v3 = vadd.f32 %v4248_v47, %v4247_v32 }
 0x27b   : > { %v4030_v9 = vld [vmem:[#allocation3 + $0xe8] sm:$0xff] }
 0x27c   : > { %v4354_v4 = vadd.f32 %v4353_v5, %v4352_v62  ;;  %v4251_v1 = vadd.f32 %v4250_v25, %v4249_v3  ;;  %v4716_v28 = vpack.c.bf16 %v4030_v9, %v4030_v9  ;;  %v4252_v16 = vsel %vm678_vm3, %v4030_v9, 0.0 }
 0x27d   : > { %v4297_v31 = vmul.f32 %v4030_v9, %v4030_v9 }
 0x27e   : > { %v4356_v21 = vadd.f32 %v4355_v58, %v4354_v4  ;;  %v4253_v18 = vadd.f32 %v4252_v16, %v4251_v1  ;;  %4191 = vst.msk [vmem:[%s5467_s30 + $0x74] sm:$0xf] %vm4161_vm4, %v4716_v28 }
 0x27f   : > { %v4357_v44 = vsel %vm678_vm3, %v4297_v31, 0.0 }
 0x280   : > { %v4255_v23 = vadd.f32 %v4254_v39, %v4253_v18  ;;  %v4358_v49 = vadd.f32 %v4357_v44, %v4356_v21 }
 0x282   : > { %v4257_v50 = vadd.f32 %v4256_v60, %v4255_v23  ;;  %v4360_v12 = vadd.f32 %v4359_v26, %v4358_v49 }
 0x284   : > { %v4258_v55 = vrot.slane %v4257_v50, 4  ;;  %v4362_v24 = vadd.f32 %v4361_v40, %v4360_v12 }
 0x286   : > { %v4259_v59 = vadd.f32 %v4258_v55, %v4257_v50  ;;  %v4363_v54 = vrot.slane %v4362_v24, 4 }
 0x288   : > { %v4260_v37 = vrot.slane %v4259_v59, 2  ;;  %v4364_v13 = vadd.f32 %v4363_v54, %v4362_v24 }
 0x28a   : > { %v4261_v45 = vadd.f32 %v4260_v37, %v4259_v59  ;;  %v4365_v17 = vrot.slane %v4364_v13, 2 }
 0x28c   : > { %v4262_v34 = vrot.slane %v4261_v45, 1  ;;  %v4366_v42 = vadd.f32 %v4365_v17, %v4364_v13 }
 0x28e   : > { %v4263_v14 = vadd.f32 %v4262_v34, %v4261_v45  ;;  %v4367_v33 = vrot.slane %v4366_v42, 1 }
 0x290   : > { %v4264_v63 = vadd.f32 %v4263_v14, %v4194_v51  ;;  %v4368_v7 = vadd.f32 %v4367_v33, %v4366_v42 }
 0x292   : > { %4266 = vst.msk [vmem:[%s6675_s5] sm:$0x1] %vm4265_vm5, %v4264_v63  ;;  %v4369_v2 = vadd.f32 %v4368_v7, %v4267_v41 }
 0x294   : > { %4370 = vst.msk [vmem:[%s6676_s6] sm:$0x1] %vm4265_vm5, %v4369_v2 }
 0x295 PF: > { %s17_s21 = sadd.s32 1, %s5412_s21  }
 0x296   : > { %p14_p5 = scmp.ge.s32.totalorder %s17_s21, 4  }
 0x298   :  { %16 = sbr.rel (!%p14_p5) target bundleno = 1 (0x1), region = 96 }

</bundles_post_ra>
